<compile_context>
chip_gen: v7x
topology: tpu7x:2x2x1
jax: 0.10.0
libtpu: 0.0.40
codegen_flags: <defaults>
</compile_context>

<pallas_src>
import numpy as np
import jax
import jax.numpy as jnp
from jax.experimental import pallas as pl
from jax.experimental.pallas import tpu as pltpu


_TB_MAX = 256        # batch-tile rows per grid step (fills 256-wide MXU M)
_OUT_LANES = 128     # lane-padded logits width (true classes = 10)


def _round_up(x, m):
    return (x + m - 1) // m * m


# ----------------------- Pallas kernel -----------------------

def _fused_mlp_kernel(x_ref, m1_ref, b1_ref, m2_ref, b2_ref, m3_ref, b3_ref,
                      pool_ref, o_ref):
    # conv1 (expanded to a dense matmul) + bias + ReLU. f32 accumulate/epilogue.
    h = jnp.dot(x_ref[...], m1_ref[...], preferred_element_type=jnp.float32)
    h = jnp.maximum(h + b1_ref[...], 0.0)
    # conv2
    h = jnp.dot(h.astype(jnp.bfloat16), m2_ref[...],
                preferred_element_type=jnp.float32)
    h = jnp.maximum(h + b2_ref[...], 0.0)
    # conv3
    h = jnp.dot(h.astype(jnp.bfloat16), m3_ref[...],
                preferred_element_type=jnp.float32)
    h = jnp.maximum(h + b3_ref[...], 0.0)
    # 4x4 avg-pool folded in as an exact f32 [160, 128] matmul epilogue
    # (lane-padded output -> unmasked full-vreg stores).
    o_ref[...] = jnp.dot(h, pool_ref[...], preferred_element_type=jnp.float32)


# ----------------------- prep: expand convs to exact dense matmuls -----------

def _make_taps(H, W):
    """0/1 selection tensor T[t, p, s]: output position p takes tap t from
    flattened input position s (k=3, stride=2, pad=1); padded taps stay 0."""
    Ho = (H + 2 - 3) // 2 + 1
    Wo = (W + 2 - 3) // 2 + 1
    T = np.zeros((9, Ho * Wo, H * W), dtype=np.float32)
    for dh in range(3):
        for dw in range(3):
            t = dh * 3 + dw
            for i in range(Ho):
                for j in range(Wo):
                    r = 2 * i + dh - 1
                    c = 2 * j + dw - 1
                    if 0 <= r < H and 0 <= c < W:
                        T[t, i * Wo + j, r * W + c] = 1.0
    return T, Ho, Wo


def _expand_conv(w_oihw, H, W):
    """PyTorch Conv2d(k=3, s=2, p=1) weight -> dense [H*W*Cin, Ho*Wo*Cout]
    matrix acting on HWC-flattened activations (exact, padding included)."""
    Cout, Cin, kh, kw = w_oihw.shape
    T, Ho, Wo = _make_taps(H, W)                                   # [9, P, S]
    wr = jnp.transpose(w_oihw, (2, 3, 1, 0)).reshape(kh * kw, Cin, Cout)
    m = jnp.einsum('tps,tio->sipo', jnp.asarray(T), wr)            # [S,Cin,P,Cout]
    return m.reshape(H * W * Cin, Ho * Wo * Cout)


def prepare_params(params):
    """One-time expansion of conv weights (done outside the hot path)."""
    m1 = _expand_conv(params["w1"], 28, 28)      # [784, 3136]
    m2 = _expand_conv(params["w2"], 14, 14)      # [3136, 784]
    m3 = _expand_conv(params["w3"], 7, 7)        # [784, 160]
    b1 = jnp.tile(params["b1"], 14 * 14)[None, :]    # [1, 3136]
    b2 = jnp.tile(params["b2"], 7 * 7)[None, :]      # [1, 784]
    b3 = jnp.tile(params["b3"], 4 * 4)[None, :]      # [1, 160]
    # Exact avg-pool matrix, lane-padded: [160, 128], columns 10..127 == 0.
    pool = np.zeros((16 * 10, _OUT_LANES), dtype=np.float32)
    pool[:, :10] = np.tile(np.eye(10, dtype=np.float32), (16, 1)) / 16.0
    return {
        "m1": m1.astype(jnp.bfloat16), "b1": b1.astype(jnp.float32),
        "m2": m2.astype(jnp.bfloat16), "b2": b2.astype(jnp.float32),
        "m3": m3.astype(jnp.bfloat16), "b3": b3.astype(jnp.float32),
        "pool": jnp.asarray(pool),
    }


# ----------------------- forward -----------------------

def mnist_cnn_forward(xb, prep):
    m1, b1 = prep["m1"], prep["b1"]
    m2, b2 = prep["m2"], prep["b2"]
    m3, b3 = prep["m3"], prep["b3"]
    pool = prep["pool"]
    k1, d1 = m1.shape
    _, d2 = m2.shape
    _, d3 = m3.shape
    _, n_out = pool.shape            # 128 (lane-padded); true classes = 10

    # xb.view(-1, 1, 28, 28): because Cin == 1 in the first layer, the plain
    # (-1, 784) flatten equals the HWC flatten the expanded matrices expect.
    # (This equivalence would NOT hold for a Cin > 1 input layer.)
    x = xb.reshape(-1, k1).astype(jnp.bfloat16)
    n = x.shape[0]

    # Batch tile: multiple of 16 (bf16 sublane packing), capped at ceil(n/2)
    # so the "parallel" grid axis has >=2 steps (keeps both v7x TCs busy),
    # and at _TB_MAX overall.
    tb = min(_TB_MAX, _round_up(max(-(-n // 2), 1), 16))
    n_pad = _round_up(n, tb)
    if n_pad != n:
        x = jnp.pad(x, ((0, n_pad - n), (0, 0)))
    grid = (n_pad // tb,)

    def _resident(shape):
        # Grid-invariant operand: constant index_map, fetched once; single
        # buffer (no point double-buffering something that never changes).
        return pl.BlockSpec(shape, lambda i: (0, 0),
                            pipeline_mode=pl.Buffered(1))

    flops = 2 * n_pad * (k1 * d1 + d1 * d2 + d2 * d3 + d3 * n_out)
    bytes_accessed = (x.size * 2 + (m1.size + m2.size + m3.size) * 2
                      + (b1.size + b2.size + b3.size + pool.size) * 4
                      + n_pad * n_out * 4)

    out = pl.pallas_call(
        _fused_mlp_kernel,
        out_shape=jax.ShapeDtypeStruct((n_pad, n_out), jnp.float32),
        grid_spec=pltpu.PrefetchScalarGridSpec(
            num_scalar_prefetch=0,
            grid=grid,
            in_specs=[
                pl.BlockSpec((tb, k1), lambda i: (i, 0)),   # batch tile (2-buf)
                _resident((k1, d1)),                        # conv1 matrix
                _resident((1, d1)),                         # conv1 bias
                _resident((d1, d2)),                        # conv2 matrix
                _resident((1, d2)),                         # conv2 bias
                _resident((d2, d3)),                        # conv3 matrix
                _resident((1, d3)),                         # conv3 bias
                _resident((d3, n_out)),                     # avg-pool matrix
            ],
            out_specs=pl.BlockSpec((tb, n_out), lambda i: (i, 0)),
        ),
        compiler_params=pltpu.CompilerParams(
            dimension_semantics=("parallel",),        # megacore sharding on v7x
            vmem_limit_bytes=40 * 1024 * 1024,        # ~17 MiB footprint + headroom
        ),
        cost_estimate=pl.CostEstimate(
            flops=flops, transcendentals=0, bytes_accessed=bytes_accessed),
    )(x, m1, b1, m2, b2, m3, b3, pool)
    return out[:n, :10]                               # == xb.view(-1, 10)


# ----------------------- pure-JAX reference (correctness check) --------------

def _reference_forward(xb, params):
    x = xb.reshape(-1, 1, 28, 28)

    def conv(x, w, b):
        y = jax.lax.conv_general_dilated(
            x, w, window_strides=(2, 2), padding=((1, 1), (1, 1)),
            dimension_numbers=("NCHW", "OIHW", "NCHW"))
        return jax.nn.relu(y + b.reshape(1, -1, 1, 1))

    x = conv(x, params["w1"], params["b1"])
    x = conv(x, params["w2"], params["b2"])
    x = conv(x, params["w3"], params["b3"])
    return jnp.mean(x, axis=(2, 3))                   # avg_pool2d(4) + view


# ----------------------- main -----------------------

if __name__ == "__main__":
    key = jax.random.PRNGKey(0)
    ks = jax.random.split(key, 7)
    params = {
        "w1": jax.random.normal(ks[0], (16, 1, 3, 3), jnp.float32) * 0.1,
        "b1": jax.random.normal(ks[1], (16,), jnp.float32) * 0.1,
        "w2": jax.random.normal(ks[2], (16, 16, 3, 3), jnp.float32) * 0.1,
        "b2": jax.random.normal(ks[3], (16,), jnp.float32) * 0.1,
        "w3": jax.random.normal(ks[4], (10, 16, 3, 3), jnp.float32) * 0.1,
        "b3": jax.random.normal(ks[5], (10,), jnp.float32) * 0.1,
    }
    x = jax.random.normal(ks[6], (2, 1, 28, 28), jnp.float32)

    prep = prepare_params(params)          # one-time conv -> matmul expansion
    fwd = jax.jit(mnist_cnn_forward)
    out = fwd(x, prep)
    jax.block_until_ready(out)

    ref = _reference_forward(x, params)
    err = float(jnp.max(jnp.abs(out - ref)))

    assert out.shape == (2, 10), out.shape
    assert out.dtype == jnp.float32
    assert err < 5e-2, f"max abs err vs f32 reference: {err}"
    print("KERNEL_OK")
</pallas_src>

<mosaic_0001>
module attributes {stable_mosaic.version = 11 : i64} {
  func.func @_fused_mlp_kernel(%arg0: i32, %arg1: memref<16x784xbf16, #tpu.memory_space<vmem>>, %arg2: memref<784x3136xbf16, #tpu.memory_space<vmem>>, %arg3: memref<1x3136xf32, #tpu.memory_space<vmem>>, %arg4: memref<3136x784xbf16, #tpu.memory_space<vmem>>, %arg5: memref<1x784xf32, #tpu.memory_space<vmem>>, %arg6: memref<784x160xbf16, #tpu.memory_space<vmem>>, %arg7: memref<1x160xf32, #tpu.memory_space<vmem>>, %arg8: memref<160x128xf32, #tpu.memory_space<vmem>>, %arg9: memref<16x128xf32, #tpu.memory_space<vmem>>) attributes {dimension_semantics = [#tpu.dimension_semantics<parallel>], iteration_bounds = array<i64: 1>, scalar_prefetch = 0 : i64, scratch_operands = 0 : i64, tpu.core_type = #tpu.core_type<tc>, window_params = [{transform_indices = @transform_0, window_bounds = array<i64: 16, 784>}, {pipeline_mode = #tpu.pipeline_mode<synchronous>, transform_indices = @transform_1, window_bounds = array<i64: 784, 3136>}, {pipeline_mode = #tpu.pipeline_mode<synchronous>, transform_indices = @transform_2, window_bounds = array<i64: 1, 3136>}, {pipeline_mode = #tpu.pipeline_mode<synchronous>, transform_indices = @transform_3, window_bounds = array<i64: 3136, 784>}, {pipeline_mode = #tpu.pipeline_mode<synchronous>, transform_indices = @transform_4, window_bounds = array<i64: 1, 784>}, {pipeline_mode = #tpu.pipeline_mode<synchronous>, transform_indices = @transform_5, window_bounds = array<i64: 784, 160>}, {pipeline_mode = #tpu.pipeline_mode<synchronous>, transform_indices = @transform_6, window_bounds = array<i64: 1, 160>}, {pipeline_mode = #tpu.pipeline_mode<synchronous>, transform_indices = @transform_7, window_bounds = array<i64: 160, 128>}, {transform_indices = @transform_8, window_bounds = array<i64: 16, 128>}]} {
    %c0 = arith.constant 0 : index
    %c0_0 = arith.constant 0 : index
    %0 = vector.load %arg1[%c0, %c0_0] : memref<16x784xbf16, #tpu.memory_space<vmem>>, vector<16x784xbf16>
    %c0_1 = arith.constant 0 : index
    %c0_2 = arith.constant 0 : index
    %1 = vector.load %arg2[%c0_1, %c0_2] : memref<784x3136xbf16, #tpu.memory_space<vmem>>, vector<784x3136xbf16>
    %cst = arith.constant dense<0.000000e+00> : vector<16x3136xf32>
    %2 = tpu.matmul %0, %1, %cst {dimension_numbers = #tpu.dot_dimension_numbers<[1], [0], [0], [1], [0, 0, 1, 1], [], []>} : vector<16x784xbf16>, vector<784x3136xbf16>, vector<16x3136xf32> -> vector<16x3136xf32>
    %c0_3 = arith.constant 0 : index
    %c0_4 = arith.constant 0 : index
    %3 = vector.load %arg3[%c0_3, %c0_4] : memref<1x3136xf32, #tpu.memory_space<vmem>>, vector<1x3136xf32>
    %4 = vector.broadcast %3 : vector<1x3136xf32> to vector<16x3136xf32>
    %5 = arith.addf %2, %4 : vector<16x3136xf32>
    %cst_5 = arith.constant 0.000000e+00 : f32
    %6 = vector.broadcast %cst_5 : f32 to vector<16x3136xf32>
    %7 = arith.maximumf %5, %6 : vector<16x3136xf32>
    %8 = arith.truncf %7 : vector<16x3136xf32> to vector<16x3136xbf16>
    %c0_6 = arith.constant 0 : index
    %c0_7 = arith.constant 0 : index
    %9 = vector.load %arg4[%c0_6, %c0_7] : memref<3136x784xbf16, #tpu.memory_space<vmem>>, vector<3136x784xbf16>
    %cst_8 = arith.constant dense<0.000000e+00> : vector<16x784xf32>
    %10 = tpu.matmul %8, %9, %cst_8 {dimension_numbers = #tpu.dot_dimension_numbers<[1], [0], [0], [1], [0, 0, 1, 1], [], []>} : vector<16x3136xbf16>, vector<3136x784xbf16>, vector<16x784xf32> -> vector<16x784xf32>
    %c0_9 = arith.constant 0 : index
    %c0_10 = arith.constant 0 : index
    %11 = vector.load %arg5[%c0_9, %c0_10] : memref<1x784xf32, #tpu.memory_space<vmem>>, vector<1x784xf32>
    %12 = vector.broadcast %11 : vector<1x784xf32> to vector<16x784xf32>
    %13 = arith.addf %10, %12 : vector<16x784xf32>
    %cst_11 = arith.constant 0.000000e+00 : f32
    %14 = vector.broadcast %cst_11 : f32 to vector<16x784xf32>
    %15 = arith.maximumf %13, %14 : vector<16x784xf32>
    %16 = arith.truncf %15 : vector<16x784xf32> to vector<16x784xbf16>
    %c0_12 = arith.constant 0 : index
    %c0_13 = arith.constant 0 : index
    %17 = vector.load %arg6[%c0_12, %c0_13] : memref<784x160xbf16, #tpu.memory_space<vmem>>, vector<784x160xbf16>
    %cst_14 = arith.constant dense<0.000000e+00> : vector<16x160xf32>
    %18 = tpu.matmul %16, %17, %cst_14 {dimension_numbers = #tpu.dot_dimension_numbers<[1], [0], [0], [1], [0, 0, 1, 1], [], []>} : vector<16x784xbf16>, vector<784x160xbf16>, vector<16x160xf32> -> vector<16x160xf32>
    %c0_15 = arith.constant 0 : index
    %c0_16 = arith.constant 0 : index
    %19 = vector.load %arg7[%c0_15, %c0_16] : memref<1x160xf32, #tpu.memory_space<vmem>>, vector<1x160xf32>
    %20 = vector.broadcast %19 : vector<1x160xf32> to vector<16x160xf32>
    %21 = arith.addf %18, %20 : vector<16x160xf32>
    %cst_17 = arith.constant 0.000000e+00 : f32
    %22 = vector.broadcast %cst_17 : f32 to vector<16x160xf32>
    %23 = arith.maximumf %21, %22 : vector<16x160xf32>
    %c0_18 = arith.constant 0 : index
    %c0_19 = arith.constant 0 : index
    %24 = vector.load %arg8[%c0_18, %c0_19] : memref<160x128xf32, #tpu.memory_space<vmem>>, vector<160x128xf32>
    %cst_20 = arith.constant dense<0.000000e+00> : vector<16x128xf32>
    %25 = tpu.matmul %23, %24, %cst_20 {dimension_numbers = #tpu.dot_dimension_numbers<[1], [0], [0], [1], [0, 0, 1, 1], [], []>} : vector<16x160xf32>, vector<160x128xf32>, vector<16x128xf32> -> vector<16x128xf32>
    %c0_21 = arith.constant 0 : index
    %c0_22 = arith.constant 0 : index
    %26 = vector.load %arg9[%c0_21, %c0_22] : memref<16x128xf32, #tpu.memory_space<vmem>>, vector<16x128xf32>
    tpu.vector_store %arg9[%c0_21, %c0_22], %25 {strides = array<i32>} : memref<16x128xf32, #tpu.memory_space<vmem>>, vector<16x128xf32>,
    return
  }
  func.func @transform_0(%arg0: i32) -> (i32, i32) {
    %c0_i32 = arith.constant 0 : i32
    %c0_i32_0 = arith.constant 0 : i32
    return %arg0, %c0_i32 : i32, i32
  }
  func.func @transform_1(%arg0: i32) -> (i32, i32) {
    %c0_i32 = arith.constant 0 : i32
    %c0_i32_0 = arith.constant 0 : i32
    %c0_i32_1 = arith.constant 0 : i32
    return %c0_i32, %c0_i32_0 : i32, i32
  }
  func.func @transform_2(%arg0: i32) -> (i32, i32) {
    %c0_i32 = arith.constant 0 : i32
    %c0_i32_0 = arith.constant 0 : i32
    %c0_i32_1 = arith.constant 0 : i32
    return %c0_i32, %c0_i32_0 : i32, i32
  }
  func.func @transform_3(%arg0: i32) -> (i32, i32) {
    %c0_i32 = arith.constant 0 : i32
    %c0_i32_0 = arith.constant 0 : i32
    %c0_i32_1 = arith.constant 0 : i32
    return %c0_i32, %c0_i32_0 : i32, i32
  }
  func.func @transform_4(%arg0: i32) -> (i32, i32) {
    %c0_i32 = arith.constant 0 : i32
    %c0_i32_0 = arith.constant 0 : i32
    %c0_i32_1 = arith.constant 0 : i32
    return %c0_i32, %c0_i32_0 : i32, i32
  }
  func.func @transform_5(%arg0: i32) -> (i32, i32) {
    %c0_i32 = arith.constant 0 : i32
    %c0_i32_0 = arith.constant 0 : i32
    %c0_i32_1 = arith.constant 0 : i32
    return %c0_i32, %c0_i32_0 : i32, i32
  }
  func.func @transform_6(%arg0: i32) -> (i32, i32) {
    %c0_i32 = arith.constant 0 : i32
    %c0_i32_0 = arith.constant 0 : i32
    %c0_i32_1 = arith.constant 0 : i32
    return %c0_i32, %c0_i32_0 : i32, i32
  }
  func.func @transform_7(%arg0: i32) -> (i32, i32) {
    %c0_i32 = arith.constant 0 : i32
    %c0_i32_0 = arith.constant 0 : i32
    %c0_i32_1 = arith.constant 0 : i32
    return %c0_i32, %c0_i32_0 : i32, i32
  }
  func.func @transform_8(%arg0: i32) -> (i32, i32) {
    %c0_i32 = arith.constant 0 : i32
    %c0_i32_0 = arith.constant 0 : i32
    return %arg0, %c0_i32 : i32, i32
  }
}

</mosaic_0001>

<bundles_post_ra>
// kernel: mnist_cnn_forward.1
= control target key start
LH: loop header
LB: loop body
LE: loop exit
PB: predicated region body
PF: predicated region fallthrough
CT: control target
= control target key end

     0   :  { %v29192_v1 = vmov 0   ;;  %vm7654_vm0 = vcmask 130048   ;;  %vm29194_vm1 = vmmov 0   ;;  %vm18622_vm2 = vcmask 523264   ;;  %s38113_s1 = inlined_call_operand.vmem [shape: bf16[784,3136], index: 1, kind: input, shape index: {}]   ;;  %s38114_s0 = inlined_call_operand.vmem [shape: bf16[16,784], index: 0, kind: input, shape index: {}]   ;;  %s38115_s2 = inlined_call_operand.vmem [shape: f32[1,3136], index: 2, kind: input, shape index: {}]   ;;  %s38116_s3 = inlined_call_operand.vmem [shape: bf16[3136,784], index: 3, kind: input, shape index: {}]   ;;  %s38117_s4 = inlined_call_operand.vmem [shape: f32[1,784], index: 4, kind: input, shape index: {}]   ;;  %s38118_s5 = inlined_call_operand.vmem [shape: bf16[784,160], index: 5, kind: input, shape index: {}]   ;;  %s38119_s7 = inlined_call_operand.vmem [shape: f32[160,128], index: 7, kind: input, shape index: {}]   ;;  %s38120_s6 = inlined_call_operand.vmem [shape: f32[1,160], index: 6, kind: input, shape index: {}]   ;;  %s38121_s8 = inlined_call_operand.vmem [shape: f32[16,128], index: 8, kind: output, shape index: {}]  }
   0x1   :  { %v25220_v0 = vld [vmem:[%s38113_s1 + $0x4] ss:$100 sps:$4 sm:$0xff]   ;;  %7819 = vmatprep.mubr.bf16.mxu1 %v29192_v1  ;;  %v25226_v5 = vld [vmem:[%s38113_s1 + $0xcc] ss:$100 sps:$4 sm:$0xff]   ;;  %v25228_v6 = vld [vmem:[%s38114_s0 + $0x18] ss:$28 sps:$4 sm:$0xff]  }
   0x2   :  { %v25222_v2 = vld [vmem:[%s38113_s1 + $0x2584] ss:$100 sps:$4 sm:$0xff]   ;;  %7658 = vmatprep.subr.bf16.mxu0 %v25220_v0  ;;  %v25231_v8 = vld [vmem:[%s38113_s1 + $0xc8c] ss:$100 sps:$4 sm:$0xff]   ;;  %v25233_v10 = vld [vmem:[%s38113_s1 + $0x194] ss:$100 sps:$4 sm:$0xff]  }
   0x3   :  { %v25224_v3 = vld [vmem:[%s38113_s1] ss:$100 sps:$4 sm:$0xff]   ;;  %7787 = vmatprep.subr.bf16.mxu1 %v25222_v2  ;;  %v25229_v7 = vld [vmem:[%s38113_s1 + $0xc88] ss:$100 sps:$4 sm:$0xff]   ;;  %v25235_v11 = vld [vmem:[%s38113_s1 + $0xd50] ss:$100 sps:$4 sm:$0xff]  }
   0x4   :  { %v25225_v4 = vld [vmem:[%s38113_s1 + $0x2580] ss:$100 sps:$4 sm:$0xff]   ;;  %7659 = vmatpush1.bf16.msra.mxu0 %v25224_v3  ;;  %v25232_v9 = vld [vmem:[%s38113_s1 + $0xc8] ss:$100 sps:$4 sm:$0xff]   ;;  %v25237_v12 = vld [vmem:[%s38113_s1 + $0xd54] ss:$100 sps:$4 sm:$0xff]  }
   0x5   :  { %7788 = vmatpush1.bf16.msra.mxu1 %v25225_v4  ;;  %7660 = vmatprep.subr.bf16.mxu0 %v25226_v5  ;;  %v25238_v13 = vld [vmem:[%s38113_s1 + $0x190] ss:$100 sps:$4 sm:$0xff]   ;;  %v25239_v14 = vld [vmem:[%s38113_s1 + $0x25c] ss:$100 sps:$4 sm:$0xff]   ;;  %v25245_v18 = vld [vmem:[%s38113_s1 + $0x324] ss:$100 sps:$4 sm:$0xff]  }
   0x6   :  { %7873 = vmatprep.subr.bf16.mxu1 %v25231_v8  ;;  %v25241_v15 = vld [vmem:[%s38113_s1 + $0xe18] ss:$100 sps:$4 sm:$0xff]   ;;  %v25249_v19 = vld [vmem:[%s38113_s1 + $0xee4] ss:$100 sps:$4 sm:$0xff]   ;;  %v25251_v22 = vld [vmem:[%s38113_s1 + $0x3ec] ss:$100 sps:$4 sm:$0xff]  }
   0x7   :  { %v25243_v16 = vld [vmem:[%s38113_s1 + $0xe1c] ss:$100 sps:$4 sm:$0xff]   ;;  %v25255_v23 = vld [vmem:[%s38113_s1 + $0xfac] ss:$100 sps:$4 sm:$0xff]   ;;  %v25257_v26 = vld [vmem:[%s38113_s1 + $0x4b4] ss:$100 sps:$4 sm:$0xff]  }
   0x8   :  { %22977 = vmatmul.mubr.msk.bf16.vlgmr.msra.gmra.mrb[0].mxu1 %vm7654_vm0, %v25228_v6  ;;  %7661 = vmatpush1.bf16.msra.mxu0 %v25232_v9  ;;  %v25244_v17 = vld [vmem:[%s38113_s1 + $0x258] ss:$100 sps:$4 sm:$0xff]   ;;  %v25247_v20 = vld [vmem:[%s38113_s1 + $0xee0] ss:$100 sps:$4 sm:$0xff]   ;;  %v25253_v24 = vld [vmem:[%s38113_s1 + $0xfa8] ss:$100 sps:$4 sm:$0xff]  }
   0x9   :  { %7874 = vmatpush1.bf16.msra.mxu1 %v25229_v7  ;;  %7662 = vmatprep.subr.bf16.mxu0 %v25233_v10  ;;  %v25250_v21 = vld [vmem:[%s38113_s1 + $0x320] ss:$100 sps:$4 sm:$0xff]   ;;  %v25256_v25 = vld [vmem:[%s38113_s1 + $0x3e8] ss:$100 sps:$4 sm:$0xff]   ;;  %v25261_v27 = vld [vmem:[%s38113_s1 + $0x1074] ss:$100 sps:$4 sm:$0xff]  }
   0xa   :  { %7875 = vmatprep.subr.bf16.mxu1 %v25237_v12  ;;  %v25259_v28 = vld [vmem:[%s38113_s1 + $0x1070] ss:$100 sps:$4 sm:$0xff]   ;;  %v25263_v30 = vld [vmem:[%s38113_s1 + $0x57c] ss:$100 sps:$4 sm:$0xff]   ;;  %v25269_v34 = vld [vmem:[%s38113_s1 + $0x644] ss:$100 sps:$4 sm:$0xff]  }
   0xb   :  { %v25262_v29 = vld [vmem:[%s38113_s1 + $0x4b0] ss:$100 sps:$4 sm:$0xff]   ;;  %v25267_v31 = vld [vmem:[%s38113_s1 + $0x113c] ss:$100 sps:$4 sm:$0xff]   ;;  %v25273_v35 = vld [vmem:[%s38113_s1 + $0x1204] ss:$100 sps:$4 sm:$0xff]  }
   0xc   :  { %7663 = vmatpush1.bf16.msra.mxu0 %v25238_v13  ;;  %v25265_v32 = vld [vmem:[%s38113_s1 + $0x1138] ss:$100 sps:$4 sm:$0xff]   ;;  %v25271_v36 = vld [vmem:[%s38113_s1 + $0x1200] ss:$100 sps:$4 sm:$0xff]   ;;  %v25275_v38 = vld [vmem:[%s38113_s1 + $0x70c] ss:$100 sps:$4 sm:$0xff]  }
   0xd   :  { %7876 = vmatpush1.bf16.msra.mxu1 %v25235_v11  ;;  %7664 = vmatprep.subr.bf16.mxu0 %v25239_v14  ;;  %v25268_v33 = vld [vmem:[%s38113_s1 + $0x578] ss:$100 sps:$4 sm:$0xff]   ;;  %v25274_v37 = vld [vmem:[%s38113_s1 + $0x640] ss:$100 sps:$4 sm:$0xff]   ;;  %v25279_v39 = vld [vmem:[%s38113_s1 + $0x12cc] ss:$100 sps:$4 sm:$0xff]  }
   0xe   :  { %7877 = vmatprep.subr.bf16.mxu1 %v25243_v16  ;;  %v25277_v40 = vld [vmem:[%s38113_s1 + $0x12c8] ss:$100 sps:$4 sm:$0xff]   ;;  %v25281_v42 = vld [vmem:[%s38113_s1 + $0x7d4] ss:$100 sps:$4 sm:$0xff]   ;;  %v25287_v46 = vld [vmem:[%s38113_s1 + $0x89c] ss:$100 sps:$4 sm:$0xff]  }
   0xf   :  { %v25280_v41 = vld [vmem:[%s38113_s1 + $0x708] ss:$100 sps:$4 sm:$0xff]   ;;  %v25285_v43 = vld [vmem:[%s38113_s1 + $0x1394] ss:$100 sps:$4 sm:$0xff]   ;;  %v25291_v47 = vld [vmem:[%s38113_s1 + $0x145c] ss:$100 sps:$4 sm:$0xff]  }
  0x10   :  { %7665 = vmatpush1.bf16.msra.mxu0 %v25244_v17  ;;  %v25283_v44 = vld [vmem:[%s38113_s1 + $0x1390] ss:$100 sps:$4 sm:$0xff]   ;;  %v25289_v48 = vld [vmem:[%s38113_s1 + $0x1458] ss:$100 sps:$4 sm:$0xff]   ;;  %v29393_v50 = vld [vmem:[%s38114_s0 + $0x4] ss:$28 sps:$4 sm:$0xff]  }
  0x11   :  { %7878 = vmatpush1.bf16.msra.mxu1 %v25241_v15  ;;  %7666 = vmatprep.subr.bf16.mxu0 %v25245_v18  ;;  %v25286_v45 = vld [vmem:[%s38113_s1 + $0x7d0] ss:$100 sps:$4 sm:$0xff]   ;;  %v25292_v49 = vld [vmem:[%s38113_s1 + $0x898] ss:$100 sps:$4 sm:$0xff]   ;;  %v25293_v51 = vld [vmem:[%s38113_s1 + $0x964] ss:$100 sps:$4 sm:$0xff]  }
  0x12   :  { %7879 = vmatprep.subr.bf16.mxu1 %v25249_v19  ;;  %v25297_v52 = vld [vmem:[%s38113_s1 + $0x1524] ss:$100 sps:$4 sm:$0xff]   ;;  %7690 = vmatprep.mubr.bf16.mxu0 %v29393_v50  ;;  %v25299_v55 = vld [vmem:[%s38113_s1 + $0xa2c] ss:$100 sps:$4 sm:$0xff]   ;;  %v25305_v60 = vld [vmem:[%s38113_s1 + $0xaf4] ss:$100 sps:$4 sm:$0xff]  }
  0x13   :  { %v25295_v53 = vld [vmem:[%s38113_s1 + $0x1520] ss:$100 sps:$4 sm:$0xff]   ;;  %v25303_v56 = vld [vmem:[%s38113_s1 + $0x15ec] ss:$100 sps:$4 sm:$0xff]   ;;  %v25309_v61 = vld [vmem:[%s38113_s1 + $0x16b4] ss:$100 sps:$4 sm:$0xff]  }
  0x14   :  { %7667 = vmatpush1.bf16.msra.mxu0 %v25250_v21  ;;  %v25298_v54 = vld [vmem:[%s38113_s1 + $0x960] ss:$100 sps:$4 sm:$0xff]   ;;  %v25329_v57 = vld [vmem:[%s38114_s0 + $0xc] ss:$28 sps:$4 sm:$0xff]   ;;  %v25307_v62 = vld [vmem:[%s38113_s1 + $0x16b0] ss:$100 sps:$4 sm:$0xff]  }
  0x15   :  { %7880 = vmatpush1.bf16.msra.mxu1 %v25247_v20  ;;  %7668 = vmatprep.subr.bf16.mxu0 %v25251_v22  ;;  %v25301_v58 = vld [vmem:[%s38113_s1 + $0x15e8] ss:$100 sps:$4 sm:$0xff]   ;;  %v25310_v63 = vld [vmem:[%s38113_s1 + $0xaf0] ss:$100 sps:$4 sm:$0xff]   ;;  %v25311_v0 = vld [vmem:[%s38113_s1 + $0xbbc] ss:$100 sps:$4 sm:$0xff]  }
  0x16   :  { %7881 = vmatprep.subr.bf16.mxu1 %v25255_v23  ;;  %7905 = vmatprep.mubr.bf16.mxu1 %v25329_v57  ;;  %v25304_v59 = vld [vmem:[%s38113_s1 + $0xa28] ss:$100 sps:$4 sm:$0xff]   ;;  %v25315_v2 = vld [vmem:[%s38113_s1 + $0x177c] ss:$100 sps:$4 sm:$0xff]   ;;  %v25337_v15 = vld [vmem:[%s38113_s1 + $0xe14] ss:$100 sps:$4 sm:$0xff]  }
  0x17   :  { %v25313_v3 = vld [vmem:[%s38113_s1 + $0x1778] ss:$100 sps:$4 sm:$0xff]   ;;  %v25321_v5 = vld [vmem:[%s38113_s1 + $0xc84] ss:$100 sps:$4 sm:$0xff]   ;;  %v25328_v10 = vld [vmem:[%s38113_s1 + $0xd4c] ss:$100 sps:$4 sm:$0xff]  }
  0x18   :  { %7669 = vmatpush1.bf16.msra.mxu0 %v25256_v25  ;;  %v25316_v4 = vld [vmem:[%s38113_s1 + $0xbb8] ss:$100 sps:$4 sm:$0xff]   ;;  %v25324_v6 = vld [vmem:[%s38113_s1 + $0x1844] ss:$100 sps:$4 sm:$0xff]   ;;  %v25333_v11 = vld [vmem:[%s38113_s1 + $0x190c] ss:$100 sps:$4 sm:$0xff]  }
  0x19   :  { %7882 = vmatpush1.bf16.msra.mxu1 %v25253_v24  ;;  %7670 = vmatprep.subr.bf16.mxu0 %v25257_v26  ;;  %v25319_v7 = vld [vmem:[%s38113_s1 + $0xc80] ss:$100 sps:$4 sm:$0xff]   ;;  %v25326_v12 = vld [vmem:[%s38113_s1 + $0xd48] ss:$100 sps:$4 sm:$0xff]   ;;  %v25340_v16 = vld [vmem:[%s38113_s1 + $0x19d4] ss:$100 sps:$4 sm:$0xff]  }
  0x1a   :  { %7883 = vmatprep.subr.bf16.mxu1 %v25261_v27  ;;  %v25325_v8 = vld [vmem:[%s38114_s0] ss:$28 sps:$4 sm:$0xff]   ;;  %v29474_v13 = vld [vmem:[%s38114_s0 + $0x8] ss:$28 sps:$4 sm:$0xff]   ;;  %v25335_v17 = vld [vmem:[%s38113_s1 + $0xe10] ss:$100 sps:$4 sm:$0xff]  }
  0x1b   :  { %v25322_v9 = vld [vmem:[%s38113_s1 + $0x1840] ss:$100 sps:$4 sm:$0xff]   ;;  %v25331_v14 = vld [vmem:[%s38113_s1 + $0x1908] ss:$100 sps:$4 sm:$0xff]   ;;  %v25338_v18 = vld [vmem:[%s38113_s1 + $0x19d0] ss:$100 sps:$4 sm:$0xff]  }
  0x1c   :  { %7671 = vmatpush1.bf16.msra.mxu0 %v25262_v29  ;;  %v25343_v19 = vld [vmem:[%s38113_s1 + $0xedc] ss:$100 sps:$4 sm:$0xff]   ;;  %v25349_v23 = vld [vmem:[%s38113_s1 + $0xfa4] ss:$100 sps:$4 sm:$0xff]   ;;  %v25355_v27 = vld [vmem:[%s38113_s1 + $0x106c] ss:$100 sps:$4 sm:$0xff]  }
  0x1d   :  { %7884 = vmatpush1.bf16.msra.mxu1 %v25259_v28  ;;  %7672 = vmatprep.subr.bf16.mxu0 %v25263_v30  ;;  %v25346_v20 = vld [vmem:[%s38113_s1 + $0x1a9c] ss:$100 sps:$4 sm:$0xff]   ;;  %v25352_v24 = vld [vmem:[%s38113_s1 + $0x1b64] ss:$100 sps:$4 sm:$0xff]   ;;  %v25358_v28 = vld [vmem:[%s38113_s1 + $0x1c2c] ss:$100 sps:$4 sm:$0xff]  }
  0x1e   :  { %7885 = vmatprep.subr.bf16.mxu1 %v25267_v31  ;;  %v25341_v21 = vld [vmem:[%s38113_s1 + $0xed8] ss:$100 sps:$4 sm:$0xff]   ;;  %v25347_v25 = vld [vmem:[%s38113_s1 + $0xfa0] ss:$100 sps:$4 sm:$0xff]   ;;  %v25353_v29 = vld [vmem:[%s38113_s1 + $0x1068] ss:$100 sps:$4 sm:$0xff]  }
  0x1f   :  { %v25344_v22 = vld [vmem:[%s38113_s1 + $0x1a98] ss:$100 sps:$4 sm:$0xff]   ;;  %v25350_v26 = vld [vmem:[%s38113_s1 + $0x1b60] ss:$100 sps:$4 sm:$0xff]   ;;  %v25356_v30 = vld [vmem:[%s38113_s1 + $0x1c28] ss:$100 sps:$4 sm:$0xff]  }
  0x20   :  { %7673 = vmatpush1.bf16.msra.mxu0 %v25268_v33  ;;  %v25361_v31 = vld [vmem:[%s38113_s1 + $0x1134] ss:$100 sps:$4 sm:$0xff]   ;;  %vm21656_vm3 = vcmask 261120  }
  0x21   :  { %7886 = vmatpush1.bf16.msra.mxu1 %v25265_v32  ;;  %7674 = vmatprep.subr.bf16.mxu0 %v25269_v34  ;;  %v25364_v32 = vld [vmem:[%s38113_s1 + $0x1cf4] ss:$100 sps:$4 sm:$0xff]  }
  0x22   :  { %7887 = vmatprep.subr.bf16.mxu1 %v25273_v35  ;;  %v25359_v33 = vld [vmem:[%s38113_s1 + $0x1130] ss:$100 sps:$4 sm:$0xff]   ;;  %v25367_v35 = vld [vmem:[%s38113_s1 + $0x11fc] ss:$100 sps:$4 sm:$0xff]  }
  0x23   :  { %v25362_v34 = vld [vmem:[%s38113_s1 + $0x1cf0] ss:$100 sps:$4 sm:$0xff]  }
  0x24   :  { %7675 = vmatpush1.bf16.msra.mxu0 %v25274_v37  ;;  %v25365_v37 = vld [vmem:[%s38113_s1 + $0x11f8] ss:$100 sps:$4 sm:$0xff]  }
  0x25   :  { %7888 = vmatpush1.bf16.msra.mxu1 %v25271_v36  ;;  %7676 = vmatprep.subr.bf16.mxu0 %v25275_v38  ;;  %v25370_v36 = vld [vmem:[%s38113_s1 + $0x1dbc] ss:$100 sps:$4 sm:$0xff]  }
  0x26   :  { %7889 = vmatprep.subr.bf16.mxu1 %v25279_v39  ;;  %v25368_v38 = vld [vmem:[%s38113_s1 + $0x1db8] ss:$100 sps:$4 sm:$0xff]   ;;  %v29555_v39 = vld [vmem:[%s38114_s0 + $0x14] ss:$28 sps:$4 sm:$0xff]  }
  0x28   :  { %7677 = vmatpush1.bf16.msra.mxu0 %v25280_v41  ;;  %v25376_v41 = vld [vmem:[%s38113_s1 + $0x1e84] ss:$100 sps:$4 sm:$0xff]  }
  0x29   :  { %7890 = vmatpush1.bf16.msra.mxu1 %v25277_v40  ;;  %7678 = vmatprep.subr.bf16.mxu0 %v25281_v42  ;;  %v25373_v40 = vld [vmem:[%s38113_s1 + $0x12c4] ss:$100 sps:$4 sm:$0xff]  }
  0x2a   :  { %7891 = vmatprep.subr.bf16.mxu1 %v25285_v43  ;;  %v25371_v42 = vld [vmem:[%s38113_s1 + $0x12c0] ss:$100 sps:$4 sm:$0xff]  }
  0x2b   :  { %v25374_v43 = vld [vmem:[%s38113_s1 + $0x1e80] ss:$100 sps:$4 sm:$0xff]  }
  0x2c   :  { %7679 = vmatpush1.bf16.msra.mxu0 %v25286_v45  ;;  %v25382_v45 = vld [vmem:[%s38113_s1 + $0x1f4c] ss:$100 sps:$4 sm:$0xff]  }
  0x2d   :  { %7892 = vmatpush1.bf16.msra.mxu1 %v25283_v44  ;;  %7680 = vmatprep.subr.bf16.mxu0 %v25287_v46  ;;  %v25379_v44 = vld [vmem:[%s38113_s1 + $0x138c] ss:$100 sps:$4 sm:$0xff]  }
  0x2e   :  { %7893 = vmatprep.subr.bf16.mxu1 %v25291_v47  ;;  %v25377_v46 = vld [vmem:[%s38113_s1 + $0x1388] ss:$100 sps:$4 sm:$0xff]  }
  0x2f   :  { %v25380_v47 = vld [vmem:[%s38113_s1 + $0x1f48] ss:$100 sps:$4 sm:$0xff]  }
  0x30   :  { %7681 = vmatpush1.bf16.msra.mxu0 %v25292_v49  ;;  %v25388_v49 = vld [vmem:[%s38113_s1 + $0x2014] ss:$100 sps:$4 sm:$0xff]  }
  0x31   :  { %7894 = vmatpush1.bf16.msra.mxu1 %v25289_v48  ;;  %7682 = vmatprep.subr.bf16.mxu0 %v25293_v51  ;;  %v25385_v48 = vld [vmem:[%s38113_s1 + $0x1454] ss:$100 sps:$4 sm:$0xff]  }
  0x32   :  { %7895 = vmatprep.subr.bf16.mxu1 %v25297_v52  ;;  %v25383_v51 = vld [vmem:[%s38113_s1 + $0x1450] ss:$100 sps:$4 sm:$0xff]  }
  0x33   :  { %v25386_v52 = vld [vmem:[%s38113_s1 + $0x2010] ss:$100 sps:$4 sm:$0xff]  }
  0x34   :  { %7683 = vmatpush1.bf16.msra.mxu0 %v25298_v54  ;;  %v25394_v54 = vld [vmem:[%s38113_s1 + $0x20dc] ss:$100 sps:$4 sm:$0xff]  }
  0x35   :  { %7896 = vmatpush1.bf16.msra.mxu1 %v25295_v53  ;;  %7684 = vmatprep.subr.bf16.mxu0 %v25299_v55  ;;  %v25391_v53 = vld [vmem:[%s38113_s1 + $0x151c] ss:$100 sps:$4 sm:$0xff]  }
  0x36   :  { %7897 = vmatprep.subr.bf16.mxu1 %v25303_v56  ;;  %v25389_v55 = vld [vmem:[%s38113_s1 + $0x1518] ss:$100 sps:$4 sm:$0xff]  }
  0x37   :  { %v25392_v56 = vld [vmem:[%s38113_s1 + $0x20d8] ss:$100 sps:$4 sm:$0xff]  }
  0x38   :  { %7685 = vmatpush1.bf16.msra.mxu0 %v25304_v59  ;;  %v25395_v59 = vld [vmem:[%s38113_s1 + $0x15e0] ss:$100 sps:$4 sm:$0xff]  }
  0x39   :  { %7898 = vmatpush1.bf16.msra.mxu1 %v25301_v58  ;;  %7686 = vmatprep.subr.bf16.mxu0 %v25305_v60  ;;  %v25400_v58 = vld [vmem:[%s38113_s1 + $0x21a4] ss:$100 sps:$4 sm:$0xff]  }
  0x3a   :  { %7899 = vmatprep.subr.bf16.mxu1 %v25309_v61  ;;  %v25398_v60 = vld [vmem:[%s38113_s1 + $0x21a0] ss:$100 sps:$4 sm:$0xff]   ;;  %v25403_v61 = vld [vmem:[%s38113_s1 + $0x16ac] ss:$100 sps:$4 sm:$0xff]  }
  0x3c   :  { %7687 = vmatpush1.bf16.msra.mxu0 %v25310_v63  ;;  %v25401_v63 = vld [vmem:[%s38113_s1 + $0x16a8] ss:$100 sps:$4 sm:$0xff]  }
  0x3d   :  { %7900 = vmatpush1.bf16.msra.mxu1 %v25307_v62  ;;  %7688 = vmatprep.subr.bf16.mxu0 %v25311_v0  ;;  %v25406_v62 = vld [vmem:[%s38113_s1 + $0x226c] ss:$100 sps:$4 sm:$0xff]  }
  0x3e   :  { %7901 = vmatprep.subr.bf16.mxu1 %v25315_v2  ;;  %v25404_v0 = vld [vmem:[%s38113_s1 + $0x2268] ss:$100 sps:$4 sm:$0xff]   ;;  %v25409_v2 = vld [vmem:[%s38113_s1 + $0x1774] ss:$100 sps:$4 sm:$0xff]  }
  0x40   :  { %7689 = vmatpush1.bf16.msra.mxu0 %v25316_v4  ;;  %v25407_v4 = vld [vmem:[%s38113_s1 + $0x1770] ss:$100 sps:$4 sm:$0xff]  }
  0x41   :  { %7902 = vmatpush1.bf16.msra.mxu1 %v25313_v3  ;;  %7701 = vmatprep.subr.bf16.mxu0 %v25321_v5  ;;  %v25412_v3 = vld [vmem:[%s38113_s1 + $0x2334] ss:$100 sps:$4 sm:$0xff]  }
  0x42   :  { %7903 = vmatprep.subr.bf16.mxu1 %v25324_v6  ;;  %v25410_v5 = vld [vmem:[%s38113_s1 + $0x2330] ss:$100 sps:$4 sm:$0xff]   ;;  %v25415_v6 = vld [vmem:[%s38113_s1 + $0x183c] ss:$100 sps:$4 sm:$0xff]  }
  0x43   :  { %7691 = vmatmul.mubr.bf16.vlgmr.msra.gmra.mrb[0].mxu0 %v25325_v8  ;;  %v25413_v8 = vld [vmem:[%s38113_s1 + $0x1838] ss:$100 sps:$4 sm:$0xff]  }
  0x44   :  { %7702 = vmatpush1.bf16.msra.mxu0 %v25319_v7  ;;  %7733 = vmatprep.mubr.bf16.mxu0 %v25329_v57  ;;  %v25397_v57 = vld [vmem:[%s38113_s1 + $0x15e4] ss:$100 sps:$4 sm:$0xff]   ;;  %v25418_v7 = vld [vmem:[%s38113_s1 + $0x23fc] ss:$100 sps:$4 sm:$0xff]  }
  0x45   :  { %7904 = vmatpush1.bf16.msra.mxu1 %v25322_v9  ;;  %7703 = vmatprep.subr.bf16.mxu0 %v25328_v10  ;;  %v25416_v9 = vld [vmem:[%s38113_s1 + $0x23f8] ss:$100 sps:$4 sm:$0xff]   ;;  %v25421_v10 = vld [vmem:[%s38113_s1 + $0x1904] ss:$100 sps:$4 sm:$0xff]  }
  0x46   :  { %7916 = vmatprep.subr.bf16.mxu1 %v25333_v11  ;;  %v25424_v11 = vld [vmem:[%s38113_s1 + $0x24c4] ss:$100 sps:$4 sm:$0xff]  }
  0x48   :  { %7906 = vmatmul.mubr.bf16.vlgmr.msra.gmra.mrb[4].mxu1 %v29474_v13  ;;  %7704 = vmatpush1.bf16.msra.mxu0 %v25326_v12  ;;  %v25419_v12 = vld [vmem:[%s38113_s1 + $0x1900] ss:$100 sps:$4 sm:$0xff]  }
  0x49   :  { %7917 = vmatpush1.bf16.msra.mxu1 %v25331_v14  ;;  %7705 = vmatprep.subr.bf16.mxu0 %v25337_v15  ;;  %v25422_v14 = vld [vmem:[%s38113_s1 + $0x24c0] ss:$100 sps:$4 sm:$0xff]   ;;  %v25429_v15 = vld [vmem:[%s38113_s1 + $0x19cc] ss:$100 sps:$4 sm:$0xff]  }
  0x4a   :  { %7918 = vmatprep.subr.bf16.mxu1 %v25340_v16  ;;  %7948 = vmatprep.mubr.bf16.mxu1 %v29555_v39  ;;  %v25433_v16 = vld [vmem:[%s38113_s1 + $0x258c] ss:$100 sps:$4 sm:$0xff]  }
  0x4c   :  { %7706 = vmatpush1.bf16.msra.mxu0 %v25335_v17  ;;  %v29676_v17 = vld [vmem:[%s38114_s0 + $0x10] ss:$28 sps:$4 sm:$0xff]  }
  0x4d   :  { %7919 = vmatpush1.bf16.msra.mxu1 %v25338_v18  ;;  %7707 = vmatprep.subr.bf16.mxu0 %v25343_v19  ;;  %v25427_v18 = vld [vmem:[%s38113_s1 + $0x19c8] ss:$100 sps:$4 sm:$0xff]  }
  0x4e   :  { %7920 = vmatprep.subr.bf16.mxu1 %v25346_v20  ;;  %v25431_v19 = vld [vmem:[%s38113_s1 + $0x2588] ss:$100 sps:$4 sm:$0xff]   ;;  %v25442_v20 = vld [vmem:[%s38113_s1 + $0x1c] ss:$100 sps:$4 sm:$0xff]  }
  0x50   :  { %7708 = vmatpush1.bf16.msra.mxu0 %v25341_v21  ;;  %v25434_v21 = vld [vmem:[%s38113_s1 + $0x1a90] ss:$100 sps:$4 sm:$0xff]  }
  0x51   :  { %7921 = vmatpush1.bf16.msra.mxu1 %v25344_v22  ;;  %7709 = vmatprep.subr.bf16.mxu0 %v25349_v23  ;;  %v25439_v22 = vld [vmem:[%s38113_s1 + $0x1b5c] ss:$100 sps:$4 sm:$0xff]  }
  0x52   :  { %7922 = vmatprep.subr.bf16.mxu1 %v25352_v24  ;;  %v25437_v23 = vld [vmem:[%s38113_s1 + $0x1b58] ss:$100 sps:$4 sm:$0xff]   ;;  %v25445_v24 = vld [vmem:[%s38113_s1 + $0x1c24] ss:$100 sps:$4 sm:$0xff]  }
  0x54   :  { %7710 = vmatpush1.bf16.msra.mxu0 %v25347_v25  ;;  %v25440_v25 = vld [vmem:[%s38113_s1 + $0x18] ss:$100 sps:$4 sm:$0xff]  }
  0x55   :  { %7923 = vmatpush1.bf16.msra.mxu1 %v25350_v26  ;;  %7711 = vmatprep.subr.bf16.mxu0 %v25355_v27  ;;  %v25443_v26 = vld [vmem:[%s38113_s1 + $0x1c20] ss:$100 sps:$4 sm:$0xff]  }
  0x56   :  { %7924 = vmatprep.subr.bf16.mxu1 %v25358_v28  ;;  %v25448_v27 = vld [vmem:[%s38113_s1 + $0xe4] ss:$100 sps:$4 sm:$0xff]   ;;  %v25451_v28 = vld [vmem:[%s38113_s1 + $0x1cec] ss:$100 sps:$4 sm:$0xff]  }
  0x58   :  { %7712 = vmatpush1.bf16.msra.mxu0 %v25353_v29  ;;  %v29150_v29 = vld [vmem:[%s38114_s0 + $0x18] ss:$28 sps:$4 sm:$0xff]  }
  0x59   :  { %7925 = vmatpush1.bf16.msra.mxu1 %v25356_v30  ;;  %7713 = vmatprep.subr.bf16.mxu0 %v25361_v31  ;;  %v25446_v30 = vld [vmem:[%s38113_s1 + $0xe0] ss:$100 sps:$4 sm:$0xff]   ;;  %v25449_v31 = vld [vmem:[%s38113_s1 + $0x1ce8] ss:$100 sps:$4 sm:$0xff]  }
  0x5a   :  { %7926 = vmatprep.subr.bf16.mxu1 %v25364_v32  ;;  %v25454_v32 = vld [vmem:[%s38113_s1 + $0x1ac] ss:$100 sps:$4 sm:$0xff]  }
  0x5c   :  { %7714 = vmatpush1.bf16.msra.mxu0 %v25359_v33  ;;  %v25457_v33 = vld [vmem:[%s38113_s1 + $0x1db4] ss:$100 sps:$4 sm:$0xff]  }
  0x5d   :  { %7927 = vmatpush1.bf16.msra.mxu1 %v25362_v34  ;;  %7715 = vmatprep.subr.bf16.mxu0 %v25367_v35  ;;  %v25452_v34 = vld [vmem:[%s38113_s1 + $0x1a8] ss:$100 sps:$4 sm:$0xff]   ;;  %v25455_v35 = vld [vmem:[%s38113_s1 + $0x1db0] ss:$100 sps:$4 sm:$0xff]  }
  0x5e   :  { %7928 = vmatprep.subr.bf16.mxu1 %v25370_v36  ;;  %v25460_v36 = vld [vmem:[%s38113_s1 + $0x274] ss:$100 sps:$4 sm:$0xff]  }
  0x60   :  { %7716 = vmatpush1.bf16.msra.mxu0 %v25365_v37  ;;  %v25458_v37 = vld [vmem:[%s38113_s1 + $0x270] ss:$100 sps:$4 sm:$0xff]  }
  0x61   :  { %7929 = vmatpush1.bf16.msra.mxu1 %v25368_v38  ;;  %7717 = vmatprep.subr.bf16.mxu0 %v25373_v40  ;;  %v25461_v38 = vld [vmem:[%s38113_s1 + $0x1e78] ss:$100 sps:$4 sm:$0xff]   ;;  %v25469_v40 = vld [vmem:[%s38113_s1 + $0x1f44] ss:$100 sps:$4 sm:$0xff]  }
  0x62   :  { %7930 = vmatprep.subr.bf16.mxu1 %v25376_v41  ;;  %v25464_v41 = vld [vmem:[%s38113_s1 + $0x338] ss:$100 sps:$4 sm:$0xff]  }
  0x64   :  { %7718 = vmatpush1.bf16.msra.mxu0 %v25371_v42  ;;  %v25467_v42 = vld [vmem:[%s38113_s1 + $0x1f40] ss:$100 sps:$4 sm:$0xff]  }
  0x65   :  { %7931 = vmatpush1.bf16.msra.mxu1 %v25374_v43  ;;  %7719 = vmatprep.subr.bf16.mxu0 %v25379_v44  ;;  %v25472_v43 = vld [vmem:[%s38113_s1 + $0x404] ss:$100 sps:$4 sm:$0xff]   ;;  %v25475_v44 = vld [vmem:[%s38113_s1 + $0x200c] ss:$100 sps:$4 sm:$0xff]  }
  0x66   :  { %7932 = vmatprep.subr.bf16.mxu1 %v25382_v45  ;;  %v25470_v45 = vld [vmem:[%s38113_s1 + $0x400] ss:$100 sps:$4 sm:$0xff]  }
  0x68   :  { %7720 = vmatpush1.bf16.msra.mxu0 %v25377_v46  ;;  %v25473_v46 = vld [vmem:[%s38113_s1 + $0x2008] ss:$100 sps:$4 sm:$0xff]  }
  0x69   :  { %7933 = vmatpush1.bf16.msra.mxu1 %v25380_v47  ;;  %7721 = vmatprep.subr.bf16.mxu0 %v25385_v48  ;;  %v25478_v47 = vld [vmem:[%s38113_s1 + $0x4cc] ss:$100 sps:$4 sm:$0xff]   ;;  %v25481_v48 = vld [vmem:[%s38113_s1 + $0x20d4] ss:$100 sps:$4 sm:$0xff]  }
  0x6a   :  { %7934 = vmatprep.subr.bf16.mxu1 %v25388_v49  ;;  %v25476_v49 = vld [vmem:[%s38113_s1 + $0x4c8] ss:$100 sps:$4 sm:$0xff]  }
  0x6c   :  { %7722 = vmatpush1.bf16.msra.mxu0 %v25383_v51  ;;  %v25479_v51 = vld [vmem:[%s38113_s1 + $0x20d0] ss:$100 sps:$4 sm:$0xff]  }
  0x6d   :  { %7935 = vmatpush1.bf16.msra.mxu1 %v25386_v52  ;;  %7723 = vmatprep.subr.bf16.mxu0 %v25391_v53  ;;  %v25484_v52 = vld [vmem:[%s38113_s1 + $0x594] ss:$100 sps:$4 sm:$0xff]   ;;  %v25487_v53 = vld [vmem:[%s38113_s1 + $0x219c] ss:$100 sps:$4 sm:$0xff]  }
  0x6e   :  { %7936 = vmatprep.subr.bf16.mxu1 %v25394_v54  ;;  %v25482_v54 = vld [vmem:[%s38113_s1 + $0x590] ss:$100 sps:$4 sm:$0xff]  }
  0x70   :  { %7724 = vmatpush1.bf16.msra.mxu0 %v25389_v55  ;;  %v25485_v55 = vld [vmem:[%s38113_s1 + $0x2198] ss:$100 sps:$4 sm:$0xff]  }
  0x71   :  { %7937 = vmatpush1.bf16.msra.mxu1 %v25392_v56  ;;  %7725 = vmatprep.subr.bf16.mxu0 %v25397_v57  ;;  %v25490_v56 = vld [vmem:[%s38113_s1 + $0x65c] ss:$100 sps:$4 sm:$0xff]   ;;  %v25493_v57 = vld [vmem:[%s38113_s1 + $0x2264] ss:$100 sps:$4 sm:$0xff]  }
  0x72   :  { %7938 = vmatprep.subr.bf16.mxu1 %v25400_v58  ;;  %v25488_v58 = vld [vmem:[%s38113_s1 + $0x658] ss:$100 sps:$4 sm:$0xff]  }
  0x74   :  { %7726 = vmatpush1.bf16.msra.mxu0 %v25395_v59  ;;  %v25491_v59 = vld [vmem:[%s38113_s1 + $0x2260] ss:$100 sps:$4 sm:$0xff]  }
  0x75   :  { %7939 = vmatpush1.bf16.msra.mxu1 %v25398_v60  ;;  %7727 = vmatprep.subr.bf16.mxu0 %v25403_v61  ;;  %v25496_v60 = vld [vmem:[%s38113_s1 + $0x724] ss:$100 sps:$4 sm:$0xff]   ;;  %v25499_v61 = vld [vmem:[%s38113_s1 + $0x232c] ss:$100 sps:$4 sm:$0xff]  }
  0x76   :  { %7940 = vmatprep.subr.bf16.mxu1 %v25406_v62  ;;  %v25494_v62 = vld [vmem:[%s38113_s1 + $0x720] ss:$100 sps:$4 sm:$0xff]  }
  0x78   :  { %7728 = vmatpush1.bf16.msra.mxu0 %v25401_v63  ;;  %v25497_v63 = vld [vmem:[%s38113_s1 + $0x2328] ss:$100 sps:$4 sm:$0xff]  }
  0x79   :  { %7941 = vmatpush1.bf16.msra.mxu1 %v25404_v0  ;;  %7729 = vmatprep.subr.bf16.mxu0 %v25409_v2  ;;  %v25502_v0 = vld [vmem:[%s38113_s1 + $0x7ec] ss:$100 sps:$4 sm:$0xff]   ;;  %v25505_v2 = vld [vmem:[%s38113_s1 + $0x23f4] ss:$100 sps:$4 sm:$0xff]  }
  0x7a   :  { %7942 = vmatprep.subr.bf16.mxu1 %v25412_v3  ;;  %v25500_v3 = vld [vmem:[%s38113_s1 + $0x7e8] ss:$100 sps:$4 sm:$0xff]  }
  0x7c   :  { %7730 = vmatpush1.bf16.msra.mxu0 %v25407_v4  ;;  %v25503_v4 = vld [vmem:[%s38113_s1 + $0x23f0] ss:$100 sps:$4 sm:$0xff]  }
  0x7d   :  { %7943 = vmatpush1.bf16.msra.mxu1 %v25410_v5  ;;  %7731 = vmatprep.subr.bf16.mxu0 %v25415_v6  ;;  %v25508_v5 = vld [vmem:[%s38113_s1 + $0x8b4] ss:$100 sps:$4 sm:$0xff]   ;;  %v25511_v6 = vld [vmem:[%s38113_s1 + $0x24bc] ss:$100 sps:$4 sm:$0xff]  }
  0x7e   :  { %7944 = vmatprep.subr.bf16.mxu1 %v25418_v7  ;;  %v25506_v7 = vld [vmem:[%s38113_s1 + $0x8b0] ss:$100 sps:$4 sm:$0xff]  }
  0x80   :  { %7732 = vmatpush1.bf16.msra.mxu0 %v25413_v8  ;;  %v25509_v8 = vld [vmem:[%s38113_s1 + $0x24b8] ss:$100 sps:$4 sm:$0xff]  }
  0x81   :  { %7945 = vmatpush1.bf16.msra.mxu1 %v25416_v9  ;;  %7744 = vmatprep.subr.bf16.mxu0 %v25421_v10  ;;  %v25514_v9 = vld [vmem:[%s38113_s1 + $0x97c] ss:$100 sps:$4 sm:$0xff]   ;;  %v25517_v10 = vld [vmem:[%s38113_s1 + $0xc] ss:$100 sps:$4 sm:$0xff]  }
  0x82   :  { %7946 = vmatprep.subr.bf16.mxu1 %v25424_v11  ;;  %v25512_v11 = vld [vmem:[%s38113_s1 + $0x978] ss:$100 sps:$4 sm:$0xff]  }
  0x83   :  { %7734 = vmatmul.mubr.bf16.vlgmr.msra.gmra.mrb[0].mxu0 %v29474_v13  ;;  %v25436_v13 = vld [vmem:[%s38113_s1 + $0x1a94] ss:$100 sps:$4 sm:$0xff]  }
  0x84   :  { %7745 = vmatpush1.bf16.msra.mxu0 %v25419_v12  ;;  %7776 = vmatprep.mubr.bf16.mxu0 %v29555_v39  ;;  %v25466_v39 = vld [vmem:[%s38113_s1 + $0x33c] ss:$100 sps:$4 sm:$0xff]   ;;  %v25515_v12 = vld [vmem:[%s38113_s1 + $0x8] ss:$100 sps:$4 sm:$0xff]  }
  0x85   :  { %7947 = vmatpush1.bf16.msra.mxu1 %v25422_v14  ;;  %7746 = vmatprep.subr.bf16.mxu0 %v25429_v15  ;;  %v25520_v14 = vld [vmem:[%s38113_s1 + $0xa44] ss:$100 sps:$4 sm:$0xff]   ;;  %v25523_v15 = vld [vmem:[%s38113_s1 + $0xd4] ss:$100 sps:$4 sm:$0xff]  }
  0x86   :  { %7959 = vmatprep.subr.bf16.mxu1 %v25433_v16  ;;  %v25518_v16 = vld [vmem:[%s38113_s1 + $0xa40] ss:$100 sps:$4 sm:$0xff]  }
  0x88   :  { %7949 = vmatmul.mubr.bf16.vlgmr.msra.gmra.mrb[4].mxu1 %v29676_v17  ;;  %7747 = vmatpush1.bf16.msra.mxu0 %v25427_v18  ;;  %v25521_v18 = vld [vmem:[%s38113_s1 + $0xd0] ss:$100 sps:$4 sm:$0xff]  }
  0x89   :  { %7960 = vmatpush1.bf16.msra.mxu1 %v25431_v19  ;;  %7748 = vmatprep.subr.bf16.mxu0 %v25436_v13  ;;  %v25526_v19 = vld [vmem:[%s38113_s1 + $0xb0c] ss:$100 sps:$4 sm:$0xff]   ;;  %v29882_v13 = vld [vmem:[%s38114_s0 + $0x4] ss:$28 sps:$4 sm:$0xff]  }
  0x8a   :  { %7991 = vmatprep.mubr.bf16.mxu1 %v29192_v1  ;;  %8174 = vmatprep.subr.bf16.mxu1 %v25442_v20  ;;  %v25524_v20 = vld [vmem:[%s38113_s1 + $0xb08] ss:$100 sps:$4 sm:$0xff]  }
  0x8c   :  { %7749 = vmatpush1.bf16.msra.mxu0 %v25434_v21  ;;  %v25527_v21 = vld [vmem:[%s38113_s1 + $0x198] ss:$100 sps:$4 sm:$0xff]  }
  0x8d   :  { %7750 = vmatprep.subr.bf16.mxu0 %v25439_v22  ;;  %v25532_v22 = vld [vmem:[%s38113_s1 + $0xbd4] ss:$100 sps:$4 sm:$0xff]  }
  0x90   :  { %7751 = vmatpush1.bf16.msra.mxu0 %v25437_v23  ;;  %v25535_v23 = vld [vmem:[%s38113_s1 + $0x264] ss:$100 sps:$4 sm:$0xff]  }
  0x91   :  { %7752 = vmatprep.subr.bf16.mxu0 %v25445_v24  ;;  %v25530_v24 = vld [vmem:[%s38113_s1 + $0xbd0] ss:$100 sps:$4 sm:$0xff]  }
  0x94   :  { %22978 = vmatmul.mubr.msk.bf16.vlgmr.msra.gmra.mrb[4].mxu1 %vm7654_vm0, %v29150_v29  ;;  %7753 = vmatpush1.bf16.msra.mxu0 %v25443_v26  ;;  %v25538_v26 = vld [vmem:[%s38113_s1 + $0xc9c] ss:$100 sps:$4 sm:$0xff]   ;;  %v25539_v29 = vld [vmem:[%s38113_s1 + $0x328] ss:$100 sps:$4 sm:$0xff]  }
  0x95   :  { %8175 = vmatpush1.bf16.msra.mxu1 %v25440_v25  ;;  %7754 = vmatprep.subr.bf16.mxu0 %v25451_v28  ;;  %v25533_v25 = vld [vmem:[%s38113_s1 + $0x260] ss:$100 sps:$4 sm:$0xff]   ;;  %v25536_v28 = vld [vmem:[%s38113_s1 + $0xc98] ss:$100 sps:$4 sm:$0xff]  }
  0x96   :  { %8176 = vmatprep.subr.bf16.mxu1 %v25448_v27  ;;  %8206 = vmatprep.mubr.bf16.mxu1 %v29393_v50  ;;  %v25463_v50 = vld [vmem:[%s38113_s1 + $0x1e7c] ss:$100 sps:$4 sm:$0xff]   ;;  %v25541_v27 = vld [vmem:[%s38113_s1 + $0x32c] ss:$100 sps:$4 sm:$0xff]  }
  0x98   :  { %7755 = vmatpush1.bf16.msra.mxu0 %v25449_v31  ;;  %v25547_v31 = vld [vmem:[%s38113_s1 + $0x3f4] ss:$100 sps:$4 sm:$0xff]  }
  0x99   :  { %8177 = vmatpush1.bf16.msra.mxu1 %v25446_v30  ;;  %7756 = vmatprep.subr.bf16.mxu0 %v25457_v33  ;;  %v25544_v30 = vld [vmem:[%s38113_s1 + $0xd64] ss:$100 sps:$4 sm:$0xff]  }
  0x9a   :  { %8178 = vmatprep.subr.bf16.mxu1 %v25454_v32  ;;  %v29924_v32 = vld [vmem:[%s38114_s0] ss:$28 sps:$4 sm:$0xff]  }
  0x9b   :  { %v25542_v33 = vld [vmem:[%s38113_s1 + $0xd60] ss:$100 sps:$4 sm:$0xff]  }
  0x9c   :  { %7757 = vmatpush1.bf16.msra.mxu0 %v25455_v35  ;;  %v25550_v35 = vld [vmem:[%s38113_s1 + $0xe2c] ss:$100 sps:$4 sm:$0xff]  }
  0x9d   :  { %8179 = vmatpush1.bf16.msra.mxu1 %v25452_v34  ;;  %7758 = vmatprep.subr.bf16.mxu0 %v25463_v50  ;;  %v25545_v34 = vld [vmem:[%s38113_s1 + $0x3f0] ss:$100 sps:$4 sm:$0xff]   ;;  %v29942_v50 = vld [vmem:[%s38114_s0 + $0xc] ss:$28 sps:$4 sm:$0xff]  }
  0x9e   :  { %8180 = vmatprep.subr.bf16.mxu1 %v25460_v36  ;;  %v25553_v36 = vld [vmem:[%s38113_s1 + $0x4bc] ss:$100 sps:$4 sm:$0xff]  }
  0xa0   :  { %7759 = vmatpush1.bf16.msra.mxu0 %v25461_v38  ;;  %v25551_v38 = vld [vmem:[%s38113_s1 + $0x4b8] ss:$100 sps:$4 sm:$0xff]  }
  0xa1   :  { %8181 = vmatpush1.bf16.msra.mxu1 %v25458_v37  ;;  %7760 = vmatprep.subr.bf16.mxu0 %v25469_v40  ;;  %v25548_v37 = vld [vmem:[%s38113_s1 + $0xe28] ss:$100 sps:$4 sm:$0xff]  }
  0xa2   :  { %8182 = vmatprep.subr.bf16.mxu1 %v25466_v39  ;;  %v25556_v39 = vld [vmem:[%s38113_s1 + $0xef4] ss:$100 sps:$4 sm:$0xff]   ;;  %v25559_v40 = vld [vmem:[%s38113_s1 + $0x584] ss:$100 sps:$4 sm:$0xff]  }
  0xa4   :  { %7761 = vmatpush1.bf16.msra.mxu0 %v25467_v42 }
  0xa5   :  { %8183 = vmatpush1.bf16.msra.mxu1 %v25464_v41  ;;  %7762 = vmatprep.subr.bf16.mxu0 %v25475_v44 }
  0xa6   :  { %8184 = vmatprep.subr.bf16.mxu1 %v25472_v43  ;;  %v25554_v43 = vld [vmem:[%s38113_s1 + $0xef0] ss:$100 sps:$4 sm:$0xff]  }
  0xa8   :  { %7763 = vmatpush1.bf16.msra.mxu0 %v25473_v46  ;;  %v25562_v46 = vld [vmem:[%s38113_s1 + $0xfbc] ss:$100 sps:$4 sm:$0xff]  }
  0xa9   :  { %8185 = vmatpush1.bf16.msra.mxu1 %v25470_v45  ;;  %7764 = vmatprep.subr.bf16.mxu0 %v25481_v48  ;;  %v25557_v45 = vld [vmem:[%s38113_s1 + $0x580] ss:$100 sps:$4 sm:$0xff]   ;;  %v25565_v48 = vld [vmem:[%s38113_s1 + $0x64c] ss:$100 sps:$4 sm:$0xff]  }
  0xaa   :  { %8186 = vmatprep.subr.bf16.mxu1 %v25478_v47 }
  0xac   :  { %7765 = vmatpush1.bf16.msra.mxu0 %v25479_v51  ;;  %v25563_v51 = vld [vmem:[%s38113_s1 + $0x648] ss:$100 sps:$4 sm:$0xff]  }
  0xad   :  { %8187 = vmatpush1.bf16.msra.mxu1 %v25476_v49  ;;  %7766 = vmatprep.subr.bf16.mxu0 %v25487_v53  ;;  %v25560_v49 = vld [vmem:[%s38113_s1 + $0xfb8] ss:$100 sps:$4 sm:$0xff]  }
  0xae   :  { %8188 = vmatprep.subr.bf16.mxu1 %v25484_v52  ;;  %v25568_v52 = vld [vmem:[%s38113_s1 + $0x1084] ss:$100 sps:$4 sm:$0xff]   ;;  %v25571_v53 = vld [vmem:[%s38113_s1 + $0x714] ss:$100 sps:$4 sm:$0xff]  }
  0xb0   :  { %7767 = vmatpush1.bf16.msra.mxu0 %v25485_v55  ;;  %v25569_v55 = vld [vmem:[%s38113_s1 + $0x710] ss:$100 sps:$4 sm:$0xff]  }
  0xb1   :  { %8189 = vmatpush1.bf16.msra.mxu1 %v25482_v54  ;;  %7768 = vmatprep.subr.bf16.mxu0 %v25493_v57  ;;  %v25566_v54 = vld [vmem:[%s38113_s1 + $0x1080] ss:$100 sps:$4 sm:$0xff]  }
  0xb2   :  { %8190 = vmatprep.subr.bf16.mxu1 %v25490_v56  ;;  %v25574_v56 = vld [vmem:[%s38113_s1 + $0x114c] ss:$100 sps:$4 sm:$0xff]   ;;  %v25577_v57 = vld [vmem:[%s38113_s1 + $0x7dc] ss:$100 sps:$4 sm:$0xff]  }
  0xb4   :  { %7769 = vmatpush1.bf16.msra.mxu0 %v25491_v59  ;;  %v25575_v59 = vld [vmem:[%s38113_s1 + $0x7d8] ss:$100 sps:$4 sm:$0xff]  }
  0xb5   :  { %8191 = vmatpush1.bf16.msra.mxu1 %v25488_v58  ;;  %7770 = vmatprep.subr.bf16.mxu0 %v25499_v61  ;;  %v25572_v58 = vld [vmem:[%s38113_s1 + $0x1148] ss:$100 sps:$4 sm:$0xff]  }
  0xb6   :  { %8192 = vmatprep.subr.bf16.mxu1 %v25496_v60  ;;  %v25580_v60 = vld [vmem:[%s38113_s1 + $0x1214] ss:$100 sps:$4 sm:$0xff]   ;;  %v25583_v61 = vld [vmem:[%s38113_s1 + $0x8a4] ss:$100 sps:$4 sm:$0xff]  }
  0xb8   :  { %7771 = vmatpush1.bf16.msra.mxu0 %v25497_v63  ;;  %v25581_v63 = vld [vmem:[%s38113_s1 + $0x8a0] ss:$100 sps:$4 sm:$0xff]  }
  0xb9   :  { %8193 = vmatpush1.bf16.msra.mxu1 %v25494_v62  ;;  %7772 = vmatprep.subr.bf16.mxu0 %v25505_v2  ;;  %v25578_v62 = vld [vmem:[%s38113_s1 + $0x1210] ss:$100 sps:$4 sm:$0xff]  }
  0xba   :  { %8194 = vmatprep.subr.bf16.mxu1 %v25502_v0  ;;  %v25586_v0 = vld [vmem:[%s38113_s1 + $0x12dc] ss:$100 sps:$4 sm:$0xff]   ;;  %v25589_v2 = vld [vmem:[%s38113_s1 + $0x96c] ss:$100 sps:$4 sm:$0xff]  }
  0xbc   :  { %7773 = vmatpush1.bf16.msra.mxu0 %v25503_v4  ;;  %v25587_v4 = vld [vmem:[%s38113_s1 + $0x968] ss:$100 sps:$4 sm:$0xff]  }
  0xbd   :  { %8195 = vmatpush1.bf16.msra.mxu1 %v25500_v3  ;;  %7774 = vmatprep.subr.bf16.mxu0 %v25511_v6  ;;  %v25584_v3 = vld [vmem:[%s38113_s1 + $0x12d8] ss:$100 sps:$4 sm:$0xff]  }
  0xbe   :  { %8196 = vmatprep.subr.bf16.mxu1 %v25508_v5  ;;  %v25592_v5 = vld [vmem:[%s38113_s1 + $0x13a4] ss:$100 sps:$4 sm:$0xff]   ;;  %v25595_v6 = vld [vmem:[%s38113_s1 + $0xa34] ss:$100 sps:$4 sm:$0xff]  }
  0xc0   :  { %7775 = vmatpush1.bf16.msra.mxu0 %v25509_v8  ;;  %v25593_v8 = vld [vmem:[%s38113_s1 + $0xa30] ss:$100 sps:$4 sm:$0xff]  }
  0xc1   :  { %8197 = vmatpush1.bf16.msra.mxu1 %v25506_v7  ;;  %7830 = vmatprep.subr.bf16.mxu0 %v25517_v10  ;;  %v25590_v7 = vld [vmem:[%s38113_s1 + $0x13a0] ss:$100 sps:$4 sm:$0xff]  }
  0xc2   :  { %8198 = vmatprep.subr.bf16.mxu1 %v25514_v9  ;;  %v25598_v9 = vld [vmem:[%s38113_s1 + $0x146c] ss:$100 sps:$4 sm:$0xff]   ;;  %v25601_v10 = vld [vmem:[%s38113_s1 + $0xafc] ss:$100 sps:$4 sm:$0xff]  }
  0xc3   :  { %7777 = vmatmul.mubr.bf16.vlgmr.msra.gmra.mrb[0].mxu0 %v29676_v17  ;;  %v25529_v17 = vld [vmem:[%s38113_s1 + $0x19c] ss:$100 sps:$4 sm:$0xff]  }
  0xc4   :  { %7831 = vmatpush1.bf16.msra.mxu0 %v25515_v12  ;;  %7862 = vmatprep.mubr.bf16.mxu0 %v29882_v13  ;;  %v25599_v12 = vld [vmem:[%s38113_s1 + $0xaf8] ss:$100 sps:$4 sm:$0xff]  }
  0xc5   :  { %8199 = vmatpush1.bf16.msra.mxu1 %v25512_v11  ;;  %7832 = vmatprep.subr.bf16.mxu0 %v25523_v15  ;;  %v25596_v11 = vld [vmem:[%s38113_s1 + $0x1468] ss:$100 sps:$4 sm:$0xff]  }
  0xc6   :  { %8200 = vmatprep.subr.bf16.mxu1 %v25520_v14  ;;  %v25604_v14 = vld [vmem:[%s38113_s1 + $0x1534] ss:$100 sps:$4 sm:$0xff]   ;;  %v25607_v15 = vld [vmem:[%s38113_s1 + $0xbc4] ss:$100 sps:$4 sm:$0xff]  }
  0xc8   :  { %7833 = vmatpush1.bf16.msra.mxu0 %v25521_v18  ;;  %v25605_v18 = vld [vmem:[%s38113_s1 + $0xbc0] ss:$100 sps:$4 sm:$0xff]  }
  0xc9   :  { %8201 = vmatpush1.bf16.msra.mxu1 %v25518_v16  ;;  %7834 = vmatprep.subr.bf16.mxu0 %v25529_v17  ;;  %v25602_v16 = vld [vmem:[%s38113_s1 + $0x1530] ss:$100 sps:$4 sm:$0xff]  }
  0xca   :  { %8202 = vmatprep.subr.bf16.mxu1 %v25526_v19  ;;  %v25610_v19 = vld [vmem:[%s38113_s1 + $0x15fc] ss:$100 sps:$4 sm:$0xff]   ;;  %v25613_v17 = vld [vmem:[%s38113_s1 + $0x14] ss:$100 sps:$4 sm:$0xff]  }
  0xcc   :  { %7835 = vmatpush1.bf16.msra.mxu0 %v25527_v21  ;;  %v25611_v21 = vld [vmem:[%s38113_s1 + $0x10] ss:$100 sps:$4 sm:$0xff]  }
  0xcd   :  { %8203 = vmatpush1.bf16.msra.mxu1 %v25524_v20  ;;  %7836 = vmatprep.subr.bf16.mxu0 %v25535_v23  ;;  %v25608_v20 = vld [vmem:[%s38113_s1 + $0x15f8] ss:$100 sps:$4 sm:$0xff]  }
  0xce   :  { %8204 = vmatprep.subr.bf16.mxu1 %v25532_v22  ;;  %v25616_v22 = vld [vmem:[%s38113_s1 + $0x16c4] ss:$100 sps:$4 sm:$0xff]   ;;  %v25619_v23 = vld [vmem:[%s38113_s1 + $0xdc] ss:$100 sps:$4 sm:$0xff]  }
  0xd0   :  { %7837 = vmatpush1.bf16.msra.mxu0 %v25533_v25  ;;  %v25617_v25 = vld [vmem:[%s38113_s1 + $0xd8] ss:$100 sps:$4 sm:$0xff]  }
  0xd1   :  { %8205 = vmatpush1.bf16.msra.mxu1 %v25530_v24  ;;  %7838 = vmatprep.subr.bf16.mxu0 %v25541_v27  ;;  %v25614_v24 = vld [vmem:[%s38113_s1 + $0x16c0] ss:$100 sps:$4 sm:$0xff]  }
  0xd2   :  { %8217 = vmatprep.subr.bf16.mxu1 %v25538_v26  ;;  %v25622_v26 = vld [vmem:[%s38113_s1 + $0x178c] ss:$100 sps:$4 sm:$0xff]   ;;  %v25625_v27 = vld [vmem:[%s38113_s1 + $0x1a4] ss:$100 sps:$4 sm:$0xff]  }
  0xd4   :  { %8207 = vmatmul.mubr.bf16.vlgmr.msra.gmra.mrb[8].mxu1 %v29924_v32  ;;  %7839 = vmatpush1.bf16.msra.mxu0 %v25539_v29  ;;  %v25623_v29 = vld [vmem:[%s38113_s1 + $0x1a0] ss:$100 sps:$4 sm:$0xff]  }
  0xd5   :  { %8218 = vmatpush1.bf16.msra.mxu1 %v25536_v28  ;;  %7840 = vmatprep.subr.bf16.mxu0 %v25547_v31  ;;  %v25620_v28 = vld [vmem:[%s38113_s1 + $0x1788] ss:$100 sps:$4 sm:$0xff]  }
  0xd6   :  { %8219 = vmatprep.subr.bf16.mxu1 %v25544_v30  ;;  %8249 = vmatprep.mubr.bf16.mxu1 %v29942_v50  ;;  %v25628_v30 = vld [vmem:[%s38113_s1 + $0x1854] ss:$100 sps:$4 sm:$0xff]   ;;  %v25631_v31 = vld [vmem:[%s38113_s1 + $0x26c] ss:$100 sps:$4 sm:$0xff]  }
  0xd8   :  { %7841 = vmatpush1.bf16.msra.mxu0 %v25545_v34  ;;  %v25634_v34 = vld [vmem:[%s38113_s1 + $0x191c] ss:$100 sps:$4 sm:$0xff]  }
  0xd9   :  { %8220 = vmatpush1.bf16.msra.mxu1 %v25542_v33  ;;  %7842 = vmatprep.subr.bf16.mxu0 %v25553_v36  ;;  %v25629_v33 = vld [vmem:[%s38113_s1 + $0x268] ss:$100 sps:$4 sm:$0xff]   ;;  %v25632_v36 = vld [vmem:[%s38113_s1 + $0x1918] ss:$100 sps:$4 sm:$0xff]  }
  0xda   :  { %8221 = vmatprep.subr.bf16.mxu1 %v25550_v35  ;;  %v25637_v35 = vld [vmem:[%s38113_s1 + $0x334] ss:$100 sps:$4 sm:$0xff]  }
  0xdb   :  { %v29957_v41 = vpop.f32.mrb[0].mxu1 }
  0xdc   :  { %v29959_v42 = vpop.f32.mrb[1].mxu1  ;;  %7843 = vmatpush1.bf16.msra.mxu0 %v25551_v38  ;;  %v25640_v38 = vld [vmem:[%s38113_s1 + $0x19e4] ss:$100 sps:$4 sm:$0xff]  }
  0xdd   :  { %8222 = vmatpush1.bf16.msra.mxu1 %v25548_v37  ;;  %v29964_v44 = vpop.f32.mrb[2].mxu1  ;;  %7844 = vmatprep.subr.bf16.mxu0 %v25559_v40  ;;  %v25635_v37 = vld [vmem:[%s38113_s1 + $0x330] ss:$100 sps:$4 sm:$0xff]   ;;  %v30138_v40 = vld [vmem:[%s38114_s0 + $0x8] ss:$28 sps:$4 sm:$0xff]  }
  0xde   :  { %v29972_v47 = vpop.f32.mrb[3].mxu1  ;;  %8223 = vmatprep.subr.bf16.mxu1 %v25556_v39  ;;  %v25643_v39 = vld [vmem:[%s38113_s1 + $0x3fc] ss:$100 sps:$4 sm:$0xff]  }
  0xe0   :  { %7845 = vmatpush1.bf16.msra.mxu0 %v25557_v45  ;;  %v25641_v45 = vld [vmem:[%s38113_s1 + $0x3f8] ss:$100 sps:$4 sm:$0xff]  }
  0xe1   :  { %8224 = vmatpush1.bf16.msra.mxu1 %v25554_v43  ;;  %7846 = vmatprep.subr.bf16.mxu0 %v25565_v48  ;;  %v25638_v43 = vld [vmem:[%s38113_s1 + $0x19e0] ss:$100 sps:$4 sm:$0xff]  }
  0xe2   :  { %8225 = vmatprep.subr.bf16.mxu1 %v25562_v46  ;;  %v25646_v46 = vld [vmem:[%s38113_s1 + $0x1aac] ss:$100 sps:$4 sm:$0xff]   ;;  %v25649_v48 = vld [vmem:[%s38113_s1 + $0x4c4] ss:$100 sps:$4 sm:$0xff]  }
  0xe4   :  { %7847 = vmatpush1.bf16.msra.mxu0 %v25563_v51  ;;  %v30159_v51 = vld [vmem:[%s38114_s0 + $0x14] ss:$28 sps:$4 sm:$0xff]  }
  0xe5   :  { %8226 = vmatpush1.bf16.msra.mxu1 %v25560_v49  ;;  %7848 = vmatprep.subr.bf16.mxu0 %v25571_v53  ;;  %v25644_v49 = vld [vmem:[%s38113_s1 + $0x1aa8] ss:$100 sps:$4 sm:$0xff]   ;;  %v25652_v53 = vld [vmem:[%s38113_s1 + $0x1b74] ss:$100 sps:$4 sm:$0xff]  }
  0xe6   :  { %8227 = vmatprep.subr.bf16.mxu1 %v25568_v52  ;;  %v25647_v52 = vld [vmem:[%s38113_s1 + $0x4c0] ss:$100 sps:$4 sm:$0xff]  }
  0xe8   :  { %7849 = vmatpush1.bf16.msra.mxu0 %v25569_v55  ;;  %v25650_v55 = vld [vmem:[%s38113_s1 + $0x1b70] ss:$100 sps:$4 sm:$0xff]  }
  0xe9   :  { %8228 = vmatpush1.bf16.msra.mxu1 %v25566_v54  ;;  %7850 = vmatprep.subr.bf16.mxu0 %v25577_v57  ;;  %v25655_v54 = vld [vmem:[%s38113_s1 + $0x58c] ss:$100 sps:$4 sm:$0xff]   ;;  %v25658_v57 = vld [vmem:[%s38113_s1 + $0x1c3c] ss:$100 sps:$4 sm:$0xff]  }
  0xea   :  { %8229 = vmatprep.subr.bf16.mxu1 %v25574_v56  ;;  %v25653_v56 = vld [vmem:[%s38113_s1 + $0x588] ss:$100 sps:$4 sm:$0xff]  }
  0xec   :  { %7851 = vmatpush1.bf16.msra.mxu0 %v25575_v59  ;;  %v25656_v59 = vld [vmem:[%s38113_s1 + $0x1c38] ss:$100 sps:$4 sm:$0xff]  }
  0xed   :  { %8230 = vmatpush1.bf16.msra.mxu1 %v25572_v58  ;;  %7852 = vmatprep.subr.bf16.mxu0 %v25583_v61  ;;  %v25661_v58 = vld [vmem:[%s38113_s1 + $0x654] ss:$100 sps:$4 sm:$0xff]   ;;  %v25664_v61 = vld [vmem:[%s38113_s1 + $0x1d04] ss:$100 sps:$4 sm:$0xff]  }
  0xee   :  { %8231 = vmatprep.subr.bf16.mxu1 %v25580_v60  ;;  %v25659_v60 = vld [vmem:[%s38113_s1 + $0x650] ss:$100 sps:$4 sm:$0xff]  }
  0xf0   :  { %7853 = vmatpush1.bf16.msra.mxu0 %v25581_v63  ;;  %v25662_v63 = vld [vmem:[%s38113_s1 + $0x1d00] ss:$100 sps:$4 sm:$0xff]  }
  0xf1   :  { %8232 = vmatpush1.bf16.msra.mxu1 %v25578_v62  ;;  %7854 = vmatprep.subr.bf16.mxu0 %v25589_v2  ;;  %v25667_v62 = vld [vmem:[%s38113_s1 + $0x71c] ss:$100 sps:$4 sm:$0xff]   ;;  %v25670_v2 = vld [vmem:[%s38113_s1 + $0x1dcc] ss:$100 sps:$4 sm:$0xff]  }
  0xf2   :  { %8233 = vmatprep.subr.bf16.mxu1 %v25586_v0  ;;  %v25665_v0 = vld [vmem:[%s38113_s1 + $0x718] ss:$100 sps:$4 sm:$0xff]  }
  0xf4   :  { %7855 = vmatpush1.bf16.msra.mxu0 %v25587_v4  ;;  %v25668_v4 = vld [vmem:[%s38113_s1 + $0x1dc8] ss:$100 sps:$4 sm:$0xff]  }
  0xf5   :  { %8234 = vmatpush1.bf16.msra.mxu1 %v25584_v3  ;;  %7856 = vmatprep.subr.bf16.mxu0 %v25595_v6  ;;  %v25673_v3 = vld [vmem:[%s38113_s1 + $0x7e4] ss:$100 sps:$4 sm:$0xff]   ;;  %v25676_v6 = vld [vmem:[%s38113_s1 + $0x1e94] ss:$100 sps:$4 sm:$0xff]  }
  0xf6   :  { %8235 = vmatprep.subr.bf16.mxu1 %v25592_v5  ;;  %v25671_v5 = vld [vmem:[%s38113_s1 + $0x7e0] ss:$100 sps:$4 sm:$0xff]  }
  0xf8   :  { %7857 = vmatpush1.bf16.msra.mxu0 %v25593_v8  ;;  %v25674_v8 = vld [vmem:[%s38113_s1 + $0x1e90] ss:$100 sps:$4 sm:$0xff]  }
  0xf9   :  { %8236 = vmatpush1.bf16.msra.mxu1 %v25590_v7  ;;  %7858 = vmatprep.subr.bf16.mxu0 %v25601_v10  ;;  %v25679_v7 = vld [vmem:[%s38113_s1 + $0x8ac] ss:$100 sps:$4 sm:$0xff]   ;;  %v25682_v10 = vld [vmem:[%s38113_s1 + $0x1f5c] ss:$100 sps:$4 sm:$0xff]  }
  0xfa   :  { %8237 = vmatprep.subr.bf16.mxu1 %v25598_v9  ;;  %v25677_v9 = vld [vmem:[%s38113_s1 + $0x8a8] ss:$100 sps:$4 sm:$0xff]  }
  0xfc   :  { %7859 = vmatpush1.bf16.msra.mxu0 %v25599_v12  ;;  %v25680_v12 = vld [vmem:[%s38113_s1 + $0x1f58] ss:$100 sps:$4 sm:$0xff]  }
  0xfd   :  { %8238 = vmatpush1.bf16.msra.mxu1 %v25596_v11  ;;  %7860 = vmatprep.subr.bf16.mxu0 %v25607_v15  ;;  %v25685_v11 = vld [vmem:[%s38113_s1 + $0x974] ss:$100 sps:$4 sm:$0xff]   ;;  %v25688_v15 = vld [vmem:[%s38113_s1 + $0x2024] ss:$100 sps:$4 sm:$0xff]  }
  0xfe   :  { %8239 = vmatprep.subr.bf16.mxu1 %v25604_v14  ;;  %v25683_v14 = vld [vmem:[%s38113_s1 + $0x970] ss:$100 sps:$4 sm:$0xff]  }
 0x100   :  { %7861 = vmatpush1.bf16.msra.mxu0 %v25605_v18  ;;  %v25686_v18 = vld [vmem:[%s38113_s1 + $0x2020] ss:$100 sps:$4 sm:$0xff]  }
 0x101   :  { %8240 = vmatpush1.bf16.msra.mxu1 %v25602_v16  ;;  %8002 = vmatprep.subr.bf16.mxu0 %v25613_v17  ;;  %v25691_v16 = vld [vmem:[%s38113_s1 + $0xa3c] ss:$100 sps:$4 sm:$0xff]   ;;  %v25694_v17 = vld [vmem:[%s38113_s1 + $0x20ec] ss:$100 sps:$4 sm:$0xff]  }
 0x102   :  { %8241 = vmatprep.subr.bf16.mxu1 %v25610_v19  ;;  %v25689_v19 = vld [vmem:[%s38113_s1 + $0xa38] ss:$100 sps:$4 sm:$0xff]  }
 0x103   :  { %7863 = vmatmul.mubr.bf16.vlgmr.msra.gmra.mrb[4].mxu0 %v29924_v32 }
 0x104   :  { %8003 = vmatpush1.bf16.msra.mxu0 %v25611_v21  ;;  %8034 = vmatprep.mubr.bf16.mxu0 %v29882_v13  ;;  %v25626_v13 = vld [vmem:[%s38113_s1 + $0x1850] ss:$100 sps:$4 sm:$0xff]   ;;  %v25692_v21 = vld [vmem:[%s38113_s1 + $0x20e8] ss:$100 sps:$4 sm:$0xff]  }
 0x105   :  { %8242 = vmatpush1.bf16.msra.mxu1 %v25608_v20  ;;  %8004 = vmatprep.subr.bf16.mxu0 %v25619_v23  ;;  %v25697_v20 = vld [vmem:[%s38113_s1 + $0xb04] ss:$100 sps:$4 sm:$0xff]   ;;  %v25700_v23 = vld [vmem:[%s38113_s1 + $0x21b4] ss:$100 sps:$4 sm:$0xff]  }
 0x106   :  { %8243 = vmatprep.subr.bf16.mxu1 %v25616_v22  ;;  %v25695_v22 = vld [vmem:[%s38113_s1 + $0xb00] ss:$100 sps:$4 sm:$0xff]  }
 0x108   :  { %8005 = vmatpush1.bf16.msra.mxu0 %v25617_v25  ;;  %v25698_v25 = vld [vmem:[%s38113_s1 + $0x21b0] ss:$100 sps:$4 sm:$0xff]  }
 0x109   :  { %8244 = vmatpush1.bf16.msra.mxu1 %v25614_v24  ;;  %8006 = vmatprep.subr.bf16.mxu0 %v25625_v27  ;;  %v25703_v24 = vld [vmem:[%s38113_s1 + $0xbcc] ss:$100 sps:$4 sm:$0xff]   ;;  %v25706_v27 = vld [vmem:[%s38113_s1 + $0x227c] ss:$100 sps:$4 sm:$0xff]  }
 0x10a   :  { %8245 = vmatprep.subr.bf16.mxu1 %v25622_v26  ;;  %v25701_v26 = vld [vmem:[%s38113_s1 + $0xbc8] ss:$100 sps:$4 sm:$0xff]  }
 0x10c   :  { %8007 = vmatpush1.bf16.msra.mxu0 %v25623_v29  ;;  %v25704_v29 = vld [vmem:[%s38113_s1 + $0x2278] ss:$100 sps:$4 sm:$0xff]  }
 0x10d   :  { %8246 = vmatpush1.bf16.msra.mxu1 %v25620_v28  ;;  %8008 = vmatprep.subr.bf16.mxu0 %v25631_v31  ;;  %v25709_v28 = vld [vmem:[%s38113_s1 + $0xc94] ss:$100 sps:$4 sm:$0xff]   ;;  %v25712_v31 = vld [vmem:[%s38113_s1 + $0x2344] ss:$100 sps:$4 sm:$0xff]  }
 0x10e   :  { %8247 = vmatprep.subr.bf16.mxu1 %v25628_v30  ;;  %v25707_v30 = vld [vmem:[%s38113_s1 + $0xc90] ss:$100 sps:$4 sm:$0xff]  }
 0x110   :  { %8009 = vmatpush1.bf16.msra.mxu0 %v25629_v33  ;;  %v25710_v33 = vld [vmem:[%s38113_s1 + $0x2340] ss:$100 sps:$4 sm:$0xff]  }
 0x111   :  { %8248 = vmatpush1.bf16.msra.mxu1 %v25626_v13  ;;  %8010 = vmatprep.subr.bf16.mxu0 %v25637_v35  ;;  %v25715_v13 = vld [vmem:[%s38113_s1 + $0xd5c] ss:$100 sps:$4 sm:$0xff]   ;;  %v25718_v35 = vld [vmem:[%s38113_s1 + $0x240c] ss:$100 sps:$4 sm:$0xff]  }
 0x112   :  { %8260 = vmatprep.subr.bf16.mxu1 %v25634_v34  ;;  %v25713_v34 = vld [vmem:[%s38113_s1 + $0xd58] ss:$100 sps:$4 sm:$0xff]  }
 0x114   :  { %8250 = vmatmul.mubr.bf16.vlgmr.msra.gmra.mrb[8].mxu1 %v30138_v40  ;;  %8011 = vmatpush1.bf16.msra.mxu0 %v25635_v37  ;;  %v25719_v37 = vld [vmem:[%s38113_s1 + $0xe20] ss:$100 sps:$4 sm:$0xff]  }
 0x115   :  { %8261 = vmatpush1.bf16.msra.mxu1 %v25632_v36  ;;  %8012 = vmatprep.subr.bf16.mxu0 %v25643_v39  ;;  %v25721_v36 = vld [vmem:[%s38113_s1 + $0xe24] ss:$100 sps:$4 sm:$0xff]   ;;  %v25722_v39 = vld [vmem:[%s38113_s1 + $0x24d0] ss:$100 sps:$4 sm:$0xff]  }
 0x116   :  { %8262 = vmatprep.subr.bf16.mxu1 %v25640_v38  ;;  %8292 = vmatprep.mubr.bf16.mxu1 %v30159_v51  ;;  %v25724_v38 = vld [vmem:[%s38113_s1 + $0x24d4] ss:$100 sps:$4 sm:$0xff]  }
 0x118   :  { %8013 = vmatpush1.bf16.msra.mxu0 %v25641_v45  ;;  %v25730_v45 = vld [vmem:[%s38113_s1 + $0x259c] ss:$100 sps:$4 sm:$0xff]  }
 0x119   :  { %8263 = vmatpush1.bf16.msra.mxu1 %v25638_v43  ;;  %8014 = vmatprep.subr.bf16.mxu0 %v25649_v48  ;;  %v25725_v43 = vld [vmem:[%s38113_s1 + $0xee8] ss:$100 sps:$4 sm:$0xff]   ;;  %v25728_v48 = vld [vmem:[%s38113_s1 + $0x2598] ss:$100 sps:$4 sm:$0xff]  }
 0x11a   :  { %8264 = vmatprep.subr.bf16.mxu1 %v25646_v46  ;;  %v25733_v46 = vld [vmem:[%s38113_s1 + $0xfb4] ss:$100 sps:$4 sm:$0xff]  }
 0x11c   :  { %8015 = vmatpush1.bf16.msra.mxu0 %v25647_v52  ;;  %v25736_v52 = vld [vmem:[%s38113_s1 + $0x107c] ss:$100 sps:$4 sm:$0xff]  }
 0x11d   :  { %8265 = vmatpush1.bf16.msra.mxu1 %v25644_v49  ;;  %8016 = vmatprep.subr.bf16.mxu0 %v25655_v54  ;;  %v25731_v49 = vld [vmem:[%s38113_s1 + $0xfb0] ss:$100 sps:$4 sm:$0xff]  }
 0x11e   :  { %8266 = vmatprep.subr.bf16.mxu1 %v25652_v53  ;;  %v25742_v53 = vld [vmem:[%s38113_s1 + $0x2c] ss:$100 sps:$4 sm:$0xff]  }
 0x11f   :  { %v30344_v54 = vld [vmem:[%s38114_s0 + $0x10] ss:$28 sps:$4 sm:$0xff]  }
 0x120   :  { %8017 = vmatpush1.bf16.msra.mxu0 %v25653_v56  ;;  %v25739_v56 = vld [vmem:[%s38113_s1 + $0x1144] ss:$100 sps:$4 sm:$0xff]  }
 0x121   :  { %8267 = vmatpush1.bf16.msra.mxu1 %v25650_v55  ;;  %8018 = vmatprep.subr.bf16.mxu0 %v25661_v58  ;;  %v25734_v55 = vld [vmem:[%s38113_s1 + $0x1078] ss:$100 sps:$4 sm:$0xff]   ;;  %v25745_v58 = vld [vmem:[%s38113_s1 + $0x120c] ss:$100 sps:$4 sm:$0xff]  }
 0x122   :  { %8268 = vmatprep.subr.bf16.mxu1 %v25658_v57  ;;  %v25737_v57 = vld [vmem:[%s38113_s1 + $0x1140] ss:$100 sps:$4 sm:$0xff]  }
 0x124   :  { %8019 = vmatpush1.bf16.msra.mxu0 %v25659_v60  ;;  %v25743_v60 = vld [vmem:[%s38113_s1 + $0x1208] ss:$100 sps:$4 sm:$0xff]  }
 0x125   :  { %8269 = vmatpush1.bf16.msra.mxu1 %v25656_v59  ;;  %8020 = vmatprep.subr.bf16.mxu0 %v25667_v62  ;;  %v25740_v59 = vld [vmem:[%s38113_s1 + $0x28] ss:$100 sps:$4 sm:$0xff]   ;;  %v25751_v62 = vld [vmem:[%s38113_s1 + $0x12d4] ss:$100 sps:$4 sm:$0xff]  }
 0x126   :  { %8270 = vmatprep.subr.bf16.mxu1 %v25664_v61  ;;  %v25748_v61 = vld [vmem:[%s38113_s1 + $0xf4] ss:$100 sps:$4 sm:$0xff]  }
 0x128   :  { %8021 = vmatpush1.bf16.msra.mxu0 %v25665_v0  ;;  %v25746_v0 = vld [vmem:[%s38113_s1 + $0xf0] ss:$100 sps:$4 sm:$0xff]  }
 0x129   :  { %8271 = vmatpush1.bf16.msra.mxu1 %v25662_v63  ;;  %8022 = vmatprep.subr.bf16.mxu0 %v25673_v3  ;;  %v30375_v63 = vld [vmem:[%s38114_s0 + $0x18] ss:$28 sps:$4 sm:$0xff]   ;;  %v25754_v3 = vld [vmem:[%s38113_s1 + $0x1bc] ss:$100 sps:$4 sm:$0xff]  }
 0x12a   :  { %8272 = vmatprep.subr.bf16.mxu1 %v25670_v2  ;;  %v25749_v2 = vld [vmem:[%s38113_s1 + $0x12d0] ss:$100 sps:$4 sm:$0xff]  }
 0x12c   :  { %8023 = vmatpush1.bf16.msra.mxu0 %v25671_v5  ;;  %v30394_v5 = vld [vmem:[%s38114_s0 + $0x4] ss:$28 sps:$4 sm:$0xff]  }
 0x12d   :  { %8273 = vmatpush1.bf16.msra.mxu1 %v25668_v4  ;;  %8024 = vmatprep.subr.bf16.mxu0 %v25679_v7  ;;  %v25757_v4 = vld [vmem:[%s38113_s1 + $0x139c] ss:$100 sps:$4 sm:$0xff]  }
 0x12e   :  { %8274 = vmatprep.subr.bf16.mxu1 %v25676_v6  ;;  %v25752_v6 = vld [vmem:[%s38113_s1 + $0x1b8] ss:$100 sps:$4 sm:$0xff]  }
 0x12f   :  { %v25755_v7 = vld [vmem:[%s38113_s1 + $0x1398] ss:$100 sps:$4 sm:$0xff]  }
 0x130   :  { %8025 = vmatpush1.bf16.msra.mxu0 %v25677_v9  ;;  %v25763_v9 = vld [vmem:[%s38113_s1 + $0x1464] ss:$100 sps:$4 sm:$0xff]  }
 0x131   :  { %8275 = vmatpush1.bf16.msra.mxu1 %v25674_v8  ;;  %8026 = vmatprep.subr.bf16.mxu0 %v25685_v11  ;;  %v25760_v8 = vld [vmem:[%s38113_s1 + $0x284] ss:$100 sps:$4 sm:$0xff]  }
 0x132   :  { %8276 = vmatprep.subr.bf16.mxu1 %v25682_v10 }
 0x134   :  { %8027 = vmatpush1.bf16.msra.mxu0 %v25683_v14  ;;  %v25758_v14 = vld [vmem:[%s38113_s1 + $0x280] ss:$100 sps:$4 sm:$0xff]  }
 0x135   :  { %8277 = vmatpush1.bf16.msra.mxu1 %v25680_v12  ;;  %8028 = vmatprep.subr.bf16.mxu0 %v25691_v16 }
 0x136   :  { %8278 = vmatprep.subr.bf16.mxu1 %v25688_v15  ;;  %v25761_v15 = vld [vmem:[%s38113_s1 + $0x1460] ss:$100 sps:$4 sm:$0xff]  }
 0x138   :  { %8029 = vmatpush1.bf16.msra.mxu0 %v25689_v19  ;;  %v25769_v19 = vld [vmem:[%s38113_s1 + $0x152c] ss:$100 sps:$4 sm:$0xff]  }
 0x139   :  { %8279 = vmatpush1.bf16.msra.mxu1 %v25686_v18  ;;  %8030 = vmatprep.subr.bf16.mxu0 %v25697_v20  ;;  %v25766_v18 = vld [vmem:[%s38113_s1 + $0x34c] ss:$100 sps:$4 sm:$0xff]  }
 0x13a   :  { %8280 = vmatprep.subr.bf16.mxu1 %v25694_v17  ;;  %v25764_v17 = vld [vmem:[%s38113_s1 + $0x348] ss:$100 sps:$4 sm:$0xff]  }
 0x13b   :  { %v25767_v20 = vld [vmem:[%s38113_s1 + $0x1528] ss:$100 sps:$4 sm:$0xff]  }
 0x13c   :  { %8031 = vmatpush1.bf16.msra.mxu0 %v25695_v22  ;;  %v25775_v22 = vld [vmem:[%s38113_s1 + $0x15f4] ss:$100 sps:$4 sm:$0xff]  }
 0x13d   :  { %8281 = vmatpush1.bf16.msra.mxu1 %v25692_v21  ;;  %8032 = vmatprep.subr.bf16.mxu0 %v25703_v24  ;;  %v25772_v21 = vld [vmem:[%s38113_s1 + $0x414] ss:$100 sps:$4 sm:$0xff]  }
 0x13e   :  { %8282 = vmatprep.subr.bf16.mxu1 %v25700_v23  ;;  %v25770_v23 = vld [vmem:[%s38113_s1 + $0x410] ss:$100 sps:$4 sm:$0xff]  }
 0x13f   :  { %v25773_v24 = vld [vmem:[%s38113_s1 + $0x15f0] ss:$100 sps:$4 sm:$0xff]  }
 0x140   :  { %8033 = vmatpush1.bf16.msra.mxu0 %v25701_v26  ;;  %v25781_v26 = vld [vmem:[%s38113_s1 + $0x16bc] ss:$100 sps:$4 sm:$0xff]  }
 0x141   :  { %8283 = vmatpush1.bf16.msra.mxu1 %v25698_v25  ;;  %8045 = vmatprep.subr.bf16.mxu0 %v25709_v28  ;;  %v25778_v25 = vld [vmem:[%s38113_s1 + $0x4dc] ss:$100 sps:$4 sm:$0xff]  }
 0x142   :  { %8284 = vmatprep.subr.bf16.mxu1 %v25706_v27  ;;  %v25776_v27 = vld [vmem:[%s38113_s1 + $0x4d8] ss:$100 sps:$4 sm:$0xff]  }
 0x143   :  { %8035 = vmatmul.mubr.bf16.vlgmr.msra.gmra.mrb[8].mxu0 %v29924_v32  ;;  %v25716_v32 = vld [vmem:[%s38113_s1 + $0x2408] ss:$100 sps:$4 sm:$0xff]   ;;  %v25779_v28 = vld [vmem:[%s38113_s1 + $0x16b8] ss:$100 sps:$4 sm:$0xff]  }
 0x144   :  { %8046 = vmatpush1.bf16.msra.mxu0 %v25707_v30  ;;  %8077 = vmatprep.mubr.bf16.mxu0 %v29942_v50  ;;  %v25727_v50 = vld [vmem:[%s38113_s1 + $0xeec] ss:$100 sps:$4 sm:$0xff]   ;;  %v25787_v30 = vld [vmem:[%s38113_s1 + $0x1784] ss:$100 sps:$4 sm:$0xff]  }
 0x145   :  { %8285 = vmatpush1.bf16.msra.mxu1 %v25704_v29  ;;  %8047 = vmatprep.subr.bf16.mxu0 %v25715_v13  ;;  %v25784_v29 = vld [vmem:[%s38113_s1 + $0x5a4] ss:$100 sps:$4 sm:$0xff]  }
 0x146   :  { %8286 = vmatprep.subr.bf16.mxu1 %v25712_v31  ;;  %v25782_v31 = vld [vmem:[%s38113_s1 + $0x5a0] ss:$100 sps:$4 sm:$0xff]  }
 0x147   :  { %v25785_v13 = vld [vmem:[%s38113_s1 + $0x1780] ss:$100 sps:$4 sm:$0xff]  }
 0x148   :  { %8048 = vmatpush1.bf16.msra.mxu0 %v25713_v34  ;;  %v25793_v34 = vld [vmem:[%s38113_s1 + $0x184c] ss:$100 sps:$4 sm:$0xff]  }
 0x149   :  { %8287 = vmatpush1.bf16.msra.mxu1 %v25710_v33  ;;  %8049 = vmatprep.subr.bf16.mxu0 %v25721_v36  ;;  %v25790_v33 = vld [vmem:[%s38113_s1 + $0x66c] ss:$100 sps:$4 sm:$0xff]  }
 0x14a   :  { %8288 = vmatprep.subr.bf16.mxu1 %v25718_v35  ;;  %v25788_v35 = vld [vmem:[%s38113_s1 + $0x668] ss:$100 sps:$4 sm:$0xff]  }
 0x14b   :  { %v25791_v36 = vld [vmem:[%s38113_s1 + $0x1848] ss:$100 sps:$4 sm:$0xff]  }
 0x14c   :  { %8050 = vmatpush1.bf16.msra.mxu0 %v25719_v37  ;;  %v25799_v37 = vld [vmem:[%s38113_s1 + $0x1914] ss:$100 sps:$4 sm:$0xff]  }
 0x14d   :  { %8289 = vmatpush1.bf16.msra.mxu1 %v25716_v32  ;;  %8051 = vmatprep.subr.bf16.mxu0 %v25727_v50  ;;  %v25796_v32 = vld [vmem:[%s38113_s1 + $0x734] ss:$100 sps:$4 sm:$0xff]  }
 0x14e   :  { %8290 = vmatprep.subr.bf16.mxu1 %v25724_v38  ;;  %v25794_v38 = vld [vmem:[%s38113_s1 + $0x730] ss:$100 sps:$4 sm:$0xff]  }
 0x14f   :  { %v25797_v50 = vld [vmem:[%s38113_s1 + $0x1910] ss:$100 sps:$4 sm:$0xff]  }
 0x150   :  { %8052 = vmatpush1.bf16.msra.mxu0 %v25725_v43  ;;  %v25805_v43 = vld [vmem:[%s38113_s1 + $0x19dc] ss:$100 sps:$4 sm:$0xff]  }
 0x151   :  { %8291 = vmatpush1.bf16.msra.mxu1 %v25722_v39  ;;  %8053 = vmatprep.subr.bf16.mxu0 %v25733_v46  ;;  %v25802_v39 = vld [vmem:[%s38113_s1 + $0x7fc] ss:$100 sps:$4 sm:$0xff]  }
 0x152   :  { %8303 = vmatprep.subr.bf16.mxu1 %v25730_v45  ;;  %v25800_v45 = vld [vmem:[%s38113_s1 + $0x7f8] ss:$100 sps:$4 sm:$0xff]  }
 0x153   :  { %v25803_v46 = vld [vmem:[%s38113_s1 + $0x19d8] ss:$100 sps:$4 sm:$0xff]  }
 0x154   :  { %8293 = vmatmul.mubr.bf16.vlgmr.msra.gmra.mrb[8].mxu1 %v30344_v54  ;;  %8054 = vmatpush1.bf16.msra.mxu0 %v25731_v49  ;;  %v1320_v49 = vlaneseq }
 0x155   :  { %8304 = vmatpush1.bf16.msra.mxu1 %v25728_v48  ;;  %8055 = vmatprep.subr.bf16.mxu0 %v25736_v52  ;;  %v25808_v48 = vld [vmem:[%s38113_s1 + $0x8c4] ss:$100 sps:$4 sm:$0xff]  }
 0x156   :  { %8335 = vmatprep.mubr.bf16.mxu1 %v29192_v1  ;;  %8518 = vmatprep.subr.bf16.mxu1 %v25742_v53  ;;  %v25806_v52 = vld [vmem:[%s38113_s1 + $0x8c0] ss:$100 sps:$4 sm:$0xff]  }
 0x157   :  { %v25809_v53 = vld [vmem:[%s38113_s1 + $0x1aa0] ss:$100 sps:$4 sm:$0xff]  }
 0x158   :  { %8056 = vmatpush1.bf16.msra.mxu0 %v25734_v55  ;;  %v25814_v55 = vld [vmem:[%s38113_s1 + $0x98c] ss:$100 sps:$4 sm:$0xff]  }
 0x159   :  { %8057 = vmatprep.subr.bf16.mxu0 %v25739_v56  ;;  %v30527_v56 = vshrl.u32 %v1320_v49, 7  ;;  %v30639_v49 = vld [vmem:[%s38114_s0 + $0xc] ss:$28 sps:$4 sm:$0xff]  }
 0x15c   :  { %8058 = vmatpush1.bf16.msra.mxu0 %v25737_v57  ;;  %v25812_v57 = vld [vmem:[%s38113_s1 + $0x988] ss:$100 sps:$4 sm:$0xff]  }
 0x15d   :  { %8059 = vmatprep.subr.bf16.mxu0 %v25745_v58  ;;  %v25815_v58 = vld [vmem:[%s38113_s1 + $0x1b68] ss:$100 sps:$4 sm:$0xff]  }
 0x160   :  { %22980 = vmatmul.mubr.msk.bf16.vlgmr.msra.gmra.mrb[8].mxu1 %vm7654_vm0, %v30375_v63  ;;  %8060 = vmatpush1.bf16.msra.mxu0 %v25743_v60  ;;  %v25823_v60 = vld [vmem:[%s38113_s1 + $0x1c34] ss:$100 sps:$4 sm:$0xff]  }
 0x161   :  { %8519 = vmatpush1.bf16.msra.mxu1 %v25740_v59  ;;  %8061 = vmatprep.subr.bf16.mxu0 %v25751_v62  ;;  %v25820_v59 = vld [vmem:[%s38113_s1 + $0xa54] ss:$100 sps:$4 sm:$0xff]   ;;  %v30545_v62 = vsub.s32 0, %v30527_v56 }
 0x162   :  { %8520 = vmatprep.subr.bf16.mxu1 %v25748_v61  ;;  %8550 = vmatprep.mubr.bf16.mxu1 %v30394_v5  ;;  %v25818_v61 = vld [vmem:[%s38113_s1 + $0xa50] ss:$100 sps:$4 sm:$0xff]  }
 0x164   :  { %8062 = vmatpush1.bf16.msra.mxu0 %v25749_v2  ;;  %v30553_v2 = vld [vmem:[%s38115_s2] sm:$0xff] }
 0x165   :  { %8521 = vmatpush1.bf16.msra.mxu1 %v25746_v0  ;;  %8063 = vmatprep.subr.bf16.mxu0 %v25757_v4  ;;  %v25821_v0 = vld [vmem:[%s38113_s1 + $0x1c30] ss:$100 sps:$4 sm:$0xff]   ;;  %v25826_v4 = vld [vmem:[%s38113_s1 + $0xb1c] ss:$100 sps:$4 sm:$0xff]  }
 0x166   :  { %8522 = vmatprep.subr.bf16.mxu1 %v25754_v3  ;;  %v30556_v3 = vsub.s32 1, %v30527_v56 }
 0x167   :  { %v30409_v10 = vpop.f32.mrb[4].mxu1 }
 0x168   :  { %v30411_v11 = vpop.f32.mrb[5].mxu1  ;;  %8064 = vmatpush1.bf16.msra.mxu0 %v25755_v7  ;;  %v1323_v7 = vrot.slane %v30553_v2, %v30545_v62 }
 0x169   :  { %8523 = vmatpush1.bf16.msra.mxu1 %v25752_v6  ;;  %v30413_v12 = vpop.f32.mrb[6].mxu1  ;;  %8065 = vmatprep.subr.bf16.mxu0 %v25763_v9  ;;  %v25829_v6 = vld [vmem:[%s38113_s1 + $0x1cfc] ss:$100 sps:$4 sm:$0xff]   ;;  %v1327_v9 = vrot.slane %v30553_v2, %v30556_v3 }
 0x16a   :  { %v30421_v16 = vpop.f32.mrb[7].mxu1  ;;  %8524 = vmatprep.subr.bf16.mxu1 %v25760_v8  ;;  %v25824_v8 = vld [vmem:[%s38113_s1 + $0xb18] ss:$100 sps:$4 sm:$0xff]  }
 0x16c   :  { %8066 = vmatpush1.bf16.msra.mxu0 %v25761_v15  ;;  %v25832_v15 = vld [vmem:[%s38113_s1 + $0xbe4] ss:$100 sps:$4 sm:$0xff]  }
 0x16d   :  { %8525 = vmatpush1.bf16.msra.mxu1 %v25758_v14  ;;  %8067 = vmatprep.subr.bf16.mxu0 %v25769_v19  ;;  %v25827_v14 = vld [vmem:[%s38113_s1 + $0x1cf8] ss:$100 sps:$4 sm:$0xff]  }
 0x16e   :  { %8526 = vmatprep.subr.bf16.mxu1 %v25766_v18  ;;  %v25835_v18 = vld [vmem:[%s38113_s1 + $0x1dc4] ss:$100 sps:$4 sm:$0xff]  }
 0x170   :  { %8068 = vmatpush1.bf16.msra.mxu0 %v25767_v20 }
 0x171   :  { %8527 = vmatpush1.bf16.msra.mxu1 %v25764_v17  ;;  %8069 = vmatprep.subr.bf16.mxu0 %v25775_v22 }
 0x172   :  { %8528 = vmatprep.subr.bf16.mxu1 %v25772_v21 }
 0x174   :  { %8070 = vmatpush1.bf16.msra.mxu0 %v25773_v24  ;;  %v25833_v24 = vld [vmem:[%s38113_s1 + $0x1dc0] ss:$100 sps:$4 sm:$0xff]  }
 0x175   :  { %8529 = vmatpush1.bf16.msra.mxu1 %v25770_v23  ;;  %8071 = vmatprep.subr.bf16.mxu0 %v25781_v26  ;;  %v25830_v23 = vld [vmem:[%s38113_s1 + $0xbe0] ss:$100 sps:$4 sm:$0xff]  }
 0x176   :  { %8530 = vmatprep.subr.bf16.mxu1 %v25778_v25 }
 0x178   :  { %8072 = vmatpush1.bf16.msra.mxu0 %v25779_v28  ;;  %v25838_v28 = vld [vmem:[%s38113_s1 + $0xcac] ss:$100 sps:$4 sm:$0xff]  }
 0x179   :  { %8531 = vmatpush1.bf16.msra.mxu1 %v25776_v27  ;;  %8073 = vmatprep.subr.bf16.mxu0 %v25787_v30 }
 0x17a   :  { %8532 = vmatprep.subr.bf16.mxu1 %v25784_v29  ;;  %v25841_v29 = vld [vmem:[%s38113_s1 + $0x1e8c] ss:$100 sps:$4 sm:$0xff]  }
 0x17c   :  { %8074 = vmatpush1.bf16.msra.mxu0 %v25785_v13  ;;  %v25836_v13 = vld [vmem:[%s38113_s1 + $0xca8] ss:$100 sps:$4 sm:$0xff]  }
 0x17d   :  { %8533 = vmatpush1.bf16.msra.mxu1 %v25782_v31  ;;  %8075 = vmatprep.subr.bf16.mxu0 %v25793_v34  ;;  %v25844_v34 = vld [vmem:[%s38113_s1 + $0xd74] ss:$100 sps:$4 sm:$0xff]  }
 0x17e   :  { %8534 = vmatprep.subr.bf16.mxu1 %v25790_v33 }
 0x180   :  { %8076 = vmatpush1.bf16.msra.mxu0 %v25791_v36 }
 0x181   :  { %8535 = vmatpush1.bf16.msra.mxu1 %v25788_v35  ;;  %8088 = vmatprep.subr.bf16.mxu0 %v25799_v37  ;;  %v25847_v35 = vld [vmem:[%s38113_s1 + $0x1f54] ss:$100 sps:$4 sm:$0xff]  }
 0x182   :  { %8536 = vmatprep.subr.bf16.mxu1 %v25796_v32 }
 0x183   :  { %8078 = vmatmul.mubr.bf16.vlgmr.msra.gmra.mrb[8].mxu0 %v30138_v40  ;;  %v25811_v40 = vld [vmem:[%s38113_s1 + $0x1aa4] ss:$100 sps:$4 sm:$0xff]  }
 0x184   :  { %8089 = vmatpush1.bf16.msra.mxu0 %v25797_v50  ;;  %8120 = vmatprep.mubr.bf16.mxu0 %v30159_v51  ;;  %v25817_v51 = vld [vmem:[%s38113_s1 + $0x1b6c] ss:$100 sps:$4 sm:$0xff]  }
 0x185   :  { %8537 = vmatpush1.bf16.msra.mxu1 %v25794_v38  ;;  %8090 = vmatprep.subr.bf16.mxu0 %v25805_v43 }
 0x186   :  { %8538 = vmatprep.subr.bf16.mxu1 %v25802_v39  ;;  %v25845_v39 = vld [vmem:[%s38113_s1 + $0x1f50] ss:$100 sps:$4 sm:$0xff]  }
 0x188   :  { %8091 = vmatpush1.bf16.msra.mxu0 %v25803_v46  ;;  %v25853_v46 = vld [vmem:[%s38113_s1 + $0x201c] ss:$100 sps:$4 sm:$0xff]  }
 0x189   :  { %8539 = vmatpush1.bf16.msra.mxu1 %v25800_v45  ;;  %8092 = vmatprep.subr.bf16.mxu0 %v25811_v40  ;;  %v25850_v45 = vld [vmem:[%s38113_s1 + $0xe3c] ss:$100 sps:$4 sm:$0xff]  }
 0x18a   :  { %8540 = vmatprep.subr.bf16.mxu1 %v25808_v48  ;;  %v25848_v48 = vld [vmem:[%s38113_s1 + $0xe38] ss:$100 sps:$4 sm:$0xff]  }
 0x18b   :  { %v25851_v40 = vld [vmem:[%s38113_s1 + $0x2018] ss:$100 sps:$4 sm:$0xff]  }
 0x18c   :  { %8093 = vmatpush1.bf16.msra.mxu0 %v25809_v53  ;;  %v25859_v53 = vld [vmem:[%s38113_s1 + $0x20e4] ss:$100 sps:$4 sm:$0xff]  }
 0x18d   :  { %8541 = vmatpush1.bf16.msra.mxu1 %v25806_v52  ;;  %8094 = vmatprep.subr.bf16.mxu0 %v25817_v51  ;;  %v25856_v52 = vld [vmem:[%s38113_s1 + $0xf04] ss:$100 sps:$4 sm:$0xff]  }
 0x18e   :  { %8542 = vmatprep.subr.bf16.mxu1 %v25814_v55  ;;  %v25854_v55 = vld [vmem:[%s38113_s1 + $0xf00] ss:$100 sps:$4 sm:$0xff]  }
 0x18f   :  { %v25857_v51 = vld [vmem:[%s38113_s1 + $0x20e0] ss:$100 sps:$4 sm:$0xff]  }
 0x190   :  { %8095 = vmatpush1.bf16.msra.mxu0 %v25815_v58  ;;  %v25865_v58 = vld [vmem:[%s38113_s1 + $0x21ac] ss:$100 sps:$4 sm:$0xff]  }
 0x191   :  { %8543 = vmatpush1.bf16.msra.mxu1 %v25812_v57  ;;  %8096 = vmatprep.subr.bf16.mxu0 %v25823_v60  ;;  %v25862_v57 = vld [vmem:[%s38113_s1 + $0xfcc] ss:$100 sps:$4 sm:$0xff]  }
 0x192   :  { %8544 = vmatprep.subr.bf16.mxu1 %v25820_v59  ;;  %v25860_v59 = vld [vmem:[%s38113_s1 + $0xfc8] ss:$100 sps:$4 sm:$0xff]  }
 0x193   :  { %v25863_v60 = vld [vmem:[%s38113_s1 + $0x21a8] ss:$100 sps:$4 sm:$0xff]  }
 0x194   :  { %8097 = vmatpush1.bf16.msra.mxu0 %v25821_v0  ;;  %v25871_v0 = vld [vmem:[%s38113_s1 + $0x2274] ss:$100 sps:$4 sm:$0xff]  }
 0x195   :  { %8545 = vmatpush1.bf16.msra.mxu1 %v25818_v61  ;;  %8098 = vmatprep.subr.bf16.mxu0 %v25829_v6  ;;  %v25868_v61 = vld [vmem:[%s38113_s1 + $0x1094] ss:$100 sps:$4 sm:$0xff]  }
 0x196   :  { %8546 = vmatprep.subr.bf16.mxu1 %v25826_v4  ;;  %v7778_v19 = vpop.f32.mrb[0].mxu0  ;;  %v25866_v4 = vld [vmem:[%s38113_s1 + $0x1090] ss:$100 sps:$4 sm:$0xff]  }
 0x197   :  { %v24852_v17 = vadd.f32 %v7778_v19, %v1323_v7  ;;  %v7780_v20 = vpop.f32.mrb[1].mxu0  ;;  %v25869_v6 = vld [vmem:[%s38113_s1 + $0x2270] ss:$100 sps:$4 sm:$0xff]   ;;  %v25878_v19 = vld [vmem:[%s38113_s1 + $0x1220] ss:$100 sps:$4 sm:$0xff]  }
 0x198   :  { %v24854_v21 = vadd.f32 %v7780_v20, %v1327_v9  ;;  %v7782_v22 = vpop.f32.mrb[2].mxu0  ;;  %8099 = vmatpush1.bf16.msra.mxu0 %v25827_v14  ;;  %v25875_v14 = vld [vmem:[%s38113_s1 + $0x2338] ss:$100 sps:$4 sm:$0xff]   ;;  %v25886_v20 = vld [vmem:[%s38113_s1 + $0x12ec] ss:$100 sps:$4 sm:$0xff]  }
 0x199   :  { %8547 = vmatpush1.bf16.msra.mxu1 %v25824_v8  ;;  %v24853_v25 = vadd.f32 %v24852_v17, %v29957_v41  ;;  %v24856_v26 = vadd.f32 %v7782_v22, %v1323_v7  ;;  %v7784_v27 = vpop.f32.mrb[3].mxu0  ;;  %8100 = vmatprep.subr.bf16.mxu0 %v25835_v18  ;;  %v25839_v41 = vld [vmem:[%s38113_s1 + $0x1e88] ss:$100 sps:$4 sm:$0xff]   ;;  %v25874_v7 = vld [vmem:[%s38113_s1 + $0x115c] ss:$100 sps:$4 sm:$0xff]  }
 0x19a   :  { %8548 = vmatprep.subr.bf16.mxu1 %v25832_v15  ;;  %v24855_v30 = vadd.f32 %v24854_v21, %v29959_v42  ;;  %v24858_v31 = vadd.f32 %v7784_v27, %v1327_v9  ;;  %v25877_v8 = vld [vmem:[%s38113_s1 + $0x233c] ss:$100 sps:$4 sm:$0xff]   ;;  %v25880_v15 = vld [vmem:[%s38113_s1 + $0x1224] ss:$100 sps:$4 sm:$0xff]   ;;  %v25889_v21 = vld [vmem:[%s38113_s1 + $0x24cc] ss:$100 sps:$4 sm:$0xff]  }
 0x19b   :  { %v24857_v33 = vadd.f32 %v24856_v26, %v29964_v44  ;;  %v9886_v36 = vmax.f32 %v24853_v25, 0.0  ;;  %v30613_v44 = vld [vmem:[%s38114_s0] ss:$28 sps:$4 sm:$0xff]   ;;  %v25883_v18 = vld [vmem:[%s38113_s1 + $0x2404] ss:$100 sps:$4 sm:$0xff]  }
 0x19c   :  { %v24859_v42 = vadd.f32 %v24858_v31, %v29972_v47  ;;  %8101 = vmatpush1.bf16.msra.mxu0 %v25833_v24  ;;  %v9887_v37 = vmax.f32 %v24855_v30, 0.0  ;;  %v25842_v47 = vld [vmem:[%s38113_s1 + $0xd70] ss:$100 sps:$4 sm:$0xff]   ;;  %v25872_v9 = vld [vmem:[%s38113_s1 + $0x1158] ss:$100 sps:$4 sm:$0xff]  }
 0x19d   :  { %8549 = vmatpush1.bf16.msra.mxu1 %v25830_v23  ;;  %v9911_v32 = vmax.f32 %v24857_v33, 0.0  ;;  %8102 = vmatprep.subr.bf16.mxu0 %v25841_v29  ;;  %v25881_v17 = vld [vmem:[%s38113_s1 + $0x2400] ss:$100 sps:$4 sm:$0xff]   ;;  %v25884_v22 = vld [vmem:[%s38113_s1 + $0x12e8] ss:$100 sps:$4 sm:$0xff]  }
 0x19e   :  { %8561 = vmatprep.subr.bf16.mxu1 %v25838_v28  ;;  %v9912_v38 = vmax.f32 %v24859_v42, 0.0  ;;  %v25887_v23 = vld [vmem:[%s38113_s1 + $0x24c8] ss:$100 sps:$4 sm:$0xff]   ;;  %v25892_v24 = vld [vmem:[%s38113_s1 + $0x13b4] ss:$100 sps:$4 sm:$0xff]  }
 0x19f   :  { %v30608_v50 = vpack.c.bf16 %v9911_v32, %v9886_v36  ;;  %v25901_v25 = vld [vmem:[%s38113_s1 + $0x2594] ss:$100 sps:$4 sm:$0xff]   ;;  %v25895_v27 = vld [vmem:[%s38113_s1 + $0x147c] ss:$100 sps:$4 sm:$0xff]   ;;  %v25907_v29 = vld [vmem:[%s38113_s1 + $0x24] ss:$100 sps:$4 sm:$0xff]  }
 0x1a0   :  { %8551 = vmatmul.mubr.bf16.vlgmr.msra.gmra.mrb[12].mxu1 %v30613_v44  ;;  %v30622_v43 = vpack.c.bf16 %v9912_v38, %v9887_v37  ;;  %8103 = vmatpush1.bf16.msra.mxu0 %v25839_v41  ;;  %v25890_v26 = vld [vmem:[%s38113_s1 + $0x13b0] ss:$100 sps:$4 sm:$0xff]   ;;  %v25893_v30 = vld [vmem:[%s38113_s1 + $0x1478] ss:$100 sps:$4 sm:$0xff]   ;;  %v25898_v31 = vld [vmem:[%s38113_s1 + $0x1544] ss:$100 sps:$4 sm:$0xff]  }
 0x1a1   :  { %8562 = vmatpush1.bf16.msra.mxu1 %v25836_v13  ;;  %8104 = vmatprep.subr.bf16.mxu0 %v25847_v35  ;;  %v25899_v28 = vld [vmem:[%s38113_s1 + $0x2590] ss:$100 sps:$4 sm:$0xff]   ;;  %v25896_v13 = vld [vmem:[%s38113_s1 + $0x1540] ss:$100 sps:$4 sm:$0xff]   ;;  %v25902_v41 = vld [vmem:[%s38113_s1 + $0x1608] ss:$100 sps:$4 sm:$0xff]  }
 0x1a2   :  { %8563 = vmatprep.subr.bf16.mxu1 %v25844_v34  ;;  %8593 = vmatprep.mubr.bf16.mxu1 %v30639_v49  ;;  %v25905_v33 = vld [vmem:[%s38113_s1 + $0x20] ss:$100 sps:$4 sm:$0xff]   ;;  %v25910_v34 = vld [vmem:[%s38113_s1 + $0x16d4] ss:$100 sps:$4 sm:$0xff]   ;;  %v25913_v35 = vld [vmem:[%s38113_s1 + $0xec] ss:$100 sps:$4 sm:$0xff]  }
 0x1a3   :  { %v25908_v42 = vld [vmem:[%s38113_s1 + $0x16d0] ss:$100 sps:$4 sm:$0xff]   ;;  %v25911_v36 = vld [vmem:[%s38113_s1 + $0xe8] ss:$100 sps:$4 sm:$0xff]   ;;  %v30767_v32 = vsub.s32 2, %v30527_v56 }
 0x1a4   :  { %8105 = vmatpush1.bf16.msra.mxu0 %v25845_v39  ;;  %v25916_v37 = vld [vmem:[%s38113_s1 + $0x179c] ss:$100 sps:$4 sm:$0xff]   ;;  %v25919_v38 = vld [vmem:[%s38113_s1 + $0x1b4] ss:$100 sps:$4 sm:$0xff]  }
 0x1a5   :  { %8564 = vmatpush1.bf16.msra.mxu1 %v25842_v47  ;;  %8106 = vmatprep.subr.bf16.mxu0 %v25853_v46  ;;  %v30776_v47 = vsub.s32 3, %v30527_v56  ;;  %v1331_v39 = vrot.slane %v30553_v2, %v30767_v32 }
 0x1a6   :  { %8565 = vmatprep.subr.bf16.mxu1 %v25850_v45  ;;  %v25917_v45 = vld [vmem:[%s38113_s1 + $0x1b0] ss:$100 sps:$4 sm:$0xff]  }
 0x1a7   :  { %v1335_v46 = vrot.slane %v30553_v2, %v30776_v47 }
 0x1a8   :  { %8107 = vmatpush1.bf16.msra.mxu0 %v25851_v40 }
 0x1a9   :  { %8566 = vmatpush1.bf16.msra.mxu1 %v25848_v48  ;;  %8108 = vmatprep.subr.bf16.mxu0 %v25859_v53  ;;  %v25925_v48 = vld [vmem:[%s38113_s1 + $0x27c] ss:$100 sps:$4 sm:$0xff]  }
 0x1aa   :  { %8567 = vmatprep.subr.bf16.mxu1 %v25856_v52 }
 0x1ac   :  { %8109 = vmatpush1.bf16.msra.mxu0 %v25857_v51 }
 0x1ad   :  { %8568 = vmatpush1.bf16.msra.mxu1 %v25854_v55  ;;  %8110 = vmatprep.subr.bf16.mxu0 %v25865_v58  ;;  %v25920_v55 = vld [vmem:[%s38113_s1 + $0x1860] ss:$100 sps:$4 sm:$0xff]   ;;  %v25928_v58 = vld [vmem:[%s38113_s1 + $0x192c] ss:$100 sps:$4 sm:$0xff]  }
 0x1ae   :  { %8569 = vmatprep.subr.bf16.mxu1 %v25862_v57  ;;  %v25923_v57 = vld [vmem:[%s38113_s1 + $0x278] ss:$100 sps:$4 sm:$0xff]  }
 0x1b0   :  { %8111 = vmatpush1.bf16.msra.mxu0 %v25863_v60 }
 0x1b1   :  { %8570 = vmatpush1.bf16.msra.mxu1 %v25860_v59  ;;  %8112 = vmatprep.subr.bf16.mxu0 %v25871_v0  ;;  %v25931_v0 = vld [vmem:[%s38113_s1 + $0x344] ss:$100 sps:$4 sm:$0xff]  }
 0x1b2   :  { %8571 = vmatprep.subr.bf16.mxu1 %v25868_v61 }
 0x1b4   :  { %8113 = vmatpush1.bf16.msra.mxu0 %v25869_v6 }
 0x1b5   :  { %8572 = vmatpush1.bf16.msra.mxu1 %v25866_v4  ;;  %8114 = vmatprep.subr.bf16.mxu0 %v25877_v8  ;;  %v25926_v8 = vld [vmem:[%s38113_s1 + $0x1928] ss:$100 sps:$4 sm:$0xff]  }
 0x1b6   :  { %8573 = vmatprep.subr.bf16.mxu1 %v25874_v7 }
 0x1b8   :  { %8115 = vmatpush1.bf16.msra.mxu0 %v25875_v14  ;;  %v25934_v14 = vld [vmem:[%s38113_s1 + $0x19f4] ss:$100 sps:$4 sm:$0xff]  }
 0x1b9   :  { %8574 = vmatpush1.bf16.msra.mxu1 %v25872_v9  ;;  %8116 = vmatprep.subr.bf16.mxu0 %v25883_v18 }
 0x1ba   :  { %8575 = vmatprep.subr.bf16.mxu1 %v25880_v15 }
 0x1bc   :  { %8117 = vmatpush1.bf16.msra.mxu0 %v25881_v17  ;;  %v30828_v17 = vld [vmem:[%s38114_s0 + $0x8] ss:$28 sps:$4 sm:$0xff]  }
 0x1bd   :  { %8576 = vmatpush1.bf16.msra.mxu1 %v25878_v19  ;;  %8118 = vmatprep.subr.bf16.mxu0 %v25889_v21 }
 0x1be   :  { %8577 = vmatprep.subr.bf16.mxu1 %v25886_v20  ;;  %v25932_v20 = vld [vmem:[%s38113_s1 + $0x19f0] ss:$100 sps:$4 sm:$0xff]  }
 0x1c0   :  { %8119 = vmatpush1.bf16.msra.mxu0 %v25887_v23  ;;  %v25940_v23 = vld [vmem:[%s38113_s1 + $0x1abc] ss:$100 sps:$4 sm:$0xff]  }
 0x1c1   :  { %8578 = vmatpush1.bf16.msra.mxu1 %v25884_v22  ;;  %8131 = vmatprep.subr.bf16.mxu0 %v25901_v25  ;;  %v25935_v22 = vld [vmem:[%s38113_s1 + $0x408] ss:$100 sps:$4 sm:$0xff]   ;;  %v30848_v25 = vld [vmem:[%s38114_s0 + $0x14] ss:$28 sps:$4 sm:$0xff]  }
 0x1c2   :  { %8579 = vmatprep.subr.bf16.mxu1 %v25892_v24  ;;  %v25943_v24 = vld [vmem:[%s38113_s1 + $0x4d4] ss:$100 sps:$4 sm:$0xff]  }
 0x1c3   :  { %8121 = vmatmul.mubr.bf16.vlgmr.msra.gmra.mrb[8].mxu0 %v30344_v54  ;;  %v25904_v54 = vld [vmem:[%s38113_s1 + $0x160c] ss:$100 sps:$4 sm:$0xff]  }
 0x1c4   :  { %8132 = vmatpush1.bf16.msra.mxu0 %v25899_v28  ;;  %8163 = vmatprep.mubr.bf16.mxu0 %v29192_v1  ;;  %v25946_v28 = vld [vmem:[%s38113_s1 + $0x1b84] ss:$100 sps:$4 sm:$0xff]  }
 0x1c5   :  { %8580 = vmatpush1.bf16.msra.mxu1 %v25890_v26  ;;  %8346 = vmatprep.subr.bf16.mxu0 %v25907_v29  ;;  %v25938_v26 = vld [vmem:[%s38113_s1 + $0x1ab8] ss:$100 sps:$4 sm:$0xff]  }
 0x1c6   :  { %8581 = vmatprep.subr.bf16.mxu1 %v25895_v27  ;;  %v25941_v27 = vld [vmem:[%s38113_s1 + $0x4d0] ss:$100 sps:$4 sm:$0xff]   ;;  %v25949_v29 = vld [vmem:[%s38113_s1 + $0x59c] ss:$100 sps:$4 sm:$0xff]  }
 0x1c9   :  { %8582 = vmatpush1.bf16.msra.mxu1 %v25893_v30  ;;  %v25944_v30 = vld [vmem:[%s38113_s1 + $0x1b80] ss:$100 sps:$4 sm:$0xff]  }
 0x1ca   :  { %8583 = vmatprep.subr.bf16.mxu1 %v25898_v31  ;;  %v25947_v31 = vld [vmem:[%s38113_s1 + $0x598] ss:$100 sps:$4 sm:$0xff]  }
 0x1cd   :  { %8584 = vmatpush1.bf16.msra.mxu1 %v25896_v13  ;;  %v25952_v13 = vld [vmem:[%s38113_s1 + $0x1c4c] ss:$100 sps:$4 sm:$0xff]  }
 0x1ce   :  { %8585 = vmatprep.subr.bf16.mxu1 %v25904_v54  ;;  %v25955_v54 = vld [vmem:[%s38113_s1 + $0x664] ss:$100 sps:$4 sm:$0xff]  }
 0x1cf   :  { %22979 = vmatmul.mubr.msk.bf16.vlgmr.msra.gmra.mrb[8].mxu0 %vm7654_vm0, %v30375_v63  ;;  %v25914_v63 = vld [vmem:[%s38113_s1 + $0x1798] ss:$100 sps:$4 sm:$0xff]  }
 0x1d0   :  { %8347 = vmatpush1.bf16.msra.mxu0 %v25905_v33  ;;  %8378 = vmatprep.mubr.bf16.mxu0 %v30394_v5  ;;  %v25922_v5 = vld [vmem:[%s38113_s1 + $0x1864] ss:$100 sps:$4 sm:$0xff]  }
 0x1d1   :  { %8586 = vmatpush1.bf16.msra.mxu1 %v25902_v41  ;;  %8348 = vmatprep.subr.bf16.mxu0 %v25913_v35  ;;  %v25950_v41 = vld [vmem:[%s38113_s1 + $0x1c48] ss:$100 sps:$4 sm:$0xff]   ;;  %v25953_v33 = vld [vmem:[%s38113_s1 + $0x660] ss:$100 sps:$4 sm:$0xff]  }
 0x1d2   :  { %8587 = vmatprep.subr.bf16.mxu1 %v25910_v34  ;;  %v25958_v34 = vld [vmem:[%s38113_s1 + $0x1d14] ss:$100 sps:$4 sm:$0xff]   ;;  %v25961_v35 = vld [vmem:[%s38113_s1 + $0x72c] ss:$100 sps:$4 sm:$0xff]  }
 0x1d4   :  { %8349 = vmatpush1.bf16.msra.mxu0 %v25911_v36  ;;  %v25959_v36 = vld [vmem:[%s38113_s1 + $0x728] ss:$100 sps:$4 sm:$0xff]  }
 0x1d5   :  { %8588 = vmatpush1.bf16.msra.mxu1 %v25908_v42  ;;  %8350 = vmatprep.subr.bf16.mxu0 %v25919_v38  ;;  %v25956_v42 = vld [vmem:[%s38113_s1 + $0x1d10] ss:$100 sps:$4 sm:$0xff]  }
 0x1d6   :  { %8589 = vmatprep.subr.bf16.mxu1 %v25916_v37  ;;  %v7864_v40 = vpop.f32.mrb[4].mxu0  ;;  %v25964_v37 = vld [vmem:[%s38113_s1 + $0x1ddc] ss:$100 sps:$4 sm:$0xff]   ;;  %v25967_v38 = vld [vmem:[%s38113_s1 + $0x7f4] ss:$100 sps:$4 sm:$0xff]  }
 0x1d7   :  { %v7865_v52 = vadd.f32 %v7864_v40, %v1331_v39  ;;  %v7866_v53 = vpop.f32.mrb[5].mxu0  ;;  %v25976_v40 = vld [vmem:[%s38113_s1 + $0x1f6c] ss:$100 sps:$4 sm:$0xff]  }
 0x1d8   :  { %v7867_v51 = vadd.f32 %v7866_v53, %v1335_v46  ;;  %8351 = vmatpush1.bf16.msra.mxu0 %v25917_v45  ;;  %v7868_v2 = vpop.f32.mrb[6].mxu0  ;;  %v25970_v45 = vld [vmem:[%s38113_s1 + $0x1ea4] ss:$100 sps:$4 sm:$0xff]  }
 0x1d9   :  { %8590 = vmatpush1.bf16.msra.mxu1 %v25914_v63  ;;  %v24861_v59 = vadd.f32 %v30409_v10, %v7865_v52  ;;  %v7869_v60 = vadd.f32 %v7868_v2, %v1331_v39  ;;  %v7870_v61 = vpop.f32.mrb[7].mxu0  ;;  %8352 = vmatprep.subr.bf16.mxu0 %v25925_v48  ;;  %v25929_v10 = vld [vmem:[%s38113_s1 + $0x340] ss:$100 sps:$4 sm:$0xff]   ;;  %v25962_v63 = vld [vmem:[%s38113_s1 + $0x1dd8] ss:$100 sps:$4 sm:$0xff]  }
 0x1da   :  { %8591 = vmatprep.subr.bf16.mxu1 %v25922_v5  ;;  %v24863_v4 = vadd.f32 %v30411_v11, %v7867_v51  ;;  %v7871_v6 = vadd.f32 %v7870_v61, %v1335_v46  ;;  %v25965_v39 = vld [vmem:[%s38113_s1 + $0x7f0] ss:$100 sps:$4 sm:$0xff]   ;;  %v25973_v46 = vld [vmem:[%s38113_s1 + $0x8bc] ss:$100 sps:$4 sm:$0xff]   ;;  %v25979_v52 = vld [vmem:[%s38113_s1 + $0x984] ss:$100 sps:$4 sm:$0xff]  }
 0x1db   :  { %v24865_v7 = vadd.f32 %v30413_v12, %v7869_v60  ;;  %v9888_v11 = vmax.f32 %v24861_v59, 0.0  ;;  %v25937_v12 = vld [vmem:[%s38113_s1 + $0x40c] ss:$100 sps:$4 sm:$0xff]   ;;  %v25968_v5 = vld [vmem:[%s38113_s1 + $0x1ea0] ss:$100 sps:$4 sm:$0xff]  }
 0x1dc   :  { %v24867_v9 = vadd.f32 %v30421_v16, %v7871_v6  ;;  %8353 = vmatpush1.bf16.msra.mxu0 %v25923_v57  ;;  %v9889_v18 = vmax.f32 %v24863_v4, 0.0  ;;  %v25971_v48 = vld [vmem:[%s38113_s1 + $0x8b8] ss:$100 sps:$4 sm:$0xff]   ;;  %v25974_v53 = vld [vmem:[%s38113_s1 + $0x1f68] ss:$100 sps:$4 sm:$0xff]  }
 0x1dd   :  { %8592 = vmatpush1.bf16.msra.mxu1 %v25920_v55  ;;  %v9913_v15 = vmax.f32 %v24865_v7, 0.0  ;;  %8354 = vmatprep.subr.bf16.mxu0 %v25931_v0  ;;  %v25977_v55 = vld [vmem:[%s38113_s1 + $0x980] ss:$100 sps:$4 sm:$0xff]   ;;  %v25982_v51 = vld [vmem:[%s38113_s1 + $0x2034] ss:$100 sps:$4 sm:$0xff]  }
 0x1de   :  { %8604 = vmatprep.subr.bf16.mxu1 %v25928_v58  ;;  %v9914_v16 = vmax.f32 %v24867_v9, 0.0  ;;  %v25985_v2 = vld [vmem:[%s38113_s1 + $0xa4c] ss:$100 sps:$4 sm:$0xff]   ;;  %v25988_v59 = vld [vmem:[%s38113_s1 + $0x20fc] ss:$100 sps:$4 sm:$0xff]  }
 0x1df   :  { %v30823_v19 = vpack.c.bf16 %v9913_v15, %v9888_v11  ;;  %v25980_v57 = vld [vmem:[%s38113_s1 + $0x2030] ss:$100 sps:$4 sm:$0xff]   ;;  %v25983_v58 = vld [vmem:[%s38113_s1 + $0xa48] ss:$100 sps:$4 sm:$0xff]   ;;  %v25986_v61 = vld [vmem:[%s38113_s1 + $0x20f8] ss:$100 sps:$4 sm:$0xff]  }
 0x1e0   :  { %8594 = vmatmul.mubr.bf16.vlgmr.msra.gmra.mrb[12].mxu1 %v30828_v17  ;;  %v30834_v21 = vpack.c.bf16 %v9914_v16, %v9889_v18  ;;  %8355 = vmatpush1.bf16.msra.mxu0 %v25929_v10  ;;  %v25991_v60 = vld [vmem:[%s38113_s1 + $0xb14] ss:$100 sps:$4 sm:$0xff]   ;;  %v25994_v4 = vld [vmem:[%s38113_s1 + $0x21c4] ss:$100 sps:$4 sm:$0xff]   ;;  %v25997_v6 = vld [vmem:[%s38113_s1 + $0xbdc] ss:$100 sps:$4 sm:$0xff]  }
 0x1e1   :  { %8605 = vmatpush1.bf16.msra.mxu1 %v25926_v8  ;;  %8356 = vmatprep.subr.bf16.mxu0 %v25937_v12  ;;  %v25989_v0 = vld [vmem:[%s38113_s1 + $0xb10] ss:$100 sps:$4 sm:$0xff]   ;;  %v25992_v7 = vld [vmem:[%s38113_s1 + $0x21c0] ss:$100 sps:$4 sm:$0xff]   ;;  %v25995_v8 = vld [vmem:[%s38113_s1 + $0xbd8] ss:$100 sps:$4 sm:$0xff]  }
 0x1e2   :  { %8606 = vmatprep.subr.bf16.mxu1 %v25934_v14  ;;  %8636 = vmatprep.mubr.bf16.mxu1 %v30848_v25  ;;  %v26000_v9 = vld [vmem:[%s38113_s1 + $0x228c] ss:$100 sps:$4 sm:$0xff]   ;;  %v26003_v10 = vld [vmem:[%s38113_s1 + $0xca4] ss:$100 sps:$4 sm:$0xff]   ;;  %v26006_v15 = vld [vmem:[%s38113_s1 + $0x2354] ss:$100 sps:$4 sm:$0xff]  }
 0x1e3   :  { %v25998_v14 = vld [vmem:[%s38113_s1 + $0x2288] ss:$100 sps:$4 sm:$0xff]   ;;  %v26001_v11 = vld [vmem:[%s38113_s1 + $0xca0] ss:$100 sps:$4 sm:$0xff]   ;;  %v26004_v18 = vld [vmem:[%s38113_s1 + $0x2350] ss:$100 sps:$4 sm:$0xff]  }
 0x1e4   :  { %8357 = vmatpush1.bf16.msra.mxu0 %v25935_v22  ;;  %v26009_v12 = vld [vmem:[%s38113_s1 + $0xd6c] ss:$100 sps:$4 sm:$0xff]   ;;  %v26015_v22 = vld [vmem:[%s38113_s1 + $0xe34] ss:$100 sps:$4 sm:$0xff]  }
 0x1e5   :  { %8607 = vmatpush1.bf16.msra.mxu1 %v25932_v20  ;;  %8358 = vmatprep.subr.bf16.mxu0 %v25943_v24  ;;  %v26007_v16 = vld [vmem:[%s38113_s1 + $0xd68] ss:$100 sps:$4 sm:$0xff]   ;;  %v26012_v20 = vld [vmem:[%s38113_s1 + $0x241c] ss:$100 sps:$4 sm:$0xff]  }
 0x1e6   :  { %8608 = vmatprep.subr.bf16.mxu1 %v25940_v23  ;;  %v26013_v23 = vld [vmem:[%s38113_s1 + $0xe30] ss:$100 sps:$4 sm:$0xff]   ;;  %v26018_v24 = vld [vmem:[%s38113_s1 + $0x24e4] ss:$100 sps:$4 sm:$0xff]  }
 0x1e8   :  { %8359 = vmatpush1.bf16.msra.mxu0 %v25941_v27  ;;  %v26019_v27 = vld [vmem:[%s38113_s1 + $0xef8] ss:$100 sps:$4 sm:$0xff]  }
 0x1e9   :  { %8609 = vmatpush1.bf16.msra.mxu1 %v25938_v26  ;;  %8360 = vmatprep.subr.bf16.mxu0 %v25949_v29  ;;  %v26016_v26 = vld [vmem:[%s38113_s1 + $0x24e0] ss:$100 sps:$4 sm:$0xff]  }
 0x1ea   :  { %8610 = vmatprep.subr.bf16.mxu1 %v25946_v28  ;;  %v26024_v28 = vld [vmem:[%s38113_s1 + $0x25ac] ss:$100 sps:$4 sm:$0xff]   ;;  %v26027_v29 = vld [vmem:[%s38113_s1 + $0xfc4] ss:$100 sps:$4 sm:$0xff]  }
 0x1ec   :  { %8361 = vmatpush1.bf16.msra.mxu0 %v25947_v31  ;;  %v26025_v31 = vld [vmem:[%s38113_s1 + $0xfc0] ss:$100 sps:$4 sm:$0xff]  }
 0x1ed   :  { %8611 = vmatpush1.bf16.msra.mxu1 %v25944_v30  ;;  %8362 = vmatprep.subr.bf16.mxu0 %v25955_v54  ;;  %v26022_v30 = vld [vmem:[%s38113_s1 + $0x25a8] ss:$100 sps:$4 sm:$0xff]   ;;  %v26036_v54 = vld [vmem:[%s38113_s1 + $0x3c] ss:$100 sps:$4 sm:$0xff]  }
 0x1ee   :  { %8612 = vmatprep.subr.bf16.mxu1 %v25952_v13  ;;  %v26030_v13 = vld [vmem:[%s38113_s1 + $0x108c] ss:$100 sps:$4 sm:$0xff]  }
 0x1f0   :  { %8363 = vmatpush1.bf16.msra.mxu0 %v25953_v33  ;;  %v26028_v33 = vld [vmem:[%s38113_s1 + $0x1088] ss:$100 sps:$4 sm:$0xff]  }
 0x1f1   :  { %8613 = vmatpush1.bf16.msra.mxu1 %v25950_v41  ;;  %8364 = vmatprep.subr.bf16.mxu0 %v25961_v35  ;;  %v31036_v41 = vld [vmem:[%s38114_s0 + $0x10] ss:$28 sps:$4 sm:$0xff]  }
 0x1f2   :  { %8614 = vmatprep.subr.bf16.mxu1 %v25958_v34  ;;  %v26033_v34 = vld [vmem:[%s38113_s1 + $0x1154] ss:$100 sps:$4 sm:$0xff]  }
 0x1f3   :  { %v26031_v35 = vld [vmem:[%s38113_s1 + $0x1150] ss:$100 sps:$4 sm:$0xff]  }
 0x1f4   :  { %8365 = vmatpush1.bf16.msra.mxu0 %v25959_v36  ;;  %v26034_v36 = vld [vmem:[%s38113_s1 + $0x38] ss:$100 sps:$4 sm:$0xff]  }
 0x1f5   :  { %8615 = vmatpush1.bf16.msra.mxu1 %v25956_v42  ;;  %8366 = vmatprep.subr.bf16.mxu0 %v25967_v38  ;;  %v26039_v42 = vld [vmem:[%s38113_s1 + $0x121c] ss:$100 sps:$4 sm:$0xff]   ;;  %v26042_v38 = vld [vmem:[%s38113_s1 + $0x104] ss:$100 sps:$4 sm:$0xff]  }
 0x1f6   :  { %8616 = vmatprep.subr.bf16.mxu1 %v25964_v37  ;;  %v26037_v37 = vld [vmem:[%s38113_s1 + $0x1218] ss:$100 sps:$4 sm:$0xff]  }
 0x1f8   :  { %8367 = vmatpush1.bf16.msra.mxu0 %v25965_v39  ;;  %v31067_v39 = vld [vmem:[%s38114_s0 + $0x18] ss:$28 sps:$4 sm:$0xff]  }
 0x1f9   :  { %8617 = vmatpush1.bf16.msra.mxu1 %v25962_v63  ;;  %8368 = vmatprep.subr.bf16.mxu0 %v25973_v46  ;;  %v26045_v63 = vld [vmem:[%s38113_s1 + $0x12e4] ss:$100 sps:$4 sm:$0xff]  }
 0x1fa   :  { %8618 = vmatprep.subr.bf16.mxu1 %v25970_v45  ;;  %v31072_v45 = vsub.s32 6, %v30527_v56  ;;  %v26040_v46 = vld [vmem:[%s38113_s1 + $0x100] ss:$100 sps:$4 sm:$0xff]  }
 0x1fc   :  { %8369 = vmatpush1.bf16.msra.mxu0 %v25971_v48  ;;  %v31081_v48 = vsub.s32 7, %v30527_v56 }
 0x1fd   :  { %8619 = vmatpush1.bf16.msra.mxu1 %v25968_v5  ;;  %8370 = vmatprep.subr.bf16.mxu0 %v25979_v52  ;;  %v26043_v5 = vld [vmem:[%s38113_s1 + $0x12e0] ss:$100 sps:$4 sm:$0xff]   ;;  %v26051_v52 = vld [vmem:[%s38113_s1 + $0x13ac] ss:$100 sps:$4 sm:$0xff]  }
 0x1fe   :  { %8620 = vmatprep.subr.bf16.mxu1 %v25976_v40  ;;  %v26048_v40 = vld [vmem:[%s38113_s1 + $0x1cc] ss:$100 sps:$4 sm:$0xff]  }
 0x200   :  { %8371 = vmatpush1.bf16.msra.mxu0 %v25977_v55  ;;  %v31098_v55 = vld [vmem:[%s38115_s2] sm:$0xff] }
 0x201   :  { %8621 = vmatpush1.bf16.msra.mxu1 %v25974_v53  ;;  %8372 = vmatprep.subr.bf16.mxu0 %v25985_v2  ;;  %v31092_v53 = vld [vmem:[%s38114_s0 + $0x4] ss:$28 sps:$4 sm:$0xff]   ;;  %v26046_v2 = vld [vmem:[%s38113_s1 + $0x1c8] ss:$100 sps:$4 sm:$0xff]  }
 0x202   :  { %8622 = vmatprep.subr.bf16.mxu1 %v25982_v51  ;;  %v1347_v51 = vrot.slane %v31098_v55, %v31072_v45 }
 0x204   :  { %8373 = vmatpush1.bf16.msra.mxu0 %v25983_v58  ;;  %v26049_v58 = vld [vmem:[%s38113_s1 + $0x13a8] ss:$100 sps:$4 sm:$0xff]  }
 0x205   :  { %8623 = vmatpush1.bf16.msra.mxu1 %v25980_v57  ;;  %8374 = vmatprep.subr.bf16.mxu0 %v25991_v60  ;;  %v1351_v57 = vrot.slane %v31098_v55, %v31081_v48  ;;  %v26057_v60 = vld [vmem:[%s38113_s1 + $0x1474] ss:$100 sps:$4 sm:$0xff]  }
 0x206   :  { %8624 = vmatprep.subr.bf16.mxu1 %v25988_v59  ;;  %v26054_v59 = vld [vmem:[%s38113_s1 + $0x294] ss:$100 sps:$4 sm:$0xff]  }
 0x208   :  { %8375 = vmatpush1.bf16.msra.mxu0 %v25989_v0 }
 0x209   :  { %8625 = vmatpush1.bf16.msra.mxu1 %v25986_v61  ;;  %8376 = vmatprep.subr.bf16.mxu0 %v25997_v6 }
 0x20a   :  { %8626 = vmatprep.subr.bf16.mxu1 %v25994_v4 }
 0x20c   :  { %8377 = vmatpush1.bf16.msra.mxu0 %v25995_v8  ;;  %v26052_v8 = vld [vmem:[%s38113_s1 + $0x290] ss:$100 sps:$4 sm:$0xff]  }
 0x20d   :  { %8627 = vmatpush1.bf16.msra.mxu1 %v25992_v7  ;;  %8389 = vmatprep.subr.bf16.mxu0 %v26003_v10 }
 0x20e   :  { %8628 = vmatprep.subr.bf16.mxu1 %v26000_v9  ;;  %v26055_v9 = vld [vmem:[%s38113_s1 + $0x1470] ss:$100 sps:$4 sm:$0xff]  }
 0x20f   :  { %8379 = vmatmul.mubr.bf16.vlgmr.msra.gmra.mrb[12].mxu0 %v30613_v44  ;;  %v26010_v44 = vld [vmem:[%s38113_s1 + $0x2418] ss:$100 sps:$4 sm:$0xff]  }
 0x210   :  { %8390 = vmatpush1.bf16.msra.mxu0 %v26001_v11  ;;  %8421 = vmatprep.mubr.bf16.mxu0 %v30639_v49  ;;  %v26021_v49 = vld [vmem:[%s38113_s1 + $0xefc] ss:$100 sps:$4 sm:$0xff]  }
 0x211   :  { %8629 = vmatpush1.bf16.msra.mxu1 %v25998_v14  ;;  %8391 = vmatprep.subr.bf16.mxu0 %v26009_v12  ;;  %v26060_v11 = vld [vmem:[%s38113_s1 + $0x35c] ss:$100 sps:$4 sm:$0xff]  }
 0x212   :  { %8630 = vmatprep.subr.bf16.mxu1 %v26006_v15  ;;  %v26063_v15 = vld [vmem:[%s38113_s1 + $0x153c] ss:$100 sps:$4 sm:$0xff]  }
 0x214   :  { %8392 = vmatpush1.bf16.msra.mxu0 %v26007_v16 }
 0x215   :  { %8631 = vmatpush1.bf16.msra.mxu1 %v26004_v18  ;;  %8393 = vmatprep.subr.bf16.mxu0 %v26015_v22  ;;  %v26058_v18 = vld [vmem:[%s38113_s1 + $0x358] ss:$100 sps:$4 sm:$0xff]  }
 0x216   :  { %8632 = vmatprep.subr.bf16.mxu1 %v26012_v20 }
 0x218   :  { %8394 = vmatpush1.bf16.msra.mxu0 %v26013_v23  ;;  %v26061_v23 = vld [vmem:[%s38113_s1 + $0x1538] ss:$100 sps:$4 sm:$0xff]  }
 0x219   :  { %8633 = vmatpush1.bf16.msra.mxu1 %v26010_v44  ;;  %8395 = vmatprep.subr.bf16.mxu0 %v26021_v49  ;;  %v26066_v49 = vld [vmem:[%s38113_s1 + $0x424] ss:$100 sps:$4 sm:$0xff]  }
 0x21a   :  { %8634 = vmatprep.subr.bf16.mxu1 %v26018_v24 }
 0x21c   :  { %8396 = vmatpush1.bf16.msra.mxu0 %v26019_v27 }
 0x21d   :  { %8635 = vmatpush1.bf16.msra.mxu1 %v26016_v26  ;;  %8397 = vmatprep.subr.bf16.mxu0 %v26027_v29  ;;  %v26069_v26 = vld [vmem:[%s38113_s1 + $0x1604] ss:$100 sps:$4 sm:$0xff]  }
 0x21e   :  { %8647 = vmatprep.subr.bf16.mxu1 %v26024_v28  ;;  %v26064_v28 = vld [vmem:[%s38113_s1 + $0x420] ss:$100 sps:$4 sm:$0xff]  }
 0x21f   :  { %v26067_v29 = vld [vmem:[%s38113_s1 + $0x1600] ss:$100 sps:$4 sm:$0xff]  }
 0x220   :  { %8637 = vmatmul.mubr.bf16.vlgmr.msra.gmra.mrb[12].mxu1 %v31036_v41  ;;  %8398 = vmatpush1.bf16.msra.mxu0 %v26025_v31  ;;  %v26075_v31 = vld [vmem:[%s38113_s1 + $0x16cc] ss:$100 sps:$4 sm:$0xff]  }
 0x221   :  { %8648 = vmatpush1.bf16.msra.mxu1 %v26022_v30  ;;  %8399 = vmatprep.subr.bf16.mxu0 %v26030_v13  ;;  %v26072_v30 = vld [vmem:[%s38113_s1 + $0x4ec] ss:$100 sps:$4 sm:$0xff]  }
 0x222   :  { %8679 = vmatprep.mubr.bf16.mxu1 %v29192_v1  ;;  %8862 = vmatprep.subr.bf16.mxu1 %v26036_v54  ;;  %v26070_v13 = vld [vmem:[%s38113_s1 + $0x4e8] ss:$100 sps:$4 sm:$0xff]  }
 0x223   :  { %v26073_v54 = vld [vmem:[%s38113_s1 + $0x16c8] ss:$100 sps:$4 sm:$0xff]  }
 0x224   :  { %8400 = vmatpush1.bf16.msra.mxu0 %v26028_v33  ;;  %v26078_v33 = vld [vmem:[%s38113_s1 + $0x5b4] ss:$100 sps:$4 sm:$0xff]  }
 0x225   :  { %8401 = vmatprep.subr.bf16.mxu0 %v26033_v34  ;;  %v26081_v34 = vld [vmem:[%s38113_s1 + $0x1794] ss:$100 sps:$4 sm:$0xff]  }
 0x228   :  { %8402 = vmatpush1.bf16.msra.mxu0 %v26031_v35  ;;  %v26076_v35 = vld [vmem:[%s38113_s1 + $0x5b0] ss:$100 sps:$4 sm:$0xff]  }
 0x229   :  { %8403 = vmatprep.subr.bf16.mxu0 %v26039_v42  ;;  %v26079_v42 = vld [vmem:[%s38113_s1 + $0x1790] ss:$100 sps:$4 sm:$0xff]  }
 0x22c   :  { %22982 = vmatmul.mubr.msk.bf16.vlgmr.msra.gmra.mrb[12].mxu1 %vm7654_vm0, %v31067_v39  ;;  %8404 = vmatpush1.bf16.msra.mxu0 %v26037_v37  ;;  %v26087_v37 = vld [vmem:[%s38113_s1 + $0x185c] ss:$100 sps:$4 sm:$0xff]  }
 0x22d   :  { %8863 = vmatpush1.bf16.msra.mxu1 %v26034_v36  ;;  %8405 = vmatprep.subr.bf16.mxu0 %v26045_v63  ;;  %v26084_v36 = vld [vmem:[%s38113_s1 + $0x67c] ss:$100 sps:$4 sm:$0xff]  }
 0x22e   :  { %8864 = vmatprep.subr.bf16.mxu1 %v26042_v38  ;;  %8894 = vmatprep.mubr.bf16.mxu1 %v31092_v53  ;;  %v26082_v38 = vld [vmem:[%s38113_s1 + $0x678] ss:$100 sps:$4 sm:$0xff]  }
 0x22f   :  { %v26085_v63 = vld [vmem:[%s38113_s1 + $0x1858] ss:$100 sps:$4 sm:$0xff]  }
 0x230   :  { %8406 = vmatpush1.bf16.msra.mxu0 %v26043_v5  ;;  %v26093_v5 = vld [vmem:[%s38113_s1 + $0x1924] ss:$100 sps:$4 sm:$0xff]  }
 0x231   :  { %8865 = vmatpush1.bf16.msra.mxu1 %v26040_v46  ;;  %8407 = vmatprep.subr.bf16.mxu0 %v26051_v52  ;;  %v26090_v46 = vld [vmem:[%s38113_s1 + $0x744] ss:$100 sps:$4 sm:$0xff]  }
 0x232   :  { %8866 = vmatprep.subr.bf16.mxu1 %v26048_v40  ;;  %v26088_v40 = vld [vmem:[%s38113_s1 + $0x740] ss:$100 sps:$4 sm:$0xff]  }
 0x233   :  { %v8337_v61 = vpop.f32.mrb[8].mxu1  ;;  %v26091_v52 = vld [vmem:[%s38113_s1 + $0x1920] ss:$100 sps:$4 sm:$0xff]  }
 0x234   :  { %v24872_v0 = vadd.f32 %v8337_v61, %v1347_v51  ;;  %v8339_v4 = vpop.f32.mrb[9].mxu1  ;;  %8408 = vmatpush1.bf16.msra.mxu0 %v26049_v58  ;;  %v26097_v58 = vld [vmem:[%s38113_s1 + $0x19e8] ss:$100 sps:$4 sm:$0xff]   ;;  %v26103_v61 = vld [vmem:[%s38113_s1 + $0x1ab0] ss:$100 sps:$4 sm:$0xff]  }
 0x235   :  { %8867 = vmatpush1.bf16.msra.mxu1 %v26046_v2  ;;  %v24873_v6 = vadd.f32 %v8339_v4, %v1351_v57  ;;  %v8341_v7 = vpop.f32.mrb[10].mxu1  ;;  %8409 = vmatprep.subr.bf16.mxu0 %v26057_v60  ;;  %v26099_v2 = vld [vmem:[%s38113_s1 + $0x19ec] ss:$100 sps:$4 sm:$0xff]   ;;  %v26106_v4 = vld [vmem:[%s38113_s1 + $0x998] ss:$100 sps:$4 sm:$0xff]  }
 0x236   :  { %v24874_v10 = vadd.f32 %v8341_v7, %v1347_v51  ;;  %v8343_v14 = vpop.f32.mrb[11].mxu1  ;;  %8868 = vmatprep.subr.bf16.mxu1 %v26054_v59  ;;  %v9892_v16 = vmax.f32 %v24872_v0, 0.0  ;;  %v26096_v51 = vld [vmem:[%s38113_s1 + $0x80c] ss:$100 sps:$4 sm:$0xff]   ;;  %v26102_v59 = vld [vmem:[%s38113_s1 + $0x8d4] ss:$100 sps:$4 sm:$0xff]  }
 0x237   :  { %v24875_v12 = vadd.f32 %v8343_v14, %v1351_v57  ;;  %v9893_v22 = vmax.f32 %v24873_v6, 0.0  ;;  %v26094_v57 = vld [vmem:[%s38113_s1 + $0x808] ss:$100 sps:$4 sm:$0xff]   ;;  %v26100_v60 = vld [vmem:[%s38113_s1 + $0x8d0] ss:$100 sps:$4 sm:$0xff]  }
 0x238   :  { %v9917_v20 = vmax.f32 %v24874_v10, 0.0  ;;  %8410 = vmatpush1.bf16.msra.mxu0 %v26055_v9  ;;  %v26108_v0 = vld [vmem:[%s38113_s1 + $0x99c] ss:$100 sps:$4 sm:$0xff]   ;;  %v26114_v7 = vld [vmem:[%s38113_s1 + $0xa64] ss:$100 sps:$4 sm:$0xff]  }
 0x239   :  { %v9918_v44 = vmax.f32 %v24875_v12, 0.0  ;;  %8869 = vmatpush1.bf16.msra.mxu1 %v26052_v8  ;;  %8411 = vmatprep.subr.bf16.mxu0 %v26063_v15  ;;  %v26109_v6 = vld [vmem:[%s38113_s1 + $0x1b78] ss:$100 sps:$4 sm:$0xff]   ;;  %v26117_v8 = vld [vmem:[%s38113_s1 + $0x1c44] ss:$100 sps:$4 sm:$0xff]  }
 0x23a   :  { %v31134_v24 = vpack.c.bf16 %v9917_v20, %v9892_v16  ;;  %8870 = vmatprep.subr.bf16.mxu1 %v26060_v11  ;;  %v26112_v9 = vld [vmem:[%s38113_s1 + $0xa60] ss:$100 sps:$4 sm:$0xff]   ;;  %v26120_v14 = vld [vmem:[%s38113_s1 + $0xb2c] ss:$100 sps:$4 sm:$0xff]   ;;  %v26129_v16 = vld [vmem:[%s38113_s1 + $0x1dd4] ss:$100 sps:$4 sm:$0xff]  }
 0x23b   :  { %v31142_v27 = vpack.c.bf16 %v9918_v44, %v9893_v22  ;;  %v26115_v10 = vld [vmem:[%s38113_s1 + $0x1c40] ss:$100 sps:$4 sm:$0xff]   ;;  %v26123_v11 = vld [vmem:[%s38113_s1 + $0x1d0c] ss:$100 sps:$4 sm:$0xff]  }
 0x23c   :  { %8412 = vmatpush1.bf16.msra.mxu0 %v26061_v23  ;;  %v26118_v15 = vld [vmem:[%s38113_s1 + $0xb28] ss:$100 sps:$4 sm:$0xff]   ;;  %v26124_v20 = vld [vmem:[%s38113_s1 + $0xbf0] ss:$100 sps:$4 sm:$0xff]   ;;  %v26132_v44 = vld [vmem:[%s38113_s1 + $0xcbc] ss:$100 sps:$4 sm:$0xff]  }
 0x23d   :  { %8871 = vmatpush1.bf16.msra.mxu1 %v26058_v18  ;;  %8413 = vmatprep.subr.bf16.mxu0 %v26069_v26  ;;  %v26121_v12 = vld [vmem:[%s38113_s1 + $0x1d08] ss:$100 sps:$4 sm:$0xff]   ;;  %v26126_v18 = vld [vmem:[%s38113_s1 + $0xbf4] ss:$100 sps:$4 sm:$0xff]   ;;  %v26135_v23 = vld [vmem:[%s38113_s1 + $0x1e9c] ss:$100 sps:$4 sm:$0xff]  }
 0x23e   :  { %8872 = vmatprep.subr.bf16.mxu1 %v26066_v49  ;;  %v26127_v22 = vld [vmem:[%s38113_s1 + $0x1dd0] ss:$100 sps:$4 sm:$0xff]   ;;  %v26130_v49 = vld [vmem:[%s38113_s1 + $0xcb8] ss:$100 sps:$4 sm:$0xff]  }
 0x23f   :  { %v26133_v26 = vld [vmem:[%s38113_s1 + $0x1e98] ss:$100 sps:$4 sm:$0xff]  }
 0x240   :  { %8414 = vmatpush1.bf16.msra.mxu0 %v26067_v29  ;;  %v26141_v29 = vld [vmem:[%s38113_s1 + $0x1f64] ss:$100 sps:$4 sm:$0xff]  }
 0x241   :  { %8873 = vmatpush1.bf16.msra.mxu1 %v26064_v28  ;;  %8415 = vmatprep.subr.bf16.mxu0 %v26075_v31  ;;  %v26138_v28 = vld [vmem:[%s38113_s1 + $0xd84] ss:$100 sps:$4 sm:$0xff]  }
 0x242   :  { %8874 = vmatprep.subr.bf16.mxu1 %v26072_v30  ;;  %v31293_v30 = vld [vmem:[%s38114_s0] ss:$28 sps:$4 sm:$0xff]  }
 0x243   :  { %v26136_v31 = vld [vmem:[%s38113_s1 + $0xd80] ss:$100 sps:$4 sm:$0xff]  }
 0x244   :  { %8416 = vmatpush1.bf16.msra.mxu0 %v26073_v54  ;;  %v26144_v54 = vld [vmem:[%s38113_s1 + $0xe4c] ss:$100 sps:$4 sm:$0xff]  }
 0x245   :  { %8875 = vmatpush1.bf16.msra.mxu1 %v26070_v13  ;;  %8417 = vmatprep.subr.bf16.mxu0 %v26081_v34  ;;  %v26139_v13 = vld [vmem:[%s38113_s1 + $0x1f60] ss:$100 sps:$4 sm:$0xff]   ;;  %v26142_v34 = vld [vmem:[%s38113_s1 + $0xe48] ss:$100 sps:$4 sm:$0xff]  }
 0x246   :  { %8876 = vmatprep.subr.bf16.mxu1 %v26078_v33  ;;  %v26147_v33 = vld [vmem:[%s38113_s1 + $0x202c] ss:$100 sps:$4 sm:$0xff]  }
 0x248   :  { %8418 = vmatpush1.bf16.msra.mxu0 %v26079_v42  ;;  %v31317_v42 = vld [vmem:[%s38114_s0 + $0xc] ss:$28 sps:$4 sm:$0xff]  }
 0x249   :  { %8877 = vmatpush1.bf16.msra.mxu1 %v26076_v35  ;;  %8419 = vmatprep.subr.bf16.mxu0 %v26087_v37  ;;  %v26145_v35 = vld [vmem:[%s38113_s1 + $0x2028] ss:$100 sps:$4 sm:$0xff]   ;;  %v26153_v37 = vld [vmem:[%s38113_s1 + $0x20f4] ss:$100 sps:$4 sm:$0xff]  }
 0x24a   :  { %8878 = vmatprep.subr.bf16.mxu1 %v26084_v36  ;;  %v26150_v36 = vld [vmem:[%s38113_s1 + $0xf14] ss:$100 sps:$4 sm:$0xff]  }
 0x24c   :  { %8420 = vmatpush1.bf16.msra.mxu0 %v26085_v63  ;;  %v26151_v63 = vld [vmem:[%s38113_s1 + $0x20f0] ss:$100 sps:$4 sm:$0xff]  }
 0x24d   :  { %8879 = vmatpush1.bf16.msra.mxu1 %v26082_v38  ;;  %8432 = vmatprep.subr.bf16.mxu0 %v26093_v5  ;;  %v26148_v38 = vld [vmem:[%s38113_s1 + $0xf10] ss:$100 sps:$4 sm:$0xff]   ;;  %v26159_v5 = vld [vmem:[%s38113_s1 + $0x21bc] ss:$100 sps:$4 sm:$0xff]  }
 0x24e   :  { %8880 = vmatprep.subr.bf16.mxu1 %v26090_v46  ;;  %v26156_v46 = vld [vmem:[%s38113_s1 + $0xfdc] ss:$100 sps:$4 sm:$0xff]  }
 0x24f   :  { %8422 = vmatmul.mubr.bf16.vlgmr.msra.gmra.mrb[12].mxu0 %v30828_v17  ;;  %v26105_v17 = vld [vmem:[%s38113_s1 + $0x1ab4] ss:$100 sps:$4 sm:$0xff]  }
 0x250   :  { %8433 = vmatpush1.bf16.msra.mxu0 %v26091_v52  ;;  %8464 = vmatprep.mubr.bf16.mxu0 %v30848_v25  ;;  %v26111_v25 = vld [vmem:[%s38113_s1 + $0x1b7c] ss:$100 sps:$4 sm:$0xff]  }
 0x251   :  { %8881 = vmatpush1.bf16.msra.mxu1 %v26088_v40  ;;  %8434 = vmatprep.subr.bf16.mxu0 %v26099_v2  ;;  %v26154_v40 = vld [vmem:[%s38113_s1 + $0xfd8] ss:$100 sps:$4 sm:$0xff]   ;;  %v26165_v2 = vld [vmem:[%s38113_s1 + $0x2284] ss:$100 sps:$4 sm:$0xff]  }
 0x252   :  { %8882 = vmatprep.subr.bf16.mxu1 %v26096_v51  ;;  %v26157_v52 = vld [vmem:[%s38113_s1 + $0x21b8] ss:$100 sps:$4 sm:$0xff]   ;;  %v26162_v51 = vld [vmem:[%s38113_s1 + $0x10a4] ss:$100 sps:$4 sm:$0xff]  }
 0x254   :  { %8435 = vmatpush1.bf16.msra.mxu0 %v26097_v58  ;;  %v26163_v58 = vld [vmem:[%s38113_s1 + $0x2280] ss:$100 sps:$4 sm:$0xff]  }
 0x255   :  { %8883 = vmatpush1.bf16.msra.mxu1 %v26094_v57  ;;  %8436 = vmatprep.subr.bf16.mxu0 %v26105_v17  ;;  %v26160_v57 = vld [vmem:[%s38113_s1 + $0x10a0] ss:$100 sps:$4 sm:$0xff]   ;;  %v26171_v17 = vld [vmem:[%s38113_s1 + $0x234c] ss:$100 sps:$4 sm:$0xff]  }
 0x256   :  { %8884 = vmatprep.subr.bf16.mxu1 %v26102_v59  ;;  %v26168_v59 = vld [vmem:[%s38113_s1 + $0x116c] ss:$100 sps:$4 sm:$0xff]  }
 0x258   :  { %8437 = vmatpush1.bf16.msra.mxu0 %v26103_v61  ;;  %v26169_v61 = vld [vmem:[%s38113_s1 + $0x2348] ss:$100 sps:$4 sm:$0xff]  }
 0x259   :  { %8885 = vmatpush1.bf16.msra.mxu1 %v26100_v60  ;;  %8438 = vmatprep.subr.bf16.mxu0 %v26111_v25  ;;  %v26166_v60 = vld [vmem:[%s38113_s1 + $0x1168] ss:$100 sps:$4 sm:$0xff]   ;;  %v26177_v25 = vld [vmem:[%s38113_s1 + $0x2414] ss:$100 sps:$4 sm:$0xff]  }
 0x25a   :  { %8886 = vmatprep.subr.bf16.mxu1 %v26108_v0  ;;  %v26174_v0 = vld [vmem:[%s38113_s1 + $0x1234] ss:$100 sps:$4 sm:$0xff]  }
 0x25c   :  { %8439 = vmatpush1.bf16.msra.mxu0 %v26109_v6  ;;  %v26175_v6 = vld [vmem:[%s38113_s1 + $0x2410] ss:$100 sps:$4 sm:$0xff]  }
 0x25d   :  { %8887 = vmatpush1.bf16.msra.mxu1 %v26106_v4  ;;  %8440 = vmatprep.subr.bf16.mxu0 %v26117_v8  ;;  %v26172_v4 = vld [vmem:[%s38113_s1 + $0x1230] ss:$100 sps:$4 sm:$0xff]   ;;  %v26183_v8 = vld [vmem:[%s38113_s1 + $0x24dc] ss:$100 sps:$4 sm:$0xff]  }
 0x25e   :  { %8888 = vmatprep.subr.bf16.mxu1 %v26114_v7  ;;  %v26180_v7 = vld [vmem:[%s38113_s1 + $0x12fc] ss:$100 sps:$4 sm:$0xff]  }
 0x260   :  { %8441 = vmatpush1.bf16.msra.mxu0 %v26115_v10  ;;  %v26181_v10 = vld [vmem:[%s38113_s1 + $0x24d8] ss:$100 sps:$4 sm:$0xff]  }
 0x261   :  { %8889 = vmatpush1.bf16.msra.mxu1 %v26112_v9  ;;  %8442 = vmatprep.subr.bf16.mxu0 %v26123_v11  ;;  %v26178_v9 = vld [vmem:[%s38113_s1 + $0x12f8] ss:$100 sps:$4 sm:$0xff]   ;;  %v26195_v11 = vld [vmem:[%s38113_s1 + $0x25a4] ss:$100 sps:$4 sm:$0xff]  }
 0x262   :  { %8890 = vmatprep.subr.bf16.mxu1 %v26120_v14  ;;  %v26186_v14 = vld [vmem:[%s38113_s1 + $0x13c4] ss:$100 sps:$4 sm:$0xff]  }
 0x264   :  { %8443 = vmatpush1.bf16.msra.mxu0 %v26121_v12  ;;  %v26189_v12 = vld [vmem:[%s38113_s1 + $0x148c] ss:$100 sps:$4 sm:$0xff]  }
 0x265   :  { %8891 = vmatpush1.bf16.msra.mxu1 %v26118_v15  ;;  %8444 = vmatprep.subr.bf16.mxu0 %v26129_v16  ;;  %v26184_v15 = vld [vmem:[%s38113_s1 + $0x13c0] ss:$100 sps:$4 sm:$0xff]   ;;  %v26201_v16 = vld [vmem:[%s38113_s1 + $0x34] ss:$100 sps:$4 sm:$0xff]  }
 0x266   :  { %8892 = vmatprep.subr.bf16.mxu1 %v26126_v18  ;;  %v26193_v18 = vld [vmem:[%s38113_s1 + $0x25a0] ss:$100 sps:$4 sm:$0xff]  }
 0x268   :  { %8445 = vmatpush1.bf16.msra.mxu0 %v26127_v22  ;;  %v26192_v22 = vld [vmem:[%s38113_s1 + $0x1554] ss:$100 sps:$4 sm:$0xff]  }
 0x269   :  { %8893 = vmatpush1.bf16.msra.mxu1 %v26124_v20  ;;  %8446 = vmatprep.subr.bf16.mxu0 %v26135_v23  ;;  %v26187_v20 = vld [vmem:[%s38113_s1 + $0x1488] ss:$100 sps:$4 sm:$0xff]   ;;  %v26196_v23 = vld [vmem:[%s38113_s1 + $0x1618] ss:$100 sps:$4 sm:$0xff]  }
 0x26a   :  { %8905 = vmatprep.subr.bf16.mxu1 %v26132_v44  ;;  %v26190_v44 = vld [vmem:[%s38113_s1 + $0x1550] ss:$100 sps:$4 sm:$0xff]  }
 0x26c   :  { %8895 = vmatmul.mubr.bf16.vlgmr.msra.gmra.mrb[16].mxu1 %v31293_v30  ;;  %8447 = vmatpush1.bf16.msra.mxu0 %v26133_v26  ;;  %v26204_v26 = vld [vmem:[%s38113_s1 + $0x16e4] ss:$100 sps:$4 sm:$0xff]  }
 0x26d   :  { %8906 = vmatpush1.bf16.msra.mxu1 %v26130_v49  ;;  %8448 = vmatprep.subr.bf16.mxu0 %v26141_v29  ;;  %v26199_v49 = vld [vmem:[%s38113_s1 + $0x30] ss:$100 sps:$4 sm:$0xff]   ;;  %v26202_v29 = vld [vmem:[%s38113_s1 + $0x16e0] ss:$100 sps:$4 sm:$0xff]  }
 0x26e   :  { %8907 = vmatprep.subr.bf16.mxu1 %v26138_v28  ;;  %8937 = vmatprep.mubr.bf16.mxu1 %v31317_v42  ;;  %v26207_v28 = vld [vmem:[%s38113_s1 + $0xfc] ss:$100 sps:$4 sm:$0xff]  }
 0x270   :  { %8449 = vmatpush1.bf16.msra.mxu0 %v26139_v13  ;;  %v26205_v13 = vld [vmem:[%s38113_s1 + $0xf8] ss:$100 sps:$4 sm:$0xff]  }
 0x271   :  { %8908 = vmatpush1.bf16.msra.mxu1 %v26136_v31  ;;  %8450 = vmatprep.subr.bf16.mxu0 %v26147_v33  ;;  %v31442_v31 = vsub.s32 4, %v30527_v56  ;;  %v31451_v33 = vsub.s32 5, %v30527_v56  ;;  %v26211_v56 = vld [vmem:[%s38113_s1 + $0x1c0] ss:$100 sps:$4 sm:$0xff]  }
 0x272   :  { %8909 = vmatprep.subr.bf16.mxu1 %v26144_v54  ;;  %v26210_v54 = vld [vmem:[%s38113_s1 + $0x17ac] ss:$100 sps:$4 sm:$0xff]  }
 0x274   :  { %8451 = vmatpush1.bf16.msra.mxu0 %v26145_v35  ;;  %v1339_v35 = vrot.slane %v31098_v55, %v31442_v31 }
 0x275   :  { %8910 = vmatpush1.bf16.msra.mxu1 %v26142_v34  ;;  %8452 = vmatprep.subr.bf16.mxu0 %v26153_v37  ;;  %v26208_v34 = vld [vmem:[%s38113_s1 + $0x17a8] ss:$100 sps:$4 sm:$0xff]   ;;  %v1343_v37 = vrot.slane %v31098_v55, %v31451_v33 }
 0x276   :  { %8911 = vmatprep.subr.bf16.mxu1 %v26150_v36  ;;  %v26216_v36 = vld [vmem:[%s38113_s1 + $0x1874] ss:$100 sps:$4 sm:$0xff]  }
 0x278   :  { %8453 = vmatpush1.bf16.msra.mxu0 %v26151_v63  ;;  %v26214_v63 = vld [vmem:[%s38113_s1 + $0x1870] ss:$100 sps:$4 sm:$0xff]  }
 0x279   :  { %8912 = vmatpush1.bf16.msra.mxu1 %v26148_v38  ;;  %8454 = vmatprep.subr.bf16.mxu0 %v26159_v5 }
 0x27a   :  { %8913 = vmatprep.subr.bf16.mxu1 %v26156_v46 }
 0x27c   :  { %8455 = vmatpush1.bf16.msra.mxu0 %v26157_v52  ;;  %v26222_v52 = vld [vmem:[%s38113_s1 + $0x193c] ss:$100 sps:$4 sm:$0xff]  }
 0x27d   :  { %8914 = vmatpush1.bf16.msra.mxu1 %v26154_v40  ;;  %8456 = vmatprep.subr.bf16.mxu0 %v26165_v2  ;;  %v26217_v40 = vld [vmem:[%s38113_s1 + $0x288] ss:$100 sps:$4 sm:$0xff]   ;;  %v26225_v2 = vld [vmem:[%s38113_s1 + $0x354] ss:$100 sps:$4 sm:$0xff]  }
 0x27e   :  { %8915 = vmatprep.subr.bf16.mxu1 %v26162_v51 }
 0x280   :  { %8457 = vmatpush1.bf16.msra.mxu0 %v26163_v58 }
 0x281   :  { %8916 = vmatpush1.bf16.msra.mxu1 %v26160_v57  ;;  %8458 = vmatprep.subr.bf16.mxu0 %v26171_v17 }
 0x282   :  { %8917 = vmatprep.subr.bf16.mxu1 %v26168_v59 }
 0x284   :  { %8459 = vmatpush1.bf16.msra.mxu0 %v26169_v61  ;;  %v26220_v61 = vld [vmem:[%s38113_s1 + $0x1938] ss:$100 sps:$4 sm:$0xff]  }
 0x285   :  { %8918 = vmatpush1.bf16.msra.mxu1 %v26166_v60  ;;  %8460 = vmatprep.subr.bf16.mxu0 %v26177_v25  ;;  %v26223_v25 = vld [vmem:[%s38113_s1 + $0x350] ss:$100 sps:$4 sm:$0xff]  }
 0x286   :  { %8919 = vmatprep.subr.bf16.mxu1 %v26174_v0 }
 0x288   :  { %8461 = vmatpush1.bf16.msra.mxu0 %v26175_v6 }
 0x289   :  { %8920 = vmatpush1.bf16.msra.mxu1 %v26172_v4  ;;  %8462 = vmatprep.subr.bf16.mxu0 %v26183_v8  ;;  %v26228_v4 = vld [vmem:[%s38113_s1 + $0x1a04] ss:$100 sps:$4 sm:$0xff]  }
 0x28a   :  { %8921 = vmatprep.subr.bf16.mxu1 %v26180_v7  ;;  %v26231_v7 = vld [vmem:[%s38113_s1 + $0x41c] ss:$100 sps:$4 sm:$0xff]  }
 0x28c   :  { %8463 = vmatpush1.bf16.msra.mxu0 %v26181_v10  ;;  %v31504_v10 = vld [vmem:[%s38114_s0 + $0x8] ss:$28 sps:$4 sm:$0xff]  }
 0x28d   :  { %8922 = vmatpush1.bf16.msra.mxu1 %v26178_v9  ;;  %8475 = vmatprep.subr.bf16.mxu0 %v26195_v11  ;;  %v26229_v11 = vld [vmem:[%s38113_s1 + $0x418] ss:$100 sps:$4 sm:$0xff]  }
 0x28e   :  { %8923 = vmatprep.subr.bf16.mxu1 %v26186_v14  ;;  %v26226_v14 = vld [vmem:[%s38113_s1 + $0x1a00] ss:$100 sps:$4 sm:$0xff]  }
 0x28f   :  { %8465 = vmatmul.mubr.bf16.vlgmr.msra.gmra.mrb[12].mxu0 %v31036_v41  ;;  %v26198_v41 = vld [vmem:[%s38113_s1 + $0x161c] ss:$100 sps:$4 sm:$0xff]  }
 0x290   :  { %8476 = vmatpush1.bf16.msra.mxu0 %v26193_v18  ;;  %8507 = vmatprep.mubr.bf16.mxu0 %v29192_v1  ;;  %v31522_v18 = vld [vmem:[%s38114_s0 + $0x14] ss:$28 sps:$4 sm:$0xff]  }
 0x291   :  { %8924 = vmatpush1.bf16.msra.mxu1 %v26184_v15  ;;  %8690 = vmatprep.subr.bf16.mxu0 %v26201_v16  ;;  %v26234_v15 = vld [vmem:[%s38113_s1 + $0x1acc] ss:$100 sps:$4 sm:$0xff]  }
 0x292   :  { %8925 = vmatprep.subr.bf16.mxu1 %v26189_v12  ;;  %v26237_v12 = vld [vmem:[%s38113_s1 + $0x4e4] ss:$100 sps:$4 sm:$0xff]  }
 0x293   :  { %v26232_v16 = vld [vmem:[%s38113_s1 + $0x1ac8] ss:$100 sps:$4 sm:$0xff]  }
 0x295   :  { %8926 = vmatpush1.bf16.msra.mxu1 %v26187_v20  ;;  %v26235_v20 = vld [vmem:[%s38113_s1 + $0x4e0] ss:$100 sps:$4 sm:$0xff]  }
 0x296   :  { %8927 = vmatprep.subr.bf16.mxu1 %v26192_v22  ;;  %v26240_v22 = vld [vmem:[%s38113_s1 + $0x1b94] ss:$100 sps:$4 sm:$0xff]  }
 0x299   :  { %8928 = vmatpush1.bf16.msra.mxu1 %v26190_v44  ;;  %v26243_v44 = vld [vmem:[%s38113_s1 + $0x5ac] ss:$100 sps:$4 sm:$0xff]  }
 0x29a   :  { %8929 = vmatprep.subr.bf16.mxu1 %v26198_v41  ;;  %v26238_v41 = vld [vmem:[%s38113_s1 + $0x1b90] ss:$100 sps:$4 sm:$0xff]  }
 0x29b   :  { %22981 = vmatmul.mubr.msk.bf16.vlgmr.msra.gmra.mrb[12].mxu0 %vm7654_vm0, %v31067_v39  ;;  %v26213_v39 = vld [vmem:[%s38113_s1 + $0x1c4] ss:$100 sps:$4 sm:$0xff]  }
 0x29c   :  { %8691 = vmatpush1.bf16.msra.mxu0 %v26199_v49  ;;  %8722 = vmatprep.mubr.bf16.mxu0 %v31092_v53  ;;  %v26219_v53 = vld [vmem:[%s38113_s1 + $0x28c] ss:$100 sps:$4 sm:$0xff]   ;;  %v26246_v49 = vld [vmem:[%s38113_s1 + $0x1c5c] ss:$100 sps:$4 sm:$0xff]  }
 0x29d   :  { %8930 = vmatpush1.bf16.msra.mxu1 %v26196_v23  ;;  %8692 = vmatprep.subr.bf16.mxu0 %v26207_v28  ;;  %v26241_v23 = vld [vmem:[%s38113_s1 + $0x5a8] ss:$100 sps:$4 sm:$0xff]   ;;  %v26244_v28 = vld [vmem:[%s38113_s1 + $0x1c58] ss:$100 sps:$4 sm:$0xff]  }
 0x29e   :  { %8931 = vmatprep.subr.bf16.mxu1 %v26204_v26  ;;  %v26249_v26 = vld [vmem:[%s38113_s1 + $0x674] ss:$100 sps:$4 sm:$0xff]  }
 0x2a0   :  { %8693 = vmatpush1.bf16.msra.mxu0 %v26205_v13  ;;  %v26252_v13 = vld [vmem:[%s38113_s1 + $0x1d24] ss:$100 sps:$4 sm:$0xff]  }
 0x2a1   :  { %8932 = vmatpush1.bf16.msra.mxu1 %v26202_v29  ;;  %8694 = vmatprep.subr.bf16.mxu0 %v26213_v39  ;;  %v26247_v29 = vld [vmem:[%s38113_s1 + $0x670] ss:$100 sps:$4 sm:$0xff]   ;;  %v26250_v39 = vld [vmem:[%s38113_s1 + $0x1d20] ss:$100 sps:$4 sm:$0xff]  }
 0x2a2   :  { %8933 = vmatprep.subr.bf16.mxu1 %v26210_v54  ;;  %v8165_v38 = vpop.f32.mrb[8].mxu0  ;;  %v26255_v54 = vld [vmem:[%s38113_s1 + $0x73c] ss:$100 sps:$4 sm:$0xff]  }
 0x2a3   :  { %v24868_v46 = vadd.f32 %v8165_v38, %v1339_v35  ;;  %v8167_v5 = vpop.f32.mrb[9].mxu0  ;;  %v26267_v38 = vld [vmem:[%s38113_s1 + $0x8cc] ss:$100 sps:$4 sm:$0xff]  }
 0x2a4   :  { %8695 = vmatpush1.bf16.msra.mxu0 %v26211_v56  ;;  %v24869_v55 = vadd.f32 %v8167_v5, %v1343_v37  ;;  %v8169_v51 = vpop.f32.mrb[10].mxu0  ;;  %v26261_v56 = vld [vmem:[%s38113_s1 + $0x804] ss:$100 sps:$4 sm:$0xff]   ;;  %v26270_v5 = vld [vmem:[%s38113_s1 + $0x1f7c] ss:$100 sps:$4 sm:$0xff]  }
 0x2a5   :  { %8934 = vmatpush1.bf16.msra.mxu1 %v26208_v34  ;;  %8696 = vmatprep.subr.bf16.mxu0 %v26219_v53  ;;  %v9890_v57 = vmax.f32 %v24868_v46, 0.0  ;;  %v24870_v58 = vadd.f32 %v8169_v51, %v1339_v35  ;;  %v8171_v59 = vpop.f32.mrb[11].mxu0  ;;  %v26253_v34 = vld [vmem:[%s38113_s1 + $0x738] ss:$100 sps:$4 sm:$0xff]   ;;  %v26258_v35 = vld [vmem:[%s38113_s1 + $0x1dec] ss:$100 sps:$4 sm:$0xff]  }
 0x2a6   :  { %8935 = vmatprep.subr.bf16.mxu1 %v26216_v36  ;;  %v9891_v17 = vmax.f32 %v24869_v55, 0.0  ;;  %v24871_v60 = vadd.f32 %v8171_v59, %v1343_v37  ;;  %v26256_v36 = vld [vmem:[%s38113_s1 + $0x1de8] ss:$100 sps:$4 sm:$0xff]   ;;  %v26259_v53 = vld [vmem:[%s38113_s1 + $0x800] ss:$100 sps:$4 sm:$0xff]  }
 0x2a7   :  { %v9915_v0 = vmax.f32 %v24870_v58, 0.0  ;;  %v26264_v37 = vld [vmem:[%s38113_s1 + $0x1eb4] ss:$100 sps:$4 sm:$0xff]   ;;  %v26265_v46 = vld [vmem:[%s38113_s1 + $0x8c8] ss:$100 sps:$4 sm:$0xff]  }
 0x2a8   :  { %8697 = vmatpush1.bf16.msra.mxu0 %v26217_v40  ;;  %v9916_v6 = vmax.f32 %v24871_v60, 0.0  ;;  %v26273_v40 = vld [vmem:[%s38113_s1 + $0x994] ss:$100 sps:$4 sm:$0xff]   ;;  %v26276_v51 = vld [vmem:[%s38113_s1 + $0x2044] ss:$100 sps:$4 sm:$0xff]  }
 0x2a9   :  { %8936 = vmatpush1.bf16.msra.mxu1 %v26214_v63  ;;  %8698 = vmatprep.subr.bf16.mxu0 %v26225_v2  ;;  %v31497_v8 = vpack.c.bf16 %v9915_v0, %v9890_v57  ;;  %v26262_v63 = vld [vmem:[%s38113_s1 + $0x1eb0] ss:$100 sps:$4 sm:$0xff]   ;;  %v26279_v2 = vld [vmem:[%s38113_s1 + $0xa5c] ss:$100 sps:$4 sm:$0xff]   ;;  %v26280_v60 = vld [vmem:[%s38113_s1 + $0x2108] ss:$100 sps:$4 sm:$0xff]  }
 0x2aa   :  { %8948 = vmatprep.subr.bf16.mxu1 %v26222_v52  ;;  %v31499_v9 = vpack.c.bf16 %v9916_v6, %v9891_v17  ;;  %v26268_v52 = vld [vmem:[%s38113_s1 + $0x1f78] ss:$100 sps:$4 sm:$0xff]   ;;  %v26271_v55 = vld [vmem:[%s38113_s1 + $0x990] ss:$100 sps:$4 sm:$0xff]   ;;  %v26274_v57 = vld [vmem:[%s38113_s1 + $0x2040] ss:$100 sps:$4 sm:$0xff]  }
 0x2ab   :  { %v26277_v58 = vld [vmem:[%s38113_s1 + $0xa58] ss:$100 sps:$4 sm:$0xff]   ;;  %v26282_v59 = vld [vmem:[%s38113_s1 + $0x210c] ss:$100 sps:$4 sm:$0xff]   ;;  %v26285_v17 = vld [vmem:[%s38113_s1 + $0xb24] ss:$100 sps:$4 sm:$0xff]  }
 0x2ac   :  { %8938 = vmatmul.mubr.bf16.vlgmr.msra.gmra.mrb[16].mxu1 %v31504_v10  ;;  %8699 = vmatpush1.bf16.msra.mxu0 %v26223_v25  ;;  %v26288_v0 = vld [vmem:[%s38113_s1 + $0x21d4] ss:$100 sps:$4 sm:$0xff]   ;;  %v26291_v25 = vld [vmem:[%s38113_s1 + $0xbec] ss:$100 sps:$4 sm:$0xff]  }
 0x2ad   :  { %8949 = vmatpush1.bf16.msra.mxu1 %v26220_v61  ;;  %8700 = vmatprep.subr.bf16.mxu0 %v26231_v7  ;;  %v26283_v61 = vld [vmem:[%s38113_s1 + $0xb20] ss:$100 sps:$4 sm:$0xff]   ;;  %v26289_v6 = vld [vmem:[%s38113_s1 + $0xbe8] ss:$100 sps:$4 sm:$0xff]  }
 0x2ae   :  { %8950 = vmatprep.subr.bf16.mxu1 %v26228_v4  ;;  %8980 = vmatprep.mubr.bf16.mxu1 %v31522_v18  ;;  %v26286_v4 = vld [vmem:[%s38113_s1 + $0x21d0] ss:$100 sps:$4 sm:$0xff]   ;;  %v26294_v7 = vld [vmem:[%s38113_s1 + $0x229c] ss:$100 sps:$4 sm:$0xff]  }
 0x2b0   :  { %8701 = vmatpush1.bf16.msra.mxu0 %v26229_v11  ;;  %v26292_v11 = vld [vmem:[%s38113_s1 + $0x2298] ss:$100 sps:$4 sm:$0xff]  }
 0x2b1   :  { %8951 = vmatpush1.bf16.msra.mxu1 %v26226_v14  ;;  %8702 = vmatprep.subr.bf16.mxu0 %v26237_v12  ;;  %v26297_v14 = vld [vmem:[%s38113_s1 + $0xcb4] ss:$100 sps:$4 sm:$0xff]   ;;  %v26300_v12 = vld [vmem:[%s38113_s1 + $0x2364] ss:$100 sps:$4 sm:$0xff]  }
 0x2b2   :  { %8952 = vmatprep.subr.bf16.mxu1 %v26234_v15  ;;  %v26295_v15 = vld [vmem:[%s38113_s1 + $0xcb0] ss:$100 sps:$4 sm:$0xff]  }
 0x2b4   :  { %8703 = vmatpush1.bf16.msra.mxu0 %v26235_v20  ;;  %v26298_v20 = vld [vmem:[%s38113_s1 + $0x2360] ss:$100 sps:$4 sm:$0xff]  }
 0x2b5   :  { %8953 = vmatpush1.bf16.msra.mxu1 %v26232_v16  ;;  %8704 = vmatprep.subr.bf16.mxu0 %v26243_v44  ;;  %v26303_v16 = vld [vmem:[%s38113_s1 + $0xd7c] ss:$100 sps:$4 sm:$0xff]   ;;  %v26306_v44 = vld [vmem:[%s38113_s1 + $0x242c] ss:$100 sps:$4 sm:$0xff]  }
 0x2b6   :  { %8954 = vmatprep.subr.bf16.mxu1 %v26240_v22  ;;  %v26301_v22 = vld [vmem:[%s38113_s1 + $0xd78] ss:$100 sps:$4 sm:$0xff]  }
 0x2b8   :  { %8705 = vmatpush1.bf16.msra.mxu0 %v26241_v23  ;;  %v26307_v23 = vld [vmem:[%s38113_s1 + $0xe40] ss:$100 sps:$4 sm:$0xff]  }
 0x2b9   :  { %8955 = vmatpush1.bf16.msra.mxu1 %v26238_v41  ;;  %8706 = vmatprep.subr.bf16.mxu0 %v26249_v26  ;;  %v26304_v41 = vld [vmem:[%s38113_s1 + $0x2428] ss:$100 sps:$4 sm:$0xff]   ;;  %v26310_v26 = vld [vmem:[%s38113_s1 + $0x24f0] ss:$100 sps:$4 sm:$0xff]  }
 0x2ba   :  { %8956 = vmatprep.subr.bf16.mxu1 %v26246_v49  ;;  %v26312_v49 = vld [vmem:[%s38113_s1 + $0x24f4] ss:$100 sps:$4 sm:$0xff]  }
 0x2bc   :  { %8707 = vmatpush1.bf16.msra.mxu0 %v26247_v29  ;;  %v26318_v29 = vld [vmem:[%s38113_s1 + $0x25bc] ss:$100 sps:$4 sm:$0xff]  }
 0x2bd   :  { %8957 = vmatpush1.bf16.msra.mxu1 %v26244_v28  ;;  %8708 = vmatprep.subr.bf16.mxu0 %v26255_v54  ;;  %v26313_v28 = vld [vmem:[%s38113_s1 + $0xf08] ss:$100 sps:$4 sm:$0xff]   ;;  %v26316_v54 = vld [vmem:[%s38113_s1 + $0x25b8] ss:$100 sps:$4 sm:$0xff]  }
 0x2be   :  { %8958 = vmatprep.subr.bf16.mxu1 %v26252_v13  ;;  %v26321_v13 = vld [vmem:[%s38113_s1 + $0xfd4] ss:$100 sps:$4 sm:$0xff]  }
 0x2c0   :  { %8709 = vmatpush1.bf16.msra.mxu0 %v26253_v34  ;;  %v26324_v34 = vld [vmem:[%s38113_s1 + $0x109c] ss:$100 sps:$4 sm:$0xff]  }
 0x2c1   :  { %8959 = vmatpush1.bf16.msra.mxu1 %v26250_v39  ;;  %8710 = vmatprep.subr.bf16.mxu0 %v26261_v56  ;;  %v26319_v39 = vld [vmem:[%s38113_s1 + $0xfd0] ss:$100 sps:$4 sm:$0xff]  }
 0x2c2   :  { %8960 = vmatprep.subr.bf16.mxu1 %v26258_v35  ;;  %v26330_v35 = vld [vmem:[%s38113_s1 + $0x4c] ss:$100 sps:$4 sm:$0xff]  }
 0x2c3   :  { %v31710_v56 = vld [vmem:[%s38114_s0 + $0x10] ss:$28 sps:$4 sm:$0xff]  }
 0x2c4   :  { %8711 = vmatpush1.bf16.msra.mxu0 %v26259_v53  ;;  %v26327_v53 = vld [vmem:[%s38113_s1 + $0x1164] ss:$100 sps:$4 sm:$0xff]  }
 0x2c5   :  { %8961 = vmatpush1.bf16.msra.mxu1 %v26256_v36  ;;  %8712 = vmatprep.subr.bf16.mxu0 %v26267_v38  ;;  %v26322_v36 = vld [vmem:[%s38113_s1 + $0x1098] ss:$100 sps:$4 sm:$0xff]   ;;  %v26333_v38 = vld [vmem:[%s38113_s1 + $0x122c] ss:$100 sps:$4 sm:$0xff]  }
 0x2c6   :  { %8962 = vmatprep.subr.bf16.mxu1 %v26264_v37  ;;  %v26325_v37 = vld [vmem:[%s38113_s1 + $0x1160] ss:$100 sps:$4 sm:$0xff]  }
 0x2c8   :  { %8713 = vmatpush1.bf16.msra.mxu0 %v26265_v46  ;;  %v26331_v46 = vld [vmem:[%s38113_s1 + $0x1228] ss:$100 sps:$4 sm:$0xff]  }
 0x2c9   :  { %8963 = vmatpush1.bf16.msra.mxu1 %v26262_v63  ;;  %8714 = vmatprep.subr.bf16.mxu0 %v26273_v40  ;;  %v26328_v63 = vld [vmem:[%s38113_s1 + $0x48] ss:$100 sps:$4 sm:$0xff]   ;;  %v26339_v40 = vld [vmem:[%s38113_s1 + $0x12f4] ss:$100 sps:$4 sm:$0xff]  }
 0x2ca   :  { %8964 = vmatprep.subr.bf16.mxu1 %v26270_v5  ;;  %v26336_v5 = vld [vmem:[%s38113_s1 + $0x114] ss:$100 sps:$4 sm:$0xff]  }
 0x2cc   :  { %8715 = vmatpush1.bf16.msra.mxu0 %v26271_v55  ;;  %v26334_v55 = vld [vmem:[%s38113_s1 + $0x110] ss:$100 sps:$4 sm:$0xff]  }
 0x2cd   :  { %8965 = vmatpush1.bf16.msra.mxu1 %v26268_v52  ;;  %8716 = vmatprep.subr.bf16.mxu0 %v26279_v2  ;;  %v31741_v52 = vld [vmem:[%s38114_s0 + $0x18] ss:$28 sps:$4 sm:$0xff]   ;;  %v31754_v2 = vld [vmem:[%s38115_s2 + $0x8] sm:$0xff] }
 0x2ce   :  { %8966 = vmatprep.subr.bf16.mxu1 %v26276_v51  ;;  %v26337_v51 = vld [vmem:[%s38113_s1 + $0x12f0] ss:$100 sps:$4 sm:$0xff]  }
 0x2d0   :  { %8717 = vmatpush1.bf16.msra.mxu0 %v26277_v58  ;;  %v26345_v58 = vld [vmem:[%s38113_s1 + $0x13bc] ss:$100 sps:$4 sm:$0xff]  }
 0x2d1   :  { %8967 = vmatpush1.bf16.msra.mxu1 %v26274_v57  ;;  %8718 = vmatprep.subr.bf16.mxu0 %v26285_v17  ;;  %v26342_v57 = vld [vmem:[%s38113_s1 + $0x1dc] ss:$100 sps:$4 sm:$0xff]   ;;  %v1363_v17 = vrot.slane %v31754_v2, %v30767_v32 }
 0x2d2   :  { %8968 = vmatprep.subr.bf16.mxu1 %v26282_v59  ;;  %v31765_v59 = vld [vmem:[%s38114_s0 + $0x4] ss:$28 sps:$4 sm:$0xff]  }
 0x2d4   :  { %8719 = vmatpush1.bf16.msra.mxu0 %v26283_v61  ;;  %v1367_v61 = vrot.slane %v31754_v2, %v30776_v47 }
 0x2d5   :  { %8969 = vmatpush1.bf16.msra.mxu1 %v26280_v60  ;;  %8720 = vmatprep.subr.bf16.mxu0 %v26291_v25  ;;  %v26340_v60 = vld [vmem:[%s38113_s1 + $0x1d8] ss:$100 sps:$4 sm:$0xff]   ;;  %v26348_v25 = vld [vmem:[%s38113_s1 + $0x2a4] ss:$100 sps:$4 sm:$0xff]  }
 0x2d6   :  { %8970 = vmatprep.subr.bf16.mxu1 %v26288_v0  ;;  %v26343_v0 = vld [vmem:[%s38113_s1 + $0x13b8] ss:$100 sps:$4 sm:$0xff]  }
 0x2d8   :  { %8721 = vmatpush1.bf16.msra.mxu0 %v26289_v6 }
 0x2d9   :  { %8971 = vmatpush1.bf16.msra.mxu1 %v26286_v4  ;;  %8733 = vmatprep.subr.bf16.mxu0 %v26297_v14  ;;  %v26351_v4 = vld [vmem:[%s38113_s1 + $0x1484] ss:$100 sps:$4 sm:$0xff]  }
 0x2da   :  { %8972 = vmatprep.subr.bf16.mxu1 %v26294_v7 }
 0x2db   :  { %8723 = vmatmul.mubr.bf16.vlgmr.msra.gmra.mrb[16].mxu0 %v31293_v30  ;;  %v26309_v30 = vld [vmem:[%s38113_s1 + $0xe44] ss:$100 sps:$4 sm:$0xff]  }
 0x2dc   :  { %8734 = vmatpush1.bf16.msra.mxu0 %v26295_v15  ;;  %8765 = vmatprep.mubr.bf16.mxu0 %v31317_v42  ;;  %v26315_v42 = vld [vmem:[%s38113_s1 + $0xf0c] ss:$100 sps:$4 sm:$0xff]  }
 0x2dd   :  { %8973 = vmatpush1.bf16.msra.mxu1 %v26292_v11  ;;  %8735 = vmatprep.subr.bf16.mxu0 %v26303_v16  ;;  %v26349_v16 = vld [vmem:[%s38113_s1 + $0x1480] ss:$100 sps:$4 sm:$0xff]  }
 0x2de   :  { %8974 = vmatprep.subr.bf16.mxu1 %v26300_v12  ;;  %v26346_v12 = vld [vmem:[%s38113_s1 + $0x2a0] ss:$100 sps:$4 sm:$0xff]  }
 0x2e0   :  { %8736 = vmatpush1.bf16.msra.mxu0 %v26301_v22 }
 0x2e1   :  { %8975 = vmatpush1.bf16.msra.mxu1 %v26298_v20  ;;  %8737 = vmatprep.subr.bf16.mxu0 %v26309_v30  ;;  %v26357_v30 = vld [vmem:[%s38113_s1 + $0x154c] ss:$100 sps:$4 sm:$0xff]  }
 0x2e2   :  { %8976 = vmatprep.subr.bf16.mxu1 %v26306_v44  ;;  %v26354_v44 = vld [vmem:[%s38113_s1 + $0x36c] ss:$100 sps:$4 sm:$0xff]  }
 0x2e4   :  { %8738 = vmatpush1.bf16.msra.mxu0 %v26307_v23 }
 0x2e5   :  { %8977 = vmatpush1.bf16.msra.mxu1 %v26304_v41  ;;  %8739 = vmatprep.subr.bf16.mxu0 %v26315_v42 }
 0x2e6   :  { %8978 = vmatprep.subr.bf16.mxu1 %v26312_v49 }
 0x2e8   :  { %8740 = vmatpush1.bf16.msra.mxu0 %v26313_v28  ;;  %v26352_v28 = vld [vmem:[%s38113_s1 + $0x368] ss:$100 sps:$4 sm:$0xff]  }
 0x2e9   :  { %8979 = vmatpush1.bf16.msra.mxu1 %v26310_v26  ;;  %8741 = vmatprep.subr.bf16.mxu0 %v26321_v13 }
 0x2ea   :  { %8991 = vmatprep.subr.bf16.mxu1 %v26318_v29  ;;  %v26355_v29 = vld [vmem:[%s38113_s1 + $0x1548] ss:$100 sps:$4 sm:$0xff]  }
 0x2ec   :  { %8981 = vmatmul.mubr.bf16.vlgmr.msra.gmra.mrb[16].mxu1 %v31710_v56  ;;  %8742 = vmatpush1.bf16.msra.mxu0 %v26319_v39  ;;  %v26363_v39 = vld [vmem:[%s38113_s1 + $0x1614] ss:$100 sps:$4 sm:$0xff]  }
 0x2ed   :  { %8992 = vmatpush1.bf16.msra.mxu1 %v26316_v54  ;;  %8743 = vmatprep.subr.bf16.mxu0 %v26324_v34  ;;  %v26360_v54 = vld [vmem:[%s38113_s1 + $0x434] ss:$100 sps:$4 sm:$0xff]  }
 0x2ee   :  { %9023 = vmatprep.mubr.bf16.mxu1 %v29192_v1  ;;  %9206 = vmatprep.subr.bf16.mxu1 %v26330_v35  ;;  %v26358_v35 = vld [vmem:[%s38113_s1 + $0x430] ss:$100 sps:$4 sm:$0xff]  }
 0x2f0   :  { %8744 = vmatpush1.bf16.msra.mxu0 %v26322_v36  ;;  %v26361_v36 = vld [vmem:[%s38113_s1 + $0x1610] ss:$100 sps:$4 sm:$0xff]  }
 0x2f1   :  { %8745 = vmatprep.subr.bf16.mxu0 %v26327_v53  ;;  %v26366_v53 = vld [vmem:[%s38113_s1 + $0x4fc] ss:$100 sps:$4 sm:$0xff]  }
 0x2f4   :  { %8746 = vmatpush1.bf16.msra.mxu0 %v26325_v37  ;;  %v26369_v37 = vld [vmem:[%s38113_s1 + $0x16dc] ss:$100 sps:$4 sm:$0xff]  }
 0x2f5   :  { %8747 = vmatprep.subr.bf16.mxu0 %v26333_v38  ;;  %v26364_v38 = vld [vmem:[%s38113_s1 + $0x4f8] ss:$100 sps:$4 sm:$0xff]  }
 0x2f8   :  { %22984 = vmatmul.mubr.msk.bf16.vlgmr.msra.gmra.mrb[16].mxu1 %vm7654_vm0, %v31741_v52  ;;  %8748 = vmatpush1.bf16.msra.mxu0 %v26331_v46  ;;  %v26372_v46 = vld [vmem:[%s38113_s1 + $0x5c4] ss:$100 sps:$4 sm:$0xff]  }
 0x2f9   :  { %9207 = vmatpush1.bf16.msra.mxu1 %v26328_v63  ;;  %8749 = vmatprep.subr.bf16.mxu0 %v26339_v40  ;;  %v26367_v63 = vld [vmem:[%s38113_s1 + $0x16d8] ss:$100 sps:$4 sm:$0xff]   ;;  %v26370_v40 = vld [vmem:[%s38113_s1 + $0x5c0] ss:$100 sps:$4 sm:$0xff]  }
 0x2fa   :  { %9208 = vmatprep.subr.bf16.mxu1 %v26336_v5  ;;  %9238 = vmatprep.mubr.bf16.mxu1 %v31765_v59  ;;  %v26375_v5 = vld [vmem:[%s38113_s1 + $0x17a4] ss:$100 sps:$4 sm:$0xff]  }
 0x2fc   :  { %8750 = vmatpush1.bf16.msra.mxu0 %v26337_v51  ;;  %v26378_v51 = vld [vmem:[%s38113_s1 + $0x68c] ss:$100 sps:$4 sm:$0xff]  }
 0x2fd   :  { %9209 = vmatpush1.bf16.msra.mxu1 %v26334_v55  ;;  %8751 = vmatprep.subr.bf16.mxu0 %v26345_v58  ;;  %v26373_v55 = vld [vmem:[%s38113_s1 + $0x17a0] ss:$100 sps:$4 sm:$0xff]   ;;  %v26376_v58 = vld [vmem:[%s38113_s1 + $0x688] ss:$100 sps:$4 sm:$0xff]  }
 0x2fe   :  { %9210 = vmatprep.subr.bf16.mxu1 %v26342_v57  ;;  %v26381_v57 = vld [vmem:[%s38113_s1 + $0x186c] ss:$100 sps:$4 sm:$0xff]  }
 0x2ff   :  { %v8681_v6 = vpop.f32.mrb[12].mxu1 }
 0x300   :  { %v24880_v7 = vadd.f32 %v8681_v6, %v1363_v17  ;;  %v8683_v14 = vpop.f32.mrb[13].mxu1  ;;  %8752 = vmatpush1.bf16.msra.mxu0 %v26343_v0  ;;  %v26382_v0 = vld [vmem:[%s38113_s1 + $0x750] ss:$100 sps:$4 sm:$0xff]   ;;  %v26393_v6 = vld [vmem:[%s38113_s1 + $0x19fc] ss:$100 sps:$4 sm:$0xff]  }
 0x301   :  { %9211 = vmatpush1.bf16.msra.mxu1 %v26340_v60  ;;  %v24881_v11 = vadd.f32 %v8683_v14, %v1367_v61  ;;  %v8685_v15 = vpop.f32.mrb[14].mxu1  ;;  %8753 = vmatprep.subr.bf16.mxu0 %v26351_v4  ;;  %v26384_v60 = vld [vmem:[%s38113_s1 + $0x754] ss:$100 sps:$4 sm:$0xff]   ;;  %v26390_v4 = vld [vmem:[%s38113_s1 + $0x81c] ss:$100 sps:$4 sm:$0xff]  }
 0x302   :  { %v24882_v20 = vadd.f32 %v8685_v15, %v1363_v17  ;;  %v8687_v22 = vpop.f32.mrb[15].mxu1  ;;  %9212 = vmatprep.subr.bf16.mxu1 %v26348_v25  ;;  %v9896_v23 = vmax.f32 %v24880_v7, 0.0  ;;  %v26379_v17 = vld [vmem:[%s38113_s1 + $0x1868] ss:$100 sps:$4 sm:$0xff]   ;;  %v26385_v25 = vld [vmem:[%s38113_s1 + $0x1930] ss:$100 sps:$4 sm:$0xff]  }
 0x303   :  { %v24883_v41 = vadd.f32 %v8687_v22, %v1367_v61  ;;  %v9897_v42 = vmax.f32 %v24881_v11, 0.0  ;;  %v26387_v61 = vld [vmem:[%s38113_s1 + $0x1934] ss:$100 sps:$4 sm:$0xff]   ;;  %v26396_v11 = vld [vmem:[%s38113_s1 + $0x8e4] ss:$100 sps:$4 sm:$0xff]  }
 0x304   :  { %v9921_v49 = vmax.f32 %v24882_v20, 0.0  ;;  %8754 = vmatpush1.bf16.msra.mxu0 %v26349_v16  ;;  %v26388_v7 = vld [vmem:[%s38113_s1 + $0x818] ss:$100 sps:$4 sm:$0xff]   ;;  %v26399_v15 = vld [vmem:[%s38113_s1 + $0x1ac4] ss:$100 sps:$4 sm:$0xff]  }
 0x305   :  { %v9922_v26 = vmax.f32 %v24883_v41, 0.0  ;;  %9213 = vmatpush1.bf16.msra.mxu1 %v26346_v12  ;;  %8755 = vmatprep.subr.bf16.mxu0 %v26357_v30  ;;  %v26391_v14 = vld [vmem:[%s38113_s1 + $0x19f8] ss:$100 sps:$4 sm:$0xff]   ;;  %v26394_v12 = vld [vmem:[%s38113_s1 + $0x8e0] ss:$100 sps:$4 sm:$0xff]  }
 0x306   :  { %v31802_v13 = vpack.c.bf16 %v9921_v49, %v9896_v23  ;;  %9214 = vmatprep.subr.bf16.mxu1 %v26354_v44  ;;  %v26397_v16 = vld [vmem:[%s38113_s1 + $0x1ac0] ss:$100 sps:$4 sm:$0xff]   ;;  %v26402_v20 = vld [vmem:[%s38113_s1 + $0x9ac] ss:$100 sps:$4 sm:$0xff]   ;;  %v26408_v41 = vld [vmem:[%s38113_s1 + $0xa74] ss:$100 sps:$4 sm:$0xff]  }
 0x307   :  { %v31810_v34 = vpack.c.bf16 %v9922_v26, %v9897_v42  ;;  %v26405_v22 = vld [vmem:[%s38113_s1 + $0x1b8c] ss:$100 sps:$4 sm:$0xff]   ;;  %v26411_v23 = vld [vmem:[%s38113_s1 + $0x1c54] ss:$100 sps:$4 sm:$0xff]   ;;  %v26414_v26 = vld [vmem:[%s38113_s1 + $0xb3c] ss:$100 sps:$4 sm:$0xff]  }
 0x308   :  { %8756 = vmatpush1.bf16.msra.mxu0 %v26355_v29  ;;  %v26400_v44 = vld [vmem:[%s38113_s1 + $0x9a8] ss:$100 sps:$4 sm:$0xff]   ;;  %v26406_v49 = vld [vmem:[%s38113_s1 + $0xa70] ss:$100 sps:$4 sm:$0xff]   ;;  %v26412_v29 = vld [vmem:[%s38113_s1 + $0xb38] ss:$100 sps:$4 sm:$0xff]  }
 0x309   :  { %9215 = vmatpush1.bf16.msra.mxu1 %v26352_v28  ;;  %8757 = vmatprep.subr.bf16.mxu0 %v26363_v39  ;;  %v26403_v30 = vld [vmem:[%s38113_s1 + $0x1b88] ss:$100 sps:$4 sm:$0xff]   ;;  %v26409_v42 = vld [vmem:[%s38113_s1 + $0x1c50] ss:$100 sps:$4 sm:$0xff]   ;;  %v26417_v28 = vld [vmem:[%s38113_s1 + $0x1d1c] ss:$100 sps:$4 sm:$0xff]  }
 0x30a   :  { %9216 = vmatprep.subr.bf16.mxu1 %v26360_v54  ;;  %v26415_v54 = vld [vmem:[%s38113_s1 + $0x1d18] ss:$100 sps:$4 sm:$0xff]   ;;  %v26420_v39 = vld [vmem:[%s38113_s1 + $0xc04] ss:$100 sps:$4 sm:$0xff]  }
 0x30c   :  { %8758 = vmatpush1.bf16.msra.mxu0 %v26361_v36  ;;  %v26418_v36 = vld [vmem:[%s38113_s1 + $0xc00] ss:$100 sps:$4 sm:$0xff]  }
 0x30d   :  { %9217 = vmatpush1.bf16.msra.mxu1 %v26358_v35  ;;  %8759 = vmatprep.subr.bf16.mxu0 %v26369_v37  ;;  %v26423_v35 = vld [vmem:[%s38113_s1 + $0x1de4] ss:$100 sps:$4 sm:$0xff]   ;;  %v26426_v37 = vld [vmem:[%s38113_s1 + $0xccc] ss:$100 sps:$4 sm:$0xff]  }
 0x30e   :  { %9218 = vmatprep.subr.bf16.mxu1 %v26366_v53  ;;  %v26421_v53 = vld [vmem:[%s38113_s1 + $0x1de0] ss:$100 sps:$4 sm:$0xff]  }
 0x310   :  { %8760 = vmatpush1.bf16.msra.mxu0 %v26367_v63  ;;  %v26424_v63 = vld [vmem:[%s38113_s1 + $0xcc8] ss:$100 sps:$4 sm:$0xff]  }
 0x311   :  { %9219 = vmatpush1.bf16.msra.mxu1 %v26364_v38  ;;  %8761 = vmatprep.subr.bf16.mxu0 %v26375_v5  ;;  %v26429_v38 = vld [vmem:[%s38113_s1 + $0x1eac] ss:$100 sps:$4 sm:$0xff]   ;;  %v26432_v5 = vld [vmem:[%s38113_s1 + $0xd94] ss:$100 sps:$4 sm:$0xff]  }
 0x312   :  { %9220 = vmatprep.subr.bf16.mxu1 %v26372_v46  ;;  %v26427_v46 = vld [vmem:[%s38113_s1 + $0x1ea8] ss:$100 sps:$4 sm:$0xff]  }
 0x314   :  { %8762 = vmatpush1.bf16.msra.mxu0 %v26373_v55  ;;  %v31961_v55 = vld [vmem:[%s38114_s0] ss:$28 sps:$4 sm:$0xff]  }
 0x315   :  { %9221 = vmatpush1.bf16.msra.mxu1 %v26370_v40  ;;  %8763 = vmatprep.subr.bf16.mxu0 %v26381_v57  ;;  %v26435_v40 = vld [vmem:[%s38113_s1 + $0x1f74] ss:$100 sps:$4 sm:$0xff]  }
 0x316   :  { %9222 = vmatprep.subr.bf16.mxu1 %v26378_v51  ;;  %v26430_v51 = vld [vmem:[%s38113_s1 + $0xd90] ss:$100 sps:$4 sm:$0xff]  }
 0x317   :  { %v26433_v57 = vld [vmem:[%s38113_s1 + $0x1f70] ss:$100 sps:$4 sm:$0xff]  }
 0x318   :  { %8764 = vmatpush1.bf16.msra.mxu0 %v26379_v17  ;;  %v26441_v17 = vld [vmem:[%s38113_s1 + $0x203c] ss:$100 sps:$4 sm:$0xff]  }
 0x319   :  { %9223 = vmatpush1.bf16.msra.mxu1 %v26376_v58  ;;  %8776 = vmatprep.subr.bf16.mxu0 %v26387_v61  ;;  %v26438_v58 = vld [vmem:[%s38113_s1 + $0xe5c] ss:$100 sps:$4 sm:$0xff]  }
 0x31a   :  { %9224 = vmatprep.subr.bf16.mxu1 %v26384_v60  ;;  %v31979_v60 = vld [vmem:[%s38114_s0 + $0xc] ss:$28 sps:$4 sm:$0xff]   ;;  %v26436_v61 = vld [vmem:[%s38113_s1 + $0xe58] ss:$100 sps:$4 sm:$0xff]  }
 0x31b   :  { %8766 = vmatmul.mubr.bf16.vlgmr.msra.gmra.mrb[16].mxu0 %v31504_v10 }
 0x31c   :  { %8777 = vmatpush1.bf16.msra.mxu0 %v26385_v25  ;;  %8808 = vmatprep.mubr.bf16.mxu0 %v31522_v18  ;;  %v26444_v25 = vld [vmem:[%s38113_s1 + $0xf24] ss:$100 sps:$4 sm:$0xff]  }
 0x31d   :  { %9225 = vmatpush1.bf16.msra.mxu1 %v26382_v0  ;;  %8778 = vmatprep.subr.bf16.mxu0 %v26393_v6  ;;  %v26439_v0 = vld [vmem:[%s38113_s1 + $0x2038] ss:$100 sps:$4 sm:$0xff]   ;;  %v26442_v6 = vld [vmem:[%s38113_s1 + $0xf20] ss:$100 sps:$4 sm:$0xff]  }
 0x31e   :  { %9226 = vmatprep.subr.bf16.mxu1 %v26390_v4  ;;  %v26447_v4 = vld [vmem:[%s38113_s1 + $0x2104] ss:$100 sps:$4 sm:$0xff]  }
 0x320   :  { %8779 = vmatpush1.bf16.msra.mxu0 %v26391_v14  ;;  %v26450_v14 = vld [vmem:[%s38113_s1 + $0xfec] ss:$100 sps:$4 sm:$0xff]  }
 0x321   :  { %9227 = vmatpush1.bf16.msra.mxu1 %v26388_v7  ;;  %8780 = vmatprep.subr.bf16.mxu0 %v26399_v15  ;;  %v26445_v7 = vld [vmem:[%s38113_s1 + $0x2100] ss:$100 sps:$4 sm:$0xff]   ;;  %v26448_v15 = vld [vmem:[%s38113_s1 + $0xfe8] ss:$100 sps:$4 sm:$0xff]  }
 0x322   :  { %9228 = vmatprep.subr.bf16.mxu1 %v26396_v11  ;;  %v26453_v11 = vld [vmem:[%s38113_s1 + $0x21cc] ss:$100 sps:$4 sm:$0xff]  }
 0x324   :  { %8781 = vmatpush1.bf16.msra.mxu0 %v26397_v16  ;;  %v26456_v16 = vld [vmem:[%s38113_s1 + $0x10b4] ss:$100 sps:$4 sm:$0xff]  }
 0x325   :  { %9229 = vmatpush1.bf16.msra.mxu1 %v26394_v12  ;;  %8782 = vmatprep.subr.bf16.mxu0 %v26405_v22  ;;  %v26451_v12 = vld [vmem:[%s38113_s1 + $0x21c8] ss:$100 sps:$4 sm:$0xff]   ;;  %v26454_v22 = vld [vmem:[%s38113_s1 + $0x10b0] ss:$100 sps:$4 sm:$0xff]  }
 0x326   :  { %9230 = vmatprep.subr.bf16.mxu1 %v26402_v20  ;;  %v26459_v20 = vld [vmem:[%s38113_s1 + $0x2294] ss:$100 sps:$4 sm:$0xff]  }
 0x328   :  { %8783 = vmatpush1.bf16.msra.mxu0 %v26403_v30  ;;  %v26462_v30 = vld [vmem:[%s38113_s1 + $0x117c] ss:$100 sps:$4 sm:$0xff]  }
 0x329   :  { %9231 = vmatpush1.bf16.msra.mxu1 %v26400_v44  ;;  %8784 = vmatprep.subr.bf16.mxu0 %v26411_v23  ;;  %v26457_v44 = vld [vmem:[%s38113_s1 + $0x2290] ss:$100 sps:$4 sm:$0xff]   ;;  %v26460_v23 = vld [vmem:[%s38113_s1 + $0x1178] ss:$100 sps:$4 sm:$0xff]  }
 0x32a   :  { %9232 = vmatprep.subr.bf16.mxu1 %v26408_v41  ;;  %v26465_v41 = vld [vmem:[%s38113_s1 + $0x235c] ss:$100 sps:$4 sm:$0xff]  }
 0x32c   :  { %8785 = vmatpush1.bf16.msra.mxu0 %v26409_v42  ;;  %v26468_v42 = vld [vmem:[%s38113_s1 + $0x1244] ss:$100 sps:$4 sm:$0xff]  }
 0x32d   :  { %9233 = vmatpush1.bf16.msra.mxu1 %v26406_v49  ;;  %8786 = vmatprep.subr.bf16.mxu0 %v26417_v28  ;;  %v26463_v49 = vld [vmem:[%s38113_s1 + $0x2358] ss:$100 sps:$4 sm:$0xff]   ;;  %v26466_v28 = vld [vmem:[%s38113_s1 + $0x1240] ss:$100 sps:$4 sm:$0xff]  }
 0x32e   :  { %9234 = vmatprep.subr.bf16.mxu1 %v26414_v26  ;;  %v26471_v26 = vld [vmem:[%s38113_s1 + $0x2424] ss:$100 sps:$4 sm:$0xff]  }
 0x330   :  { %8787 = vmatpush1.bf16.msra.mxu0 %v26415_v54  ;;  %v26474_v54 = vld [vmem:[%s38113_s1 + $0x130c] ss:$100 sps:$4 sm:$0xff]  }
 0x331   :  { %9235 = vmatpush1.bf16.msra.mxu1 %v26412_v29  ;;  %8788 = vmatprep.subr.bf16.mxu0 %v26423_v35  ;;  %v26469_v29 = vld [vmem:[%s38113_s1 + $0x2420] ss:$100 sps:$4 sm:$0xff]   ;;  %v26472_v35 = vld [vmem:[%s38113_s1 + $0x1308] ss:$100 sps:$4 sm:$0xff]  }
 0x332   :  { %9236 = vmatprep.subr.bf16.mxu1 %v26420_v39  ;;  %v26477_v39 = vld [vmem:[%s38113_s1 + $0x24ec] ss:$100 sps:$4 sm:$0xff]  }
 0x334   :  { %8789 = vmatpush1.bf16.msra.mxu0 %v26421_v53  ;;  %v26480_v53 = vld [vmem:[%s38113_s1 + $0x13d4] ss:$100 sps:$4 sm:$0xff]  }
 0x335   :  { %9237 = vmatpush1.bf16.msra.mxu1 %v26418_v36  ;;  %8790 = vmatprep.subr.bf16.mxu0 %v26429_v38  ;;  %v26475_v36 = vld [vmem:[%s38113_s1 + $0x24e8] ss:$100 sps:$4 sm:$0xff]   ;;  %v26478_v38 = vld [vmem:[%s38113_s1 + $0x13d0] ss:$100 sps:$4 sm:$0xff]  }
 0x336   :  { %9249 = vmatprep.subr.bf16.mxu1 %v26426_v37  ;;  %v26489_v37 = vld [vmem:[%s38113_s1 + $0x25b4] ss:$100 sps:$4 sm:$0xff]  }
 0x338   :  { %9239 = vmatmul.mubr.bf16.vlgmr.msra.gmra.mrb[20].mxu1 %v31961_v55  ;;  %8791 = vmatpush1.bf16.msra.mxu0 %v26427_v46  ;;  %v26483_v46 = vld [vmem:[%s38113_s1 + $0x149c] ss:$100 sps:$4 sm:$0xff]  }
 0x339   :  { %9250 = vmatpush1.bf16.msra.mxu1 %v26424_v63  ;;  %8792 = vmatprep.subr.bf16.mxu0 %v26435_v40  ;;  %v26487_v63 = vld [vmem:[%s38113_s1 + $0x25b0] ss:$100 sps:$4 sm:$0xff]   ;;  %v26481_v40 = vld [vmem:[%s38113_s1 + $0x1498] ss:$100 sps:$4 sm:$0xff]  }
 0x33a   :  { %9251 = vmatprep.subr.bf16.mxu1 %v26432_v5  ;;  %9281 = vmatprep.mubr.bf16.mxu1 %v31979_v60  ;;  %v26495_v5 = vld [vmem:[%s38113_s1 + $0x44] ss:$100 sps:$4 sm:$0xff]  }
 0x33c   :  { %8793 = vmatpush1.bf16.msra.mxu0 %v26433_v57  ;;  %v26484_v57 = vld [vmem:[%s38113_s1 + $0x1560] ss:$100 sps:$4 sm:$0xff]  }
 0x33d   :  { %9252 = vmatpush1.bf16.msra.mxu1 %v26430_v51  ;;  %8794 = vmatprep.subr.bf16.mxu0 %v26441_v17  ;;  %v26486_v51 = vld [vmem:[%s38113_s1 + $0x1564] ss:$100 sps:$4 sm:$0xff]  }
 0x33e   :  { %9253 = vmatprep.subr.bf16.mxu1 %v26438_v58  ;;  %v26492_v58 = vld [vmem:[%s38113_s1 + $0x162c] ss:$100 sps:$4 sm:$0xff]  }
 0x33f   :  { %v26490_v17 = vld [vmem:[%s38113_s1 + $0x1628] ss:$100 sps:$4 sm:$0xff]  }
 0x340   :  { %8795 = vmatpush1.bf16.msra.mxu0 %v26439_v0  ;;  %v26498_v0 = vld [vmem:[%s38113_s1 + $0x16f4] ss:$100 sps:$4 sm:$0xff]  }
 0x341   :  { %9254 = vmatpush1.bf16.msra.mxu1 %v26436_v61  ;;  %8796 = vmatprep.subr.bf16.mxu0 %v26447_v4  ;;  %v26493_v61 = vld [vmem:[%s38113_s1 + $0x40] ss:$100 sps:$4 sm:$0xff]   ;;  %v26496_v4 = vld [vmem:[%s38113_s1 + $0x16f0] ss:$100 sps:$4 sm:$0xff]  }
 0x342   :  { %9255 = vmatprep.subr.bf16.mxu1 %v26444_v25  ;;  %v26501_v25 = vld [vmem:[%s38113_s1 + $0x10c] ss:$100 sps:$4 sm:$0xff]  }
 0x344   :  { %8797 = vmatpush1.bf16.msra.mxu0 %v26445_v7  ;;  %v26504_v7 = vld [vmem:[%s38113_s1 + $0x17bc] ss:$100 sps:$4 sm:$0xff]  }
 0x345   :  { %9256 = vmatpush1.bf16.msra.mxu1 %v26442_v6  ;;  %8798 = vmatprep.subr.bf16.mxu0 %v26453_v11  ;;  %v26499_v6 = vld [vmem:[%s38113_s1 + $0x108] ss:$100 sps:$4 sm:$0xff]   ;;  %v1355_v11 = vrot.slane %v31754_v2, %v30545_v62 }
 0x346   :  { %9257 = vmatprep.subr.bf16.mxu1 %v26450_v14  ;;  %v26507_v14 = vld [vmem:[%s38113_s1 + $0x1d4] ss:$100 sps:$4 sm:$0xff]  }
 0x348   :  { %8799 = vmatpush1.bf16.msra.mxu0 %v26451_v12  ;;  %v26505_v12 = vld [vmem:[%s38113_s1 + $0x1d0] ss:$100 sps:$4 sm:$0xff]  }
 0x349   :  { %9258 = vmatpush1.bf16.msra.mxu1 %v26448_v15  ;;  %8800 = vmatprep.subr.bf16.mxu0 %v26459_v20  ;;  %v26502_v15 = vld [vmem:[%s38113_s1 + $0x17b8] ss:$100 sps:$4 sm:$0xff]   ;;  %v26510_v20 = vld [vmem:[%s38113_s1 + $0x1884] ss:$100 sps:$4 sm:$0xff]  }
 0x34a   :  { %9259 = vmatprep.subr.bf16.mxu1 %v26456_v16  ;;  %v1359_v16 = vrot.slane %v31754_v2, %v30556_v3 }
 0x34c   :  { %8801 = vmatpush1.bf16.msra.mxu0 %v26457_v44 }
 0x34d   :  { %9260 = vmatpush1.bf16.msra.mxu1 %v26454_v22  ;;  %8802 = vmatprep.subr.bf16.mxu0 %v26465_v41  ;;  %v26513_v22 = vld [vmem:[%s38113_s1 + $0x29c] ss:$100 sps:$4 sm:$0xff]  }
 0x34e   :  { %9261 = vmatprep.subr.bf16.mxu1 %v26462_v30 }
 0x350   :  { %8803 = vmatpush1.bf16.msra.mxu0 %v26463_v49  ;;  %v26511_v49 = vld [vmem:[%s38113_s1 + $0x298] ss:$100 sps:$4 sm:$0xff]  }
 0x351   :  { %9262 = vmatpush1.bf16.msra.mxu1 %v26460_v23  ;;  %8804 = vmatprep.subr.bf16.mxu0 %v26471_v26  ;;  %v26508_v23 = vld [vmem:[%s38113_s1 + $0x1880] ss:$100 sps:$4 sm:$0xff]  }
 0x352   :  { %9263 = vmatprep.subr.bf16.mxu1 %v26468_v42 }
 0x354   :  { %8805 = vmatpush1.bf16.msra.mxu0 %v26469_v29  ;;  %v26519_v29 = vld [vmem:[%s38113_s1 + $0x364] ss:$100 sps:$4 sm:$0xff]  }
 0x355   :  { %9264 = vmatpush1.bf16.msra.mxu1 %v26466_v28  ;;  %8806 = vmatprep.subr.bf16.mxu0 %v26477_v39  ;;  %v26516_v28 = vld [vmem:[%s38113_s1 + $0x194c] ss:$100 sps:$4 sm:$0xff]  }
 0x356   :  { %9265 = vmatprep.subr.bf16.mxu1 %v26474_v54 }
 0x358   :  { %8807 = vmatpush1.bf16.msra.mxu0 %v26475_v36 }
 0x359   :  { %9266 = vmatpush1.bf16.msra.mxu1 %v26472_v35  ;;  %8819 = vmatprep.subr.bf16.mxu0 %v26489_v37 }
 0x35a   :  { %9267 = vmatprep.subr.bf16.mxu1 %v26480_v53 }
 0x35b   :  { %8809 = vmatmul.mubr.bf16.vlgmr.msra.gmra.mrb[16].mxu0 %v31710_v56 }
 0x35c   :  { %8820 = vmatpush1.bf16.msra.mxu0 %v26487_v63  ;;  %8851 = vmatprep.mubr.bf16.mxu0 %v29192_v1  ;;  %v26517_v63 = vld [vmem:[%s38113_s1 + $0x360] ss:$100 sps:$4 sm:$0xff]  }
 0x35d   :  { %9268 = vmatpush1.bf16.msra.mxu1 %v26478_v38  ;;  %9034 = vmatprep.subr.bf16.mxu0 %v26495_v5  ;;  %v26514_v38 = vld [vmem:[%s38113_s1 + $0x1948] ss:$100 sps:$4 sm:$0xff]   ;;  %v26522_v5 = vld [vmem:[%s38113_s1 + $0x1a14] ss:$100 sps:$4 sm:$0xff]  }
 0x35e   :  { %9269 = vmatprep.subr.bf16.mxu1 %v26483_v46 }
 0x361   :  { %9270 = vmatpush1.bf16.msra.mxu1 %v26481_v40  ;;  %v26525_v40 = vld [vmem:[%s38113_s1 + $0x42c] ss:$100 sps:$4 sm:$0xff]  }
 0x362   :  { %9271 = vmatprep.subr.bf16.mxu1 %v26486_v51 }
 0x365   :  { %9272 = vmatpush1.bf16.msra.mxu1 %v26484_v57 }
 0x366   :  { %9273 = vmatprep.subr.bf16.mxu1 %v26492_v58  ;;  %v26520_v58 = vld [vmem:[%s38113_s1 + $0x1a10] ss:$100 sps:$4 sm:$0xff]  }
 0x367   :  { %22983 = vmatmul.mubr.msk.bf16.vlgmr.msra.gmra.mrb[16].mxu0 %vm7654_vm0, %v31741_v52 }
 0x368   :  { %9035 = vmatpush1.bf16.msra.mxu0 %v26493_v61  ;;  %9066 = vmatprep.mubr.bf16.mxu0 %v31765_v59  ;;  %v26528_v61 = vld [vmem:[%s38113_s1 + $0x1adc] ss:$100 sps:$4 sm:$0xff]  }
 0x369   :  { %9274 = vmatpush1.bf16.msra.mxu1 %v26490_v17  ;;  %9036 = vmatprep.subr.bf16.mxu0 %v26501_v25  ;;  %v26523_v17 = vld [vmem:[%s38113_s1 + $0x428] ss:$100 sps:$4 sm:$0xff]   ;;  %v26529_v25 = vld [vmem:[%s38113_s1 + $0x4f0] ss:$100 sps:$4 sm:$0xff]  }
 0x36a   :  { %9275 = vmatprep.subr.bf16.mxu1 %v26498_v0  ;;  %v26526_v0 = vld [vmem:[%s38113_s1 + $0x1ad8] ss:$100 sps:$4 sm:$0xff]  }
 0x36c   :  { %9037 = vmatpush1.bf16.msra.mxu0 %v26499_v6  ;;  %v26532_v6 = vld [vmem:[%s38113_s1 + $0x1ba0] ss:$100 sps:$4 sm:$0xff]  }
 0x36d   :  { %9276 = vmatpush1.bf16.msra.mxu1 %v26496_v4  ;;  %9038 = vmatprep.subr.bf16.mxu0 %v26507_v14  ;;  %v26534_v4 = vld [vmem:[%s38113_s1 + $0x1ba4] ss:$100 sps:$4 sm:$0xff]   ;;  %v26540_v14 = vld [vmem:[%s38113_s1 + $0x1c6c] ss:$100 sps:$4 sm:$0xff]  }
 0x36e   :  { %9277 = vmatprep.subr.bf16.mxu1 %v26504_v7  ;;  %v8509_v44 = vpop.f32.mrb[12].mxu0  ;;  %v26535_v7 = vld [vmem:[%s38113_s1 + $0x5b8] ss:$100 sps:$4 sm:$0xff]  }
 0x36f   :  { %v24876_v30 = vadd.f32 %v8509_v44, %v1355_v11  ;;  %v8511_v41 = vpop.f32.mrb[13].mxu0  ;;  %v26547_v44 = vld [vmem:[%s38113_s1 + $0x748] ss:$100 sps:$4 sm:$0xff]  }
 0x370   :  { %9039 = vmatpush1.bf16.msra.mxu0 %v26505_v12  ;;  %v24877_v42 = vadd.f32 %v8511_v41, %v1359_v16  ;;  %v8513_v26 = vpop.f32.mrb[14].mxu0  ;;  %v26541_v12 = vld [vmem:[%s38113_s1 + $0x680] ss:$100 sps:$4 sm:$0xff]   ;;  %v26555_v41 = vld [vmem:[%s38113_s1 + $0x814] ss:$100 sps:$4 sm:$0xff]  }
 0x371   :  { %9278 = vmatpush1.bf16.msra.mxu1 %v26502_v15  ;;  %9040 = vmatprep.subr.bf16.mxu0 %v26513_v22  ;;  %v9894_v54 = vmax.f32 %v24876_v30, 0.0  ;;  %v24878_v39 = vadd.f32 %v8513_v26, %v1355_v11  ;;  %v8515_v35 = vpop.f32.mrb[15].mxu0  ;;  %v26543_v11 = vld [vmem:[%s38113_s1 + $0x684] ss:$100 sps:$4 sm:$0xff]   ;;  %v26544_v22 = vld [vmem:[%s38113_s1 + $0x1d30] ss:$100 sps:$4 sm:$0xff]  }
 0x372   :  { %9279 = vmatprep.subr.bf16.mxu1 %v26510_v20  ;;  %v9895_v36 = vmax.f32 %v24877_v42, 0.0  ;;  %v24879_v53 = vadd.f32 %v8515_v35, %v1359_v16  ;;  %v26538_v15 = vld [vmem:[%s38113_s1 + $0x1c68] ss:$100 sps:$4 sm:$0xff]   ;;  %v26546_v16 = vld [vmem:[%s38113_s1 + $0x1d34] ss:$100 sps:$4 sm:$0xff]  }
 0x373   :  { %v9919_v37 = vmax.f32 %v24878_v39, 0.0  ;;  %v26549_v20 = vld [vmem:[%s38113_s1 + $0x74c] ss:$100 sps:$4 sm:$0xff]   ;;  %v26552_v30 = vld [vmem:[%s38113_s1 + $0x1dfc] ss:$100 sps:$4 sm:$0xff]  }
 0x374   :  { %9041 = vmatpush1.bf16.msra.mxu0 %v26511_v49  ;;  %v9920_v46 = vmax.f32 %v24879_v53, 0.0  ;;  %v26553_v49 = vld [vmem:[%s38113_s1 + $0x810] ss:$100 sps:$4 sm:$0xff]   ;;  %v26558_v42 = vld [vmem:[%s38113_s1 + $0x1ec4] ss:$100 sps:$4 sm:$0xff]  }
 0x375   :  { %9280 = vmatpush1.bf16.msra.mxu1 %v26508_v23  ;;  %9042 = vmatprep.subr.bf16.mxu0 %v26519_v29  ;;  %v32159_v51 = vpack.c.bf16 %v9919_v37, %v9894_v54  ;;  %v26550_v23 = vld [vmem:[%s38113_s1 + $0x1df8] ss:$100 sps:$4 sm:$0xff]   ;;  %v26564_v54 = vld [vmem:[%s38113_s1 + $0x1f8c] ss:$100 sps:$4 sm:$0xff]   ;;  %v26567_v39 = vld [vmem:[%s38113_s1 + $0x9a4] ss:$100 sps:$4 sm:$0xff]  }
 0x376   :  { %9292 = vmatprep.subr.bf16.mxu1 %v26516_v28  ;;  %v32161_v57 = vpack.c.bf16 %v9920_v46, %v9895_v36  ;;  %v26561_v26 = vld [vmem:[%s38113_s1 + $0x8dc] ss:$100 sps:$4 sm:$0xff]   ;;  %v26562_v35 = vld [vmem:[%s38113_s1 + $0x1f88] ss:$100 sps:$4 sm:$0xff]   ;;  %v26570_v53 = vld [vmem:[%s38113_s1 + $0x2054] ss:$100 sps:$4 sm:$0xff]  }
 0x377   :  { %v26556_v28 = vld [vmem:[%s38113_s1 + $0x1ec0] ss:$100 sps:$4 sm:$0xff]   ;;  %v26559_v29 = vld [vmem:[%s38113_s1 + $0x8d8] ss:$100 sps:$4 sm:$0xff]   ;;  %v26573_v37 = vld [vmem:[%s38113_s1 + $0xa6c] ss:$100 sps:$4 sm:$0xff]  }
 0x378   :  { %9282 = vmatmul.mubr.bf16.vlgmr.msra.gmra.mrb[20].mxu1 %v31504_v10  ;;  %9043 = vmatpush1.bf16.msra.mxu0 %v26517_v63  ;;  %v26531_v10 = vld [vmem:[%s38113_s1 + $0x4f4] ss:$100 sps:$4 sm:$0xff]   ;;  %v26565_v36 = vld [vmem:[%s38113_s1 + $0x9a0] ss:$100 sps:$4 sm:$0xff]   ;;  %v26571_v63 = vld [vmem:[%s38113_s1 + $0xa68] ss:$100 sps:$4 sm:$0xff]  }
 0x379   :  { %9293 = vmatpush1.bf16.msra.mxu1 %v26514_v38  ;;  %9044 = vmatprep.subr.bf16.mxu0 %v26525_v40  ;;  %v26568_v38 = vld [vmem:[%s38113_s1 + $0x2050] ss:$100 sps:$4 sm:$0xff]   ;;  %v26576_v46 = vld [vmem:[%s38113_s1 + $0x211c] ss:$100 sps:$4 sm:$0xff]  }
 0x37a   :  { %9294 = vmatprep.subr.bf16.mxu1 %v26522_v5  ;;  %9324 = vmatprep.mubr.bf16.mxu1 %v31522_v18  ;;  %v26537_v18 = vld [vmem:[%s38113_s1 + $0x5bc] ss:$100 sps:$4 sm:$0xff]   ;;  %v26579_v5 = vld [vmem:[%s38113_s1 + $0xb34] ss:$100 sps:$4 sm:$0xff]  }
 0x37b   :  { %v26574_v40 = vld [vmem:[%s38113_s1 + $0x2118] ss:$100 sps:$4 sm:$0xff]  }
 0x37c   :  { %9045 = vmatpush1.bf16.msra.mxu0 %v26523_v17  ;;  %v26582_v17 = vld [vmem:[%s38113_s1 + $0x21e4] ss:$100 sps:$4 sm:$0xff]  }
 0x37d   :  { %9295 = vmatpush1.bf16.msra.mxu1 %v26520_v58  ;;  %9046 = vmatprep.subr.bf16.mxu0 %v26531_v10  ;;  %v26577_v58 = vld [vmem:[%s38113_s1 + $0xb30] ss:$100 sps:$4 sm:$0xff]   ;;  %v26580_v10 = vld [vmem:[%s38113_s1 + $0x21e0] ss:$100 sps:$4 sm:$0xff]  }
 0x37e   :  { %9296 = vmatprep.subr.bf16.mxu1 %v26528_v61  ;;  %v26585_v61 = vld [vmem:[%s38113_s1 + $0xbfc] ss:$100 sps:$4 sm:$0xff]  }
 0x380   :  { %9047 = vmatpush1.bf16.msra.mxu0 %v26529_v25  ;;  %v26588_v25 = vld [vmem:[%s38113_s1 + $0x22ac] ss:$100 sps:$4 sm:$0xff]  }
 0x381   :  { %9297 = vmatpush1.bf16.msra.mxu1 %v26526_v0  ;;  %9048 = vmatprep.subr.bf16.mxu0 %v26537_v18  ;;  %v26583_v0 = vld [vmem:[%s38113_s1 + $0xbf8] ss:$100 sps:$4 sm:$0xff]   ;;  %v26586_v18 = vld [vmem:[%s38113_s1 + $0x22a8] ss:$100 sps:$4 sm:$0xff]  }
 0x382   :  { %9298 = vmatprep.subr.bf16.mxu1 %v26534_v4  ;;  %v26591_v4 = vld [vmem:[%s38113_s1 + $0xcc4] ss:$100 sps:$4 sm:$0xff]  }
 0x384   :  { %9049 = vmatpush1.bf16.msra.mxu0 %v26535_v7  ;;  %v26594_v7 = vld [vmem:[%s38113_s1 + $0x2374] ss:$100 sps:$4 sm:$0xff]  }
 0x385   :  { %9299 = vmatpush1.bf16.msra.mxu1 %v26532_v6  ;;  %9050 = vmatprep.subr.bf16.mxu0 %v26543_v11  ;;  %v26589_v6 = vld [vmem:[%s38113_s1 + $0xcc0] ss:$100 sps:$4 sm:$0xff]   ;;  %v26592_v11 = vld [vmem:[%s38113_s1 + $0x2370] ss:$100 sps:$4 sm:$0xff]  }
 0x386   :  { %9300 = vmatprep.subr.bf16.mxu1 %v26540_v14  ;;  %v26597_v14 = vld [vmem:[%s38113_s1 + $0xd8c] ss:$100 sps:$4 sm:$0xff]  }
 0x388   :  { %9051 = vmatpush1.bf16.msra.mxu0 %v26541_v12  ;;  %v26600_v12 = vld [vmem:[%s38113_s1 + $0x243c] ss:$100 sps:$4 sm:$0xff]  }
 0x389   :  { %9301 = vmatpush1.bf16.msra.mxu1 %v26538_v15  ;;  %9052 = vmatprep.subr.bf16.mxu0 %v26549_v20  ;;  %v26595_v15 = vld [vmem:[%s38113_s1 + $0xd88] ss:$100 sps:$4 sm:$0xff]   ;;  %v26598_v20 = vld [vmem:[%s38113_s1 + $0x2438] ss:$100 sps:$4 sm:$0xff]  }
 0x38a   :  { %9302 = vmatprep.subr.bf16.mxu1 %v26546_v16  ;;  %v26603_v16 = vld [vmem:[%s38113_s1 + $0xe54] ss:$100 sps:$4 sm:$0xff]  }
 0x38c   :  { %9053 = vmatpush1.bf16.msra.mxu0 %v26547_v44  ;;  %v26606_v44 = vld [vmem:[%s38113_s1 + $0x2504] ss:$100 sps:$4 sm:$0xff]  }
 0x38d   :  { %9303 = vmatpush1.bf16.msra.mxu1 %v26544_v22  ;;  %9054 = vmatprep.subr.bf16.mxu0 %v26555_v41  ;;  %v26601_v22 = vld [vmem:[%s38113_s1 + $0xe50] ss:$100 sps:$4 sm:$0xff]   ;;  %v26604_v41 = vld [vmem:[%s38113_s1 + $0x2500] ss:$100 sps:$4 sm:$0xff]  }
 0x38e   :  { %9304 = vmatprep.subr.bf16.mxu1 %v26552_v30  ;;  %v26609_v30 = vld [vmem:[%s38113_s1 + $0xf1c] ss:$100 sps:$4 sm:$0xff]  }
 0x390   :  { %9055 = vmatpush1.bf16.msra.mxu0 %v26553_v49  ;;  %v26612_v49 = vld [vmem:[%s38113_s1 + $0x25cc] ss:$100 sps:$4 sm:$0xff]  }
 0x391   :  { %9305 = vmatpush1.bf16.msra.mxu1 %v26550_v23  ;;  %9056 = vmatprep.subr.bf16.mxu0 %v26561_v26  ;;  %v26607_v23 = vld [vmem:[%s38113_s1 + $0xf18] ss:$100 sps:$4 sm:$0xff]   ;;  %v26610_v26 = vld [vmem:[%s38113_s1 + $0x25c8] ss:$100 sps:$4 sm:$0xff]  }
 0x392   :  { %9306 = vmatprep.subr.bf16.mxu1 %v26558_v42  ;;  %v26615_v42 = vld [vmem:[%s38113_s1 + $0xfe4] ss:$100 sps:$4 sm:$0xff]  }
 0x394   :  { %9057 = vmatpush1.bf16.msra.mxu0 %v26559_v29  ;;  %v26618_v29 = vld [vmem:[%s38113_s1 + $0x10ac] ss:$100 sps:$4 sm:$0xff]  }
 0x395   :  { %9307 = vmatpush1.bf16.msra.mxu1 %v26556_v28  ;;  %9058 = vmatprep.subr.bf16.mxu0 %v26567_v39  ;;  %v26613_v28 = vld [vmem:[%s38113_s1 + $0xfe0] ss:$100 sps:$4 sm:$0xff]   ;;  %v26616_v39 = vld [vmem:[%s38113_s1 + $0x10a8] ss:$100 sps:$4 sm:$0xff]  }
 0x396   :  { %9308 = vmatprep.subr.bf16.mxu1 %v26564_v54  ;;  %v26624_v54 = vld [vmem:[%s38113_s1 + $0x5c] ss:$100 sps:$4 sm:$0xff]  }
 0x398   :  { %9059 = vmatpush1.bf16.msra.mxu0 %v26565_v36  ;;  %v26619_v36 = vld [vmem:[%s38113_s1 + $0x1170] ss:$100 sps:$4 sm:$0xff]  }
 0x399   :  { %9309 = vmatpush1.bf16.msra.mxu1 %v26562_v35  ;;  %9060 = vmatprep.subr.bf16.mxu0 %v26573_v37  ;;  %v26621_v35 = vld [vmem:[%s38113_s1 + $0x1174] ss:$100 sps:$4 sm:$0xff]  }
 0x39a   :  { %9310 = vmatprep.subr.bf16.mxu1 %v26570_v53  ;;  %v26622_v53 = vld [vmem:[%s38113_s1 + $0x58] ss:$100 sps:$4 sm:$0xff]  }
 0x39b   :  { %v26625_v37 = vld [vmem:[%s38113_s1 + $0x1238] ss:$100 sps:$4 sm:$0xff]  }
 0x39c   :  { %9061 = vmatpush1.bf16.msra.mxu0 %v26571_v63  ;;  %v26633_v63 = vld [vmem:[%s38113_s1 + $0x1304] ss:$100 sps:$4 sm:$0xff]  }
 0x39d   :  { %9311 = vmatpush1.bf16.msra.mxu1 %v26568_v38  ;;  %9062 = vmatprep.subr.bf16.mxu0 %v26579_v5  ;;  %v26630_v38 = vld [vmem:[%s38113_s1 + $0x124] ss:$100 sps:$4 sm:$0xff]  }
 0x39e   :  { %9312 = vmatprep.subr.bf16.mxu1 %v26576_v46  ;;  %v26628_v46 = vld [vmem:[%s38113_s1 + $0x120] ss:$100 sps:$4 sm:$0xff]  }
 0x39f   :  { %v26631_v5 = vld [vmem:[%s38113_s1 + $0x1300] ss:$100 sps:$4 sm:$0xff]  }
 0x3a0   :  { %9063 = vmatpush1.bf16.msra.mxu0 %v26577_v58  ;;  %v1379_v58 = vrot.slane %v31754_v2, %v31072_v45 }
 0x3a1   :  { %9313 = vmatpush1.bf16.msra.mxu1 %v26574_v40  ;;  %9064 = vmatprep.subr.bf16.mxu0 %v26585_v61  ;;  %v26636_v40 = vld [vmem:[%s38113_s1 + $0x1ec] ss:$100 sps:$4 sm:$0xff]   ;;  %v1383_v61 = vrot.slane %v31754_v2, %v31081_v48 }
 0x3a2   :  { %9314 = vmatprep.subr.bf16.mxu1 %v26582_v17  ;;  %v26634_v17 = vld [vmem:[%s38113_s1 + $0x1e8] ss:$100 sps:$4 sm:$0xff]  }
 0x3a4   :  { %9065 = vmatpush1.bf16.msra.mxu0 %v26583_v0  ;;  %v26645_v0 = vld [vmem:[%s38113_s1 + $0x1494] ss:$100 sps:$4 sm:$0xff]  }
 0x3a5   :  { %9315 = vmatpush1.bf16.msra.mxu1 %v26580_v10  ;;  %9077 = vmatprep.subr.bf16.mxu0 %v26591_v4  ;;  %v26637_v10 = vld [vmem:[%s38113_s1 + $0x13c8] ss:$100 sps:$4 sm:$0xff]  }
 0x3a6   :  { %9316 = vmatprep.subr.bf16.mxu1 %v26588_v25 }
 0x3a7   :  { %9067 = vmatmul.mubr.bf16.vlgmr.msra.gmra.mrb[20].mxu0 %v31961_v55 }
 0x3a8   :  { %9078 = vmatpush1.bf16.msra.mxu0 %v26589_v6  ;;  %9109 = vmatprep.mubr.bf16.mxu0 %v31979_v60 }
 0x3a9   :  { %9317 = vmatpush1.bf16.msra.mxu1 %v26586_v18  ;;  %9079 = vmatprep.subr.bf16.mxu0 %v26597_v14  ;;  %v26643_v14 = vld [vmem:[%s38113_s1 + $0x1490] ss:$100 sps:$4 sm:$0xff]  }
 0x3aa   :  { %9318 = vmatprep.subr.bf16.mxu1 %v26594_v7  ;;  %v26640_v7 = vld [vmem:[%s38113_s1 + $0x2b0] ss:$100 sps:$4 sm:$0xff]  }
 0x3ac   :  { %9080 = vmatpush1.bf16.msra.mxu0 %v26595_v15 }
 0x3ad   :  { %9319 = vmatpush1.bf16.msra.mxu1 %v26592_v11  ;;  %9081 = vmatprep.subr.bf16.mxu0 %v26603_v16  ;;  %v26651_v16 = vld [vmem:[%s38113_s1 + $0x155c] ss:$100 sps:$4 sm:$0xff]  }
 0x3ae   :  { %9320 = vmatprep.subr.bf16.mxu1 %v26600_v12  ;;  %v26648_v12 = vld [vmem:[%s38113_s1 + $0x37c] ss:$100 sps:$4 sm:$0xff]  }
 0x3b0   :  { %9082 = vmatpush1.bf16.msra.mxu0 %v26601_v22 }
 0x3b1   :  { %9321 = vmatpush1.bf16.msra.mxu1 %v26598_v20  ;;  %9083 = vmatprep.subr.bf16.mxu0 %v26609_v30 }
 0x3b2   :  { %9322 = vmatprep.subr.bf16.mxu1 %v26606_v44 }
 0x3b4   :  { %9084 = vmatpush1.bf16.msra.mxu0 %v26607_v23  ;;  %v26646_v23 = vld [vmem:[%s38113_s1 + $0x378] ss:$100 sps:$4 sm:$0xff]  }
 0x3b5   :  { %9323 = vmatpush1.bf16.msra.mxu1 %v26604_v41  ;;  %9085 = vmatprep.subr.bf16.mxu0 %v26615_v42 }
 0x3b6   :  { %9335 = vmatprep.subr.bf16.mxu1 %v26612_v49  ;;  %v26649_v49 = vld [vmem:[%s38113_s1 + $0x1558] ss:$100 sps:$4 sm:$0xff]  }
 0x3b8   :  { %9325 = vmatmul.mubr.bf16.vlgmr.msra.gmra.mrb[20].mxu1 %v31710_v56  ;;  %9086 = vmatpush1.bf16.msra.mxu0 %v26613_v28  ;;  %v26627_v56 = vld [vmem:[%s38113_s1 + $0x123c] ss:$100 sps:$4 sm:$0xff]   ;;  %v26657_v28 = vld [vmem:[%s38113_s1 + $0x1624] ss:$100 sps:$4 sm:$0xff]  }
 0x3b9   :  { %9336 = vmatpush1.bf16.msra.mxu1 %v26610_v26  ;;  %9087 = vmatprep.subr.bf16.mxu0 %v26618_v29  ;;  %v26654_v26 = vld [vmem:[%s38113_s1 + $0x444] ss:$100 sps:$4 sm:$0xff]  }
 0x3ba   :  { %9367 = vmatprep.mubr.bf16.mxu1 %v29192_v1  ;;  %9550 = vmatprep.subr.bf16.mxu1 %v26624_v54  ;;  %v26652_v54 = vld [vmem:[%s38113_s1 + $0x440] ss:$100 sps:$4 sm:$0xff]  }
 0x3bc   :  { %9088 = vmatpush1.bf16.msra.mxu0 %v26616_v39  ;;  %v26655_v39 = vld [vmem:[%s38113_s1 + $0x1620] ss:$100 sps:$4 sm:$0xff]  }
 0x3bd   :  { %9089 = vmatprep.subr.bf16.mxu0 %v26621_v35  ;;  %v26660_v35 = vld [vmem:[%s38113_s1 + $0x50c] ss:$100 sps:$4 sm:$0xff]  }
 0x3c0   :  { %9090 = vmatpush1.bf16.msra.mxu0 %v26619_v36  ;;  %v26663_v36 = vld [vmem:[%s38113_s1 + $0x16ec] ss:$100 sps:$4 sm:$0xff]  }
 0x3c1   :  { %9091 = vmatprep.subr.bf16.mxu0 %v26627_v56  ;;  %v26658_v56 = vld [vmem:[%s38113_s1 + $0x508] ss:$100 sps:$4 sm:$0xff]  }
 0x3c4   :  { %22986 = vmatmul.mubr.msk.bf16.vlgmr.msra.gmra.mrb[20].mxu1 %vm7654_vm0, %v31741_v52  ;;  %9092 = vmatpush1.bf16.msra.mxu0 %v26625_v37  ;;  %v26639_v52 = vld [vmem:[%s38113_s1 + $0x13cc] ss:$100 sps:$4 sm:$0xff]   ;;  %v26666_v37 = vld [vmem:[%s38113_s1 + $0x5d4] ss:$100 sps:$4 sm:$0xff]  }
 0x3c5   :  { %9551 = vmatpush1.bf16.msra.mxu1 %v26622_v53  ;;  %9093 = vmatprep.subr.bf16.mxu0 %v26633_v63  ;;  %v26661_v53 = vld [vmem:[%s38113_s1 + $0x16e8] ss:$100 sps:$4 sm:$0xff]   ;;  %v26664_v63 = vld [vmem:[%s38113_s1 + $0x5d0] ss:$100 sps:$4 sm:$0xff]  }
 0x3c6   :  { %9552 = vmatprep.subr.bf16.mxu1 %v26630_v38  ;;  %9582 = vmatprep.mubr.bf16.mxu1 %v31765_v59  ;;  %v26642_v59 = vld [vmem:[%s38113_s1 + $0x2b4] ss:$100 sps:$4 sm:$0xff]  }
 0x3c7   :  { %v26669_v38 = vld [vmem:[%s38113_s1 + $0x17b4] ss:$100 sps:$4 sm:$0xff]  }
 0x3c8   :  { %9094 = vmatpush1.bf16.msra.mxu0 %v26631_v5  ;;  %v26672_v5 = vld [vmem:[%s38113_s1 + $0x69c] ss:$100 sps:$4 sm:$0xff]  }
 0x3c9   :  { %9553 = vmatpush1.bf16.msra.mxu1 %v26628_v46  ;;  %9095 = vmatprep.subr.bf16.mxu0 %v26639_v52  ;;  %v26667_v46 = vld [vmem:[%s38113_s1 + $0x17b0] ss:$100 sps:$4 sm:$0xff]   ;;  %v26670_v52 = vld [vmem:[%s38113_s1 + $0x698] ss:$100 sps:$4 sm:$0xff]  }
 0x3ca   :  { %9554 = vmatprep.subr.bf16.mxu1 %v26636_v40  ;;  %v26675_v40 = vld [vmem:[%s38113_s1 + $0x187c] ss:$100 sps:$4 sm:$0xff]  }
 0x3cb   :  { %v9025_v25 = vpop.f32.mrb[16].mxu1 }
 0x3cc   :  { %v24888_v4 = vadd.f32 %v9025_v25, %v1379_v58  ;;  %v9027_v18 = vpop.f32.mrb[17].mxu1  ;;  %9096 = vmatpush1.bf16.msra.mxu0 %v26637_v10  ;;  %v26676_v10 = vld [vmem:[%s38113_s1 + $0x760] ss:$100 sps:$4 sm:$0xff]   ;;  %v26687_v25 = vld [vmem:[%s38113_s1 + $0x1a0c] ss:$100 sps:$4 sm:$0xff]  }
 0x3cd   :  { %9555 = vmatpush1.bf16.msra.mxu1 %v26634_v17  ;;  %v24889_v6 = vadd.f32 %v9027_v18, %v1383_v61  ;;  %v9029_v2 = vpop.f32.mrb[18].mxu1  ;;  %9097 = vmatprep.subr.bf16.mxu0 %v26645_v0  ;;  %v26678_v17 = vld [vmem:[%s38113_s1 + $0x764] ss:$100 sps:$4 sm:$0xff]   ;;  %v26684_v0 = vld [vmem:[%s38113_s1 + $0x82c] ss:$100 sps:$4 sm:$0xff]  }
 0x3ce   :  { %v24890_v11 = vadd.f32 %v9029_v2, %v1379_v58  ;;  %v9031_v15 = vpop.f32.mrb[19].mxu1  ;;  %9556 = vmatprep.subr.bf16.mxu1 %v26642_v59  ;;  %v9900_v22 = vmax.f32 %v24888_v4, 0.0  ;;  %v26673_v58 = vld [vmem:[%s38113_s1 + $0x1878] ss:$100 sps:$4 sm:$0xff]   ;;  %v26679_v59 = vld [vmem:[%s38113_s1 + $0x1940] ss:$100 sps:$4 sm:$0xff]  }
 0x3cf   :  { %v24891_v20 = vadd.f32 %v9031_v15, %v1383_v61  ;;  %v9901_v30 = vmax.f32 %v24889_v6, 0.0  ;;  %v26681_v61 = vld [vmem:[%s38113_s1 + $0x1944] ss:$100 sps:$4 sm:$0xff]   ;;  %v26690_v2 = vld [vmem:[%s38113_s1 + $0x8f4] ss:$100 sps:$4 sm:$0xff]  }
 0x3d0   :  { %v9925_v44 = vmax.f32 %v24890_v11, 0.0  ;;  %9098 = vmatpush1.bf16.msra.mxu0 %v26643_v14  ;;  %v32507_v4 = vld [vmem:[%s38114_s0 + $0x8] ss:$28 sps:$4 sm:$0xff]   ;;  %v32525_v14 = vld [vmem:[%s38114_s0 + $0x14] ss:$28 sps:$4 sm:$0xff]  }
 0x3d1   :  { %v9926_v41 = vmax.f32 %v24891_v20, 0.0  ;;  %9557 = vmatpush1.bf16.msra.mxu1 %v26640_v7  ;;  %9099 = vmatprep.subr.bf16.mxu0 %v26651_v16  ;;  %v26682_v18 = vld [vmem:[%s38113_s1 + $0x828] ss:$100 sps:$4 sm:$0xff]   ;;  %v26693_v7 = vld [vmem:[%s38113_s1 + $0x1ad4] ss:$100 sps:$4 sm:$0xff]  }
 0x3d2   :  { %v32434_v42 = vpack.c.bf16 %v9925_v44, %v9900_v22  ;;  %9558 = vmatprep.subr.bf16.mxu1 %v26648_v12  ;;  %v26685_v6 = vld [vmem:[%s38113_s1 + $0x1a08] ss:$100 sps:$4 sm:$0xff]   ;;  %v26688_v11 = vld [vmem:[%s38113_s1 + $0x8f0] ss:$100 sps:$4 sm:$0xff]   ;;  %v26696_v12 = vld [vmem:[%s38113_s1 + $0x9bc] ss:$100 sps:$4 sm:$0xff]  }
 0x3d3   :  { %v32442_v29 = vpack.c.bf16 %v9926_v41, %v9901_v30  ;;  %v26691_v15 = vld [vmem:[%s38113_s1 + $0x1ad0] ss:$100 sps:$4 sm:$0xff]   ;;  %v26699_v16 = vld [vmem:[%s38113_s1 + $0x1b9c] ss:$100 sps:$4 sm:$0xff]   ;;  %v26702_v44 = vld [vmem:[%s38113_s1 + $0xa84] ss:$100 sps:$4 sm:$0xff]  }
 0x3d4   :  { %9100 = vmatpush1.bf16.msra.mxu0 %v26649_v49  ;;  %v26694_v20 = vld [vmem:[%s38113_s1 + $0x9b8] ss:$100 sps:$4 sm:$0xff]   ;;  %v26705_v30 = vld [vmem:[%s38113_s1 + $0x1c64] ss:$100 sps:$4 sm:$0xff]   ;;  %v26708_v49 = vld [vmem:[%s38113_s1 + $0xb4c] ss:$100 sps:$4 sm:$0xff]  }
 0x3d5   :  { %9559 = vmatpush1.bf16.msra.mxu1 %v26646_v23  ;;  %9101 = vmatprep.subr.bf16.mxu0 %v26657_v28  ;;  %v26697_v22 = vld [vmem:[%s38113_s1 + $0x1b98] ss:$100 sps:$4 sm:$0xff]   ;;  %v26700_v41 = vld [vmem:[%s38113_s1 + $0xa80] ss:$100 sps:$4 sm:$0xff]   ;;  %v26706_v28 = vld [vmem:[%s38113_s1 + $0xb48] ss:$100 sps:$4 sm:$0xff]  }
 0x3d6   :  { %9560 = vmatprep.subr.bf16.mxu1 %v26654_v26  ;;  %v26703_v23 = vld [vmem:[%s38113_s1 + $0x1c60] ss:$100 sps:$4 sm:$0xff]   ;;  %v26711_v26 = vld [vmem:[%s38113_s1 + $0x1d2c] ss:$100 sps:$4 sm:$0xff]  }
 0x3d8   :  { %9102 = vmatpush1.bf16.msra.mxu0 %v26655_v39  ;;  %v26714_v39 = vld [vmem:[%s38113_s1 + $0xc14] ss:$100 sps:$4 sm:$0xff]  }
 0x3d9   :  { %9561 = vmatpush1.bf16.msra.mxu1 %v26652_v54  ;;  %9103 = vmatprep.subr.bf16.mxu0 %v26663_v36  ;;  %v26709_v54 = vld [vmem:[%s38113_s1 + $0x1d28] ss:$100 sps:$4 sm:$0xff]   ;;  %v26712_v36 = vld [vmem:[%s38113_s1 + $0xc10] ss:$100 sps:$4 sm:$0xff]  }
 0x3da   :  { %9562 = vmatprep.subr.bf16.mxu1 %v26660_v35  ;;  %v26717_v35 = vld [vmem:[%s38113_s1 + $0x1df4] ss:$100 sps:$4 sm:$0xff]  }
 0x3dc   :  { %9104 = vmatpush1.bf16.msra.mxu0 %v26661_v53  ;;  %v26720_v53 = vld [vmem:[%s38113_s1 + $0xcdc] ss:$100 sps:$4 sm:$0xff]  }
 0x3dd   :  { %9563 = vmatpush1.bf16.msra.mxu1 %v26658_v56  ;;  %9105 = vmatprep.subr.bf16.mxu0 %v26669_v38  ;;  %v26715_v56 = vld [vmem:[%s38113_s1 + $0x1df0] ss:$100 sps:$4 sm:$0xff]   ;;  %v26718_v38 = vld [vmem:[%s38113_s1 + $0xcd8] ss:$100 sps:$4 sm:$0xff]  }
 0x3de   :  { %9564 = vmatprep.subr.bf16.mxu1 %v26666_v37  ;;  %v26723_v37 = vld [vmem:[%s38113_s1 + $0x1ebc] ss:$100 sps:$4 sm:$0xff]  }
 0x3e0   :  { %9106 = vmatpush1.bf16.msra.mxu0 %v26667_v46  ;;  %v26726_v46 = vld [vmem:[%s38113_s1 + $0xda4] ss:$100 sps:$4 sm:$0xff]  }
 0x3e1   :  { %9565 = vmatpush1.bf16.msra.mxu1 %v26664_v63  ;;  %9107 = vmatprep.subr.bf16.mxu0 %v26675_v40  ;;  %v26721_v63 = vld [vmem:[%s38113_s1 + $0x1eb8] ss:$100 sps:$4 sm:$0xff]   ;;  %v26724_v40 = vld [vmem:[%s38113_s1 + $0xda0] ss:$100 sps:$4 sm:$0xff]  }
 0x3e2   :  { %9566 = vmatprep.subr.bf16.mxu1 %v26672_v5  ;;  %v26729_v5 = vld [vmem:[%s38113_s1 + $0x1f84] ss:$100 sps:$4 sm:$0xff]  }
 0x3e4   :  { %9108 = vmatpush1.bf16.msra.mxu0 %v26673_v58  ;;  %v26732_v58 = vld [vmem:[%s38113_s1 + $0xe6c] ss:$100 sps:$4 sm:$0xff]  }
 0x3e5   :  { %9567 = vmatpush1.bf16.msra.mxu1 %v26670_v52  ;;  %9120 = vmatprep.subr.bf16.mxu0 %v26681_v61  ;;  %v26727_v52 = vld [vmem:[%s38113_s1 + $0x1f80] ss:$100 sps:$4 sm:$0xff]   ;;  %v26733_v61 = vld [vmem:[%s38113_s1 + $0x2048] ss:$100 sps:$4 sm:$0xff]  }
 0x3e6   :  { %9568 = vmatprep.subr.bf16.mxu1 %v26678_v17  ;;  %v26730_v17 = vld [vmem:[%s38113_s1 + $0xe68] ss:$100 sps:$4 sm:$0xff]  }
 0x3e7   :  { %9110 = vmatmul.mubr.bf16.vlgmr.msra.gmra.mrb[20].mxu0 %v32507_v4 }
 0x3e8   :  { %9121 = vmatpush1.bf16.msra.mxu0 %v26679_v59  ;;  %9152 = vmatprep.mubr.bf16.mxu0 %v32525_v14  ;;  %v26736_v59 = vld [vmem:[%s38113_s1 + $0xf30] ss:$100 sps:$4 sm:$0xff]  }
 0x3e9   :  { %9569 = vmatpush1.bf16.msra.mxu1 %v26676_v10  ;;  %9122 = vmatprep.subr.bf16.mxu0 %v26687_v25  ;;  %v26738_v10 = vld [vmem:[%s38113_s1 + $0xf34] ss:$100 sps:$4 sm:$0xff]   ;;  %v26744_v25 = vld [vmem:[%s38113_s1 + $0xffc] ss:$100 sps:$4 sm:$0xff]  }
 0x3ea   :  { %9570 = vmatprep.subr.bf16.mxu1 %v26684_v0  ;;  %v26739_v0 = vld [vmem:[%s38113_s1 + $0x2110] ss:$100 sps:$4 sm:$0xff]  }
 0x3ec   :  { %9123 = vmatpush1.bf16.msra.mxu0 %v26685_v6  ;;  %v26742_v6 = vld [vmem:[%s38113_s1 + $0xff8] ss:$100 sps:$4 sm:$0xff]  }
 0x3ed   :  { %9571 = vmatpush1.bf16.msra.mxu1 %v26682_v18  ;;  %9124 = vmatprep.subr.bf16.mxu0 %v26693_v7  ;;  %v26747_v18 = vld [vmem:[%s38113_s1 + $0x21dc] ss:$100 sps:$4 sm:$0xff]   ;;  %v26750_v7 = vld [vmem:[%s38113_s1 + $0x10c4] ss:$100 sps:$4 sm:$0xff]  }
 0x3ee   :  { %9572 = vmatprep.subr.bf16.mxu1 %v26690_v2  ;;  %v26745_v2 = vld [vmem:[%s38113_s1 + $0x21d8] ss:$100 sps:$4 sm:$0xff]  }
 0x3f0   :  { %9125 = vmatpush1.bf16.msra.mxu0 %v26691_v15  ;;  %v26748_v15 = vld [vmem:[%s38113_s1 + $0x10c0] ss:$100 sps:$4 sm:$0xff]  }
 0x3f1   :  { %9573 = vmatpush1.bf16.msra.mxu1 %v26688_v11  ;;  %9126 = vmatprep.subr.bf16.mxu0 %v26699_v16  ;;  %v26753_v11 = vld [vmem:[%s38113_s1 + $0x22a4] ss:$100 sps:$4 sm:$0xff]   ;;  %v26756_v16 = vld [vmem:[%s38113_s1 + $0x118c] ss:$100 sps:$4 sm:$0xff]  }
 0x3f2   :  { %9574 = vmatprep.subr.bf16.mxu1 %v26696_v12  ;;  %v26751_v12 = vld [vmem:[%s38113_s1 + $0x22a0] ss:$100 sps:$4 sm:$0xff]  }
 0x3f4   :  { %9127 = vmatpush1.bf16.msra.mxu0 %v26697_v22  ;;  %v26754_v22 = vld [vmem:[%s38113_s1 + $0x1188] ss:$100 sps:$4 sm:$0xff]  }
 0x3f5   :  { %9575 = vmatpush1.bf16.msra.mxu1 %v26694_v20  ;;  %9128 = vmatprep.subr.bf16.mxu0 %v26705_v30  ;;  %v26759_v20 = vld [vmem:[%s38113_s1 + $0x236c] ss:$100 sps:$4 sm:$0xff]   ;;  %v26762_v30 = vld [vmem:[%s38113_s1 + $0x1254] ss:$100 sps:$4 sm:$0xff]  }
 0x3f6   :  { %9576 = vmatprep.subr.bf16.mxu1 %v26702_v44  ;;  %v26757_v44 = vld [vmem:[%s38113_s1 + $0x2368] ss:$100 sps:$4 sm:$0xff]  }
 0x3f8   :  { %9129 = vmatpush1.bf16.msra.mxu0 %v26703_v23  ;;  %v26760_v23 = vld [vmem:[%s38113_s1 + $0x1250] ss:$100 sps:$4 sm:$0xff]  }
 0x3f9   :  { %9577 = vmatpush1.bf16.msra.mxu1 %v26700_v41  ;;  %9130 = vmatprep.subr.bf16.mxu0 %v26711_v26  ;;  %v26765_v41 = vld [vmem:[%s38113_s1 + $0x2434] ss:$100 sps:$4 sm:$0xff]   ;;  %v26768_v26 = vld [vmem:[%s38113_s1 + $0x131c] ss:$100 sps:$4 sm:$0xff]  }
 0x3fa   :  { %9578 = vmatprep.subr.bf16.mxu1 %v26708_v49  ;;  %v26763_v49 = vld [vmem:[%s38113_s1 + $0x2430] ss:$100 sps:$4 sm:$0xff]  }
 0x3fc   :  { %9131 = vmatpush1.bf16.msra.mxu0 %v26709_v54  ;;  %v26766_v54 = vld [vmem:[%s38113_s1 + $0x1318] ss:$100 sps:$4 sm:$0xff]  }
 0x3fd   :  { %9579 = vmatpush1.bf16.msra.mxu1 %v26706_v28  ;;  %9132 = vmatprep.subr.bf16.mxu0 %v26717_v35  ;;  %v26771_v28 = vld [vmem:[%s38113_s1 + $0x24fc] ss:$100 sps:$4 sm:$0xff]   ;;  %v26774_v35 = vld [vmem:[%s38113_s1 + $0x13e4] ss:$100 sps:$4 sm:$0xff]  }
 0x3fe   :  { %9580 = vmatprep.subr.bf16.mxu1 %v26714_v39  ;;  %v26769_v39 = vld [vmem:[%s38113_s1 + $0x24f8] ss:$100 sps:$4 sm:$0xff]  }
 0x400   :  { %9133 = vmatpush1.bf16.msra.mxu0 %v26715_v56  ;;  %v26772_v56 = vld [vmem:[%s38113_s1 + $0x13e0] ss:$100 sps:$4 sm:$0xff]  }
 0x401   :  { %9581 = vmatpush1.bf16.msra.mxu1 %v26712_v36  ;;  %9134 = vmatprep.subr.bf16.mxu0 %v26723_v37  ;;  %v26783_v36 = vld [vmem:[%s38113_s1 + $0x25c4] ss:$100 sps:$4 sm:$0xff]   ;;  %v26777_v37 = vld [vmem:[%s38113_s1 + $0x14ac] ss:$100 sps:$4 sm:$0xff]  }
 0x402   :  { %9593 = vmatprep.subr.bf16.mxu1 %v26720_v53  ;;  %v26781_v53 = vld [vmem:[%s38113_s1 + $0x25c0] ss:$100 sps:$4 sm:$0xff]  }
 0x404   :  { %9583 = vmatmul.mubr.bf16.vlgmr.msra.gmra.mrb[24].mxu1 %v31961_v55  ;;  %9135 = vmatpush1.bf16.msra.mxu0 %v26721_v63  ;;  %v26735_v55 = vld [vmem:[%s38113_s1 + $0x204c] ss:$100 sps:$4 sm:$0xff]  }
 0x405   :  { %9594 = vmatpush1.bf16.msra.mxu1 %v26718_v38  ;;  %9136 = vmatprep.subr.bf16.mxu0 %v26729_v5  ;;  %v26789_v38 = vld [vmem:[%s38113_s1 + $0x54] ss:$100 sps:$4 sm:$0xff]   ;;  %v32713_v63 = vld [vmem:[%s38114_s0 + $0x10] ss:$28 sps:$4 sm:$0xff]  }
 0x406   :  { %9595 = vmatprep.subr.bf16.mxu1 %v26726_v46  ;;  %9625 = vmatprep.mubr.bf16.mxu1 %v31979_v60  ;;  %v26741_v60 = vld [vmem:[%s38113_s1 + $0x2114] ss:$100 sps:$4 sm:$0xff]   ;;  %v26775_v46 = vld [vmem:[%s38113_s1 + $0x14a8] ss:$100 sps:$4 sm:$0xff]  }
 0x407   :  { %v26780_v5 = vld [vmem:[%s38113_s1 + $0x1574] ss:$100 sps:$4 sm:$0xff]  }
 0x408   :  { %9137 = vmatpush1.bf16.msra.mxu0 %v26727_v52  ;;  %v26786_v52 = vld [vmem:[%s38113_s1 + $0x163c] ss:$100 sps:$4 sm:$0xff]  }
 0x409   :  { %9596 = vmatpush1.bf16.msra.mxu1 %v26724_v40  ;;  %9138 = vmatprep.subr.bf16.mxu0 %v26735_v55  ;;  %v26778_v40 = vld [vmem:[%s38113_s1 + $0x1570] ss:$100 sps:$4 sm:$0xff]  }
 0x40a   :  { %9597 = vmatprep.subr.bf16.mxu1 %v26732_v58  ;;  %v26784_v58 = vld [vmem:[%s38113_s1 + $0x1638] ss:$100 sps:$4 sm:$0xff]   ;;  %v26787_v55 = vld [vmem:[%s38113_s1 + $0x50] ss:$100 sps:$4 sm:$0xff]  }
 0x40c   :  { %9139 = vmatpush1.bf16.msra.mxu0 %v26733_v61  ;;  %v26795_v61 = vld [vmem:[%s38113_s1 + $0x11c] ss:$100 sps:$4 sm:$0xff]  }
 0x40d   :  { %9598 = vmatpush1.bf16.msra.mxu1 %v26730_v17  ;;  %9140 = vmatprep.subr.bf16.mxu0 %v26741_v60  ;;  %v26792_v17 = vld [vmem:[%s38113_s1 + $0x1704] ss:$100 sps:$4 sm:$0xff]  }
 0x40e   :  { %9599 = vmatprep.subr.bf16.mxu1 %v26738_v10  ;;  %v32744_v10 = vld [vmem:[%s38114_s0 + $0x18] ss:$28 sps:$4 sm:$0xff]   ;;  %v26790_v60 = vld [vmem:[%s38113_s1 + $0x1700] ss:$100 sps:$4 sm:$0xff]  }
 0x410   :  { %9141 = vmatpush1.bf16.msra.mxu0 %v26739_v0  ;;  %v26798_v0 = vld [vmem:[%s38113_s1 + $0x17cc] ss:$100 sps:$4 sm:$0xff]  }
 0x411   :  { %9600 = vmatpush1.bf16.msra.mxu1 %v26736_v59  ;;  %9142 = vmatprep.subr.bf16.mxu0 %v26747_v18  ;;  %v26793_v59 = vld [vmem:[%s38113_s1 + $0x118] ss:$100 sps:$4 sm:$0xff]   ;;  %v29180_v18 = vld [vmem:[%s38114_s0 + $0x4] ss:$28 sps:$4 sm:$0xff]  }
 0x412   :  { %9601 = vmatprep.subr.bf16.mxu1 %v26744_v25  ;;  %v26801_v25 = vld [vmem:[%s38113_s1 + $0x1e4] ss:$100 sps:$4 sm:$0xff]  }
 0x414   :  { %9143 = vmatpush1.bf16.msra.mxu0 %v26745_v2 }
 0x415   :  { %9602 = vmatpush1.bf16.msra.mxu1 %v26742_v6  ;;  %9144 = vmatprep.subr.bf16.mxu0 %v26753_v11  ;;  %v29181_v6 = vld [vmem:[%s38115_s2 + $0x8] sm:$0xff]  ;;  %v26799_v11 = vld [vmem:[%s38113_s1 + $0x1e0] ss:$100 sps:$4 sm:$0xff]  }
 0x416   :  { %9603 = vmatprep.subr.bf16.mxu1 %v26750_v7  ;;  %v1371_v2 = vrot.slane %v29181_v6, %v31442_v31  ;;  %v26796_v7 = vld [vmem:[%s38113_s1 + $0x17c8] ss:$100 sps:$4 sm:$0xff]  }
 0x418   :  { %9145 = vmatpush1.bf16.msra.mxu0 %v26751_v12  ;;  %v26804_v12 = vld [vmem:[%s38113_s1 + $0x1894] ss:$100 sps:$4 sm:$0xff]  }
 0x419   :  { %9604 = vmatpush1.bf16.msra.mxu1 %v26748_v15  ;;  %9146 = vmatprep.subr.bf16.mxu0 %v26759_v20  ;;  %v1375_v15 = vrot.slane %v29181_v6, %v31451_v33  ;;  %v26834_v6 = vld [vmem:[%s38113_s1 + $0x1c7c] ss:$100 sps:$4 sm:$0xff]  }
 0x41a   :  { %9605 = vmatprep.subr.bf16.mxu1 %v26756_v16  ;;  %v26807_v16 = vld [vmem:[%s38113_s1 + $0x2ac] ss:$100 sps:$4 sm:$0xff]  }
 0x41c   :  { %9147 = vmatpush1.bf16.msra.mxu0 %v26757_v44 }
 0x41d   :  { %9606 = vmatpush1.bf16.msra.mxu1 %v26754_v22  ;;  %9148 = vmatprep.subr.bf16.mxu0 %v26765_v41  ;;  %v26805_v41 = vld [vmem:[%s38113_s1 + $0x2a8] ss:$100 sps:$4 sm:$0xff]  }
 0x41e   :  { %9607 = vmatprep.subr.bf16.mxu1 %v26762_v30  ;;  %v26802_v30 = vld [vmem:[%s38113_s1 + $0x1890] ss:$100 sps:$4 sm:$0xff]  }
 0x420   :  { %9149 = vmatpush1.bf16.msra.mxu0 %v26763_v49 }
 0x421   :  { %9608 = vmatpush1.bf16.msra.mxu1 %v26760_v23  ;;  %9150 = vmatprep.subr.bf16.mxu0 %v26771_v28  ;;  %v26813_v28 = vld [vmem:[%s38113_s1 + $0x374] ss:$100 sps:$4 sm:$0xff]  }
 0x422   :  { %9609 = vmatprep.subr.bf16.mxu1 %v26768_v26  ;;  %v26810_v26 = vld [vmem:[%s38113_s1 + $0x195c] ss:$100 sps:$4 sm:$0xff]  }
 0x424   :  { %9151 = vmatpush1.bf16.msra.mxu0 %v26769_v39 }
 0x425   :  { %9610 = vmatpush1.bf16.msra.mxu1 %v26766_v54  ;;  %9163 = vmatprep.subr.bf16.mxu0 %v26783_v36 }
 0x426   :  { %9611 = vmatprep.subr.bf16.mxu1 %v26774_v35 }
 0x427   :  { %9153 = vmatmul.mubr.bf16.vlgmr.msra.gmra.mrb[20].mxu0 %v32713_v63 }
 0x428   :  { %9164 = vmatpush1.bf16.msra.mxu0 %v26781_v53  ;;  %9195 = vmatprep.mubr.bf16.mxu0 %v29192_v1 }
 0x429   :  { %9612 = vmatpush1.bf16.msra.mxu1 %v26772_v56  ;;  %9378 = vmatprep.subr.bf16.mxu0 %v26789_v38  ;;  %v26811_v38 = vld [vmem:[%s38113_s1 + $0x370] ss:$100 sps:$4 sm:$0xff]  }
 0x42a   :  { %9613 = vmatprep.subr.bf16.mxu1 %v26777_v37  ;;  %v26808_v37 = vld [vmem:[%s38113_s1 + $0x1958] ss:$100 sps:$4 sm:$0xff]  }
 0x42d   :  { %9614 = vmatpush1.bf16.msra.mxu1 %v26775_v46 }
 0x42e   :  { %9615 = vmatprep.subr.bf16.mxu1 %v26780_v5  ;;  %v26816_v5 = vld [vmem:[%s38113_s1 + $0x1a24] ss:$100 sps:$4 sm:$0xff]  }
 0x431   :  { %9616 = vmatpush1.bf16.msra.mxu1 %v26778_v40  ;;  %v26819_v40 = vld [vmem:[%s38113_s1 + $0x43c] ss:$100 sps:$4 sm:$0xff]  }
 0x432   :  { %9617 = vmatprep.subr.bf16.mxu1 %v26786_v52 }
 0x433   :  { %22985 = vmatmul.mubr.msk.bf16.vlgmr.msra.gmra.mrb[20].mxu0 %vm7654_vm0, %v32744_v10 }
 0x434   :  { %9379 = vmatpush1.bf16.msra.mxu0 %v26787_v55  ;;  %9410 = vmatprep.mubr.bf16.mxu0 %v29180_v18  ;;  %v26814_v55 = vld [vmem:[%s38113_s1 + $0x1a20] ss:$100 sps:$4 sm:$0xff]   ;;  %v26829_v18 = vld [vmem:[%s38113_s1 + $0x5c8] ss:$100 sps:$4 sm:$0xff]  }
 0x435   :  { %9618 = vmatpush1.bf16.msra.mxu1 %v26784_v58  ;;  %9380 = vmatprep.subr.bf16.mxu0 %v26795_v61  ;;  %v26822_v61 = vld [vmem:[%s38113_s1 + $0x1aec] ss:$100 sps:$4 sm:$0xff]  }
 0x436   :  { %9619 = vmatprep.subr.bf16.mxu1 %v26792_v17  ;;  %v26817_v17 = vld [vmem:[%s38113_s1 + $0x438] ss:$100 sps:$4 sm:$0xff]  }
 0x438   :  { %9381 = vmatpush1.bf16.msra.mxu0 %v26793_v59  ;;  %v26823_v59 = vld [vmem:[%s38113_s1 + $0x500] ss:$100 sps:$4 sm:$0xff]  }
 0x439   :  { %9620 = vmatpush1.bf16.msra.mxu1 %v26790_v60  ;;  %9382 = vmatprep.subr.bf16.mxu0 %v26801_v25  ;;  %v26820_v60 = vld [vmem:[%s38113_s1 + $0x1ae8] ss:$100 sps:$4 sm:$0xff]   ;;  %v26826_v25 = vld [vmem:[%s38113_s1 + $0x1bb0] ss:$100 sps:$4 sm:$0xff]  }
 0x43a   :  { %9621 = vmatprep.subr.bf16.mxu1 %v26798_v0  ;;  %v8853_v20 = vpop.f32.mrb[16].mxu0  ;;  %v26828_v0 = vld [vmem:[%s38113_s1 + $0x1bb4] ss:$100 sps:$4 sm:$0xff]  }
 0x43b   :  { %v24884_v22 = vadd.f32 %v8853_v20, %v1371_v2  ;;  %v8855_v44 = vpop.f32.mrb[17].mxu0  ;;  %v26841_v20 = vld [vmem:[%s38113_s1 + $0x758] ss:$100 sps:$4 sm:$0xff]  }
 0x43c   :  { %9383 = vmatpush1.bf16.msra.mxu0 %v26799_v11  ;;  %v24885_v23 = vadd.f32 %v8855_v44, %v1375_v15  ;;  %v8857_v49 = vpop.f32.mrb[18].mxu0  ;;  %v26835_v11 = vld [vmem:[%s38113_s1 + $0x690] ss:$100 sps:$4 sm:$0xff]   ;;  %v26849_v44 = vld [vmem:[%s38113_s1 + $0x824] ss:$100 sps:$4 sm:$0xff]  }
 0x43d   :  { %9622 = vmatpush1.bf16.msra.mxu1 %v26796_v7  ;;  %9384 = vmatprep.subr.bf16.mxu0 %v26807_v16  ;;  %v9898_v54 = vmax.f32 %v24884_v22, 0.0  ;;  %v24886_v39 = vadd.f32 %v8857_v49, %v1371_v2  ;;  %v8859_v35 = vpop.f32.mrb[19].mxu0  ;;  %v26837_v2 = vld [vmem:[%s38113_s1 + $0x694] ss:$100 sps:$4 sm:$0xff]   ;;  %v26838_v16 = vld [vmem:[%s38113_s1 + $0x1d40] ss:$100 sps:$4 sm:$0xff]  }
 0x43e   :  { %9623 = vmatprep.subr.bf16.mxu1 %v26804_v12  ;;  %v9899_v36 = vmax.f32 %v24885_v23, 0.0  ;;  %v24887_v56 = vadd.f32 %v8859_v35, %v1375_v15  ;;  %v26832_v7 = vld [vmem:[%s38113_s1 + $0x1c78] ss:$100 sps:$4 sm:$0xff]   ;;  %v26840_v15 = vld [vmem:[%s38113_s1 + $0x1d44] ss:$100 sps:$4 sm:$0xff]  }
 0x43f   :  { %v9923_v53 = vmax.f32 %v24886_v39, 0.0  ;;  %v26843_v12 = vld [vmem:[%s38113_s1 + $0x75c] ss:$100 sps:$4 sm:$0xff]   ;;  %v26846_v22 = vld [vmem:[%s38113_s1 + $0x1e0c] ss:$100 sps:$4 sm:$0xff]  }
 0x440   :  { %9385 = vmatpush1.bf16.msra.mxu0 %v26805_v41  ;;  %v9924_v46 = vmax.f32 %v24887_v56, 0.0  ;;  %v26847_v41 = vld [vmem:[%s38113_s1 + $0x820] ss:$100 sps:$4 sm:$0xff]   ;;  %v26852_v23 = vld [vmem:[%s38113_s1 + $0x1ed4] ss:$100 sps:$4 sm:$0xff]  }
 0x441   :  { %9624 = vmatpush1.bf16.msra.mxu1 %v26802_v30  ;;  %9386 = vmatprep.subr.bf16.mxu0 %v26813_v28  ;;  %v32804_v52 = vpack.c.bf16 %v9923_v53, %v9898_v54  ;;  %v26844_v30 = vld [vmem:[%s38113_s1 + $0x1e08] ss:$100 sps:$4 sm:$0xff]   ;;  %v26858_v54 = vld [vmem:[%s38113_s1 + $0x1f9c] ss:$100 sps:$4 sm:$0xff]   ;;  %v26861_v39 = vld [vmem:[%s38113_s1 + $0x9b4] ss:$100 sps:$4 sm:$0xff]  }
 0x442   :  { %9636 = vmatprep.subr.bf16.mxu1 %v26810_v26  ;;  %v32806_v58 = vpack.c.bf16 %v9924_v46, %v9899_v36  ;;  %v26855_v49 = vld [vmem:[%s38113_s1 + $0x8ec] ss:$100 sps:$4 sm:$0xff]   ;;  %v26856_v35 = vld [vmem:[%s38113_s1 + $0x1f98] ss:$100 sps:$4 sm:$0xff]   ;;  %v26864_v56 = vld [vmem:[%s38113_s1 + $0x2064] ss:$100 sps:$4 sm:$0xff]  }
 0x443   :  { %v26850_v26 = vld [vmem:[%s38113_s1 + $0x1ed0] ss:$100 sps:$4 sm:$0xff]   ;;  %v26853_v28 = vld [vmem:[%s38113_s1 + $0x8e8] ss:$100 sps:$4 sm:$0xff]   ;;  %v26867_v53 = vld [vmem:[%s38113_s1 + $0xa7c] ss:$100 sps:$4 sm:$0xff]  }
 0x444   :  { %9626 = vmatmul.mubr.bf16.vlgmr.msra.gmra.mrb[24].mxu1 %v32507_v4  ;;  %9387 = vmatpush1.bf16.msra.mxu0 %v26811_v38  ;;  %v26825_v4 = vld [vmem:[%s38113_s1 + $0x504] ss:$100 sps:$4 sm:$0xff]   ;;  %v26859_v36 = vld [vmem:[%s38113_s1 + $0x9b0] ss:$100 sps:$4 sm:$0xff]   ;;  %v26865_v38 = vld [vmem:[%s38113_s1 + $0xa78] ss:$100 sps:$4 sm:$0xff]  }
 0x445   :  { %9637 = vmatpush1.bf16.msra.mxu1 %v26808_v37  ;;  %9388 = vmatprep.subr.bf16.mxu0 %v26819_v40  ;;  %v26862_v37 = vld [vmem:[%s38113_s1 + $0x2060] ss:$100 sps:$4 sm:$0xff]   ;;  %v26870_v46 = vld [vmem:[%s38113_s1 + $0x212c] ss:$100 sps:$4 sm:$0xff]  }
 0x446   :  { %9638 = vmatprep.subr.bf16.mxu1 %v26816_v5  ;;  %9668 = vmatprep.mubr.bf16.mxu1 %v32525_v14  ;;  %v26831_v14 = vld [vmem:[%s38113_s1 + $0x5cc] ss:$100 sps:$4 sm:$0xff]   ;;  %v26873_v5 = vld [vmem:[%s38113_s1 + $0xb44] ss:$100 sps:$4 sm:$0xff]  }
 0x447   :  { %v26868_v40 = vld [vmem:[%s38113_s1 + $0x2128] ss:$100 sps:$4 sm:$0xff]  }
 0x448   :  { %9389 = vmatpush1.bf16.msra.mxu0 %v26817_v17  ;;  %v26876_v17 = vld [vmem:[%s38113_s1 + $0x21f4] ss:$100 sps:$4 sm:$0xff]  }
 0x449   :  { %9639 = vmatpush1.bf16.msra.mxu1 %v26814_v55  ;;  %9390 = vmatprep.subr.bf16.mxu0 %v26825_v4  ;;  %v26871_v55 = vld [vmem:[%s38113_s1 + $0xb40] ss:$100 sps:$4 sm:$0xff]   ;;  %v26874_v4 = vld [vmem:[%s38113_s1 + $0x21f0] ss:$100 sps:$4 sm:$0xff]  }
 0x44a   :  { %9640 = vmatprep.subr.bf16.mxu1 %v26822_v61  ;;  %v26879_v61 = vld [vmem:[%s38113_s1 + $0xc0c] ss:$100 sps:$4 sm:$0xff]  }
 0x44c   :  { %9391 = vmatpush1.bf16.msra.mxu0 %v26823_v59  ;;  %v26882_v59 = vld [vmem:[%s38113_s1 + $0x22bc] ss:$100 sps:$4 sm:$0xff]  }
 0x44d   :  { %9641 = vmatpush1.bf16.msra.mxu1 %v26820_v60  ;;  %9392 = vmatprep.subr.bf16.mxu0 %v26831_v14  ;;  %v26877_v60 = vld [vmem:[%s38113_s1 + $0xc08] ss:$100 sps:$4 sm:$0xff]   ;;  %v26880_v14 = vld [vmem:[%s38113_s1 + $0x22b8] ss:$100 sps:$4 sm:$0xff]  }
 0x44e   :  { %9642 = vmatprep.subr.bf16.mxu1 %v26828_v0  ;;  %v26885_v0 = vld [vmem:[%s38113_s1 + $0xcd4] ss:$100 sps:$4 sm:$0xff]  }
 0x450   :  { %9393 = vmatpush1.bf16.msra.mxu0 %v26829_v18  ;;  %v26888_v18 = vld [vmem:[%s38113_s1 + $0x2384] ss:$100 sps:$4 sm:$0xff]  }
 0x451   :  { %9643 = vmatpush1.bf16.msra.mxu1 %v26826_v25  ;;  %9394 = vmatprep.subr.bf16.mxu0 %v26837_v2  ;;  %v26883_v25 = vld [vmem:[%s38113_s1 + $0xcd0] ss:$100 sps:$4 sm:$0xff]   ;;  %v26886_v2 = vld [vmem:[%s38113_s1 + $0x2380] ss:$100 sps:$4 sm:$0xff]  }
 0x452   :  { %9644 = vmatprep.subr.bf16.mxu1 %v26834_v6  ;;  %v26891_v6 = vld [vmem:[%s38113_s1 + $0xd9c] ss:$100 sps:$4 sm:$0xff]  }
 0x454   :  { %9395 = vmatpush1.bf16.msra.mxu0 %v26835_v11  ;;  %v29182_v11 = vld [vmem:[%s38114_s0] ss:$28 sps:$4 sm:$0xff]  }
 0x455   :  { %9645 = vmatpush1.bf16.msra.mxu1 %v26832_v7  ;;  %9396 = vmatprep.subr.bf16.mxu0 %v26843_v12  ;;  %v26889_v7 = vld [vmem:[%s38113_s1 + $0xd98] ss:$100 sps:$4 sm:$0xff]   ;;  %v26897_v12 = vld [vmem:[%s38113_s1 + $0xe64] ss:$100 sps:$4 sm:$0xff]  }
 0x456   :  { %9646 = vmatprep.subr.bf16.mxu1 %v26840_v15  ;;  %v26894_v15 = vld [vmem:[%s38113_s1 + $0x244c] ss:$100 sps:$4 sm:$0xff]  }
 0x458   :  { %9397 = vmatpush1.bf16.msra.mxu0 %v26841_v20  ;;  %v26895_v20 = vld [vmem:[%s38113_s1 + $0xe60] ss:$100 sps:$4 sm:$0xff]  }
 0x459   :  { %9647 = vmatpush1.bf16.msra.mxu1 %v26838_v16  ;;  %9398 = vmatprep.subr.bf16.mxu0 %v26849_v44  ;;  %v26892_v16 = vld [vmem:[%s38113_s1 + $0x2448] ss:$100 sps:$4 sm:$0xff]   ;;  %v26900_v44 = vld [vmem:[%s38113_s1 + $0x2514] ss:$100 sps:$4 sm:$0xff]  }
 0x45a   :  { %9648 = vmatprep.subr.bf16.mxu1 %v26846_v22  ;;  %v29183_v22 = vld [vmem:[%s38114_s0 + $0xc] ss:$28 sps:$4 sm:$0xff]  }
 0x45c   :  { %9399 = vmatpush1.bf16.msra.mxu0 %v26847_v41  ;;  %v26898_v41 = vld [vmem:[%s38113_s1 + $0x2510] ss:$100 sps:$4 sm:$0xff]  }
 0x45d   :  { %9649 = vmatpush1.bf16.msra.mxu1 %v26844_v30  ;;  %9400 = vmatprep.subr.bf16.mxu0 %v26855_v49  ;;  %v26903_v30 = vld [vmem:[%s38113_s1 + $0xf2c] ss:$100 sps:$4 sm:$0xff]   ;;  %v26906_v49 = vld [vmem:[%s38113_s1 + $0x25dc] ss:$100 sps:$4 sm:$0xff]  }
 0x45e   :  { %9650 = vmatprep.subr.bf16.mxu1 %v26852_v23  ;;  %v26901_v23 = vld [vmem:[%s38113_s1 + $0xf28] ss:$100 sps:$4 sm:$0xff]  }
 0x460   :  { %9401 = vmatpush1.bf16.msra.mxu0 %v26853_v28  ;;  %v26904_v28 = vld [vmem:[%s38113_s1 + $0x25d8] ss:$100 sps:$4 sm:$0xff]  }
 0x461   :  { %9651 = vmatpush1.bf16.msra.mxu1 %v26850_v26  ;;  %9402 = vmatprep.subr.bf16.mxu0 %v26861_v39  ;;  %v26909_v26 = vld [vmem:[%s38113_s1 + $0xff4] ss:$100 sps:$4 sm:$0xff]   ;;  %v26912_v39 = vld [vmem:[%s38113_s1 + $0x10bc] ss:$100 sps:$4 sm:$0xff]  }
 0x462   :  { %9652 = vmatprep.subr.bf16.mxu1 %v26858_v54  ;;  %v26907_v54 = vld [vmem:[%s38113_s1 + $0xff0] ss:$100 sps:$4 sm:$0xff]  }
 0x464   :  { %9403 = vmatpush1.bf16.msra.mxu0 %v26859_v36  ;;  %v26910_v36 = vld [vmem:[%s38113_s1 + $0x10b8] ss:$100 sps:$4 sm:$0xff]  }
 0x465   :  { %9653 = vmatpush1.bf16.msra.mxu1 %v26856_v35  ;;  %9404 = vmatprep.subr.bf16.mxu0 %v26867_v53  ;;  %v26916_v35 = vld [vmem:[%s38113_s1 + $0x1320] ss:$100 sps:$4 sm:$0xff]  }
 0x466   :  { %9654 = vmatprep.subr.bf16.mxu1 %v26864_v56  ;;  %v26915_v56 = vld [vmem:[%s38113_s1 + $0x1184] ss:$100 sps:$4 sm:$0xff]  }
 0x467   :  { %v26913_v53 = vld [vmem:[%s38113_s1 + $0x1180] ss:$100 sps:$4 sm:$0xff]  }
 0x468   :  { %9405 = vmatpush1.bf16.msra.mxu0 %v26865_v38  ;;  %v26918_v38 = vld [vmem:[%s38113_s1 + $0x1248] ss:$100 sps:$4 sm:$0xff]  }
 0x469   :  { %9655 = vmatpush1.bf16.msra.mxu1 %v26862_v37  ;;  %9406 = vmatprep.subr.bf16.mxu0 %v26873_v5  ;;  %v26917_v37 = vld [vmem:[%s38113_s1 + $0xce0] ss:$100 sps:$4 sm:$0xff]   ;;  %v26925_v5 = vld [vmem:[%s38113_s1 + $0x1314] ss:$100 sps:$4 sm:$0xff]  }
 0x46a   :  { %9656 = vmatprep.subr.bf16.mxu1 %v26870_v46  ;;  %v26921_v46 = vld [vmem:[%s38113_s1 + $0x13e8] ss:$100 sps:$4 sm:$0xff]  }
 0x46c   :  { %9407 = vmatpush1.bf16.msra.mxu0 %v26871_v55  ;;  %v26923_v55 = vld [vmem:[%s38113_s1 + $0x1310] ss:$100 sps:$4 sm:$0xff]  }
 0x46d   :  { %9657 = vmatpush1.bf16.msra.mxu1 %v26868_v40  ;;  %9408 = vmatprep.subr.bf16.mxu0 %v26879_v61  ;;  %v26922_v40 = vld [vmem:[%s38113_s1 + $0xda8] ss:$100 sps:$4 sm:$0xff]   ;;  %v26926_v61 = vld [vmem:[%s38113_s1 + $0x14b0] ss:$100 sps:$4 sm:$0xff]  }
 0x46e   :  { %9658 = vmatprep.subr.bf16.mxu1 %v26876_v17  ;;  %v33045_v17 = vld [vmem:[%s38115_s2 + $0x10] sm:$0xff] }
 0x470   :  { %9409 = vmatpush1.bf16.msra.mxu0 %v26877_v60  ;;  %v26927_v60 = vld [vmem:[%s38113_s1 + $0xe70] ss:$100 sps:$4 sm:$0xff]  }
 0x471   :  { %9659 = vmatpush1.bf16.msra.mxu1 %v26874_v4  ;;  %9421 = vmatprep.subr.bf16.mxu0 %v26885_v0  ;;  %v1395_v4 = vrot.slane %v33045_v17, %v30767_v32  ;;  %v26928_v0 = vld [vmem:[%s38113_s1 + $0x13d8] ss:$100 sps:$4 sm:$0xff]  }
 0x472   :  { %9660 = vmatprep.subr.bf16.mxu1 %v26882_v59  ;;  %v1399_v59 = vrot.slane %v33045_v17, %v30776_v47 }
 0x473   :  { %9411 = vmatmul.mubr.bf16.vlgmr.msra.gmra.mrb[24].mxu0 %v29182_v11 }
 0x474   :  { %9422 = vmatpush1.bf16.msra.mxu0 %v26883_v25  ;;  %9453 = vmatprep.mubr.bf16.mxu0 %v29183_v22  ;;  %v26935_v25 = vld [vmem:[%s38113_s1 + $0x14a4] ss:$100 sps:$4 sm:$0xff]  }
 0x475   :  { %9661 = vmatpush1.bf16.msra.mxu1 %v26880_v14  ;;  %9423 = vmatprep.subr.bf16.mxu0 %v26891_v6  ;;  %v26931_v14 = vld [vmem:[%s38113_s1 + $0x1578] ss:$100 sps:$4 sm:$0xff]  }
 0x476   :  { %9662 = vmatprep.subr.bf16.mxu1 %v26888_v18 }
 0x478   :  { %9424 = vmatpush1.bf16.msra.mxu0 %v26889_v7  ;;  %v26932_v7 = vld [vmem:[%s38113_s1 + $0xf38] ss:$100 sps:$4 sm:$0xff]  }
 0x479   :  { %9663 = vmatpush1.bf16.msra.mxu1 %v26886_v2  ;;  %9425 = vmatprep.subr.bf16.mxu0 %v26897_v12  ;;  %v26933_v12 = vld [vmem:[%s38113_s1 + $0x14a0] ss:$100 sps:$4 sm:$0xff]  }
 0x47a   :  { %9664 = vmatprep.subr.bf16.mxu1 %v26894_v15 }
 0x47c   :  { %9426 = vmatpush1.bf16.msra.mxu0 %v26895_v20 }
 0x47d   :  { %9665 = vmatpush1.bf16.msra.mxu1 %v26892_v16  ;;  %9427 = vmatprep.subr.bf16.mxu0 %v26903_v30 }
 0x47e   :  { %9666 = vmatprep.subr.bf16.mxu1 %v26900_v44  ;;  %v26940_v44 = vld [vmem:[%s38113_s1 + $0x156c] ss:$100 sps:$4 sm:$0xff]  }
 0x480   :  { %9428 = vmatpush1.bf16.msra.mxu0 %v26901_v23 }
 0x481   :  { %9667 = vmatpush1.bf16.msra.mxu1 %v26898_v41  ;;  %9429 = vmatprep.subr.bf16.mxu0 %v26909_v26 }
 0x482   :  { %9679 = vmatprep.subr.bf16.mxu1 %v26906_v49  ;;  %v26937_v49 = vld [vmem:[%s38113_s1 + $0x1000] ss:$100 sps:$4 sm:$0xff]  }
 0x484   :  { %9669 = vmatmul.mubr.bf16.vlgmr.msra.gmra.mrb[24].mxu1 %v32713_v63  ;;  %9430 = vmatpush1.bf16.msra.mxu0 %v26907_v54  ;;  %v26920_v63 = vld [vmem:[%s38113_s1 + $0x124c] ss:$100 sps:$4 sm:$0xff]  }
 0x485   :  { %9680 = vmatpush1.bf16.msra.mxu1 %v26904_v28  ;;  %9431 = vmatprep.subr.bf16.mxu0 %v26912_v39  ;;  %v26938_v54 = vld [vmem:[%s38113_s1 + $0x1568] ss:$100 sps:$4 sm:$0xff]  }
 0x486   :  { %9711 = vmatprep.mubr.bf16.mxu1 %v29192_v1  ;;  %24489 = vmatprep.subr.bf16.mxu1 %v26916_v35  ;;  %v26941_v35 = vld [vmem:[%s38113_s1 + $0x1708] ss:$100 sps:$4 sm:$0xff]  }
 0x488   :  { %9432 = vmatpush1.bf16.msra.mxu0 %v26910_v36  ;;  %v26945_v36 = vld [vmem:[%s38113_s1 + $0x1634] ss:$100 sps:$4 sm:$0xff]  }
 0x489   :  { %9433 = vmatprep.subr.bf16.mxu0 %v26915_v56 }
 0x48c   :  { %9434 = vmatpush1.bf16.msra.mxu0 %v26913_v53  ;;  %v26942_v53 = vld [vmem:[%s38113_s1 + $0x10c8] ss:$100 sps:$4 sm:$0xff]  }
 0x48d   :  { %9435 = vmatprep.subr.bf16.mxu0 %v26920_v63  ;;  %v26943_v63 = vld [vmem:[%s38113_s1 + $0x1630] ss:$100 sps:$4 sm:$0xff]  }
 0x490   :  { %22988 = vmatmul.mubr.msk.bf16.vlgmr.msra.gmra.mrb[24].mxu1 %vm7654_vm0, %v32744_v10  ;;  %9436 = vmatpush1.bf16.msra.mxu0 %v26918_v38  ;;  %v26930_v10 = vld [vmem:[%s38113_s1 + $0x13dc] ss:$100 sps:$4 sm:$0xff]  }
 0x491   :  { %24490 = vmatpush3.bf16.msra.mxu1 %v26917_v37  ;;  %9437 = vmatprep.subr.bf16.mxu0 %v26925_v5  ;;  %v26946_v37 = vld [vmem:[%s38113_s1 + $0x17d0] ss:$100 sps:$4 sm:$0xff]   ;;  %v26950_v38 = vld [vmem:[%s38113_s1 + $0x16fc] ss:$100 sps:$4 sm:$0xff]  }
 0x492   :  { %24491 = vmatprep.subr.bf16.mxu1 %v26921_v46  ;;  %9795 = vmatprep.mubr.bf16.mxu1 %v29183_v22  ;;  %v26936_v22 = vld [vmem:[%s38113_s1 + $0x1640] ss:$100 sps:$4 sm:$0xff]   ;;  %v26947_v46 = vld [vmem:[%s38113_s1 + $0x1190] ss:$100 sps:$4 sm:$0xff]   ;;  %v26948_v5 = vld [vmem:[%s38113_s1 + $0x16f8] ss:$100 sps:$4 sm:$0xff]  }
 0x494   :  { %9438 = vmatpush1.bf16.msra.mxu0 %v26923_v55  ;;  %v26955_v55 = vld [vmem:[%s38113_s1 + $0x17c4] ss:$100 sps:$4 sm:$0xff]  }
 0x495   :  { %24492 = vmatpush3.bf16.msra.mxu1 %v26922_v40  ;;  %9439 = vmatprep.subr.bf16.mxu0 %v26930_v10  ;;  %v26951_v40 = vld [vmem:[%s38113_s1 + $0x1898] ss:$100 sps:$4 sm:$0xff]   ;;  %v26953_v10 = vld [vmem:[%s38113_s1 + $0x17c0] ss:$100 sps:$4 sm:$0xff]  }
 0x496   :  { %24493 = vmatprep.subr.bf16.mxu1 %v26926_v61  ;;  %v26952_v61 = vld [vmem:[%s38113_s1 + $0x1258] ss:$100 sps:$4 sm:$0xff]  }
 0x497   :  { %v9369_v18 = vpop.f32.mrb[20].mxu1 }
 0x498   :  { %v24896_v6 = vadd.f32 %v9369_v18, %v1395_v4  ;;  %v9371_v2 = vpop.f32.mrb[21].mxu1  ;;  %9440 = vmatpush1.bf16.msra.mxu0 %v26928_v0  ;;  %v29193_v0 = vmov 0.0   ;;  %v29184_v18 = vld [vmem:[%s38114_s0 + $0x8] ss:$28 sps:$4 sm:$0xff]  }
 0x499   :  { %24494 = vmatpush3.bf16.msra.mxu1 %v26927_v60  ;;  %v24897_v11 = vadd.f32 %v9371_v2, %v1399_v59  ;;  %v9373_v15 = vpop.f32.mrb[22].mxu1  ;;  %9441 = vmatprep.subr.bf16.mxu0 %v26935_v25  ;;  %v26956_v60 = vld [vmem:[%s38113_s1 + $0x25e0] ss:$100 sps:$4 sm:$0xff]  }
 0x49a   :  { %v24898_v16 = vadd.f32 %v9373_v15, %v1395_v4  ;;  %v9375_v20 = vpop.f32.mrb[23].mxu1  ;;  %24495 = vmatprep.subr.bf16.mxu1 %v26931_v14  ;;  %v9904_v41 = vmax.f32 %v24896_v6, 0.0  ;;  %v26959_v4 = vld [vmem:[%s38113_s1 + $0x188c] ss:$100 sps:$4 sm:$0xff]   ;;  %v26962_v14 = vld [vmem:[%s38113_s1 + $0x1954] ss:$100 sps:$4 sm:$0xff]  }
 0x49b   :  { %v24899_v30 = vadd.f32 %v9375_v20, %v1399_v59  ;;  %v9905_v26 = vmax.f32 %v24897_v11, 0.0  ;;  %v26957_v59 = vld [vmem:[%s38113_s1 + $0x1888] ss:$100 sps:$4 sm:$0xff]   ;;  %v26965_v25 = vld [vmem:[%s38116_s3 + $0x4] ss:$28 sps:$4 sm:$0xff]  }
 0x49c   :  { %v9929_v23 = vmax.f32 %v24898_v16, 0.0  ;;  %9442 = vmatpush1.bf16.msra.mxu0 %v26933_v12  ;;  %v26960_v6 = vld [vmem:[%s38113_s1 + $0x1950] ss:$100 sps:$4 sm:$0xff]   ;;  %v26968_v2 = vld [vmem:[%s38113_s1 + $0x1a1c] ss:$100 sps:$4 sm:$0xff]  }
 0x49d   :  { %v9930_v28 = vmax.f32 %v24899_v30, 0.0  ;;  %24496 = vmatpush3.bf16.msra.mxu1 %v26932_v7  ;;  %9443 = vmatprep.subr.bf16.mxu0 %v26940_v44  ;;  %v26963_v7 = vld [vmem:[%s38116_s3] ss:$28 sps:$4 sm:$0xff]   ;;  %v33163_v15 = vld [vmem:[%s38114_s0 + $0x14] ss:$28 sps:$4 sm:$0xff]  }
 0x49e   :  { %v33087_v39 = vpack.c.bf16 %v9929_v23, %v9904_v41  ;;  %24497 = vmatprep.subr.bf16.mxu1 %v26936_v22  ;;  %v26966_v11 = vld [vmem:[%s38113_s1 + $0x1a18] ss:$100 sps:$4 sm:$0xff]   ;;  %v26974_v16 = vld [vmem:[%s38113_s1 + $0x1ae4] ss:$100 sps:$4 sm:$0xff]   ;;  %v26977_v30 = vld [vmem:[%s38116_s3 + $0x74] ss:$28 sps:$4 sm:$0xff]  }
 0x49f   :  { %v33095_v56 = vpack.c.bf16 %v9930_v28, %v9905_v26  ;;  %v26971_v12 = vld [vmem:[%s38116_s3 + $0x3c] ss:$28 sps:$4 sm:$0xff]   ;;  %v26972_v44 = vld [vmem:[%s38113_s1 + $0x1ae0] ss:$100 sps:$4 sm:$0xff]   ;;  %v26980_v41 = vld [vmem:[%s38113_s1 + $0x1bac] ss:$100 sps:$4 sm:$0xff]  }
 0x4a0   :  { %9444 = vmatpush1.bf16.msra.mxu0 %v26938_v54  ;;  %v33175_v20 = vld [vmem:[%s38114_s0 + $0x18] ss:$28 sps:$4 sm:$0xff]   ;;  %v26975_v23 = vld [vmem:[%s38116_s3 + $0x70] ss:$28 sps:$4 sm:$0xff]   ;;  %v26981_v54 = vld [vmem:[%s38116_s3 + $0xa8] ss:$28 sps:$4 sm:$0xff]  }
 0x4a1   :  { %24498 = vmatpush3.bf16.msra.mxu1 %v26937_v49  ;;  %9445 = vmatprep.subr.bf16.mxu0 %v26945_v36  ;;  %v26969_v22 = vld [vmem:[%s38116_s3 + $0x38] ss:$28 sps:$4 sm:$0xff]   ;;  %v26978_v49 = vld [vmem:[%s38113_s1 + $0x1ba8] ss:$100 sps:$4 sm:$0xff]   ;;  %v26989_v36 = vld [vmem:[%s38116_s3 + $0xe4] ss:$28 sps:$4 sm:$0xff]  }
 0x4a2   :  { %24499 = vmatprep.subr.bf16.mxu1 %v26941_v35  ;;  %v26983_v26 = vld [vmem:[%s38116_s3 + $0xac] ss:$28 sps:$4 sm:$0xff]   ;;  %v26986_v28 = vld [vmem:[%s38113_s1 + $0x1c74] ss:$100 sps:$4 sm:$0xff]  }
 0x4a3   :  { %v26984_v35 = vld [vmem:[%s38113_s1 + $0x1c70] ss:$100 sps:$4 sm:$0xff]  }
 0x4a4   :  { %9446 = vmatpush1.bf16.msra.mxu0 %v26943_v63  ;;  %v26987_v63 = vld [vmem:[%s38116_s3 + $0xe0] ss:$28 sps:$4 sm:$0xff]  }
 0x4a5   :  { %24500 = vmatpush3.bf16.msra.mxu1 %v26942_v53  ;;  %9447 = vmatprep.subr.bf16.mxu0 %v26950_v38  ;;  %v26992_v53 = vld [vmem:[%s38113_s1 + $0x1d3c] ss:$100 sps:$4 sm:$0xff]  }
 0x4a6   :  { %24501 = vmatprep.subr.bf16.mxu1 %v26946_v37  ;;  %v26990_v37 = vld [vmem:[%s38113_s1 + $0x1d38] ss:$100 sps:$4 sm:$0xff]  }
 0x4a7   :  { %v26995_v38 = vld [vmem:[%s38116_s3 + $0x11c] ss:$28 sps:$4 sm:$0xff]  }
 0x4a8   :  { %9448 = vmatpush1.bf16.msra.mxu0 %v26948_v5  ;;  %v26993_v5 = vld [vmem:[%s38116_s3 + $0x118] ss:$28 sps:$4 sm:$0xff]  }
 0x4a9   :  { %24502 = vmatpush3.bf16.msra.mxu1 %v26947_v46  ;;  %9449 = vmatprep.subr.bf16.mxu0 %v26955_v55  ;;  %v26998_v46 = vld [vmem:[%s38113_s1 + $0x1e04] ss:$100 sps:$4 sm:$0xff]   ;;  %v27001_v55 = vld [vmem:[%s38116_s3 + $0x154] ss:$28 sps:$4 sm:$0xff]  }
 0x4aa   :  { %24503 = vmatprep.subr.bf16.mxu1 %v26951_v40  ;;  %v26996_v40 = vld [vmem:[%s38113_s1 + $0x1e00] ss:$100 sps:$4 sm:$0xff]  }
 0x4ac   :  { %9450 = vmatpush1.bf16.msra.mxu0 %v26953_v10  ;;  %v26999_v10 = vld [vmem:[%s38116_s3 + $0x150] ss:$28 sps:$4 sm:$0xff]  }
 0x4ad   :  { %24504 = vmatpush3.bf16.msra.mxu1 %v26952_v61  ;;  %9451 = vmatprep.subr.bf16.mxu0 %v26959_v4  ;;  %v27004_v61 = vld [vmem:[%s38113_s1 + $0x1ecc] ss:$100 sps:$4 sm:$0xff]  }
 0x4ae   :  { %24804 = vmatprep.subr.bf16.mxu1 %v29193_v0  ;;  %v27002_v4 = vld [vmem:[%s38113_s1 + $0x1ec8] ss:$100 sps:$4 sm:$0xff]  }
 0x4b0   :  { %9796 = vmatmul.mubr.bf16.vlgmr.msra.gmra.mrb[28].mxu1 %v29184_v18  ;;  %9452 = vmatpush1.bf16.msra.mxu0 %v26957_v59  ;;  %v27010_v59 = vld [vmem:[%s38113_s1 + $0x1f94] ss:$100 sps:$4 sm:$0xff]  }
 0x4b1   :  { %24805 = vmatpush3.bf16.msra.mxu1 %v26956_v60  ;;  %9464 = vmatprep.subr.bf16.mxu0 %v26962_v14  ;;  %v27007_v60 = vld [vmem:[%s38116_s3 + $0x18c] ss:$28 sps:$4 sm:$0xff]  }
 0x4b2   :  { %24806 = vmatprep.mubr.msk.bf16.mxu1 %vm29194_vm1, %v29193_v0  ;;  %18626 = vmatprep.subr.bf16.mxu1 %v26965_v25  ;;  %v27005_v14 = vld [vmem:[%s38116_s3 + $0x188] ss:$28 sps:$4 sm:$0xff]   ;;  %v27008_v25 = vld [vmem:[%s38113_s1 + $0x1f90] ss:$100 sps:$4 sm:$0xff]  }
 0x4b3   :  { %9454 = vmatmul.mubr.bf16.vlgmr.msra.gmra.mrb[24].mxu0 %v29184_v18  ;;  %v27013_v18 = vld [vmem:[%s38116_s3 + $0x1c4] ss:$28 sps:$4 sm:$0xff]  }
 0x4b4   :  { %9465 = vmatpush1.bf16.msra.mxu0 %v26960_v6  ;;  %9496 = vmatprep.mubr.bf16.mxu0 %v33163_v15  ;;  %v27016_v6 = vld [vmem:[%s38113_s1 + $0x205c] ss:$100 sps:$4 sm:$0xff]  }
 0x4b5   :  { %9466 = vmatprep.subr.bf16.mxu0 %v26968_v2  ;;  %v27011_v2 = vld [vmem:[%s38116_s3 + $0x1c0] ss:$28 sps:$4 sm:$0xff]  }
 0x4b8   :  { %24807 = vmatmul.mubr.msk.bf16.vlgmr.msra.gmra.mrb[32].mxu1 %vm7654_vm0, %v33175_v20  ;;  %9467 = vmatpush1.bf16.msra.mxu0 %v26966_v11  ;;  %v27019_v11 = vld [vmem:[%s38116_s3 + $0x1fc] ss:$28 sps:$4 sm:$0xff]  }
 0x4b9   :  { %18627 = vmatpush1.bf16.msra.mxu1 %v26963_v7  ;;  %18658 = vmatprep.mubr.bf16.mxu1 %v30622_v43  ;;  %v27014_v7 = vld [vmem:[%s38113_s1 + $0x2058] ss:$100 sps:$4 sm:$0xff]  }
 0x4ba   :  { %18628 = vmatprep.subr.bf16.mxu1 %v26971_v12  ;;  %9468 = vmatprep.subr.bf16.mxu0 %v26974_v16  ;;  %v27022_v12 = vld [vmem:[%s38113_s1 + $0x2124] ss:$100 sps:$4 sm:$0xff]   ;;  %v27017_v16 = vld [vmem:[%s38116_s3 + $0x1f8] ss:$28 sps:$4 sm:$0xff]  }
 0x4bc   :  { %9469 = vmatpush1.bf16.msra.mxu0 %v26972_v44  ;;  %v27025_v44 = vld [vmem:[%s38116_s3 + $0x234] ss:$28 sps:$4 sm:$0xff]  }
 0x4bd   :  { %18629 = vmatpush1.bf16.msra.mxu1 %v26969_v22  ;;  %9470 = vmatprep.subr.bf16.mxu0 %v26980_v41  ;;  %v27020_v22 = vld [vmem:[%s38113_s1 + $0x2120] ss:$100 sps:$4 sm:$0xff]   ;;  %v27023_v41 = vld [vmem:[%s38116_s3 + $0x230] ss:$28 sps:$4 sm:$0xff]  }
 0x4be   :  { %18630 = vmatprep.subr.bf16.mxu1 %v26977_v30  ;;  %v27028_v30 = vld [vmem:[%s38113_s1 + $0x21ec] ss:$100 sps:$4 sm:$0xff]  }
 0x4c0   :  { %9471 = vmatpush1.bf16.msra.mxu0 %v26978_v49  ;;  %v27031_v49 = vld [vmem:[%s38116_s3 + $0x26c] ss:$28 sps:$4 sm:$0xff]  }
 0x4c1   :  { %18631 = vmatpush1.bf16.msra.mxu1 %v26975_v23  ;;  %9472 = vmatprep.subr.bf16.mxu0 %v26986_v28  ;;  %v27026_v23 = vld [vmem:[%s38113_s1 + $0x21e8] ss:$100 sps:$4 sm:$0xff]  }
 0x4c2   :  { %18632 = vmatprep.subr.bf16.mxu1 %v26983_v26  ;;  %v27034_v26 = vld [vmem:[%s38113_s1 + $0x22b4] ss:$100 sps:$4 sm:$0xff]   ;;  %v27029_v28 = vld [vmem:[%s38116_s3 + $0x268] ss:$28 sps:$4 sm:$0xff]  }
 0x4c4   :  { %9473 = vmatpush1.bf16.msra.mxu0 %v26984_v35  ;;  %v27037_v35 = vld [vmem:[%s38116_s3 + $0x2a4] ss:$28 sps:$4 sm:$0xff]  }
 0x4c5   :  { %18633 = vmatpush1.bf16.msra.mxu1 %v26981_v54  ;;  %9474 = vmatprep.subr.bf16.mxu0 %v26992_v53  ;;  %v27032_v54 = vld [vmem:[%s38113_s1 + $0x22b0] ss:$100 sps:$4 sm:$0xff]   ;;  %v27035_v53 = vld [vmem:[%s38116_s3 + $0x2a0] ss:$28 sps:$4 sm:$0xff]  }
 0x4c6   :  { %18634 = vmatprep.subr.bf16.mxu1 %v26989_v36  ;;  %v27040_v36 = vld [vmem:[%s38113_s1 + $0x237c] ss:$100 sps:$4 sm:$0xff]  }
 0x4c8   :  { %9475 = vmatpush1.bf16.msra.mxu0 %v26990_v37  ;;  %v27043_v37 = vld [vmem:[%s38116_s3 + $0x2dc] ss:$28 sps:$4 sm:$0xff]  }
 0x4c9   :  { %18635 = vmatpush1.bf16.msra.mxu1 %v26987_v63  ;;  %9476 = vmatprep.subr.bf16.mxu0 %v26998_v46  ;;  %v27038_v63 = vld [vmem:[%s38113_s1 + $0x2378] ss:$100 sps:$4 sm:$0xff]  }
 0x4ca   :  { %18636 = vmatprep.subr.bf16.mxu1 %v26995_v38  ;;  %v27046_v38 = vld [vmem:[%s38113_s1 + $0x2444] ss:$100 sps:$4 sm:$0xff]   ;;  %v27041_v46 = vld [vmem:[%s38116_s3 + $0x2d8] ss:$28 sps:$4 sm:$0xff]  }
 0x4cc   :  { %9477 = vmatpush1.bf16.msra.mxu0 %v26996_v40  ;;  %v27049_v40 = vld [vmem:[%s38116_s3 + $0x314] ss:$28 sps:$4 sm:$0xff]  }
 0x4cd   :  { %18637 = vmatpush1.bf16.msra.mxu1 %v26993_v5  ;;  %9478 = vmatprep.subr.bf16.mxu0 %v27004_v61  ;;  %v27044_v5 = vld [vmem:[%s38113_s1 + $0x2440] ss:$100 sps:$4 sm:$0xff]   ;;  %v27047_v61 = vld [vmem:[%s38116_s3 + $0x310] ss:$28 sps:$4 sm:$0xff]  }
 0x4ce   :  { %18638 = vmatprep.subr.bf16.mxu1 %v27001_v55  ;;  %v27052_v55 = vld [vmem:[%s38113_s1 + $0x250c] ss:$100 sps:$4 sm:$0xff]  }
 0x4d0   :  { %9479 = vmatpush1.bf16.msra.mxu0 %v27002_v4  ;;  %v27055_v4 = vld [vmem:[%s38116_s3 + $0x34c] ss:$28 sps:$4 sm:$0xff]  }
 0x4d1   :  { %18639 = vmatpush1.bf16.msra.mxu1 %v26999_v10  ;;  %9480 = vmatprep.subr.bf16.mxu0 %v27010_v59  ;;  %v27050_v10 = vld [vmem:[%s38113_s1 + $0x2508] ss:$100 sps:$4 sm:$0xff]  }
 0x4d2   :  { %18640 = vmatprep.subr.bf16.mxu1 %v27007_v60  ;;  %v27064_v60 = vld [vmem:[%s38113_s1 + $0x25d4] ss:$100 sps:$4 sm:$0xff]   ;;  %v27053_v59 = vld [vmem:[%s38116_s3 + $0x348] ss:$28 sps:$4 sm:$0xff]  }
 0x4d4   :  { %9481 = vmatpush1.bf16.msra.mxu0 %v27008_v25  ;;  %v27062_v25 = vld [vmem:[%s38113_s1 + $0x25d0] ss:$100 sps:$4 sm:$0xff]  }
 0x4d5   :  { %18641 = vmatpush1.bf16.msra.mxu1 %v27005_v14  ;;  %9482 = vmatprep.subr.bf16.mxu0 %v27016_v6  ;;  %v27058_v14 = vld [vmem:[%s38116_s3 + $0x384] ss:$28 sps:$4 sm:$0xff]   ;;  %v33363_v6 = vld [vmem:[%s38114_s0 + $0x10] ss:$28 sps:$4 sm:$0xff]  }
 0x4d6   :  { %18642 = vmatprep.subr.bf16.mxu1 %v27013_v18  ;;  %v27068_v18 = vld [vmem:[%s38113_s1 + $0x6a0] ss:$100 sps:$4 sm:$0xff]  }
 0x4d8   :  { %9483 = vmatpush1.bf16.msra.mxu0 %v27014_v7  ;;  %v27061_v7 = vld [vmem:[%s38116_s3 + $0x3bc] ss:$28 sps:$4 sm:$0xff]  }
 0x4d9   :  { %18643 = vmatpush1.bf16.msra.mxu1 %v27011_v2  ;;  %9484 = vmatprep.subr.bf16.mxu0 %v27022_v12  ;;  %v27056_v2 = vld [vmem:[%s38116_s3 + $0x380] ss:$28 sps:$4 sm:$0xff]   ;;  %v27067_v12 = vld [vmem:[%s38116_s3 + $0x3f4] ss:$28 sps:$4 sm:$0xff]  }
 0x4da   :  { %18644 = vmatprep.subr.bf16.mxu1 %v27019_v11  ;;  %v27059_v11 = vld [vmem:[%s38116_s3 + $0x3b8] ss:$28 sps:$4 sm:$0xff]  }
 0x4dc   :  { %9485 = vmatpush1.bf16.msra.mxu0 %v27020_v22  ;;  %v27069_v22 = vld [vmem:[%s38113_s1 + $0x60] ss:$100 sps:$4 sm:$0xff]  }
 0x4dd   :  { %18645 = vmatpush1.bf16.msra.mxu1 %v27017_v16  ;;  %9486 = vmatprep.subr.bf16.mxu0 %v27028_v30  ;;  %v27065_v16 = vld [vmem:[%s38116_s3 + $0x3f0] ss:$28 sps:$4 sm:$0xff]  }
 0x4de   :  { %18646 = vmatprep.subr.bf16.mxu1 %v27025_v44  ;;  %v27072_v44 = vld [vmem:[%s38116_s3 + $0x42c] ss:$28 sps:$4 sm:$0xff]  }
 0x4df   :  { %v27073_v30 = vld [vmem:[%s38113_s1 + $0x768] ss:$100 sps:$4 sm:$0xff]  }
 0x4e0   :  { %9487 = vmatpush1.bf16.msra.mxu0 %v27026_v23  ;;  %v27074_v23 = vld [vmem:[%s38113_s1 + $0x128] ss:$100 sps:$4 sm:$0xff]  }
 0x4e1   :  { %18647 = vmatpush1.bf16.msra.mxu1 %v27023_v41  ;;  %9488 = vmatprep.subr.bf16.mxu0 %v27034_v26  ;;  %v27070_v41 = vld [vmem:[%s38116_s3 + $0x428] ss:$28 sps:$4 sm:$0xff]   ;;  %v27078_v26 = vld [vmem:[%s38113_s1 + $0x830] ss:$100 sps:$4 sm:$0xff]  }
 0x4e2   :  { %18648 = vmatprep.subr.bf16.mxu1 %v27031_v49  ;;  %v27077_v49 = vld [vmem:[%s38116_s3 + $0x464] ss:$28 sps:$4 sm:$0xff]  }
 0x4e4   :  { %9489 = vmatpush1.bf16.msra.mxu0 %v27032_v54  ;;  %v1387_v54 = vrot.slane %v33045_v17, %v30545_v62 }
 0x4e5   :  { %18649 = vmatpush1.bf16.msra.mxu1 %v27029_v28  ;;  %9490 = vmatprep.subr.bf16.mxu0 %v27040_v36  ;;  %v29188_v28 = vld [vmem:[%s38114_s0 + $0x4] ss:$28 sps:$4 sm:$0xff]   ;;  %v1391_v36 = vrot.slane %v33045_v17, %v30556_v3  ;;  %v27084_v17 = vld [vmem:[%s38113_s1 + $0x2b8] ss:$100 sps:$4 sm:$0xff]  }
 0x4e6   :  { %18650 = vmatprep.subr.bf16.mxu1 %v27037_v35  ;;  %v27079_v35 = vld [vmem:[%s38113_s1 + $0x1f0] ss:$100 sps:$4 sm:$0xff]  }
 0x4e8   :  { %9491 = vmatpush1.bf16.msra.mxu0 %v27038_v63  ;;  %v27083_v63 = vld [vmem:[%s38113_s1 + $0x8f8] ss:$100 sps:$4 sm:$0xff]  }
 0x4e9   :  { %18651 = vmatpush1.bf16.msra.mxu1 %v27035_v53  ;;  %9492 = vmatprep.subr.bf16.mxu0 %v27046_v38  ;;  %v27082_v53 = vld [vmem:[%s38116_s3 + $0x49c] ss:$28 sps:$4 sm:$0xff]  }
 0x4ea   :  { %18652 = vmatprep.subr.bf16.mxu1 %v27043_v37  ;;  %v27080_v38 = vld [vmem:[%s38116_s3 + $0x498] ss:$28 sps:$4 sm:$0xff]  }
 0x4ec   :  { %9493 = vmatpush1.bf16.msra.mxu0 %v27044_v5 }
 0x4ed   :  { %18653 = vmatpush1.bf16.msra.mxu1 %v27041_v46  ;;  %9494 = vmatprep.subr.bf16.mxu0 %v27052_v55 }
 0x4ee   :  { %18654 = vmatprep.subr.bf16.mxu1 %v27049_v40 }
 0x4f0   :  { %9495 = vmatpush1.bf16.msra.mxu0 %v27050_v10 }
 0x4f1   :  { %18655 = vmatpush1.bf16.msra.mxu1 %v27047_v61  ;;  %9507 = vmatprep.subr.bf16.mxu0 %v27064_v60  ;;  %v27087_v61 = vld [vmem:[%s38116_s3 + $0x4d4] ss:$28 sps:$4 sm:$0xff]  }
 0x4f2   :  { %18656 = vmatprep.subr.bf16.mxu1 %v27055_v4 }
 0x4f3   :  { %9497 = vmatmul.mubr.bf16.vlgmr.msra.gmra.mrb[24].mxu0 %v33363_v6 }
 0x4f4   :  { %9508 = vmatpush1.bf16.msra.mxu0 %v27062_v25  ;;  %9539 = vmatprep.mubr.bf16.mxu0 %v29192_v1 }
 0x4f5   :  { %18657 = vmatpush1.bf16.msra.mxu1 %v27053_v59  ;;  %24467 = vmatprep.subr.bf16.mxu0 %v27068_v18  ;;  %v27088_v59 = vld [vmem:[%s38113_s1 + $0x9c0] ss:$100 sps:$4 sm:$0xff]   ;;  %v27085_v18 = vld [vmem:[%s38116_s3 + $0x4d0] ss:$28 sps:$4 sm:$0xff]  }
 0x4f6   :  { %18669 = vmatprep.subr.bf16.mxu1 %v27058_v14 }
 0x4f8   :  { %18659 = vmatmul.mubr.bf16.vlgmr.msra.gmra.mrb[36].mxu1 %v30608_v50 }
 0x4f9   :  { %18670 = vmatpush1.bf16.msra.mxu1 %v27056_v2  ;;  %18701 = vmatprep.mubr.bf16.mxu1 %v30834_v21 }
 0x4fa   :  { %18671 = vmatprep.subr.bf16.mxu1 %v27061_v7  ;;  %v27089_v7 = vld [vmem:[%s38113_s1 + $0x380] ss:$100 sps:$4 sm:$0xff]  }
 0x4fd   :  { %18672 = vmatpush1.bf16.msra.mxu1 %v27059_v11 }
 0x4fe   :  { %18673 = vmatprep.subr.bf16.mxu1 %v27067_v12  ;;  %v27092_v12 = vld [vmem:[%s38116_s3 + $0x50c] ss:$28 sps:$4 sm:$0xff]  }
 0x4ff   :  { %22987 = vmatmul.mubr.msk.bf16.vlgmr.msra.gmra.mrb[24].mxu0 %vm7654_vm0, %v33175_v20  ;;  %v27075_v20 = vld [vmem:[%s38116_s3 + $0x460] ss:$28 sps:$4 sm:$0xff]  }
 0x500   :  { %24468 = vmatpush3.bf16.msra.mxu0 %v27069_v22  ;;  %9754 = vmatprep.mubr.bf16.mxu0 %v29188_v28  ;;  %v27099_v28 = vld [vmem:[%s38113_s1 + $0x510] ss:$100 sps:$4 sm:$0xff]  }
 0x501   :  { %18674 = vmatpush1.bf16.msra.mxu1 %v27065_v16  ;;  %24469 = vmatprep.subr.bf16.mxu0 %v27073_v30  ;;  %v27093_v16 = vld [vmem:[%s38113_s1 + $0xa88] ss:$100 sps:$4 sm:$0xff]  }
 0x502   :  { %18675 = vmatprep.subr.bf16.mxu1 %v27072_v44  ;;  %v27090_v30 = vld [vmem:[%s38116_s3 + $0x508] ss:$28 sps:$4 sm:$0xff]  }
 0x504   :  { %24470 = vmatpush3.bf16.msra.mxu0 %v27074_v23  ;;  %v27097_v23 = vld [vmem:[%s38116_s3 + $0x544] ss:$28 sps:$4 sm:$0xff]  }
 0x505   :  { %18676 = vmatpush1.bf16.msra.mxu1 %v27070_v41  ;;  %24471 = vmatprep.subr.bf16.mxu0 %v27078_v26  ;;  %v27094_v41 = vld [vmem:[%s38113_s1 + $0x448] ss:$100 sps:$4 sm:$0xff]   ;;  %v27095_v26 = vld [vmem:[%s38116_s3 + $0x540] ss:$28 sps:$4 sm:$0xff]  }
 0x506   :  { %18677 = vmatprep.subr.bf16.mxu1 %v27077_v49  ;;  %v9197_v37 = vpop.f32.mrb[20].mxu0  ;;  %v27098_v49 = vld [vmem:[%s38113_s1 + $0xb50] ss:$100 sps:$4 sm:$0xff]  }
 0x507   :  { %v24892_v46 = vadd.f32 %v9197_v37, %v1387_v54  ;;  %v9199_v5 = vpop.f32.mrb[21].mxu0  ;;  %v27105_v37 = vld [vmem:[%s38116_s3 + $0x5b0] ss:$28 sps:$4 sm:$0xff]  }
 0x508   :  { %v24893_v40 = vadd.f32 %v9199_v5, %v1391_v36  ;;  %v9201_v55 = vpop.f32.mrb[22].mxu0  ;;  %24472 = vmatpush3.bf16.msra.mxu0 %v27079_v35  ;;  %v27100_v35 = vld [vmem:[%s38116_s3 + $0x578] ss:$28 sps:$4 sm:$0xff]   ;;  %v27113_v5 = vld [vmem:[%s38113_s1 + $0x2068] ss:$100 sps:$4 sm:$0xff]  }
 0x509   :  { %18678 = vmatpush1.bf16.msra.mxu1 %v27075_v20  ;;  %v9902_v10 = vmax.f32 %v24892_v46, 0.0  ;;  %v24894_v4 = vadd.f32 %v9201_v55, %v1387_v54  ;;  %v9203_v60 = vpop.f32.mrb[23].mxu0  ;;  %24473 = vmatprep.subr.bf16.mxu0 %v27083_v63  ;;  %v27102_v20 = vld [vmem:[%s38116_s3 + $0x57c] ss:$28 sps:$4 sm:$0xff]   ;;  %v27108_v63 = vld [vmem:[%s38113_s1 + $0x1fa0] ss:$100 sps:$4 sm:$0xff]  }
 0x50a   :  { %18679 = vmatprep.subr.bf16.mxu1 %v27082_v53  ;;  %v9903_v14 = vmax.f32 %v24893_v40, 0.0  ;;  %v24895_v25 = vadd.f32 %v9203_v60, %v1391_v36  ;;  %v27103_v54 = vld [vmem:[%s38113_s1 + $0xc18] ss:$100 sps:$4 sm:$0xff]   ;;  %v27107_v53 = vld [vmem:[%s38116_s3 + $0x5b4] ss:$28 sps:$4 sm:$0xff]  }
 0x50b   :  { %v9927_v2 = vmax.f32 %v24894_v4, 0.0  ;;  %v27104_v36 = vld [vmem:[%s38113_s1 + $0x5d8] ss:$100 sps:$4 sm:$0xff]   ;;  %v27112_v46 = vld [vmem:[%s38116_s3 + $0x5ec] ss:$28 sps:$4 sm:$0xff]  }
 0x50c   :  { %v9928_v11 = vmax.f32 %v24895_v25, 0.0  ;;  %24474 = vmatpush3.bf16.msra.mxu0 %v27084_v17  ;;  %v27110_v17 = vld [vmem:[%s38116_s3 + $0x5e8] ss:$28 sps:$4 sm:$0xff]   ;;  %v29189_v40 = vld [vmem:[%s38114_s0] ss:$28 sps:$4 sm:$0xff]  }
 0x50d   :  { %18680 = vmatpush1.bf16.msra.mxu1 %v27080_v38  ;;  %v33450_v22 = vpack.c.bf16 %v9927_v2, %v9902_v10  ;;  %24475 = vmatprep.subr.bf16.mxu0 %v27088_v59  ;;  %v27109_v38 = vld [vmem:[%s38113_s1 + $0x1960] ss:$100 sps:$4 sm:$0xff]   ;;  %v27114_v55 = vld [vmem:[%s38113_s1 + $0x1a28] ss:$100 sps:$4 sm:$0xff]   ;;  %v27118_v10 = vld [vmem:[%s38113_s1 + $0x2130] ss:$100 sps:$4 sm:$0xff]  }
 0x50e   :  { %18681 = vmatprep.subr.bf16.mxu1 %v27087_v61  ;;  %v33452_v44 = vpack.c.bf16 %v9928_v11, %v9903_v14  ;;  %v27117_v61 = vld [vmem:[%s38116_s3 + $0x624] ss:$28 sps:$4 sm:$0xff]   ;;  %v27119_v60 = vld [vmem:[%s38113_s1 + $0x1af0] ss:$100 sps:$4 sm:$0xff]   ;;  %v27122_v59 = vld [vmem:[%s38116_s3 + $0x65c] ss:$28 sps:$4 sm:$0xff]  }
 0x50f   :  { %v27115_v4 = vld [vmem:[%s38116_s3 + $0x620] ss:$28 sps:$4 sm:$0xff]  }
 0x510   :  { %24476 = vmatpush3.bf16.msra.mxu0 %v27089_v7  ;;  %v27123_v14 = vld [vmem:[%s38113_s1 + $0x21f8] ss:$100 sps:$4 sm:$0xff]   ;;  %v27128_v2 = vld [vmem:[%s38113_s1 + $0x22c0] ss:$100 sps:$4 sm:$0xff]   ;;  %v27125_v7 = vld [vmem:[%s38116_s3 + $0x690] ss:$28 sps:$4 sm:$0xff]  }
 0x511   :  { %18682 = vmatpush1.bf16.msra.mxu1 %v27085_v18  ;;  %24477 = vmatprep.subr.bf16.mxu0 %v27093_v16  ;;  %v27124_v25 = vld [vmem:[%s38113_s1 + $0x1bb8] ss:$100 sps:$4 sm:$0xff]   ;;  %v27127_v18 = vld [vmem:[%s38116_s3 + $0x694] ss:$28 sps:$4 sm:$0xff]   ;;  %v27129_v11 = vld [vmem:[%s38113_s1 + $0x1c80] ss:$100 sps:$4 sm:$0xff]  }
 0x512   :  { %18683 = vmatprep.subr.bf16.mxu1 %v27092_v12  ;;  %v27132_v12 = vld [vmem:[%s38116_s3 + $0x6cc] ss:$28 sps:$4 sm:$0xff]  }
 0x513   :  { %v27133_v16 = vld [vmem:[%s38113_s1 + $0x2388] ss:$100 sps:$4 sm:$0xff]  }
 0x514   :  { %24478 = vmatpush3.bf16.msra.mxu0 %v27094_v41  ;;  %v27134_v41 = vld [vmem:[%s38113_s1 + $0x1d48] ss:$100 sps:$4 sm:$0xff]  }
 0x515   :  { %18684 = vmatpush1.bf16.msra.mxu1 %v27090_v30  ;;  %24479 = vmatprep.subr.bf16.mxu0 %v27098_v49  ;;  %v27130_v30 = vld [vmem:[%s38116_s3 + $0x6c8] ss:$28 sps:$4 sm:$0xff]   ;;  %v27138_v49 = vld [vmem:[%s38113_s1 + $0x2450] ss:$100 sps:$4 sm:$0xff]  }
 0x516   :  { %18685 = vmatprep.subr.bf16.mxu1 %v27097_v23  ;;  %v27137_v23 = vld [vmem:[%s38116_s3 + $0x704] ss:$28 sps:$4 sm:$0xff]  }
 0x518   :  { %24480 = vmatpush3.bf16.msra.mxu0 %v27099_v28  ;;  %v27139_v28 = vld [vmem:[%s38113_s1 + $0x1e10] ss:$100 sps:$4 sm:$0xff]  }
 0x519   :  { %18686 = vmatpush1.bf16.msra.mxu1 %v27095_v26  ;;  %24481 = vmatprep.subr.bf16.mxu0 %v27103_v54  ;;  %v27135_v26 = vld [vmem:[%s38116_s3 + $0x700] ss:$28 sps:$4 sm:$0xff]  }
 0x51a   :  { %18687 = vmatprep.subr.bf16.mxu1 %v27102_v20  ;;  %v27142_v20 = vld [vmem:[%s38116_s3 + $0x73c] ss:$28 sps:$4 sm:$0xff]  }
 0x51b   :  { %v27143_v54 = vld [vmem:[%s38113_s1 + $0x2518] ss:$100 sps:$4 sm:$0xff]  }
 0x51c   :  { %24482 = vmatpush3.bf16.msra.mxu0 %v27104_v36  ;;  %v27144_v36 = vld [vmem:[%s38113_s1 + $0x1ed8] ss:$100 sps:$4 sm:$0xff]  }
 0x51d   :  { %18688 = vmatpush1.bf16.msra.mxu1 %v27100_v35  ;;  %24511 = vmatprep.subr.bf16.mxu0 %v27108_v63  ;;  %v27140_v35 = vld [vmem:[%s38116_s3 + $0x738] ss:$28 sps:$4 sm:$0xff]   ;;  %v27150_v63 = vld [vmem:[%s38116_s3 + $0xc] ss:$28 sps:$4 sm:$0xff]  }
 0x51e   :  { %18689 = vmatprep.subr.bf16.mxu1 %v27107_v53  ;;  %v27147_v53 = vld [vmem:[%s38116_s3 + $0x774] ss:$28 sps:$4 sm:$0xff]  }
 0x51f   :  { %9755 = vmatmul.mubr.bf16.vlgmr.msra.gmra.mrb[28].mxu0 %v29189_v40  ;;  %v27154_v40 = vld [vmem:[%s38116_s3 + $0x40] ss:$28 sps:$4 sm:$0xff]  }
 0x520   :  { %24512 = vmatpush3.bf16.msra.mxu0 %v27109_v38  ;;  %9836 = vmatprep.mubr.bf16.mxu0 %v33163_v15  ;;  %v27120_v15 = vld [vmem:[%s38116_s3 + $0x658] ss:$28 sps:$4 sm:$0xff]   ;;  %v27148_v38 = vld [vmem:[%s38116_s3 + $0x8] ss:$28 sps:$4 sm:$0xff]  }
 0x521   :  { %18690 = vmatpush1.bf16.msra.mxu1 %v27105_v37  ;;  %24513 = vmatprep.subr.bf16.mxu0 %v27113_v5  ;;  %v27145_v37 = vld [vmem:[%s38116_s3 + $0x770] ss:$28 sps:$4 sm:$0xff]   ;;  %v27156_v5 = vld [vmem:[%s38116_s3 + $0x44] ss:$28 sps:$4 sm:$0xff]  }
 0x522   :  { %18691 = vmatprep.subr.bf16.mxu1 %v27112_v46  ;;  %v27153_v46 = vld [vmem:[%s38116_s3 + $0x7ac] ss:$28 sps:$4 sm:$0xff]  }
 0x524   :  { %24514 = vmatpush3.bf16.msra.mxu0 %v27114_v55  ;;  %v27159_v55 = vld [vmem:[%s38116_s3 + $0x7e4] ss:$28 sps:$4 sm:$0xff]  }
 0x525   :  { %18692 = vmatpush1.bf16.msra.mxu1 %v27110_v17  ;;  %24515 = vmatprep.subr.bf16.mxu0 %v27118_v10  ;;  %v27151_v17 = vld [vmem:[%s38116_s3 + $0x7a8] ss:$28 sps:$4 sm:$0xff]   ;;  %v27160_v10 = vld [vmem:[%s38116_s3 + $0x78] ss:$28 sps:$4 sm:$0xff]  }
 0x526   :  { %18693 = vmatprep.subr.bf16.mxu1 %v27117_v61  ;;  %v27162_v61 = vld [vmem:[%s38116_s3 + $0x7c] ss:$28 sps:$4 sm:$0xff]  }
 0x528   :  { %24516 = vmatpush3.bf16.msra.mxu0 %v27119_v60  ;;  %v27168_v60 = vld [vmem:[%s38116_s3 + $0xb4] ss:$28 sps:$4 sm:$0xff]  }
 0x529   :  { %18694 = vmatpush1.bf16.msra.mxu1 %v27115_v4  ;;  %24517 = vmatprep.subr.bf16.mxu0 %v27123_v14  ;;  %v27165_v4 = vld [vmem:[%s38116_s3 + $0x81c] ss:$28 sps:$4 sm:$0xff]   ;;  %v27166_v14 = vld [vmem:[%s38116_s3 + $0xb0] ss:$28 sps:$4 sm:$0xff]  }
 0x52a   :  { %18695 = vmatprep.subr.bf16.mxu1 %v27122_v59  ;;  %v27163_v59 = vld [vmem:[%s38116_s3 + $0x818] ss:$28 sps:$4 sm:$0xff]  }
 0x52c   :  { %24518 = vmatpush3.bf16.msra.mxu0 %v27124_v25  ;;  %v27174_v25 = vld [vmem:[%s38116_s3 + $0xec] ss:$28 sps:$4 sm:$0xff]  }
 0x52d   :  { %18696 = vmatpush1.bf16.msra.mxu1 %v27120_v15  ;;  %24519 = vmatprep.subr.bf16.mxu0 %v27128_v2  ;;  %v27171_v15 = vld [vmem:[%s38116_s3 + $0x854] ss:$28 sps:$4 sm:$0xff]   ;;  %v27172_v2 = vld [vmem:[%s38116_s3 + $0xe8] ss:$28 sps:$4 sm:$0xff]  }
 0x52e   :  { %18697 = vmatprep.subr.bf16.mxu1 %v27127_v18  ;;  %v27169_v18 = vld [vmem:[%s38116_s3 + $0x850] ss:$28 sps:$4 sm:$0xff]  }
 0x530   :  { %24520 = vmatpush3.bf16.msra.mxu0 %v27129_v11  ;;  %v27180_v11 = vld [vmem:[%s38116_s3 + $0x124] ss:$28 sps:$4 sm:$0xff]  }
 0x531   :  { %18698 = vmatpush1.bf16.msra.mxu1 %v27125_v7  ;;  %24521 = vmatprep.subr.bf16.mxu0 %v27133_v16  ;;  %v27177_v7 = vld [vmem:[%s38116_s3 + $0x88c] ss:$28 sps:$4 sm:$0xff]   ;;  %v27178_v16 = vld [vmem:[%s38116_s3 + $0x120] ss:$28 sps:$4 sm:$0xff]  }
 0x532   :  { %18699 = vmatprep.subr.bf16.mxu1 %v27132_v12  ;;  %v27175_v12 = vld [vmem:[%s38116_s3 + $0x888] ss:$28 sps:$4 sm:$0xff]  }
 0x534   :  { %24522 = vmatpush3.bf16.msra.mxu0 %v27134_v41  ;;  %v27186_v41 = vld [vmem:[%s38116_s3 + $0x15c] ss:$28 sps:$4 sm:$0xff]  }
 0x535   :  { %18700 = vmatpush1.bf16.msra.mxu1 %v27130_v30  ;;  %24523 = vmatprep.subr.bf16.mxu0 %v27138_v49  ;;  %v27183_v30 = vld [vmem:[%s38116_s3 + $0x8c4] ss:$28 sps:$4 sm:$0xff]   ;;  %v27184_v49 = vld [vmem:[%s38116_s3 + $0x158] ss:$28 sps:$4 sm:$0xff]  }
 0x536   :  { %18712 = vmatprep.subr.bf16.mxu1 %v27137_v23  ;;  %v27181_v23 = vld [vmem:[%s38116_s3 + $0x8c0] ss:$28 sps:$4 sm:$0xff]  }
 0x538   :  { %18702 = vmatmul.mubr.bf16.vlgmr.msra.gmra.mrb[36].mxu1 %v30823_v19  ;;  %24524 = vmatpush3.bf16.msra.mxu0 %v27139_v28  ;;  %v27192_v28 = vld [vmem:[%s38116_s3 + $0x194] ss:$28 sps:$4 sm:$0xff]  }
 0x539   :  { %18713 = vmatpush1.bf16.msra.mxu1 %v27135_v26  ;;  %18744 = vmatprep.mubr.bf16.mxu1 %v31499_v9  ;;  %v27189_v26 = vld [vmem:[%s38116_s3 + $0x8fc] ss:$28 sps:$4 sm:$0xff]  }
 0x53a   :  { %18714 = vmatprep.subr.bf16.mxu1 %v27142_v20  ;;  %24525 = vmatprep.subr.bf16.mxu0 %v27143_v54  ;;  %v27187_v20 = vld [vmem:[%s38116_s3 + $0x8f8] ss:$28 sps:$4 sm:$0xff]   ;;  %v27190_v54 = vld [vmem:[%s38116_s3 + $0x190] ss:$28 sps:$4 sm:$0xff]  }
 0x53c   :  { %24526 = vmatpush3.bf16.msra.mxu0 %v27144_v36  ;;  %v27198_v36 = vld [vmem:[%s38116_s3 + $0x1cc] ss:$28 sps:$4 sm:$0xff]  }
 0x53d   :  { %18715 = vmatpush1.bf16.msra.mxu1 %v27140_v35  ;;  %19185 = vmatprep.subr.bf16.mxu0 %v27150_v63  ;;  %v27195_v35 = vld [vmem:[%s38116_s3 + $0x934] ss:$28 sps:$4 sm:$0xff]   ;;  %v27196_v63 = vld [vmem:[%s38116_s3 + $0x1c8] ss:$28 sps:$4 sm:$0xff]  }
 0x53e   :  { %18716 = vmatprep.subr.bf16.mxu1 %v27147_v53  ;;  %v27193_v53 = vld [vmem:[%s38116_s3 + $0x930] ss:$28 sps:$4 sm:$0xff]  }
 0x53f   :  { %9837 = vmatmul.mubr.bf16.vlgmr.msra.gmra.mrb[32].mxu0 %v33363_v6  ;;  %v27157_v6 = vld [vmem:[%s38116_s3 + $0x7e0] ss:$28 sps:$4 sm:$0xff]  }
 0x540   :  { %19186 = vmatpush1.bf16.msra.mxu0 %v27148_v38  ;;  %19217 = vmatprep.mubr.bf16.mxu0 %v30622_v43  ;;  %v27204_v38 = vld [vmem:[%s38116_s3 + $0x204] ss:$28 sps:$4 sm:$0xff]  }
 0x541   :  { %18717 = vmatpush1.bf16.msra.mxu1 %v27145_v37  ;;  %19187 = vmatprep.subr.bf16.mxu0 %v27156_v5  ;;  %v27201_v37 = vld [vmem:[%s38116_s3 + $0x96c] ss:$28 sps:$4 sm:$0xff]   ;;  %v33708_v5 = vld [vmem:[%s38115_s2 + $0x10] sm:$0xff] }
 0x542   :  { %18718 = vmatprep.subr.bf16.mxu1 %v27153_v46  ;;  %v27199_v46 = vld [vmem:[%s38116_s3 + $0x968] ss:$28 sps:$4 sm:$0xff]  }
 0x544   :  { %19188 = vmatpush1.bf16.msra.mxu0 %v27154_v40  ;;  %v1415_v40 = vrot.slane %v33708_v5, %v31081_v48  ;;  %v27205_v48 = vld [vmem:[%s38116_s3 + $0x9a0] ss:$28 sps:$4 sm:$0xff]  }
 0x545   :  { %18719 = vmatpush1.bf16.msra.mxu1 %v27151_v17  ;;  %19189 = vmatprep.subr.bf16.mxu0 %v27162_v61  ;;  %v1411_v17 = vrot.slane %v33708_v5, %v31072_v45  ;;  %v27207_v61 = vld [vmem:[%s38116_s3 + $0x9a4] ss:$28 sps:$4 sm:$0xff]  }
 0x546   :  { %18720 = vmatprep.subr.bf16.mxu1 %v27159_v55  ;;  %v27202_v55 = vld [vmem:[%s38116_s3 + $0x200] ss:$28 sps:$4 sm:$0xff]  }
 0x548   :  { %19190 = vmatpush1.bf16.msra.mxu0 %v27160_v10 }
 0x549   :  { %18721 = vmatpush1.bf16.msra.mxu1 %v27157_v6  ;;  %19191 = vmatprep.subr.bf16.mxu0 %v27168_v60  ;;  %v27210_v6 = vld [vmem:[%s38116_s3 + $0x23c] ss:$28 sps:$4 sm:$0xff]  }
 0x54a   :  { %18722 = vmatprep.subr.bf16.mxu1 %v27165_v4 }
 0x54c   :  { %19192 = vmatpush1.bf16.msra.mxu0 %v27166_v14 }
 0x54d   :  { %18723 = vmatpush1.bf16.msra.mxu1 %v27163_v59  ;;  %19193 = vmatprep.subr.bf16.mxu0 %v27174_v25 }
 0x54e   :  { %18724 = vmatprep.subr.bf16.mxu1 %v27171_v15  ;;  %v27208_v15 = vld [vmem:[%s38116_s3 + $0x238] ss:$28 sps:$4 sm:$0xff]  }
 0x550   :  { %19194 = vmatpush1.bf16.msra.mxu0 %v27172_v2  ;;  %v27213_v2 = vld [vmem:[%s38116_s3 + $0x9dc] ss:$28 sps:$4 sm:$0xff]  }
 0x551   :  { %18725 = vmatpush1.bf16.msra.mxu1 %v27169_v18  ;;  %19195 = vmatprep.subr.bf16.mxu0 %v27180_v11 }
 0x552   :  { %18726 = vmatprep.subr.bf16.mxu1 %v27177_v7  ;;  %v27216_v7 = vld [vmem:[%s38116_s3 + $0x274] ss:$28 sps:$4 sm:$0xff]  }
 0x554   :  { %19196 = vmatpush1.bf16.msra.mxu0 %v27178_v16 }
 0x555   :  { %18727 = vmatpush1.bf16.msra.mxu1 %v27175_v12  ;;  %19197 = vmatprep.subr.bf16.mxu0 %v27186_v41 }
 0x556   :  { %18728 = vmatprep.subr.bf16.mxu1 %v27183_v30  ;;  %v27211_v30 = vld [vmem:[%s38116_s3 + $0x9d8] ss:$28 sps:$4 sm:$0xff]  }
 0x558   :  { %19198 = vmatpush1.bf16.msra.mxu0 %v27184_v49  ;;  %v27214_v49 = vld [vmem:[%s38116_s3 + $0x270] ss:$28 sps:$4 sm:$0xff]  }
 0x559   :  { %18729 = vmatpush1.bf16.msra.mxu1 %v27181_v23  ;;  %19199 = vmatprep.subr.bf16.mxu0 %v27192_v28  ;;  %v27219_v28 = vld [vmem:[%s38116_s3 + $0xa14] ss:$28 sps:$4 sm:$0xff]  }
 0x55a   :  { %18730 = vmatprep.subr.bf16.mxu1 %v27189_v26 }
 0x55c   :  { %19200 = vmatpush1.bf16.msra.mxu0 %v27190_v54 }
 0x55d   :  { %18731 = vmatpush1.bf16.msra.mxu1 %v27187_v20  ;;  %19201 = vmatprep.subr.bf16.mxu0 %v27198_v36  ;;  %v27222_v20 = vld [vmem:[%s38116_s3 + $0x2ac] ss:$28 sps:$4 sm:$0xff]  }
 0x55e   :  { %18732 = vmatprep.subr.bf16.mxu1 %v27195_v35  ;;  %v27217_v35 = vld [vmem:[%s38116_s3 + $0xa10] ss:$28 sps:$4 sm:$0xff]   ;;  %v27220_v36 = vld [vmem:[%s38116_s3 + $0x2a8] ss:$28 sps:$4 sm:$0xff]  }
 0x560   :  { %19202 = vmatpush1.bf16.msra.mxu0 %v27196_v63  ;;  %v27228_v63 = vld [vmem:[%s38116_s3 + $0x2e4] ss:$28 sps:$4 sm:$0xff]  }
 0x561   :  { %18733 = vmatpush1.bf16.msra.mxu1 %v27193_v53  ;;  %19203 = vmatprep.subr.bf16.mxu0 %v27204_v38  ;;  %v27225_v53 = vld [vmem:[%s38116_s3 + $0xa4c] ss:$28 sps:$4 sm:$0xff]   ;;  %v27226_v38 = vld [vmem:[%s38116_s3 + $0x2e0] ss:$28 sps:$4 sm:$0xff]  }
 0x562   :  { %18734 = vmatprep.subr.bf16.mxu1 %v27201_v37  ;;  %v27223_v37 = vld [vmem:[%s38116_s3 + $0xa48] ss:$28 sps:$4 sm:$0xff]  }
 0x563   :  { %v9713_v10 = vpop.f32.mrb[24].mxu1 }
 0x564   :  { %v24904_v4 = vadd.f32 %v9713_v10, %v1411_v17  ;;  %v9715_v60 = vpop.f32.mrb[25].mxu1  ;;  %19204 = vmatpush1.bf16.msra.mxu0 %v27202_v55  ;;  %v27232_v55 = vld [vmem:[%s38116_s3 + $0x318] ss:$28 sps:$4 sm:$0xff]  }
 0x565   :  { %18735 = vmatpush1.bf16.msra.mxu1 %v27199_v46  ;;  %v24905_v59 = vadd.f32 %v9715_v60, %v1415_v40  ;;  %v9717_v14 = vpop.f32.mrb[26].mxu1  ;;  %19205 = vmatprep.subr.bf16.mxu0 %v27210_v6  ;;  %v27231_v46 = vld [vmem:[%s38116_s3 + $0xa84] ss:$28 sps:$4 sm:$0xff]   ;;  %v27240_v6 = vld [vmem:[%s38116_s3 + $0x354] ss:$28 sps:$4 sm:$0xff]  }
 0x566   :  { %v24906_v25 = vadd.f32 %v9717_v14, %v1411_v17  ;;  %v9719_v18 = vpop.f32.mrb[27].mxu1  ;;  %18736 = vmatprep.subr.bf16.mxu1 %v27207_v61  ;;  %v9908_v12 = vmax.f32 %v24904_v4, 0.0  ;;  %v27234_v17 = vld [vmem:[%s38116_s3 + $0x31c] ss:$28 sps:$4 sm:$0xff]   ;;  %v27238_v4 = vld [vmem:[%s38116_s3 + $0x350] ss:$28 sps:$4 sm:$0xff]  }
 0x567   :  { %v24907_v11 = vadd.f32 %v9719_v18, %v1415_v40  ;;  %v9909_v41 = vmax.f32 %v24905_v59, 0.0  ;;  %v27229_v40 = vld [vmem:[%s38116_s3 + $0xa80] ss:$28 sps:$4 sm:$0xff]   ;;  %v27235_v10 = vld [vmem:[%s38116_s3 + $0xab8] ss:$28 sps:$4 sm:$0xff]  }
 0x568   :  { %v9933_v16 = vmax.f32 %v24906_v25, 0.0  ;;  %19206 = vmatpush1.bf16.msra.mxu0 %v27208_v15  ;;  %v27237_v61 = vld [vmem:[%s38116_s3 + $0xabc] ss:$28 sps:$4 sm:$0xff]   ;;  %v27243_v60 = vld [vmem:[%s38116_s3 + $0xaf4] ss:$28 sps:$4 sm:$0xff]  }
 0x569   :  { %v9934_v23 = vmax.f32 %v24907_v11, 0.0  ;;  %18737 = vmatpush1.bf16.msra.mxu1 %v27205_v48  ;;  %19207 = vmatprep.subr.bf16.mxu0 %v27216_v7  ;;  %v27246_v48 = vld [vmem:[%s38116_s3 + $0x38c] ss:$28 sps:$4 sm:$0xff]   ;;  %v27252_v25 = vld [vmem:[%s38116_s3 + $0x3c4] ss:$28 sps:$4 sm:$0xff]  }
 0x56a   :  { %v33741_v26 = vpack.c.bf16 %v9933_v16, %v9908_v12  ;;  %18738 = vmatprep.subr.bf16.mxu1 %v27213_v2  ;;  %v27241_v59 = vld [vmem:[%s38116_s3 + $0xaf0] ss:$28 sps:$4 sm:$0xff]   ;;  %v27244_v14 = vld [vmem:[%s38116_s3 + $0x388] ss:$28 sps:$4 sm:$0xff]   ;;  %v27250_v2 = vld [vmem:[%s38116_s3 + $0x3c0] ss:$28 sps:$4 sm:$0xff]  }
 0x56b   :  { %v33749_v54 = vpack.c.bf16 %v9934_v23, %v9909_v41  ;;  %v27249_v15 = vld [vmem:[%s38116_s3 + $0xb2c] ss:$28 sps:$4 sm:$0xff]   ;;  %v27255_v7 = vld [vmem:[%s38116_s3 + $0xb64] ss:$28 sps:$4 sm:$0xff]   ;;  %v27258_v11 = vld [vmem:[%s38116_s3 + $0x3fc] ss:$28 sps:$4 sm:$0xff]  }
 0x56c   :  { %19208 = vmatpush1.bf16.msra.mxu0 %v27214_v49  ;;  %v27247_v18 = vld [vmem:[%s38116_s3 + $0xb28] ss:$28 sps:$4 sm:$0xff]   ;;  %v27256_v49 = vld [vmem:[%s38116_s3 + $0x3f8] ss:$28 sps:$4 sm:$0xff]  }
 0x56d   :  { %18739 = vmatpush1.bf16.msra.mxu1 %v27211_v30  ;;  %19209 = vmatprep.subr.bf16.mxu0 %v27222_v20  ;;  %v27253_v30 = vld [vmem:[%s38116_s3 + $0xb60] ss:$28 sps:$4 sm:$0xff]  }
 0x56e   :  { %18740 = vmatprep.subr.bf16.mxu1 %v27219_v28  ;;  %v27261_v20 = vld [vmem:[%s38116_s3 + $0xb9c] ss:$28 sps:$4 sm:$0xff]  }
 0x570   :  { %19210 = vmatpush1.bf16.msra.mxu0 %v27220_v36 }
 0x571   :  { %18741 = vmatpush1.bf16.msra.mxu1 %v27217_v35  ;;  %19211 = vmatprep.subr.bf16.mxu0 %v27228_v63  ;;  %v27264_v35 = vld [vmem:[%s38116_s3 + $0x434] ss:$28 sps:$4 sm:$0xff]  }
 0x572   :  { %18742 = vmatprep.subr.bf16.mxu1 %v27225_v53  ;;  %v27259_v53 = vld [vmem:[%s38116_s3 + $0xb98] ss:$28 sps:$4 sm:$0xff]   ;;  %v27262_v63 = vld [vmem:[%s38116_s3 + $0x430] ss:$28 sps:$4 sm:$0xff]  }
 0x574   :  { %19212 = vmatpush1.bf16.msra.mxu0 %v27226_v38  ;;  %v27270_v38 = vld [vmem:[%s38116_s3 + $0x46c] ss:$28 sps:$4 sm:$0xff]  }
 0x575   :  { %18743 = vmatpush1.bf16.msra.mxu1 %v27223_v37  ;;  %19213 = vmatprep.subr.bf16.mxu0 %v27234_v17  ;;  %v27267_v37 = vld [vmem:[%s38116_s3 + $0xbd4] ss:$28 sps:$4 sm:$0xff]  }
 0x576   :  { %18755 = vmatprep.subr.bf16.mxu1 %v27231_v46 }
 0x578   :  { %18745 = vmatmul.mubr.bf16.vlgmr.msra.gmra.mrb[36].mxu1 %v31497_v8  ;;  %19214 = vmatpush1.bf16.msra.mxu0 %v27232_v55 }
 0x579   :  { %18756 = vmatpush1.bf16.msra.mxu1 %v27229_v40  ;;  %18787 = vmatprep.mubr.bf16.mxu1 %v31142_v27  ;;  %v27265_v40 = vld [vmem:[%s38116_s3 + $0xbd0] ss:$28 sps:$4 sm:$0xff]  }
 0x57a   :  { %18757 = vmatprep.subr.bf16.mxu1 %v27237_v61  ;;  %19215 = vmatprep.subr.bf16.mxu0 %v27240_v6  ;;  %v27268_v61 = vld [vmem:[%s38116_s3 + $0x468] ss:$28 sps:$4 sm:$0xff]  }
 0x57c   :  { %19216 = vmatpush1.bf16.msra.mxu0 %v27238_v4  ;;  %v27276_v4 = vld [vmem:[%s38116_s3 + $0x4a4] ss:$28 sps:$4 sm:$0xff]  }
 0x57d   :  { %18758 = vmatpush1.bf16.msra.mxu1 %v27235_v10  ;;  %19228 = vmatprep.subr.bf16.mxu0 %v27246_v48  ;;  %v27273_v10 = vld [vmem:[%s38116_s3 + $0xc0c] ss:$28 sps:$4 sm:$0xff]   ;;  %v27274_v48 = vld [vmem:[%s38116_s3 + $0x4a0] ss:$28 sps:$4 sm:$0xff]  }
 0x57e   :  { %18759 = vmatprep.subr.bf16.mxu1 %v27243_v60  ;;  %v27271_v60 = vld [vmem:[%s38116_s3 + $0xc08] ss:$28 sps:$4 sm:$0xff]  }
 0x57f   :  { %19218 = vmatmul.mubr.bf16.vlgmr.msra.gmra.mrb[36].mxu0 %v30608_v50 }
 0x580   :  { %19229 = vmatpush1.bf16.msra.mxu0 %v27244_v14  ;;  %19260 = vmatprep.mubr.bf16.mxu0 %v30834_v21  ;;  %v27282_v14 = vld [vmem:[%s38116_s3 + $0x4dc] ss:$28 sps:$4 sm:$0xff]  }
 0x581   :  { %18760 = vmatpush1.bf16.msra.mxu1 %v27241_v59  ;;  %19230 = vmatprep.subr.bf16.mxu0 %v27252_v25  ;;  %v27279_v59 = vld [vmem:[%s38116_s3 + $0xc44] ss:$28 sps:$4 sm:$0xff]   ;;  %v27280_v25 = vld [vmem:[%s38116_s3 + $0x4d8] ss:$28 sps:$4 sm:$0xff]  }
 0x582   :  { %18761 = vmatprep.subr.bf16.mxu1 %v27249_v15  ;;  %v27277_v15 = vld [vmem:[%s38116_s3 + $0xc40] ss:$28 sps:$4 sm:$0xff]  }
 0x583   :  { %v24505_v12 = vpop.f32.mrb[28].mxu1 }
 0x584   :  { %v24506_v16 = vpop.f32.mrb[29].mxu1  ;;  %19231 = vmatpush1.bf16.msra.mxu0 %v27250_v2  ;;  %v27288_v2 = vld [vmem:[%s38116_s3 + $0x514] ss:$28 sps:$4 sm:$0xff]  }
 0x585   :  { %v33830_v41 = vadd.f32 %v24506_v16, %v24505_v12  ;;  %18762 = vmatpush1.bf16.msra.mxu1 %v27247_v18  ;;  %v24508_v23 = vpop.f32.mrb[30].mxu1  ;;  %19232 = vmatprep.subr.bf16.mxu0 %v27258_v11  ;;  %v27285_v18 = vld [vmem:[%s38116_s3 + $0xc7c] ss:$28 sps:$4 sm:$0xff]   ;;  %v27286_v11 = vld [vmem:[%s38116_s3 + $0x510] ss:$28 sps:$4 sm:$0xff]  }
 0x586   :  { %v24509_v28 = vpop.f32.mrb[31].mxu1  ;;  %18763 = vmatprep.subr.bf16.mxu1 %v27255_v7  ;;  %v27283_v7 = vld [vmem:[%s38116_s3 + $0xc78] ss:$28 sps:$4 sm:$0xff]   ;;  %v27294_v16 = vld [vmem:[%s38116_s3 + $0x54c] ss:$28 sps:$4 sm:$0xff]  }
 0x587   :  { %v33841_v36 = vadd.f32 %v24509_v28, %v24508_v23  ;;  %v27291_v12 = vld [vmem:[%s38116_s3 + $0xcb4] ss:$28 sps:$4 sm:$0xff]   ;;  %v27292_v23 = vld [vmem:[%s38116_s3 + $0x548] ss:$28 sps:$4 sm:$0xff]  }
 0x588   :  { %19233 = vmatpush1.bf16.msra.mxu0 %v27256_v49  ;;  %v27297_v49 = vld [vmem:[%s38116_s3 + $0xcec] ss:$28 sps:$4 sm:$0xff]   ;;  %v27300_v28 = vld [vmem:[%s38116_s3 + $0x584] ss:$28 sps:$4 sm:$0xff]  }
 0x589   :  { %18764 = vmatpush1.bf16.msra.mxu1 %v27253_v30  ;;  %19234 = vmatprep.subr.bf16.mxu0 %v27264_v35  ;;  %v27289_v30 = vld [vmem:[%s38116_s3 + $0xcb0] ss:$28 sps:$4 sm:$0xff]   ;;  %v27298_v35 = vld [vmem:[%s38116_s3 + $0x580] ss:$28 sps:$4 sm:$0xff]  }
 0x58a   :  { %18765 = vmatprep.subr.bf16.mxu1 %v27261_v20  ;;  %v27295_v20 = vld [vmem:[%s38116_s3 + $0xce8] ss:$28 sps:$4 sm:$0xff]  }
 0x58b   :  { %v33855_v46 = vpop.f32.mrb[32].mxu1 }
 0x58c   :  { %v24808_v17 = vpop.f32.mrb[33].mxu1  ;;  %19235 = vmatpush1.bf16.msra.mxu0 %v27262_v63  ;;  %v27306_v63 = vld [vmem:[%s38116_s3 + $0x5bc] ss:$28 sps:$4 sm:$0xff]  }
 0x58d   :  { %18766 = vmatpush1.bf16.msra.mxu1 %v27259_v53  ;;  %v33860_v55 = vpop.f32.mrb[34].mxu1  ;;  %19236 = vmatprep.subr.bf16.mxu0 %v27270_v38  ;;  %v27303_v53 = vld [vmem:[%s38116_s3 + $0xd24] ss:$28 sps:$4 sm:$0xff]   ;;  %v27304_v38 = vld [vmem:[%s38116_s3 + $0x5b8] ss:$28 sps:$4 sm:$0xff]  }
 0x58e   :  { %v24809_v6 = vpop.f32.mrb[35].mxu1  ;;  %18767 = vmatprep.subr.bf16.mxu1 %v27267_v37  ;;  %v27301_v37 = vld [vmem:[%s38116_s3 + $0xd20] ss:$28 sps:$4 sm:$0xff]  }
 0x58f   :  { %v27309_v17 = vld [vmem:[%s38116_s3 + $0xd5c] ss:$28 sps:$4 sm:$0xff]   ;;  %v27310_v6 = vld [vmem:[%s38116_s3 + $0x5f0] ss:$28 sps:$4 sm:$0xff]  }
 0x590   :  { %19237 = vmatpush1.bf16.msra.mxu0 %v27268_v61  ;;  %v27307_v61 = vld [vmem:[%s38116_s3 + $0xd58] ss:$28 sps:$4 sm:$0xff]  }
 0x591   :  { %18768 = vmatpush1.bf16.msra.mxu1 %v27265_v40  ;;  %19238 = vmatprep.subr.bf16.mxu0 %v27276_v4  ;;  %v27312_v40 = vld [vmem:[%s38116_s3 + $0x5f4] ss:$28 sps:$4 sm:$0xff]   ;;  %v27318_v4 = vld [vmem:[%s38116_s3 + $0x62c] ss:$28 sps:$4 sm:$0xff]  }
 0x592   :  { %18769 = vmatprep.subr.bf16.mxu1 %v27273_v10  ;;  %v27315_v10 = vld [vmem:[%s38116_s3 + $0xd94] ss:$28 sps:$4 sm:$0xff]  }
 0x594   :  { %19239 = vmatpush1.bf16.msra.mxu0 %v27274_v48  ;;  %v27316_v48 = vld [vmem:[%s38116_s3 + $0x628] ss:$28 sps:$4 sm:$0xff]  }
 0x595   :  { %18770 = vmatpush1.bf16.msra.mxu1 %v27271_v60  ;;  %19240 = vmatprep.subr.bf16.mxu0 %v27282_v14  ;;  %v27313_v60 = vld [vmem:[%s38116_s3 + $0xd90] ss:$28 sps:$4 sm:$0xff]   ;;  %v27324_v14 = vld [vmem:[%s38116_s3 + $0x664] ss:$28 sps:$4 sm:$0xff]  }
 0x596   :  { %18771 = vmatprep.subr.bf16.mxu1 %v27279_v59  ;;  %v27321_v59 = vld [vmem:[%s38116_s3 + $0xdcc] ss:$28 sps:$4 sm:$0xff]  }
 0x598   :  { %19241 = vmatpush1.bf16.msra.mxu0 %v27280_v25  ;;  %v27322_v25 = vld [vmem:[%s38116_s3 + $0x660] ss:$28 sps:$4 sm:$0xff]  }
 0x599   :  { %18772 = vmatpush1.bf16.msra.mxu1 %v27277_v15  ;;  %19242 = vmatprep.subr.bf16.mxu0 %v27288_v2  ;;  %v27319_v15 = vld [vmem:[%s38116_s3 + $0xdc8] ss:$28 sps:$4 sm:$0xff]   ;;  %v27330_v2 = vld [vmem:[%s38116_s3 + $0x69c] ss:$28 sps:$4 sm:$0xff]  }
 0x59a   :  { %18773 = vmatprep.subr.bf16.mxu1 %v27285_v18  ;;  %v27327_v18 = vld [vmem:[%s38116_s3 + $0xe04] ss:$28 sps:$4 sm:$0xff]  }
 0x59c   :  { %19243 = vmatpush1.bf16.msra.mxu0 %v27286_v11  ;;  %v27328_v11 = vld [vmem:[%s38116_s3 + $0x698] ss:$28 sps:$4 sm:$0xff]  }
 0x59d   :  { %18774 = vmatpush1.bf16.msra.mxu1 %v27283_v7  ;;  %19244 = vmatprep.subr.bf16.mxu0 %v27294_v16  ;;  %v27325_v7 = vld [vmem:[%s38116_s3 + $0xe00] ss:$28 sps:$4 sm:$0xff]   ;;  %v27336_v16 = vld [vmem:[%s38116_s3 + $0x6d4] ss:$28 sps:$4 sm:$0xff]  }
 0x59e   :  { %18775 = vmatprep.subr.bf16.mxu1 %v27291_v12  ;;  %v27333_v12 = vld [vmem:[%s38116_s3 + $0xe3c] ss:$28 sps:$4 sm:$0xff]  }
 0x5a0   :  { %19245 = vmatpush1.bf16.msra.mxu0 %v27292_v23  ;;  %v27334_v23 = vld [vmem:[%s38116_s3 + $0x6d0] ss:$28 sps:$4 sm:$0xff]  }
 0x5a1   :  { %18776 = vmatpush1.bf16.msra.mxu1 %v27289_v30  ;;  %19246 = vmatprep.subr.bf16.mxu0 %v27300_v28  ;;  %v27331_v30 = vld [vmem:[%s38116_s3 + $0xe38] ss:$28 sps:$4 sm:$0xff]   ;;  %v27342_v28 = vld [vmem:[%s38116_s3 + $0x70c] ss:$28 sps:$4 sm:$0xff]  }
 0x5a2   :  { %18777 = vmatprep.subr.bf16.mxu1 %v27297_v49  ;;  %v27339_v49 = vld [vmem:[%s38116_s3 + $0xe74] ss:$28 sps:$4 sm:$0xff]  }
 0x5a4   :  { %19247 = vmatpush1.bf16.msra.mxu0 %v27298_v35  ;;  %v27340_v35 = vld [vmem:[%s38116_s3 + $0x708] ss:$28 sps:$4 sm:$0xff]  }
 0x5a5   :  { %18778 = vmatpush1.bf16.msra.mxu1 %v27295_v20  ;;  %19248 = vmatprep.subr.bf16.mxu0 %v27306_v63  ;;  %v27337_v20 = vld [vmem:[%s38116_s3 + $0xe70] ss:$28 sps:$4 sm:$0xff]   ;;  %v27348_v63 = vld [vmem:[%s38116_s3 + $0x744] ss:$28 sps:$4 sm:$0xff]  }
 0x5a6   :  { %18779 = vmatprep.subr.bf16.mxu1 %v27303_v53  ;;  %v27345_v53 = vld [vmem:[%s38116_s3 + $0xeac] ss:$28 sps:$4 sm:$0xff]  }
 0x5a8   :  { %19249 = vmatpush1.bf16.msra.mxu0 %v27304_v38  ;;  %v27346_v38 = vld [vmem:[%s38116_s3 + $0x740] ss:$28 sps:$4 sm:$0xff]  }
 0x5a9   :  { %18780 = vmatpush1.bf16.msra.mxu1 %v27301_v37  ;;  %19250 = vmatprep.subr.bf16.mxu0 %v27312_v40  ;;  %v27343_v37 = vld [vmem:[%s38116_s3 + $0xea8] ss:$28 sps:$4 sm:$0xff]   ;;  %v27354_v40 = vld [vmem:[%s38116_s3 + $0x77c] ss:$28 sps:$4 sm:$0xff]  }
 0x5aa   :  { %18781 = vmatprep.subr.bf16.mxu1 %v27309_v17  ;;  %v27351_v17 = vld [vmem:[%s38116_s3 + $0xee4] ss:$28 sps:$4 sm:$0xff]  }
 0x5ac   :  { %19251 = vmatpush1.bf16.msra.mxu0 %v27310_v6  ;;  %v27352_v6 = vld [vmem:[%s38116_s3 + $0x778] ss:$28 sps:$4 sm:$0xff]  }
 0x5ad   :  { %18782 = vmatpush1.bf16.msra.mxu1 %v27307_v61  ;;  %19252 = vmatprep.subr.bf16.mxu0 %v27318_v4  ;;  %v27349_v61 = vld [vmem:[%s38116_s3 + $0xee0] ss:$28 sps:$4 sm:$0xff]   ;;  %v27360_v4 = vld [vmem:[%s38116_s3 + $0x7b4] ss:$28 sps:$4 sm:$0xff]  }
 0x5ae   :  { %18783 = vmatprep.subr.bf16.mxu1 %v27315_v10  ;;  %v27357_v10 = vld [vmem:[%s38116_s3 + $0xf1c] ss:$28 sps:$4 sm:$0xff]  }
 0x5b0   :  { %19253 = vmatpush1.bf16.msra.mxu0 %v27316_v48  ;;  %v27358_v48 = vld [vmem:[%s38116_s3 + $0x7b0] ss:$28 sps:$4 sm:$0xff]  }
 0x5b1   :  { %18784 = vmatpush1.bf16.msra.mxu1 %v27313_v60  ;;  %19254 = vmatprep.subr.bf16.mxu0 %v27324_v14  ;;  %v27355_v60 = vld [vmem:[%s38116_s3 + $0xf18] ss:$28 sps:$4 sm:$0xff]   ;;  %v27366_v14 = vld [vmem:[%s38116_s3 + $0x7ec] ss:$28 sps:$4 sm:$0xff]  }
 0x5b2   :  { %18785 = vmatprep.subr.bf16.mxu1 %v27321_v59  ;;  %v27363_v59 = vld [vmem:[%s38116_s3 + $0xf54] ss:$28 sps:$4 sm:$0xff]  }
 0x5b4   :  { %19255 = vmatpush1.bf16.msra.mxu0 %v27322_v25  ;;  %v27364_v25 = vld [vmem:[%s38116_s3 + $0x7e8] ss:$28 sps:$4 sm:$0xff]  }
 0x5b5   :  { %18786 = vmatpush1.bf16.msra.mxu1 %v27319_v15  ;;  %19256 = vmatprep.subr.bf16.mxu0 %v27330_v2  ;;  %v27361_v15 = vld [vmem:[%s38116_s3 + $0xf50] ss:$28 sps:$4 sm:$0xff]   ;;  %v27372_v2 = vld [vmem:[%s38116_s3 + $0x824] ss:$28 sps:$4 sm:$0xff]  }
 0x5b6   :  { %18798 = vmatprep.subr.bf16.mxu1 %v27327_v18  ;;  %v27369_v18 = vld [vmem:[%s38116_s3 + $0xf8c] ss:$28 sps:$4 sm:$0xff]  }
 0x5b8   :  { %18788 = vmatmul.mubr.bf16.vlgmr.msra.gmra.mrb[36].mxu1 %v31134_v24  ;;  %19257 = vmatpush1.bf16.msra.mxu0 %v27328_v11  ;;  %v27370_v11 = vld [vmem:[%s38116_s3 + $0x820] ss:$28 sps:$4 sm:$0xff]  }
 0x5b9   :  { %18799 = vmatpush1.bf16.msra.mxu1 %v27325_v7  ;;  %18830 = vmatprep.mubr.bf16.mxu1 %v32161_v57  ;;  %v27367_v7 = vld [vmem:[%s38116_s3 + $0xf88] ss:$28 sps:$4 sm:$0xff]  }
 0x5ba   :  { %18800 = vmatprep.subr.bf16.mxu1 %v27333_v12  ;;  %19258 = vmatprep.subr.bf16.mxu0 %v27336_v16  ;;  %v1403_v12 = vrot.slane %v33708_v5, %v31442_v31  ;;  %v27375_v16 = vld [vmem:[%s38116_s3 + $0xfc4] ss:$28 sps:$4 sm:$0xff]  }
 0x5bc   :  { %19259 = vmatpush1.bf16.msra.mxu0 %v27334_v23  ;;  %v1407_v23 = vrot.slane %v33708_v5, %v31451_v33  ;;  %v27384_v5 = vld [vmem:[%s38116_s3 + $0x894] ss:$28 sps:$4 sm:$0xff]  }
 0x5bd   :  { %18801 = vmatpush1.bf16.msra.mxu1 %v27331_v30  ;;  %19271 = vmatprep.subr.bf16.mxu0 %v27342_v28  ;;  %v27378_v30 = vld [vmem:[%s38116_s3 + $0x85c] ss:$28 sps:$4 sm:$0xff]  }
 0x5be   :  { %18802 = vmatprep.subr.bf16.mxu1 %v27339_v49  ;;  %v27373_v49 = vld [vmem:[%s38116_s3 + $0xfc0] ss:$28 sps:$4 sm:$0xff]  }
 0x5bf   :  { %19261 = vmatmul.mubr.bf16.vlgmr.msra.gmra.mrb[36].mxu0 %v30823_v19 }
 0x5c0   :  { %19272 = vmatpush1.bf16.msra.mxu0 %v27340_v35  ;;  %19303 = vmatprep.mubr.bf16.mxu0 %v31499_v9 }
 0x5c1   :  { %18803 = vmatpush1.bf16.msra.mxu1 %v27337_v20  ;;  %19273 = vmatprep.subr.bf16.mxu0 %v27348_v63  ;;  %v27376_v20 = vld [vmem:[%s38116_s3 + $0x858] ss:$28 sps:$4 sm:$0xff]  }
 0x5c2   :  { %18804 = vmatprep.subr.bf16.mxu1 %v27345_v53  ;;  %v27381_v63 = vld [vmem:[%s38116_s3 + $0xffc] ss:$28 sps:$4 sm:$0xff]  }
 0x5c4   :  { %19274 = vmatpush1.bf16.msra.mxu0 %v27346_v38 }
 0x5c5   :  { %18805 = vmatpush1.bf16.msra.mxu1 %v27343_v37  ;;  %19275 = vmatprep.subr.bf16.mxu0 %v27354_v40 }
 0x5c6   :  { %18806 = vmatprep.subr.bf16.mxu1 %v27351_v17 }
 0x5c8   :  { %19276 = vmatpush1.bf16.msra.mxu0 %v27352_v6  ;;  %v27379_v6 = vld [vmem:[%s38116_s3 + $0xff8] ss:$28 sps:$4 sm:$0xff]  }
 0x5c9   :  { %18807 = vmatpush1.bf16.msra.mxu1 %v27349_v61  ;;  %19277 = vmatprep.subr.bf16.mxu0 %v27360_v4 }
 0x5ca   :  { %18808 = vmatprep.subr.bf16.mxu1 %v27357_v10 }
 0x5cc   :  { %19278 = vmatpush1.bf16.msra.mxu0 %v27358_v48 }
 0x5cd   :  { %18809 = vmatpush1.bf16.msra.mxu1 %v27355_v60  ;;  %19279 = vmatprep.subr.bf16.mxu0 %v27366_v14  ;;  %v27382_v60 = vld [vmem:[%s38116_s3 + $0x890] ss:$28 sps:$4 sm:$0xff]  }
 0x5ce   :  { %18810 = vmatprep.subr.bf16.mxu1 %v27363_v59  ;;  %v27387_v59 = vld [vmem:[%s38116_s3 + $0x1034] ss:$28 sps:$4 sm:$0xff]   ;;  %v27390_v14 = vld [vmem:[%s38116_s3 + $0x8cc] ss:$28 sps:$4 sm:$0xff]  }
 0x5d0   :  { %19280 = vmatpush1.bf16.msra.mxu0 %v27364_v25 }
 0x5d1   :  { %18811 = vmatpush1.bf16.msra.mxu1 %v27361_v15  ;;  %19281 = vmatprep.subr.bf16.mxu0 %v27372_v2 }
 0x5d2   :  { %18812 = vmatprep.subr.bf16.mxu1 %v27369_v18  ;;  %v9541_v28 = vpop.f32.mrb[24].mxu0  ;;  %v27385_v18 = vld [vmem:[%s38116_s3 + $0x1030] ss:$28 sps:$4 sm:$0xff]  }
 0x5d3   :  { %v24900_v35 = vadd.f32 %v9541_v28, %v1403_v12  ;;  %v9543_v53 = vpop.f32.mrb[25].mxu0  ;;  %v27397_v28 = vld [vmem:[%s38116_s3 + $0x10a0] ss:$28 sps:$4 sm:$0xff]  }
 0x5d4   :  { %19282 = vmatpush1.bf16.msra.mxu0 %v27370_v11  ;;  %v24901_v37 = vadd.f32 %v9543_v53, %v1407_v23  ;;  %v9545_v38 = vpop.f32.mrb[26].mxu0  ;;  %v27393_v11 = vld [vmem:[%s38116_s3 + $0x106c] ss:$28 sps:$4 sm:$0xff]   ;;  %v27408_v53 = vld [vmem:[%s38116_s3 + $0x974] ss:$28 sps:$4 sm:$0xff]  }
 0x5d5   :  { %18813 = vmatpush1.bf16.msra.mxu1 %v27367_v7  ;;  %19283 = vmatprep.subr.bf16.mxu0 %v27378_v30  ;;  %v9906_v17 = vmax.f32 %v24900_v35, 0.0  ;;  %v24902_v40 = vadd.f32 %v9545_v38, %v1403_v12  ;;  %v9547_v61 = vpop.f32.mrb[27].mxu0  ;;  %v27388_v7 = vld [vmem:[%s38116_s3 + $0x8c8] ss:$28 sps:$4 sm:$0xff]   ;;  %v27394_v30 = vld [vmem:[%s38116_s3 + $0x900] ss:$28 sps:$4 sm:$0xff]  }
 0x5d6   :  { %18814 = vmatprep.subr.bf16.mxu1 %v27375_v16  ;;  %v9907_v10 = vmax.f32 %v24901_v37, 0.0  ;;  %v24903_v4 = vadd.f32 %v9547_v61, %v1407_v23  ;;  %v27396_v12 = vld [vmem:[%s38116_s3 + $0x904] ss:$28 sps:$4 sm:$0xff]   ;;  %v27405_v35 = vld [vmem:[%s38116_s3 + $0x10dc] ss:$28 sps:$4 sm:$0xff]  }
 0x5d7   :  { %v9931_v48 = vmax.f32 %v24902_v40, 0.0  ;;  %v27391_v16 = vld [vmem:[%s38116_s3 + $0x1068] ss:$28 sps:$4 sm:$0xff]   ;;  %v27411_v37 = vld [vmem:[%s38116_s3 + $0x1114] ss:$28 sps:$4 sm:$0xff]  }
 0x5d8   :  { %19284 = vmatpush1.bf16.msra.mxu0 %v27376_v20  ;;  %v9932_v15 = vmax.f32 %v24903_v4, 0.0  ;;  %v27399_v23 = vld [vmem:[%s38116_s3 + $0x10a4] ss:$28 sps:$4 sm:$0xff]   ;;  %v27400_v20 = vld [vmem:[%s38116_s3 + $0x938] ss:$28 sps:$4 sm:$0xff]  }
 0x5d9   :  { %18815 = vmatpush1.bf16.msra.mxu1 %v27373_v49  ;;  %19285 = vmatprep.subr.bf16.mxu0 %v27384_v5  ;;  %v34107_v25 = vpack.c.bf16 %v9931_v48, %v9906_v17  ;;  %v27402_v49 = vld [vmem:[%s38116_s3 + $0x93c] ss:$28 sps:$4 sm:$0xff]   ;;  %v27406_v5 = vld [vmem:[%s38116_s3 + $0x970] ss:$28 sps:$4 sm:$0xff]   ;;  %v27412_v40 = vld [vmem:[%s38116_s3 + $0x9a8] ss:$28 sps:$4 sm:$0xff]  }
 0x5da   :  { %18816 = vmatprep.subr.bf16.mxu1 %v27381_v63  ;;  %v34112_v2 = vpack.c.bf16 %v9932_v15, %v9907_v10  ;;  %v27403_v63 = vld [vmem:[%s38116_s3 + $0x10d8] ss:$28 sps:$4 sm:$0xff]   ;;  %v27414_v38 = vld [vmem:[%s38116_s3 + $0x9ac] ss:$28 sps:$4 sm:$0xff]   ;;  %v27418_v4 = vld [vmem:[%s38116_s3 + $0x9e0] ss:$28 sps:$4 sm:$0xff]  }
 0x5db   :  { %v27409_v17 = vld [vmem:[%s38116_s3 + $0x1110] ss:$28 sps:$4 sm:$0xff]   ;;  %v27415_v10 = vld [vmem:[%s38116_s3 + $0x1148] ss:$28 sps:$4 sm:$0xff]   ;;  %v27426_v48 = vld [vmem:[%s38116_s3 + $0xa1c] ss:$28 sps:$4 sm:$0xff]  }
 0x5dc   :  { %19286 = vmatpush1.bf16.msra.mxu0 %v27382_v60  ;;  %v27417_v61 = vld [vmem:[%s38116_s3 + $0x114c] ss:$28 sps:$4 sm:$0xff]   ;;  %v27423_v60 = vld [vmem:[%s38116_s3 + $0x1184] ss:$28 sps:$4 sm:$0xff]  }
 0x5dd   :  { %18817 = vmatpush1.bf16.msra.mxu1 %v27379_v6  ;;  %19287 = vmatprep.subr.bf16.mxu0 %v27390_v14  ;;  %v27420_v6 = vld [vmem:[%s38116_s3 + $0x9e4] ss:$28 sps:$4 sm:$0xff]  }
 0x5de   :  { %18818 = vmatprep.subr.bf16.mxu1 %v27387_v59  ;;  %v21744_v59 = vld [vmem:[%s38115_s2 + $0x18] ss:$0 sm:$0xff]  ;;  %v27421_v15 = vld [vmem:[%s38116_s3 + $0x1180] ss:$28 sps:$4 sm:$0xff]  }
 0x5e0   :  { %19288 = vmatpush1.bf16.msra.mxu0 %v27388_v7  ;;  %v27424_v7 = vld [vmem:[%s38116_s3 + $0xa18] ss:$28 sps:$4 sm:$0xff]  }
 0x5e1   :  { %18819 = vmatpush1.bf16.msra.mxu1 %v27385_v18  ;;  %19289 = vmatprep.subr.bf16.mxu0 %v27396_v12 }
 0x5e2   :  { %18820 = vmatprep.subr.bf16.mxu1 %v27393_v11 }
 0x5e4   :  { %19290 = vmatpush1.bf16.msra.mxu0 %v27394_v30 }
 0x5e5   :  { %18821 = vmatpush1.bf16.msra.mxu1 %v27391_v16  ;;  %19291 = vmatprep.subr.bf16.mxu0 %v27402_v49  ;;  %v27429_v16 = vld [vmem:[%s38116_s3 + $0x11bc] ss:$28 sps:$4 sm:$0xff]  }
 0x5e6   :  { %18822 = vmatprep.subr.bf16.mxu1 %v27399_v23  ;;  %v27432_v23 = vld [vmem:[%s38116_s3 + $0xa54] ss:$28 sps:$4 sm:$0xff]  }
 0x5e8   :  { %19292 = vmatpush1.bf16.msra.mxu0 %v27400_v20  ;;  %v27427_v20 = vld [vmem:[%s38116_s3 + $0x11b8] ss:$28 sps:$4 sm:$0xff]  }
 0x5e9   :  { %18823 = vmatpush1.bf16.msra.mxu1 %v27397_v28  ;;  %19293 = vmatprep.subr.bf16.mxu0 %v27408_v53 }
 0x5ea   :  { %18824 = vmatprep.subr.bf16.mxu1 %v27405_v35  ;;  %v27430_v35 = vld [vmem:[%s38116_s3 + $0xa50] ss:$28 sps:$4 sm:$0xff]  }
 0x5ec   :  { %19294 = vmatpush1.bf16.msra.mxu0 %v27406_v5  ;;  %v27438_v5 = vld [vmem:[%s38116_s3 + $0xa8c] ss:$28 sps:$4 sm:$0xff]  }
 0x5ed   :  { %18825 = vmatpush1.bf16.msra.mxu1 %v27403_v63  ;;  %19295 = vmatprep.subr.bf16.mxu0 %v27414_v38  ;;  %v27435_v63 = vld [vmem:[%s38116_s3 + $0x11f4] ss:$28 sps:$4 sm:$0xff]  }
 0x5ee   :  { %18826 = vmatprep.subr.bf16.mxu1 %v27411_v37  ;;  %v27433_v38 = vld [vmem:[%s38116_s3 + $0x11f0] ss:$28 sps:$4 sm:$0xff]  }
 0x5f0   :  { %19296 = vmatpush1.bf16.msra.mxu0 %v27412_v40  ;;  %v27436_v40 = vld [vmem:[%s38116_s3 + $0xa88] ss:$28 sps:$4 sm:$0xff]  }
 0x5f1   :  { %18827 = vmatpush1.bf16.msra.mxu1 %v27409_v17  ;;  %19297 = vmatprep.subr.bf16.mxu0 %v27420_v6  ;;  %v27442_v6 = vld [vmem:[%s38116_s3 + $0xac0] ss:$28 sps:$4 sm:$0xff]  }
 0x5f2   :  { %18828 = vmatprep.subr.bf16.mxu1 %v27417_v61  ;;  %v24483_v14 = vpop.f32.mrb[28].mxu0  ;;  %v27444_v61 = vld [vmem:[%s38116_s3 + $0xac4] ss:$28 sps:$4 sm:$0xff]  }
 0x5f3   :  { %v24484_v18 = vpop.f32.mrb[29].mxu0 }
 0x5f4   :  { %v24485_v11 = vadd.f32 %v24484_v18, %v24483_v14  ;;  %v24486_v12 = vpop.f32.mrb[30].mxu0  ;;  %19298 = vmatpush1.bf16.msra.mxu0 %v27418_v4  ;;  %v27450_v4 = vld [vmem:[%s38116_s3 + $0xafc] ss:$28 sps:$4 sm:$0xff]   ;;  %v27456_v14 = vld [vmem:[%s38116_s3 + $0xb34] ss:$28 sps:$4 sm:$0xff]  }
 0x5f5   :  { %18829 = vmatpush1.bf16.msra.mxu1 %v27415_v10  ;;  %v24487_v30 = vpop.f32.mrb[31].mxu0  ;;  %19299 = vmatprep.subr.bf16.mxu0 %v27426_v48  ;;  %v27447_v10 = vld [vmem:[%s38116_s3 + $0x1264] ss:$28 sps:$4 sm:$0xff]   ;;  %v27448_v48 = vld [vmem:[%s38116_s3 + $0xaf8] ss:$28 sps:$4 sm:$0xff]  }
 0x5f6   :  { %18841 = vmatprep.subr.bf16.mxu1 %v27423_v60  ;;  %v9757_v49 = vadd.f32 %v24485_v11, %v21744_v59  ;;  %v24488_v28 = vadd.f32 %v24487_v30, %v24486_v12  ;;  %v27445_v60 = vld [vmem:[%s38116_s3 + $0x1260] ss:$28 sps:$4 sm:$0xff]   ;;  %v27454_v18 = vld [vmem:[%s38116_s3 + $0xb30] ss:$28 sps:$4 sm:$0xff]  }
 0x5f7   :  { %v27462_v11 = vld [vmem:[%s38116_s3 + $0xb6c] ss:$28 sps:$4 sm:$0xff]  }
 0x5f8   :  { %18831 = vmatmul.mubr.bf16.vlgmr.msra.gmra.mrb[36].mxu1 %v32159_v51  ;;  %v9760_v53 = vadd.f32 %v24488_v28, %v21744_v59  ;;  %19300 = vmatpush1.bf16.msra.mxu0 %v27424_v7  ;;  %v34213_v37 = vadd.f32 %v33830_v41, %v9757_v49  ;;  %v27441_v41 = vld [vmem:[%s38116_s3 + $0x122c] ss:$28 sps:$4 sm:$0xff]   ;;  %v27453_v59 = vld [vmem:[%s38116_s3 + $0x129c] ss:$28 sps:$4 sm:$0xff]   ;;  %v27459_v7 = vld [vmem:[%s38116_s3 + $0x12d4] ss:$28 sps:$4 sm:$0xff]  }
 0x5f9   :  { %18842 = vmatpush1.bf16.msra.mxu1 %v27421_v15  ;;  %18873 = vmatprep.mubr.bf16.mxu1 %v31810_v34  ;;  %v27451_v15 = vld [vmem:[%s38116_s3 + $0x1298] ss:$28 sps:$4 sm:$0xff]   ;;  %v27457_v12 = vld [vmem:[%s38116_s3 + $0x12d0] ss:$28 sps:$4 sm:$0xff]   ;;  %v27463_v49 = vld [vmem:[%s38116_s3 + $0x1308] ss:$28 sps:$4 sm:$0xff]  }
 0x5fa   :  { %18843 = vmatprep.subr.bf16.mxu1 %v27429_v16  ;;  %19301 = vmatprep.subr.bf16.mxu0 %v27432_v23  ;;  %v34219_v17 = vadd.f32 %v33841_v36, %v9760_v53  ;;  %v27439_v36 = vld [vmem:[%s38116_s3 + $0x1228] ss:$28 sps:$4 sm:$0xff]   ;;  %v27466_v28 = vld [vmem:[%s38116_s3 + $0xba0] ss:$28 sps:$4 sm:$0xff]  }
 0x5fb   :  { %v27460_v16 = vld [vmem:[%s38116_s3 + $0xb68] ss:$28 sps:$4 sm:$0xff]  }
 0x5fc   :  { %19302 = vmatpush1.bf16.msra.mxu0 %v27430_v35  ;;  %v27465_v30 = vld [vmem:[%s38116_s3 + $0x130c] ss:$28 sps:$4 sm:$0xff]   ;;  %v27468_v23 = vld [vmem:[%s38116_s3 + $0xba4] ss:$28 sps:$4 sm:$0xff]   ;;  %v27474_v35 = vld [vmem:[%s38116_s3 + $0xbdc] ss:$28 sps:$4 sm:$0xff]  }
 0x5fd   :  { %18844 = vmatpush1.bf16.msra.mxu1 %v27427_v20  ;;  %19314 = vmatprep.subr.bf16.mxu0 %v27438_v5  ;;  %v27471_v20 = vld [vmem:[%s38116_s3 + $0x1344] ss:$28 sps:$4 sm:$0xff]  }
 0x5fe   :  { %18845 = vmatprep.subr.bf16.mxu1 %v27435_v63  ;;  %v27469_v63 = vld [vmem:[%s38116_s3 + $0x1340] ss:$28 sps:$4 sm:$0xff]  }
 0x5ff   :  { %19304 = vmatmul.mubr.bf16.vlgmr.msra.gmra.mrb[36].mxu0 %v31497_v8 }
 0x600   :  { %19315 = vmatpush1.bf16.msra.mxu0 %v27436_v40  ;;  %19346 = vmatprep.mubr.bf16.mxu0 %v31142_v27 }
 0x601   :  { %18846 = vmatpush1.bf16.msra.mxu1 %v27433_v38  ;;  %19316 = vmatprep.subr.bf16.mxu0 %v27444_v61  ;;  %v27472_v38 = vld [vmem:[%s38116_s3 + $0xbd8] ss:$28 sps:$4 sm:$0xff]  }
 0x602   :  { %18847 = vmatprep.subr.bf16.mxu1 %v27441_v41  ;;  %v27477_v61 = vld [vmem:[%s38116_s3 + $0x137c] ss:$28 sps:$4 sm:$0xff]  }
 0x604   :  { %19317 = vmatpush1.bf16.msra.mxu0 %v27442_v6 }
 0x605   :  { %18848 = vmatpush1.bf16.msra.mxu1 %v27439_v36  ;;  %19318 = vmatprep.subr.bf16.mxu0 %v27450_v4  ;;  %v27480_v36 = vld [vmem:[%s38116_s3 + $0xc14] ss:$28 sps:$4 sm:$0xff]  }
 0x606   :  { %18849 = vmatprep.subr.bf16.mxu1 %v27447_v10 }
 0x608   :  { %19319 = vmatpush1.bf16.msra.mxu0 %v27448_v48  ;;  %v27478_v48 = vld [vmem:[%s38116_s3 + $0xc10] ss:$28 sps:$4 sm:$0xff]  }
 0x609   :  { %18850 = vmatpush1.bf16.msra.mxu1 %v27445_v60  ;;  %19320 = vmatprep.subr.bf16.mxu0 %v27456_v14  ;;  %v27475_v60 = vld [vmem:[%s38116_s3 + $0x1378] ss:$28 sps:$4 sm:$0xff]  }
 0x60a   :  { %18851 = vmatprep.subr.bf16.mxu1 %v27453_v59 }
 0x60c   :  { %19321 = vmatpush1.bf16.msra.mxu0 %v27454_v18  ;;  %v27481_v18 = vld [vmem:[%s38116_s3 + $0x13b0] ss:$28 sps:$4 sm:$0xff]  }
 0x60d   :  { %18852 = vmatpush1.bf16.msra.mxu1 %v27451_v15  ;;  %19322 = vmatprep.subr.bf16.mxu0 %v27462_v11  ;;  %v27486_v15 = vld [vmem:[%s38116_s3 + $0xc4c] ss:$28 sps:$4 sm:$0xff]  }
 0x60e   :  { %18853 = vmatprep.subr.bf16.mxu1 %v27459_v7 }
 0x610   :  { %19323 = vmatpush1.bf16.msra.mxu0 %v27460_v16  ;;  %v27492_v16 = vld [vmem:[%s38116_s3 + $0xc84] ss:$28 sps:$4 sm:$0xff]  }
 0x611   :  { %18854 = vmatpush1.bf16.msra.mxu1 %v27457_v12  ;;  %19324 = vmatprep.subr.bf16.mxu0 %v27468_v23  ;;  %v27490_v23 = vld [vmem:[%s38116_s3 + $0xc80] ss:$28 sps:$4 sm:$0xff]  }
 0x612   :  { %18855 = vmatprep.subr.bf16.mxu1 %v27465_v30  ;;  %v24527_v53 = vpop.f32.mrb[32].mxu0 }
 0x613   :  { %v24528_v5 = vpop.f32.mrb[33].mxu0 }
 0x614   :  { %v24529_v40 = vadd.f32 %v24528_v5, %v24527_v53  ;;  %v24530_v41 = vpop.f32.mrb[34].mxu0  ;;  %19325 = vmatpush1.bf16.msra.mxu0 %v27466_v28  ;;  %v27498_v28 = vld [vmem:[%s38116_s3 + $0xcbc] ss:$28 sps:$4 sm:$0xff]  }
 0x615   :  { %18856 = vmatpush1.bf16.msra.mxu1 %v27463_v49  ;;  %v24531_v6 = vpop.f32.mrb[35].mxu0  ;;  %19326 = vmatprep.subr.bf16.mxu0 %v27474_v35  ;;  %v27495_v49 = vld [vmem:[%s38116_s3 + $0x1424] ss:$28 sps:$4 sm:$0xff]   ;;  %v27496_v35 = vld [vmem:[%s38116_s3 + $0xcb8] ss:$28 sps:$4 sm:$0xff]  }
 0x616   :  { %18857 = vmatprep.subr.bf16.mxu1 %v27471_v20  ;;  %v9839_v10 = vadd.f32 %v24529_v40, %v34213_v37  ;;  %v24532_v4 = vadd.f32 %v24531_v6, %v24530_v41  ;;  %v27483_v37 = vld [vmem:[%s38116_s3 + $0x13b4] ss:$28 sps:$4 sm:$0xff]   ;;  %v27493_v20 = vld [vmem:[%s38116_s3 + $0x1420] ss:$28 sps:$4 sm:$0xff]   ;;  %v27510_v41 = vld [vmem:[%s38116_s3 + $0xd2c] ss:$28 sps:$4 sm:$0xff]  }
 0x617   :  { %v27501_v53 = vld [vmem:[%s38116_s3 + $0x145c] ss:$28 sps:$4 sm:$0xff]   ;;  %v27507_v40 = vld [vmem:[%s38116_s3 + $0x1494] ss:$28 sps:$4 sm:$0xff]   ;;  %v27513_v6 = vld [vmem:[%s38116_s3 + $0x14cc] ss:$28 sps:$4 sm:$0xff]  }
 0x618   :  { %v9880_v59 = vadd.f32 %v33855_v46, %v9839_v10  ;;  %v9842_v14 = vadd.f32 %v24532_v4, %v34219_v17  ;;  %19327 = vmatpush1.bf16.msra.mxu0 %v27472_v38  ;;  %v27484_v46 = vld [vmem:[%s38116_s3 + $0xc48] ss:$28 sps:$4 sm:$0xff]   ;;  %v27499_v5 = vld [vmem:[%s38116_s3 + $0x1458] ss:$28 sps:$4 sm:$0xff]   ;;  %v27502_v38 = vld [vmem:[%s38116_s3 + $0xcf0] ss:$28 sps:$4 sm:$0xff]  }
 0x619   :  { %18858 = vmatpush1.bf16.msra.mxu1 %v27469_v63  ;;  %19328 = vmatprep.subr.bf16.mxu0 %v27480_v36  ;;  %v27489_v17 = vld [vmem:[%s38116_s3 + $0x13ec] ss:$28 sps:$4 sm:$0xff]   ;;  %v27504_v63 = vld [vmem:[%s38116_s3 + $0xcf4] ss:$28 sps:$4 sm:$0xff]   ;;  %v27516_v10 = vld [vmem:[%s38116_s3 + $0xd64] ss:$28 sps:$4 sm:$0xff]  }
 0x61a   :  { %18859 = vmatprep.subr.bf16.mxu1 %v27477_v61  ;;  %v9883_v7 = vadd.f32 %v33860_v55, %v9842_v14  ;;  %v9910_v11 = vmax.f32 %v9880_v59, 0.0  ;;  %v27487_v55 = vld [vmem:[%s38116_s3 + $0x13e8] ss:$28 sps:$4 sm:$0xff]   ;;  %v27505_v61 = vld [vmem:[%s38116_s3 + $0x1490] ss:$28 sps:$4 sm:$0xff]  }
 0x61b   :  { %v27508_v36 = vld [vmem:[%s38116_s3 + $0xd28] ss:$28 sps:$4 sm:$0xff]   ;;  %v27522_v59 = vld [vmem:[%s38116_s3 + $0xd9c] ss:$28 sps:$4 sm:$0xff]  }
 0x61c   :  { %v9935_v12 = vmax.f32 %v9883_v7, 0.0  ;;  %19329 = vmatpush1.bf16.msra.mxu0 %v27478_v48  ;;  %v27511_v4 = vld [vmem:[%s38116_s3 + $0x14c8] ss:$28 sps:$4 sm:$0xff]   ;;  %v27517_v14 = vld [vmem:[%s38116_s3 + $0x1500] ss:$28 sps:$4 sm:$0xff]  }
 0x61d   :  { %18860 = vmatpush1.bf16.msra.mxu1 %v27475_v60  ;;  %19330 = vmatprep.subr.bf16.mxu0 %v27486_v15  ;;  %v27514_v60 = vld [vmem:[%s38116_s3 + $0xd60] ss:$28 sps:$4 sm:$0xff]   ;;  %v27523_v7 = vld [vmem:[%s38116_s3 + $0x1538] ss:$28 sps:$4 sm:$0xff]  }
 0x61e   :  { %18861 = vmatprep.subr.bf16.mxu1 %v27483_v37  ;;  %v34332_v30 = vpack.c.bf16 %v9935_v12, %v9910_v11  ;;  %v27519_v48 = vld [vmem:[%s38116_s3 + $0x1504] ss:$28 sps:$4 sm:$0xff]   ;;  %v27520_v37 = vld [vmem:[%s38116_s3 + $0xd98] ss:$28 sps:$4 sm:$0xff]   ;;  %v27534_v11 = vld [vmem:[%s38116_s3 + $0xe0c] ss:$28 sps:$4 sm:$0xff]  }
 0x61f   :  { %v27525_v15 = vld [vmem:[%s38116_s3 + $0x153c] ss:$28 sps:$4 sm:$0xff]   ;;  %v27529_v12 = vld [vmem:[%s38116_s3 + $0x1570] ss:$28 sps:$4 sm:$0xff]  }
 0x620   :  { %19331 = vmatpush1.bf16.msra.mxu0 %v27484_v46  ;;  %v27526_v46 = vld [vmem:[%s38116_s3 + $0xdd0] ss:$28 sps:$4 sm:$0xff]  }
 0x621   :  { %18862 = vmatpush1.bf16.msra.mxu1 %v27481_v18  ;;  %19332 = vmatprep.subr.bf16.mxu0 %v27492_v16  ;;  %v27528_v18 = vld [vmem:[%s38116_s3 + $0xdd4] ss:$28 sps:$4 sm:$0xff]   ;;  %v27532_v16 = vld [vmem:[%s38116_s3 + $0xe08] ss:$28 sps:$4 sm:$0xff]  }
 0x622   :  { %18863 = vmatprep.subr.bf16.mxu1 %v27489_v17  ;;  %v27531_v17 = vld [vmem:[%s38116_s3 + $0x1574] ss:$28 sps:$4 sm:$0xff]  }
 0x624   :  { %19333 = vmatpush1.bf16.msra.mxu0 %v27490_v23  ;;  %v27540_v23 = vld [vmem:[%s38116_s3 + $0xe44] ss:$28 sps:$4 sm:$0xff]  }
 0x625   :  { %18864 = vmatpush1.bf16.msra.mxu1 %v27487_v55  ;;  %19334 = vmatprep.subr.bf16.mxu0 %v27498_v28  ;;  %v27537_v55 = vld [vmem:[%s38116_s3 + $0x15ac] ss:$28 sps:$4 sm:$0xff]   ;;  %v27538_v28 = vld [vmem:[%s38116_s3 + $0xe40] ss:$28 sps:$4 sm:$0xff]  }
 0x626   :  { %18865 = vmatprep.subr.bf16.mxu1 %v27495_v49  ;;  %v27535_v49 = vld [vmem:[%s38116_s3 + $0x15a8] ss:$28 sps:$4 sm:$0xff]  }
 0x628   :  { %19335 = vmatpush1.bf16.msra.mxu0 %v27496_v35  ;;  %v27546_v35 = vld [vmem:[%s38116_s3 + $0xe7c] ss:$28 sps:$4 sm:$0xff]  }
 0x629   :  { %18866 = vmatpush1.bf16.msra.mxu1 %v27493_v20  ;;  %19336 = vmatprep.subr.bf16.mxu0 %v27504_v63  ;;  %v27543_v20 = vld [vmem:[%s38116_s3 + $0x15e4] ss:$28 sps:$4 sm:$0xff]   ;;  %v27544_v63 = vld [vmem:[%s38116_s3 + $0xe78] ss:$28 sps:$4 sm:$0xff]  }
 0x62a   :  { %18867 = vmatprep.subr.bf16.mxu1 %v27501_v53  ;;  %v27541_v53 = vld [vmem:[%s38116_s3 + $0x15e0] ss:$28 sps:$4 sm:$0xff]  }
 0x62c   :  { %19337 = vmatpush1.bf16.msra.mxu0 %v27502_v38  ;;  %v27552_v38 = vld [vmem:[%s38116_s3 + $0xeb4] ss:$28 sps:$4 sm:$0xff]  }
 0x62d   :  { %18868 = vmatpush1.bf16.msra.mxu1 %v27499_v5  ;;  %19338 = vmatprep.subr.bf16.mxu0 %v27510_v41  ;;  %v27549_v5 = vld [vmem:[%s38116_s3 + $0x161c] ss:$28 sps:$4 sm:$0xff]   ;;  %v27550_v41 = vld [vmem:[%s38116_s3 + $0xeb0] ss:$28 sps:$4 sm:$0xff]  }
 0x62e   :  { %18869 = vmatprep.subr.bf16.mxu1 %v27507_v40  ;;  %v27547_v40 = vld [vmem:[%s38116_s3 + $0x1618] ss:$28 sps:$4 sm:$0xff]  }
 0x630   :  { %19339 = vmatpush1.bf16.msra.mxu0 %v27508_v36  ;;  %v27558_v36 = vld [vmem:[%s38116_s3 + $0xeec] ss:$28 sps:$4 sm:$0xff]  }
 0x631   :  { %18870 = vmatpush1.bf16.msra.mxu1 %v27505_v61  ;;  %19340 = vmatprep.subr.bf16.mxu0 %v27516_v10  ;;  %v27555_v61 = vld [vmem:[%s38116_s3 + $0x1654] ss:$28 sps:$4 sm:$0xff]   ;;  %v27556_v10 = vld [vmem:[%s38116_s3 + $0xee8] ss:$28 sps:$4 sm:$0xff]  }
 0x632   :  { %18871 = vmatprep.subr.bf16.mxu1 %v27513_v6  ;;  %v27553_v6 = vld [vmem:[%s38116_s3 + $0x1650] ss:$28 sps:$4 sm:$0xff]  }
 0x634   :  { %19341 = vmatpush1.bf16.msra.mxu0 %v27514_v60  ;;  %v27564_v60 = vld [vmem:[%s38116_s3 + $0xf24] ss:$28 sps:$4 sm:$0xff]  }
 0x635   :  { %18872 = vmatpush1.bf16.msra.mxu1 %v27511_v4  ;;  %19342 = vmatprep.subr.bf16.mxu0 %v27522_v59  ;;  %v27561_v4 = vld [vmem:[%s38116_s3 + $0x168c] ss:$28 sps:$4 sm:$0xff]   ;;  %v27562_v59 = vld [vmem:[%s38116_s3 + $0xf20] ss:$28 sps:$4 sm:$0xff]  }
 0x636   :  { %18884 = vmatprep.subr.bf16.mxu1 %v27519_v48  ;;  %v27559_v48 = vld [vmem:[%s38116_s3 + $0x1688] ss:$28 sps:$4 sm:$0xff]  }
 0x638   :  { %18874 = vmatmul.mubr.bf16.vlgmr.msra.gmra.mrb[36].mxu1 %v31802_v13  ;;  %19343 = vmatpush1.bf16.msra.mxu0 %v27520_v37  ;;  %v27570_v37 = vld [vmem:[%s38116_s3 + $0xf5c] ss:$28 sps:$4 sm:$0xff]  }
 0x639   :  { %18885 = vmatpush1.bf16.msra.mxu1 %v27517_v14  ;;  %18916 = vmatprep.mubr.bf16.mxu1 %v32806_v58  ;;  %v27567_v14 = vld [vmem:[%s38116_s3 + $0x16c4] ss:$28 sps:$4 sm:$0xff]  }
 0x63a   :  { %18886 = vmatprep.subr.bf16.mxu1 %v27525_v15  ;;  %19344 = vmatprep.subr.bf16.mxu0 %v27528_v18  ;;  %v27565_v15 = vld [vmem:[%s38116_s3 + $0x16c0] ss:$28 sps:$4 sm:$0xff]   ;;  %v27568_v18 = vld [vmem:[%s38116_s3 + $0xf58] ss:$28 sps:$4 sm:$0xff]  }
 0x63c   :  { %19345 = vmatpush1.bf16.msra.mxu0 %v27526_v46  ;;  %v27576_v46 = vld [vmem:[%s38116_s3 + $0xf94] ss:$28 sps:$4 sm:$0xff]  }
 0x63d   :  { %18887 = vmatpush1.bf16.msra.mxu1 %v27523_v7  ;;  %19357 = vmatprep.subr.bf16.mxu0 %v27534_v11  ;;  %v27573_v7 = vld [vmem:[%s38116_s3 + $0x16fc] ss:$28 sps:$4 sm:$0xff]   ;;  %v27574_v11 = vld [vmem:[%s38116_s3 + $0xf90] ss:$28 sps:$4 sm:$0xff]  }
 0x63e   :  { %18888 = vmatprep.subr.bf16.mxu1 %v27531_v17  ;;  %v27571_v17 = vld [vmem:[%s38116_s3 + $0x16f8] ss:$28 sps:$4 sm:$0xff]  }
 0x63f   :  { %19347 = vmatmul.mubr.bf16.vlgmr.msra.gmra.mrb[36].mxu0 %v31134_v24 }
 0x640   :  { %19358 = vmatpush1.bf16.msra.mxu0 %v27532_v16  ;;  %19389 = vmatprep.mubr.bf16.mxu0 %v32161_v57  ;;  %v27582_v16 = vld [vmem:[%s38116_s3 + $0xfcc] ss:$28 sps:$4 sm:$0xff]  }
 0x641   :  { %18889 = vmatpush1.bf16.msra.mxu1 %v27529_v12  ;;  %19359 = vmatprep.subr.bf16.mxu0 %v27540_v23  ;;  %v27579_v12 = vld [vmem:[%s38116_s3 + $0x1734] ss:$28 sps:$4 sm:$0xff]   ;;  %v27580_v23 = vld [vmem:[%s38116_s3 + $0xfc8] ss:$28 sps:$4 sm:$0xff]  }
 0x642   :  { %18890 = vmatprep.subr.bf16.mxu1 %v27537_v55  ;;  %v27577_v55 = vld [vmem:[%s38116_s3 + $0x1730] ss:$28 sps:$4 sm:$0xff]  }
 0x644   :  { %19360 = vmatpush1.bf16.msra.mxu0 %v27538_v28  ;;  %v27588_v28 = vld [vmem:[%s38116_s3 + $0x1004] ss:$28 sps:$4 sm:$0xff]  }
 0x645   :  { %18891 = vmatpush1.bf16.msra.mxu1 %v27535_v49  ;;  %19361 = vmatprep.subr.bf16.mxu0 %v27546_v35  ;;  %v27585_v49 = vld [vmem:[%s38116_s3 + $0x176c] ss:$28 sps:$4 sm:$0xff]   ;;  %v27586_v35 = vld [vmem:[%s38116_s3 + $0x1000] ss:$28 sps:$4 sm:$0xff]  }
 0x646   :  { %18892 = vmatprep.subr.bf16.mxu1 %v27543_v20  ;;  %v27583_v20 = vld [vmem:[%s38116_s3 + $0x1768] ss:$28 sps:$4 sm:$0xff]  }
 0x648   :  { %19362 = vmatpush1.bf16.msra.mxu0 %v27544_v63  ;;  %v27594_v63 = vld [vmem:[%s38116_s3 + $0x103c] ss:$28 sps:$4 sm:$0xff]  }
 0x649   :  { %18893 = vmatpush1.bf16.msra.mxu1 %v27541_v53  ;;  %19363 = vmatprep.subr.bf16.mxu0 %v27552_v38  ;;  %v27591_v53 = vld [vmem:[%s38116_s3 + $0x17a4] ss:$28 sps:$4 sm:$0xff]   ;;  %v27592_v38 = vld [vmem:[%s38116_s3 + $0x1038] ss:$28 sps:$4 sm:$0xff]  }
 0x64a   :  { %18894 = vmatprep.subr.bf16.mxu1 %v27549_v5  ;;  %v27589_v5 = vld [vmem:[%s38116_s3 + $0x17a0] ss:$28 sps:$4 sm:$0xff]  }
 0x64c   :  { %19364 = vmatpush1.bf16.msra.mxu0 %v27550_v41  ;;  %v27600_v41 = vld [vmem:[%s38116_s3 + $0x1074] ss:$28 sps:$4 sm:$0xff]  }
 0x64d   :  { %18895 = vmatpush1.bf16.msra.mxu1 %v27547_v40  ;;  %19365 = vmatprep.subr.bf16.mxu0 %v27558_v36  ;;  %v27597_v40 = vld [vmem:[%s38116_s3 + $0x17dc] ss:$28 sps:$4 sm:$0xff]   ;;  %v27598_v36 = vld [vmem:[%s38116_s3 + $0x1070] ss:$28 sps:$4 sm:$0xff]  }
 0x64e   :  { %18896 = vmatprep.subr.bf16.mxu1 %v27555_v61  ;;  %v27595_v61 = vld [vmem:[%s38116_s3 + $0x17d8] ss:$28 sps:$4 sm:$0xff]  }
 0x650   :  { %19366 = vmatpush1.bf16.msra.mxu0 %v27556_v10  ;;  %v27606_v10 = vld [vmem:[%s38116_s3 + $0x10ac] ss:$28 sps:$4 sm:$0xff]  }
 0x651   :  { %18897 = vmatpush1.bf16.msra.mxu1 %v27553_v6  ;;  %19367 = vmatprep.subr.bf16.mxu0 %v27564_v60  ;;  %v27603_v6 = vld [vmem:[%s38116_s3 + $0x1814] ss:$28 sps:$4 sm:$0xff]   ;;  %v27604_v60 = vld [vmem:[%s38116_s3 + $0x10a8] ss:$28 sps:$4 sm:$0xff]  }
 0x652   :  { %18898 = vmatprep.subr.bf16.mxu1 %v27561_v4  ;;  %v27601_v4 = vld [vmem:[%s38116_s3 + $0x1810] ss:$28 sps:$4 sm:$0xff]  }
 0x654   :  { %19368 = vmatpush1.bf16.msra.mxu0 %v27562_v59  ;;  %v27612_v59 = vld [vmem:[%s38116_s3 + $0x10e4] ss:$28 sps:$4 sm:$0xff]  }
 0x655   :  { %18899 = vmatpush1.bf16.msra.mxu1 %v27559_v48  ;;  %19369 = vmatprep.subr.bf16.mxu0 %v27570_v37  ;;  %v27609_v48 = vld [vmem:[%s38116_s3 + $0x184c] ss:$28 sps:$4 sm:$0xff]   ;;  %v27610_v37 = vld [vmem:[%s38116_s3 + $0x10e0] ss:$28 sps:$4 sm:$0xff]  }
 0x656   :  { %18900 = vmatprep.subr.bf16.mxu1 %v27567_v14  ;;  %v27607_v14 = vld [vmem:[%s38116_s3 + $0x1848] ss:$28 sps:$4 sm:$0xff]  }
 0x658   :  { %19370 = vmatpush1.bf16.msra.mxu0 %v27568_v18  ;;  %v27618_v18 = vld [vmem:[%s38116_s3 + $0x111c] ss:$28 sps:$4 sm:$0xff]  }
 0x659   :  { %18901 = vmatpush1.bf16.msra.mxu1 %v27565_v15  ;;  %19371 = vmatprep.subr.bf16.mxu0 %v27576_v46  ;;  %v27615_v15 = vld [vmem:[%s38116_s3 + $0x1884] ss:$28 sps:$4 sm:$0xff]   ;;  %v27616_v46 = vld [vmem:[%s38116_s3 + $0x1118] ss:$28 sps:$4 sm:$0xff]  }
 0x65a   :  { %18902 = vmatprep.subr.bf16.mxu1 %v27573_v7  ;;  %v27613_v7 = vld [vmem:[%s38116_s3 + $0x1880] ss:$28 sps:$4 sm:$0xff]  }
 0x65c   :  { %19372 = vmatpush1.bf16.msra.mxu0 %v27574_v11  ;;  %v27624_v11 = vld [vmem:[%s38116_s3 + $0x1154] ss:$28 sps:$4 sm:$0xff]  }
 0x65d   :  { %18903 = vmatpush1.bf16.msra.mxu1 %v27571_v17  ;;  %19373 = vmatprep.subr.bf16.mxu0 %v27582_v16  ;;  %v27621_v17 = vld [vmem:[%s38116_s3 + $0x18bc] ss:$28 sps:$4 sm:$0xff]   ;;  %v27622_v16 = vld [vmem:[%s38116_s3 + $0x1150] ss:$28 sps:$4 sm:$0xff]  }
 0x65e   :  { %18904 = vmatprep.subr.bf16.mxu1 %v27579_v12  ;;  %v27619_v12 = vld [vmem:[%s38116_s3 + $0x18b8] ss:$28 sps:$4 sm:$0xff]  }
 0x660   :  { %19374 = vmatpush1.bf16.msra.mxu0 %v27580_v23  ;;  %v27630_v23 = vld [vmem:[%s38116_s3 + $0x118c] ss:$28 sps:$4 sm:$0xff]  }
 0x661   :  { %18905 = vmatpush1.bf16.msra.mxu1 %v27577_v55  ;;  %19375 = vmatprep.subr.bf16.mxu0 %v27588_v28  ;;  %v27627_v55 = vld [vmem:[%s38116_s3 + $0x18f4] ss:$28 sps:$4 sm:$0xff]   ;;  %v27628_v28 = vld [vmem:[%s38116_s3 + $0x1188] ss:$28 sps:$4 sm:$0xff]  }
 0x662   :  { %18906 = vmatprep.subr.bf16.mxu1 %v27585_v49  ;;  %v27625_v49 = vld [vmem:[%s38116_s3 + $0x18f0] ss:$28 sps:$4 sm:$0xff]  }
 0x664   :  { %19376 = vmatpush1.bf16.msra.mxu0 %v27586_v35  ;;  %v27636_v35 = vld [vmem:[%s38116_s3 + $0x11c4] ss:$28 sps:$4 sm:$0xff]  }
 0x665   :  { %18907 = vmatpush1.bf16.msra.mxu1 %v27583_v20  ;;  %19377 = vmatprep.subr.bf16.mxu0 %v27594_v63  ;;  %v27633_v20 = vld [vmem:[%s38116_s3 + $0x192c] ss:$28 sps:$4 sm:$0xff]   ;;  %v27634_v63 = vld [vmem:[%s38116_s3 + $0x11c0] ss:$28 sps:$4 sm:$0xff]  }
 0x666   :  { %18908 = vmatprep.subr.bf16.mxu1 %v27591_v53  ;;  %v27631_v53 = vld [vmem:[%s38116_s3 + $0x1928] ss:$28 sps:$4 sm:$0xff]  }
 0x668   :  { %19378 = vmatpush1.bf16.msra.mxu0 %v27592_v38  ;;  %v27642_v38 = vld [vmem:[%s38116_s3 + $0x11fc] ss:$28 sps:$4 sm:$0xff]  }
 0x669   :  { %18909 = vmatpush1.bf16.msra.mxu1 %v27589_v5  ;;  %19379 = vmatprep.subr.bf16.mxu0 %v27600_v41  ;;  %v27639_v5 = vld [vmem:[%s38116_s3 + $0x1964] ss:$28 sps:$4 sm:$0xff]   ;;  %v27640_v41 = vld [vmem:[%s38116_s3 + $0x11f8] ss:$28 sps:$4 sm:$0xff]  }
 0x66a   :  { %18910 = vmatprep.subr.bf16.mxu1 %v27597_v40  ;;  %v27637_v40 = vld [vmem:[%s38116_s3 + $0x1960] ss:$28 sps:$4 sm:$0xff]  }
 0x66c   :  { %19380 = vmatpush1.bf16.msra.mxu0 %v27598_v36  ;;  %v27648_v36 = vld [vmem:[%s38116_s3 + $0x1234] ss:$28 sps:$4 sm:$0xff]  }
 0x66d   :  { %18911 = vmatpush1.bf16.msra.mxu1 %v27595_v61  ;;  %19381 = vmatprep.subr.bf16.mxu0 %v27606_v10  ;;  %v27645_v61 = vld [vmem:[%s38116_s3 + $0x199c] ss:$28 sps:$4 sm:$0xff]   ;;  %v27646_v10 = vld [vmem:[%s38116_s3 + $0x1230] ss:$28 sps:$4 sm:$0xff]  }
 0x66e   :  { %18912 = vmatprep.subr.bf16.mxu1 %v27603_v6  ;;  %v27643_v6 = vld [vmem:[%s38116_s3 + $0x1998] ss:$28 sps:$4 sm:$0xff]  }
 0x670   :  { %19382 = vmatpush1.bf16.msra.mxu0 %v27604_v60  ;;  %v27654_v60 = vld [vmem:[%s38116_s3 + $0x126c] ss:$28 sps:$4 sm:$0xff]  }
 0x671   :  { %18913 = vmatpush1.bf16.msra.mxu1 %v27601_v4  ;;  %19383 = vmatprep.subr.bf16.mxu0 %v27612_v59  ;;  %v27651_v4 = vld [vmem:[%s38116_s3 + $0x19d4] ss:$28 sps:$4 sm:$0xff]   ;;  %v27652_v59 = vld [vmem:[%s38116_s3 + $0x1268] ss:$28 sps:$4 sm:$0xff]  }
 0x672   :  { %18914 = vmatprep.subr.bf16.mxu1 %v27609_v48  ;;  %v27649_v48 = vld [vmem:[%s38116_s3 + $0x19d0] ss:$28 sps:$4 sm:$0xff]  }
 0x674   :  { %19384 = vmatpush1.bf16.msra.mxu0 %v27610_v37  ;;  %v27660_v37 = vld [vmem:[%s38116_s3 + $0x12a4] ss:$28 sps:$4 sm:$0xff]  }
 0x675   :  { %18915 = vmatpush1.bf16.msra.mxu1 %v27607_v14  ;;  %19385 = vmatprep.subr.bf16.mxu0 %v27618_v18  ;;  %v27657_v14 = vld [vmem:[%s38116_s3 + $0x1a0c] ss:$28 sps:$4 sm:$0xff]   ;;  %v27658_v18 = vld [vmem:[%s38116_s3 + $0x12a0] ss:$28 sps:$4 sm:$0xff]  }
 0x676   :  { %18927 = vmatprep.subr.bf16.mxu1 %v27615_v15  ;;  %v27655_v15 = vld [vmem:[%s38116_s3 + $0x1a08] ss:$28 sps:$4 sm:$0xff]  }
 0x678   :  { %18917 = vmatmul.mubr.bf16.vlgmr.msra.gmra.mrb[36].mxu1 %v32804_v52  ;;  %19386 = vmatpush1.bf16.msra.mxu0 %v27616_v46  ;;  %v27666_v46 = vld [vmem:[%s38116_s3 + $0x12dc] ss:$28 sps:$4 sm:$0xff]  }
 0x679   :  { %18928 = vmatpush1.bf16.msra.mxu1 %v27613_v7  ;;  %18959 = vmatprep.mubr.bf16.mxu1 %v32442_v29  ;;  %v27663_v7 = vld [vmem:[%s38116_s3 + $0x1a44] ss:$28 sps:$4 sm:$0xff]  }
 0x67a   :  { %18929 = vmatprep.subr.bf16.mxu1 %v27621_v17  ;;  %19387 = vmatprep.subr.bf16.mxu0 %v27624_v11  ;;  %v27661_v17 = vld [vmem:[%s38116_s3 + $0x1a40] ss:$28 sps:$4 sm:$0xff]   ;;  %v27664_v11 = vld [vmem:[%s38116_s3 + $0x12d8] ss:$28 sps:$4 sm:$0xff]  }
 0x67c   :  { %19388 = vmatpush1.bf16.msra.mxu0 %v27622_v16  ;;  %v27672_v16 = vld [vmem:[%s38116_s3 + $0x1314] ss:$28 sps:$4 sm:$0xff]  }
 0x67d   :  { %18930 = vmatpush1.bf16.msra.mxu1 %v27619_v12  ;;  %19400 = vmatprep.subr.bf16.mxu0 %v27630_v23  ;;  %v27669_v12 = vld [vmem:[%s38116_s3 + $0x1a7c] ss:$28 sps:$4 sm:$0xff]   ;;  %v27670_v23 = vld [vmem:[%s38116_s3 + $0x1310] ss:$28 sps:$4 sm:$0xff]  }
 0x67e   :  { %18931 = vmatprep.subr.bf16.mxu1 %v27627_v55  ;;  %v27667_v55 = vld [vmem:[%s38116_s3 + $0x1a78] ss:$28 sps:$4 sm:$0xff]  }
 0x67f   :  { %19390 = vmatmul.mubr.bf16.vlgmr.msra.gmra.mrb[36].mxu0 %v32159_v51 }
 0x680   :  { %19401 = vmatpush1.bf16.msra.mxu0 %v27628_v28  ;;  %19432 = vmatprep.mubr.bf16.mxu0 %v31810_v34  ;;  %v27678_v28 = vld [vmem:[%s38116_s3 + $0x134c] ss:$28 sps:$4 sm:$0xff]  }
 0x681   :  { %18932 = vmatpush1.bf16.msra.mxu1 %v27625_v49  ;;  %19402 = vmatprep.subr.bf16.mxu0 %v27636_v35  ;;  %v27675_v49 = vld [vmem:[%s38116_s3 + $0x1ab4] ss:$28 sps:$4 sm:$0xff]   ;;  %v27676_v35 = vld [vmem:[%s38116_s3 + $0x1348] ss:$28 sps:$4 sm:$0xff]  }
 0x682   :  { %18933 = vmatprep.subr.bf16.mxu1 %v27633_v20  ;;  %v27673_v20 = vld [vmem:[%s38116_s3 + $0x1ab0] ss:$28 sps:$4 sm:$0xff]  }
 0x684   :  { %19403 = vmatpush1.bf16.msra.mxu0 %v27634_v63  ;;  %v27684_v63 = vld [vmem:[%s38116_s3 + $0x1384] ss:$28 sps:$4 sm:$0xff]  }
 0x685   :  { %18934 = vmatpush1.bf16.msra.mxu1 %v27631_v53  ;;  %19404 = vmatprep.subr.bf16.mxu0 %v27642_v38  ;;  %v27681_v53 = vld [vmem:[%s38116_s3 + $0x1aec] ss:$28 sps:$4 sm:$0xff]   ;;  %v27682_v38 = vld [vmem:[%s38116_s3 + $0x1380] ss:$28 sps:$4 sm:$0xff]  }
 0x686   :  { %18935 = vmatprep.subr.bf16.mxu1 %v27639_v5  ;;  %v27679_v5 = vld [vmem:[%s38116_s3 + $0x1ae8] ss:$28 sps:$4 sm:$0xff]  }
 0x688   :  { %19405 = vmatpush1.bf16.msra.mxu0 %v27640_v41  ;;  %v27690_v41 = vld [vmem:[%s38116_s3 + $0x13bc] ss:$28 sps:$4 sm:$0xff]  }
 0x689   :  { %18936 = vmatpush1.bf16.msra.mxu1 %v27637_v40  ;;  %19406 = vmatprep.subr.bf16.mxu0 %v27648_v36  ;;  %v27687_v40 = vld [vmem:[%s38116_s3 + $0x1b24] ss:$28 sps:$4 sm:$0xff]   ;;  %v27688_v36 = vld [vmem:[%s38116_s3 + $0x13b8] ss:$28 sps:$4 sm:$0xff]  }
 0x68a   :  { %18937 = vmatprep.subr.bf16.mxu1 %v27645_v61  ;;  %v27685_v61 = vld [vmem:[%s38116_s3 + $0x1b20] ss:$28 sps:$4 sm:$0xff]  }
 0x68c   :  { %19407 = vmatpush1.bf16.msra.mxu0 %v27646_v10  ;;  %v27696_v10 = vld [vmem:[%s38116_s3 + $0x13f4] ss:$28 sps:$4 sm:$0xff]  }
 0x68d   :  { %18938 = vmatpush1.bf16.msra.mxu1 %v27643_v6  ;;  %19408 = vmatprep.subr.bf16.mxu0 %v27654_v60  ;;  %v27693_v6 = vld [vmem:[%s38116_s3 + $0x1b5c] ss:$28 sps:$4 sm:$0xff]   ;;  %v27694_v60 = vld [vmem:[%s38116_s3 + $0x13f0] ss:$28 sps:$4 sm:$0xff]  }
 0x68e   :  { %18939 = vmatprep.subr.bf16.mxu1 %v27651_v4  ;;  %v27691_v4 = vld [vmem:[%s38116_s3 + $0x1b58] ss:$28 sps:$4 sm:$0xff]  }
 0x690   :  { %19409 = vmatpush1.bf16.msra.mxu0 %v27652_v59  ;;  %v27702_v59 = vld [vmem:[%s38116_s3 + $0x142c] ss:$28 sps:$4 sm:$0xff]  }
 0x691   :  { %18940 = vmatpush1.bf16.msra.mxu1 %v27649_v48  ;;  %19410 = vmatprep.subr.bf16.mxu0 %v27660_v37  ;;  %v27699_v48 = vld [vmem:[%s38116_s3 + $0x1b94] ss:$28 sps:$4 sm:$0xff]   ;;  %v27700_v37 = vld [vmem:[%s38116_s3 + $0x1428] ss:$28 sps:$4 sm:$0xff]  }
 0x692   :  { %18941 = vmatprep.subr.bf16.mxu1 %v27657_v14  ;;  %v27697_v14 = vld [vmem:[%s38116_s3 + $0x1b90] ss:$28 sps:$4 sm:$0xff]  }
 0x694   :  { %19411 = vmatpush1.bf16.msra.mxu0 %v27658_v18  ;;  %v27708_v18 = vld [vmem:[%s38116_s3 + $0x1464] ss:$28 sps:$4 sm:$0xff]  }
 0x695   :  { %18942 = vmatpush1.bf16.msra.mxu1 %v27655_v15  ;;  %19412 = vmatprep.subr.bf16.mxu0 %v27666_v46  ;;  %v27705_v15 = vld [vmem:[%s38116_s3 + $0x1bcc] ss:$28 sps:$4 sm:$0xff]   ;;  %v27706_v46 = vld [vmem:[%s38116_s3 + $0x1460] ss:$28 sps:$4 sm:$0xff]  }
 0x696   :  { %18943 = vmatprep.subr.bf16.mxu1 %v27663_v7  ;;  %v27703_v7 = vld [vmem:[%s38116_s3 + $0x1bc8] ss:$28 sps:$4 sm:$0xff]  }
 0x698   :  { %19413 = vmatpush1.bf16.msra.mxu0 %v27664_v11  ;;  %v27714_v11 = vld [vmem:[%s38116_s3 + $0x149c] ss:$28 sps:$4 sm:$0xff]  }
 0x699   :  { %18944 = vmatpush1.bf16.msra.mxu1 %v27661_v17  ;;  %19414 = vmatprep.subr.bf16.mxu0 %v27672_v16  ;;  %v27711_v17 = vld [vmem:[%s38116_s3 + $0x1c04] ss:$28 sps:$4 sm:$0xff]   ;;  %v27712_v16 = vld [vmem:[%s38116_s3 + $0x1498] ss:$28 sps:$4 sm:$0xff]  }
 0x69a   :  { %18945 = vmatprep.subr.bf16.mxu1 %v27669_v12  ;;  %v27709_v12 = vld [vmem:[%s38116_s3 + $0x1c00] ss:$28 sps:$4 sm:$0xff]  }
 0x69c   :  { %19415 = vmatpush1.bf16.msra.mxu0 %v27670_v23  ;;  %v27720_v23 = vld [vmem:[%s38116_s3 + $0x14d4] ss:$28 sps:$4 sm:$0xff]  }
 0x69d   :  { %18946 = vmatpush1.bf16.msra.mxu1 %v27667_v55  ;;  %19416 = vmatprep.subr.bf16.mxu0 %v27678_v28  ;;  %v27717_v55 = vld [vmem:[%s38116_s3 + $0x1c3c] ss:$28 sps:$4 sm:$0xff]   ;;  %v27718_v28 = vld [vmem:[%s38116_s3 + $0x14d0] ss:$28 sps:$4 sm:$0xff]  }
 0x69e   :  { %18947 = vmatprep.subr.bf16.mxu1 %v27675_v49  ;;  %v27715_v49 = vld [vmem:[%s38116_s3 + $0x1c38] ss:$28 sps:$4 sm:$0xff]  }
 0x6a0   :  { %19417 = vmatpush1.bf16.msra.mxu0 %v27676_v35  ;;  %v27726_v35 = vld [vmem:[%s38116_s3 + $0x150c] ss:$28 sps:$4 sm:$0xff]  }
 0x6a1   :  { %18948 = vmatpush1.bf16.msra.mxu1 %v27673_v20  ;;  %19418 = vmatprep.subr.bf16.mxu0 %v27684_v63  ;;  %v27723_v20 = vld [vmem:[%s38116_s3 + $0x1c74] ss:$28 sps:$4 sm:$0xff]   ;;  %v27724_v63 = vld [vmem:[%s38116_s3 + $0x1508] ss:$28 sps:$4 sm:$0xff]  }
 0x6a2   :  { %18949 = vmatprep.subr.bf16.mxu1 %v27681_v53  ;;  %v27721_v53 = vld [vmem:[%s38116_s3 + $0x1c70] ss:$28 sps:$4 sm:$0xff]  }
 0x6a4   :  { %19419 = vmatpush1.bf16.msra.mxu0 %v27682_v38  ;;  %v27732_v38 = vld [vmem:[%s38116_s3 + $0x1544] ss:$28 sps:$4 sm:$0xff]  }
 0x6a5   :  { %18950 = vmatpush1.bf16.msra.mxu1 %v27679_v5  ;;  %19420 = vmatprep.subr.bf16.mxu0 %v27690_v41  ;;  %v27729_v5 = vld [vmem:[%s38116_s3 + $0x1cac] ss:$28 sps:$4 sm:$0xff]   ;;  %v27730_v41 = vld [vmem:[%s38116_s3 + $0x1540] ss:$28 sps:$4 sm:$0xff]  }
 0x6a6   :  { %18951 = vmatprep.subr.bf16.mxu1 %v27687_v40  ;;  %v27727_v40 = vld [vmem:[%s38116_s3 + $0x1ca8] ss:$28 sps:$4 sm:$0xff]  }
 0x6a8   :  { %19421 = vmatpush1.bf16.msra.mxu0 %v27688_v36  ;;  %v27738_v36 = vld [vmem:[%s38116_s3 + $0x157c] ss:$28 sps:$4 sm:$0xff]  }
 0x6a9   :  { %18952 = vmatpush1.bf16.msra.mxu1 %v27685_v61  ;;  %19422 = vmatprep.subr.bf16.mxu0 %v27696_v10  ;;  %v27735_v61 = vld [vmem:[%s38116_s3 + $0x1ce4] ss:$28 sps:$4 sm:$0xff]   ;;  %v27736_v10 = vld [vmem:[%s38116_s3 + $0x1578] ss:$28 sps:$4 sm:$0xff]  }
 0x6aa   :  { %18953 = vmatprep.subr.bf16.mxu1 %v27693_v6  ;;  %v27733_v6 = vld [vmem:[%s38116_s3 + $0x1ce0] ss:$28 sps:$4 sm:$0xff]  }
 0x6ac   :  { %19423 = vmatpush1.bf16.msra.mxu0 %v27694_v60  ;;  %v27744_v60 = vld [vmem:[%s38116_s3 + $0x15b4] ss:$28 sps:$4 sm:$0xff]  }
 0x6ad   :  { %18954 = vmatpush1.bf16.msra.mxu1 %v27691_v4  ;;  %19424 = vmatprep.subr.bf16.mxu0 %v27702_v59  ;;  %v27741_v4 = vld [vmem:[%s38116_s3 + $0x1d1c] ss:$28 sps:$4 sm:$0xff]   ;;  %v27742_v59 = vld [vmem:[%s38116_s3 + $0x15b0] ss:$28 sps:$4 sm:$0xff]  }
 0x6ae   :  { %18955 = vmatprep.subr.bf16.mxu1 %v27699_v48  ;;  %v27739_v48 = vld [vmem:[%s38116_s3 + $0x1d18] ss:$28 sps:$4 sm:$0xff]  }
 0x6b0   :  { %19425 = vmatpush1.bf16.msra.mxu0 %v27700_v37  ;;  %v27750_v37 = vld [vmem:[%s38116_s3 + $0x15ec] ss:$28 sps:$4 sm:$0xff]  }
 0x6b1   :  { %18956 = vmatpush1.bf16.msra.mxu1 %v27697_v14  ;;  %19426 = vmatprep.subr.bf16.mxu0 %v27708_v18  ;;  %v27747_v14 = vld [vmem:[%s38116_s3 + $0x1d54] ss:$28 sps:$4 sm:$0xff]   ;;  %v27748_v18 = vld [vmem:[%s38116_s3 + $0x15e8] ss:$28 sps:$4 sm:$0xff]  }
 0x6b2   :  { %18957 = vmatprep.subr.bf16.mxu1 %v27705_v15  ;;  %v27745_v15 = vld [vmem:[%s38116_s3 + $0x1d50] ss:$28 sps:$4 sm:$0xff]  }
 0x6b4   :  { %19427 = vmatpush1.bf16.msra.mxu0 %v27706_v46  ;;  %v27756_v46 = vld [vmem:[%s38116_s3 + $0x1624] ss:$28 sps:$4 sm:$0xff]  }
 0x6b5   :  { %18958 = vmatpush1.bf16.msra.mxu1 %v27703_v7  ;;  %19428 = vmatprep.subr.bf16.mxu0 %v27714_v11  ;;  %v27753_v7 = vld [vmem:[%s38116_s3 + $0x1d8c] ss:$28 sps:$4 sm:$0xff]   ;;  %v27754_v11 = vld [vmem:[%s38116_s3 + $0x1620] ss:$28 sps:$4 sm:$0xff]  }
 0x6b6   :  { %18970 = vmatprep.subr.bf16.mxu1 %v27711_v17  ;;  %v27751_v17 = vld [vmem:[%s38116_s3 + $0x1d88] ss:$28 sps:$4 sm:$0xff]  }
 0x6b8   :  { %18960 = vmatmul.mubr.bf16.vlgmr.msra.gmra.mrb[36].mxu1 %v32434_v42  ;;  %19429 = vmatpush1.bf16.msra.mxu0 %v27712_v16  ;;  %v27762_v16 = vld [vmem:[%s38116_s3 + $0x165c] ss:$28 sps:$4 sm:$0xff]  }
 0x6b9   :  { %18971 = vmatpush1.bf16.msra.mxu1 %v27709_v12  ;;  %19002 = vmatprep.mubr.bf16.mxu1 %v33452_v44  ;;  %v27759_v12 = vld [vmem:[%s38116_s3 + $0x1dc4] ss:$28 sps:$4 sm:$0xff]  }
 0x6ba   :  { %18972 = vmatprep.subr.bf16.mxu1 %v27717_v55  ;;  %19430 = vmatprep.subr.bf16.mxu0 %v27720_v23  ;;  %v27757_v55 = vld [vmem:[%s38116_s3 + $0x1dc0] ss:$28 sps:$4 sm:$0xff]   ;;  %v27760_v23 = vld [vmem:[%s38116_s3 + $0x1658] ss:$28 sps:$4 sm:$0xff]  }
 0x6bc   :  { %19431 = vmatpush1.bf16.msra.mxu0 %v27718_v28  ;;  %v27768_v28 = vld [vmem:[%s38116_s3 + $0x1694] ss:$28 sps:$4 sm:$0xff]  }
 0x6bd   :  { %18973 = vmatpush1.bf16.msra.mxu1 %v27715_v49  ;;  %19443 = vmatprep.subr.bf16.mxu0 %v27726_v35  ;;  %v27765_v49 = vld [vmem:[%s38116_s3 + $0x1dfc] ss:$28 sps:$4 sm:$0xff]   ;;  %v27766_v35 = vld [vmem:[%s38116_s3 + $0x1690] ss:$28 sps:$4 sm:$0xff]  }
 0x6be   :  { %18974 = vmatprep.subr.bf16.mxu1 %v27723_v20  ;;  %v27763_v20 = vld [vmem:[%s38116_s3 + $0x1df8] ss:$28 sps:$4 sm:$0xff]  }
 0x6bf   :  { %19433 = vmatmul.mubr.bf16.vlgmr.msra.gmra.mrb[36].mxu0 %v31802_v13 }
 0x6c0   :  { %19444 = vmatpush1.bf16.msra.mxu0 %v27724_v63  ;;  %19475 = vmatprep.mubr.bf16.mxu0 %v32806_v58  ;;  %v27774_v63 = vld [vmem:[%s38116_s3 + $0x16cc] ss:$28 sps:$4 sm:$0xff]  }
 0x6c1   :  { %18975 = vmatpush1.bf16.msra.mxu1 %v27721_v53  ;;  %19445 = vmatprep.subr.bf16.mxu0 %v27732_v38  ;;  %v27771_v53 = vld [vmem:[%s38116_s3 + $0x1e34] ss:$28 sps:$4 sm:$0xff]   ;;  %v27772_v38 = vld [vmem:[%s38116_s3 + $0x16c8] ss:$28 sps:$4 sm:$0xff]  }
 0x6c2   :  { %18976 = vmatprep.subr.bf16.mxu1 %v27729_v5  ;;  %v27769_v5 = vld [vmem:[%s38116_s3 + $0x1e30] ss:$28 sps:$4 sm:$0xff]  }
 0x6c4   :  { %19446 = vmatpush1.bf16.msra.mxu0 %v27730_v41  ;;  %v27780_v41 = vld [vmem:[%s38116_s3 + $0x1704] ss:$28 sps:$4 sm:$0xff]  }
 0x6c5   :  { %18977 = vmatpush1.bf16.msra.mxu1 %v27727_v40  ;;  %19447 = vmatprep.subr.bf16.mxu0 %v27738_v36  ;;  %v27777_v40 = vld [vmem:[%s38116_s3 + $0x1e6c] ss:$28 sps:$4 sm:$0xff]   ;;  %v27778_v36 = vld [vmem:[%s38116_s3 + $0x1700] ss:$28 sps:$4 sm:$0xff]  }
 0x6c6   :  { %18978 = vmatprep.subr.bf16.mxu1 %v27735_v61  ;;  %v27775_v61 = vld [vmem:[%s38116_s3 + $0x1e68] ss:$28 sps:$4 sm:$0xff]  }
 0x6c8   :  { %19448 = vmatpush1.bf16.msra.mxu0 %v27736_v10  ;;  %v27786_v10 = vld [vmem:[%s38116_s3 + $0x173c] ss:$28 sps:$4 sm:$0xff]  }
 0x6c9   :  { %18979 = vmatpush1.bf16.msra.mxu1 %v27733_v6  ;;  %19449 = vmatprep.subr.bf16.mxu0 %v27744_v60  ;;  %v27783_v6 = vld [vmem:[%s38116_s3 + $0x1ea4] ss:$28 sps:$4 sm:$0xff]   ;;  %v27784_v60 = vld [vmem:[%s38116_s3 + $0x1738] ss:$28 sps:$4 sm:$0xff]  }
 0x6ca   :  { %18980 = vmatprep.subr.bf16.mxu1 %v27741_v4  ;;  %v27781_v4 = vld [vmem:[%s38116_s3 + $0x1ea0] ss:$28 sps:$4 sm:$0xff]  }
 0x6cc   :  { %19450 = vmatpush1.bf16.msra.mxu0 %v27742_v59  ;;  %v27792_v59 = vld [vmem:[%s38116_s3 + $0x1774] ss:$28 sps:$4 sm:$0xff]  }
 0x6cd   :  { %18981 = vmatpush1.bf16.msra.mxu1 %v27739_v48  ;;  %19451 = vmatprep.subr.bf16.mxu0 %v27750_v37  ;;  %v27789_v48 = vld [vmem:[%s38116_s3 + $0x1edc] ss:$28 sps:$4 sm:$0xff]   ;;  %v27790_v37 = vld [vmem:[%s38116_s3 + $0x1770] ss:$28 sps:$4 sm:$0xff]  }
 0x6ce   :  { %18982 = vmatprep.subr.bf16.mxu1 %v27747_v14  ;;  %v27787_v14 = vld [vmem:[%s38116_s3 + $0x1ed8] ss:$28 sps:$4 sm:$0xff]  }
 0x6d0   :  { %19452 = vmatpush1.bf16.msra.mxu0 %v27748_v18  ;;  %v27798_v18 = vld [vmem:[%s38116_s3 + $0x17ac] ss:$28 sps:$4 sm:$0xff]  }
 0x6d1   :  { %18983 = vmatpush1.bf16.msra.mxu1 %v27745_v15  ;;  %19453 = vmatprep.subr.bf16.mxu0 %v27756_v46  ;;  %v27795_v15 = vld [vmem:[%s38116_s3 + $0x1f14] ss:$28 sps:$4 sm:$0xff]   ;;  %v27796_v46 = vld [vmem:[%s38116_s3 + $0x17a8] ss:$28 sps:$4 sm:$0xff]  }
 0x6d2   :  { %18984 = vmatprep.subr.bf16.mxu1 %v27753_v7  ;;  %v27793_v7 = vld [vmem:[%s38116_s3 + $0x1f10] ss:$28 sps:$4 sm:$0xff]  }
 0x6d4   :  { %19454 = vmatpush1.bf16.msra.mxu0 %v27754_v11  ;;  %v27804_v11 = vld [vmem:[%s38116_s3 + $0x17e4] ss:$28 sps:$4 sm:$0xff]  }
 0x6d5   :  { %18985 = vmatpush1.bf16.msra.mxu1 %v27751_v17  ;;  %19455 = vmatprep.subr.bf16.mxu0 %v27762_v16  ;;  %v27801_v17 = vld [vmem:[%s38116_s3 + $0x1f4c] ss:$28 sps:$4 sm:$0xff]   ;;  %v27802_v16 = vld [vmem:[%s38116_s3 + $0x17e0] ss:$28 sps:$4 sm:$0xff]  }
 0x6d6   :  { %18986 = vmatprep.subr.bf16.mxu1 %v27759_v12  ;;  %v27799_v12 = vld [vmem:[%s38116_s3 + $0x1f48] ss:$28 sps:$4 sm:$0xff]  }
 0x6d8   :  { %19456 = vmatpush1.bf16.msra.mxu0 %v27760_v23  ;;  %v27810_v23 = vld [vmem:[%s38116_s3 + $0x181c] ss:$28 sps:$4 sm:$0xff]  }
 0x6d9   :  { %18987 = vmatpush1.bf16.msra.mxu1 %v27757_v55  ;;  %19457 = vmatprep.subr.bf16.mxu0 %v27768_v28  ;;  %v27807_v55 = vld [vmem:[%s38116_s3 + $0x1f84] ss:$28 sps:$4 sm:$0xff]   ;;  %v27808_v28 = vld [vmem:[%s38116_s3 + $0x1818] ss:$28 sps:$4 sm:$0xff]  }
 0x6da   :  { %18988 = vmatprep.subr.bf16.mxu1 %v27765_v49  ;;  %v27805_v49 = vld [vmem:[%s38116_s3 + $0x1f80] ss:$28 sps:$4 sm:$0xff]  }
 0x6dc   :  { %19458 = vmatpush1.bf16.msra.mxu0 %v27766_v35  ;;  %v27816_v35 = vld [vmem:[%s38116_s3 + $0x1854] ss:$28 sps:$4 sm:$0xff]  }
 0x6dd   :  { %18989 = vmatpush1.bf16.msra.mxu1 %v27763_v20  ;;  %19459 = vmatprep.subr.bf16.mxu0 %v27774_v63  ;;  %v27813_v20 = vld [vmem:[%s38116_s3 + $0x1fbc] ss:$28 sps:$4 sm:$0xff]   ;;  %v27814_v63 = vld [vmem:[%s38116_s3 + $0x1850] ss:$28 sps:$4 sm:$0xff]  }
 0x6de   :  { %18990 = vmatprep.subr.bf16.mxu1 %v27771_v53  ;;  %v27811_v53 = vld [vmem:[%s38116_s3 + $0x1fb8] ss:$28 sps:$4 sm:$0xff]  }
 0x6e0   :  { %19460 = vmatpush1.bf16.msra.mxu0 %v27772_v38  ;;  %v27822_v38 = vld [vmem:[%s38116_s3 + $0x188c] ss:$28 sps:$4 sm:$0xff]  }
 0x6e1   :  { %18991 = vmatpush1.bf16.msra.mxu1 %v27769_v5  ;;  %19461 = vmatprep.subr.bf16.mxu0 %v27780_v41  ;;  %v27819_v5 = vld [vmem:[%s38116_s3 + $0x1ff4] ss:$28 sps:$4 sm:$0xff]   ;;  %v27820_v41 = vld [vmem:[%s38116_s3 + $0x1888] ss:$28 sps:$4 sm:$0xff]  }
 0x6e2   :  { %18992 = vmatprep.subr.bf16.mxu1 %v27777_v40  ;;  %v27817_v40 = vld [vmem:[%s38116_s3 + $0x1ff0] ss:$28 sps:$4 sm:$0xff]  }
 0x6e4   :  { %19462 = vmatpush1.bf16.msra.mxu0 %v27778_v36  ;;  %v27828_v36 = vld [vmem:[%s38116_s3 + $0x18c4] ss:$28 sps:$4 sm:$0xff]  }
 0x6e5   :  { %18993 = vmatpush1.bf16.msra.mxu1 %v27775_v61  ;;  %19463 = vmatprep.subr.bf16.mxu0 %v27786_v10  ;;  %v27825_v61 = vld [vmem:[%s38116_s3 + $0x202c] ss:$28 sps:$4 sm:$0xff]   ;;  %v27826_v10 = vld [vmem:[%s38116_s3 + $0x18c0] ss:$28 sps:$4 sm:$0xff]  }
 0x6e6   :  { %18994 = vmatprep.subr.bf16.mxu1 %v27783_v6  ;;  %v27823_v6 = vld [vmem:[%s38116_s3 + $0x2028] ss:$28 sps:$4 sm:$0xff]  }
 0x6e8   :  { %19464 = vmatpush1.bf16.msra.mxu0 %v27784_v60  ;;  %v27834_v60 = vld [vmem:[%s38116_s3 + $0x18fc] ss:$28 sps:$4 sm:$0xff]  }
 0x6e9   :  { %18995 = vmatpush1.bf16.msra.mxu1 %v27781_v4  ;;  %19465 = vmatprep.subr.bf16.mxu0 %v27792_v59  ;;  %v27831_v4 = vld [vmem:[%s38116_s3 + $0x2064] ss:$28 sps:$4 sm:$0xff]   ;;  %v27832_v59 = vld [vmem:[%s38116_s3 + $0x18f8] ss:$28 sps:$4 sm:$0xff]  }
 0x6ea   :  { %18996 = vmatprep.subr.bf16.mxu1 %v27789_v48  ;;  %v27829_v48 = vld [vmem:[%s38116_s3 + $0x2060] ss:$28 sps:$4 sm:$0xff]  }
 0x6ec   :  { %19466 = vmatpush1.bf16.msra.mxu0 %v27790_v37  ;;  %v27840_v37 = vld [vmem:[%s38116_s3 + $0x1934] ss:$28 sps:$4 sm:$0xff]  }
 0x6ed   :  { %18997 = vmatpush1.bf16.msra.mxu1 %v27787_v14  ;;  %19467 = vmatprep.subr.bf16.mxu0 %v27798_v18  ;;  %v27837_v14 = vld [vmem:[%s38116_s3 + $0x209c] ss:$28 sps:$4 sm:$0xff]   ;;  %v27838_v18 = vld [vmem:[%s38116_s3 + $0x1930] ss:$28 sps:$4 sm:$0xff]  }
 0x6ee   :  { %18998 = vmatprep.subr.bf16.mxu1 %v27795_v15  ;;  %v27835_v15 = vld [vmem:[%s38116_s3 + $0x2098] ss:$28 sps:$4 sm:$0xff]  }
 0x6f0   :  { %19468 = vmatpush1.bf16.msra.mxu0 %v27796_v46  ;;  %v27846_v46 = vld [vmem:[%s38116_s3 + $0x196c] ss:$28 sps:$4 sm:$0xff]  }
 0x6f1   :  { %18999 = vmatpush1.bf16.msra.mxu1 %v27793_v7  ;;  %19469 = vmatprep.subr.bf16.mxu0 %v27804_v11  ;;  %v27843_v7 = vld [vmem:[%s38116_s3 + $0x20d4] ss:$28 sps:$4 sm:$0xff]   ;;  %v27844_v11 = vld [vmem:[%s38116_s3 + $0x1968] ss:$28 sps:$4 sm:$0xff]  }
 0x6f2   :  { %19000 = vmatprep.subr.bf16.mxu1 %v27801_v17  ;;  %v27841_v17 = vld [vmem:[%s38116_s3 + $0x20d0] ss:$28 sps:$4 sm:$0xff]  }
 0x6f4   :  { %19470 = vmatpush1.bf16.msra.mxu0 %v27802_v16  ;;  %v27852_v16 = vld [vmem:[%s38116_s3 + $0x19a4] ss:$28 sps:$4 sm:$0xff]  }
 0x6f5   :  { %19001 = vmatpush1.bf16.msra.mxu1 %v27799_v12  ;;  %19471 = vmatprep.subr.bf16.mxu0 %v27810_v23  ;;  %v27849_v12 = vld [vmem:[%s38116_s3 + $0x210c] ss:$28 sps:$4 sm:$0xff]   ;;  %v27850_v23 = vld [vmem:[%s38116_s3 + $0x19a0] ss:$28 sps:$4 sm:$0xff]  }
 0x6f6   :  { %19013 = vmatprep.subr.bf16.mxu1 %v27807_v55  ;;  %v27847_v55 = vld [vmem:[%s38116_s3 + $0x2108] ss:$28 sps:$4 sm:$0xff]  }
 0x6f8   :  { %19003 = vmatmul.mubr.bf16.vlgmr.msra.gmra.mrb[36].mxu1 %v33450_v22  ;;  %19472 = vmatpush1.bf16.msra.mxu0 %v27808_v28  ;;  %v27858_v28 = vld [vmem:[%s38116_s3 + $0x19dc] ss:$28 sps:$4 sm:$0xff]  }
 0x6f9   :  { %19014 = vmatpush1.bf16.msra.mxu1 %v27805_v49  ;;  %19045 = vmatprep.mubr.bf16.mxu1 %v33095_v56  ;;  %v27855_v49 = vld [vmem:[%s38116_s3 + $0x2144] ss:$28 sps:$4 sm:$0xff]  }
 0x6fa   :  { %19015 = vmatprep.subr.bf16.mxu1 %v27813_v20  ;;  %19473 = vmatprep.subr.bf16.mxu0 %v27816_v35  ;;  %v27853_v20 = vld [vmem:[%s38116_s3 + $0x2140] ss:$28 sps:$4 sm:$0xff]   ;;  %v27856_v35 = vld [vmem:[%s38116_s3 + $0x19d8] ss:$28 sps:$4 sm:$0xff]  }
 0x6fc   :  { %19474 = vmatpush1.bf16.msra.mxu0 %v27814_v63  ;;  %v27864_v63 = vld [vmem:[%s38116_s3 + $0x1a14] ss:$28 sps:$4 sm:$0xff]  }
 0x6fd   :  { %19016 = vmatpush1.bf16.msra.mxu1 %v27811_v53  ;;  %19486 = vmatprep.subr.bf16.mxu0 %v27822_v38  ;;  %v27861_v53 = vld [vmem:[%s38116_s3 + $0x217c] ss:$28 sps:$4 sm:$0xff]   ;;  %v27862_v38 = vld [vmem:[%s38116_s3 + $0x1a10] ss:$28 sps:$4 sm:$0xff]  }
 0x6fe   :  { %19017 = vmatprep.subr.bf16.mxu1 %v27819_v5  ;;  %v27859_v5 = vld [vmem:[%s38116_s3 + $0x2178] ss:$28 sps:$4 sm:$0xff]  }
 0x6ff   :  { %19476 = vmatmul.mubr.bf16.vlgmr.msra.gmra.mrb[36].mxu0 %v32804_v52 }
 0x700   :  { %19487 = vmatpush1.bf16.msra.mxu0 %v27820_v41  ;;  %19518 = vmatprep.mubr.bf16.mxu0 %v32442_v29  ;;  %v27870_v41 = vld [vmem:[%s38116_s3 + $0x1a4c] ss:$28 sps:$4 sm:$0xff]  }
 0x701   :  { %19018 = vmatpush1.bf16.msra.mxu1 %v27817_v40  ;;  %19488 = vmatprep.subr.bf16.mxu0 %v27828_v36  ;;  %v27867_v40 = vld [vmem:[%s38116_s3 + $0x21b4] ss:$28 sps:$4 sm:$0xff]   ;;  %v27868_v36 = vld [vmem:[%s38116_s3 + $0x1a48] ss:$28 sps:$4 sm:$0xff]  }
 0x702   :  { %19019 = vmatprep.subr.bf16.mxu1 %v27825_v61  ;;  %v27865_v61 = vld [vmem:[%s38116_s3 + $0x21b0] ss:$28 sps:$4 sm:$0xff]  }
 0x704   :  { %19489 = vmatpush1.bf16.msra.mxu0 %v27826_v10  ;;  %v27876_v10 = vld [vmem:[%s38116_s3 + $0x1a84] ss:$28 sps:$4 sm:$0xff]  }
 0x705   :  { %19020 = vmatpush1.bf16.msra.mxu1 %v27823_v6  ;;  %19490 = vmatprep.subr.bf16.mxu0 %v27834_v60  ;;  %v27873_v6 = vld [vmem:[%s38116_s3 + $0x21ec] ss:$28 sps:$4 sm:$0xff]   ;;  %v27874_v60 = vld [vmem:[%s38116_s3 + $0x1a80] ss:$28 sps:$4 sm:$0xff]  }
 0x706   :  { %19021 = vmatprep.subr.bf16.mxu1 %v27831_v4  ;;  %v27871_v4 = vld [vmem:[%s38116_s3 + $0x21e8] ss:$28 sps:$4 sm:$0xff]  }
 0x708   :  { %19491 = vmatpush1.bf16.msra.mxu0 %v27832_v59  ;;  %v27882_v59 = vld [vmem:[%s38116_s3 + $0x1abc] ss:$28 sps:$4 sm:$0xff]  }
 0x709   :  { %19022 = vmatpush1.bf16.msra.mxu1 %v27829_v48  ;;  %19492 = vmatprep.subr.bf16.mxu0 %v27840_v37  ;;  %v27879_v48 = vld [vmem:[%s38116_s3 + $0x2224] ss:$28 sps:$4 sm:$0xff]   ;;  %v27880_v37 = vld [vmem:[%s38116_s3 + $0x1ab8] ss:$28 sps:$4 sm:$0xff]  }
 0x70a   :  { %19023 = vmatprep.subr.bf16.mxu1 %v27837_v14  ;;  %v27877_v14 = vld [vmem:[%s38116_s3 + $0x2220] ss:$28 sps:$4 sm:$0xff]  }
 0x70c   :  { %19493 = vmatpush1.bf16.msra.mxu0 %v27838_v18  ;;  %v27888_v18 = vld [vmem:[%s38116_s3 + $0x1af4] ss:$28 sps:$4 sm:$0xff]  }
 0x70d   :  { %19024 = vmatpush1.bf16.msra.mxu1 %v27835_v15  ;;  %19494 = vmatprep.subr.bf16.mxu0 %v27846_v46  ;;  %v27885_v15 = vld [vmem:[%s38116_s3 + $0x225c] ss:$28 sps:$4 sm:$0xff]   ;;  %v27886_v46 = vld [vmem:[%s38116_s3 + $0x1af0] ss:$28 sps:$4 sm:$0xff]  }
 0x70e   :  { %19025 = vmatprep.subr.bf16.mxu1 %v27843_v7  ;;  %v27883_v7 = vld [vmem:[%s38116_s3 + $0x2258] ss:$28 sps:$4 sm:$0xff]  }
 0x710   :  { %19495 = vmatpush1.bf16.msra.mxu0 %v27844_v11  ;;  %v27894_v11 = vld [vmem:[%s38116_s3 + $0x1b2c] ss:$28 sps:$4 sm:$0xff]  }
 0x711   :  { %19026 = vmatpush1.bf16.msra.mxu1 %v27841_v17  ;;  %19496 = vmatprep.subr.bf16.mxu0 %v27852_v16  ;;  %v27891_v17 = vld [vmem:[%s38116_s3 + $0x2294] ss:$28 sps:$4 sm:$0xff]   ;;  %v27892_v16 = vld [vmem:[%s38116_s3 + $0x1b28] ss:$28 sps:$4 sm:$0xff]  }
 0x712   :  { %19027 = vmatprep.subr.bf16.mxu1 %v27849_v12  ;;  %v27889_v12 = vld [vmem:[%s38116_s3 + $0x2290] ss:$28 sps:$4 sm:$0xff]  }
 0x714   :  { %19497 = vmatpush1.bf16.msra.mxu0 %v27850_v23  ;;  %v27900_v23 = vld [vmem:[%s38116_s3 + $0x1b64] ss:$28 sps:$4 sm:$0xff]  }
 0x715   :  { %19028 = vmatpush1.bf16.msra.mxu1 %v27847_v55  ;;  %19498 = vmatprep.subr.bf16.mxu0 %v27858_v28  ;;  %v27897_v55 = vld [vmem:[%s38116_s3 + $0x22cc] ss:$28 sps:$4 sm:$0xff]   ;;  %v27898_v28 = vld [vmem:[%s38116_s3 + $0x1b60] ss:$28 sps:$4 sm:$0xff]  }
 0x716   :  { %19029 = vmatprep.subr.bf16.mxu1 %v27855_v49  ;;  %v27895_v49 = vld [vmem:[%s38116_s3 + $0x22c8] ss:$28 sps:$4 sm:$0xff]  }
 0x718   :  { %19499 = vmatpush1.bf16.msra.mxu0 %v27856_v35  ;;  %v27906_v35 = vld [vmem:[%s38116_s3 + $0x1b9c] ss:$28 sps:$4 sm:$0xff]  }
 0x719   :  { %19030 = vmatpush1.bf16.msra.mxu1 %v27853_v20  ;;  %19500 = vmatprep.subr.bf16.mxu0 %v27864_v63  ;;  %v27903_v20 = vld [vmem:[%s38116_s3 + $0x2304] ss:$28 sps:$4 sm:$0xff]   ;;  %v27904_v63 = vld [vmem:[%s38116_s3 + $0x1b98] ss:$28 sps:$4 sm:$0xff]  }
 0x71a   :  { %19031 = vmatprep.subr.bf16.mxu1 %v27861_v53  ;;  %v27901_v53 = vld [vmem:[%s38116_s3 + $0x2300] ss:$28 sps:$4 sm:$0xff]  }
 0x71c   :  { %19501 = vmatpush1.bf16.msra.mxu0 %v27862_v38  ;;  %v27912_v38 = vld [vmem:[%s38116_s3 + $0x1bd4] ss:$28 sps:$4 sm:$0xff]  }
 0x71d   :  { %19032 = vmatpush1.bf16.msra.mxu1 %v27859_v5  ;;  %19502 = vmatprep.subr.bf16.mxu0 %v27870_v41  ;;  %v27909_v5 = vld [vmem:[%s38116_s3 + $0x233c] ss:$28 sps:$4 sm:$0xff]   ;;  %v27910_v41 = vld [vmem:[%s38116_s3 + $0x1bd0] ss:$28 sps:$4 sm:$0xff]  }
 0x71e   :  { %19033 = vmatprep.subr.bf16.mxu1 %v27867_v40  ;;  %v27907_v40 = vld [vmem:[%s38116_s3 + $0x2338] ss:$28 sps:$4 sm:$0xff]  }
 0x720   :  { %19503 = vmatpush1.bf16.msra.mxu0 %v27868_v36  ;;  %v27918_v36 = vld [vmem:[%s38116_s3 + $0x1c0c] ss:$28 sps:$4 sm:$0xff]  }
 0x721   :  { %19034 = vmatpush1.bf16.msra.mxu1 %v27865_v61  ;;  %19504 = vmatprep.subr.bf16.mxu0 %v27876_v10  ;;  %v27915_v61 = vld [vmem:[%s38116_s3 + $0x2374] ss:$28 sps:$4 sm:$0xff]   ;;  %v27916_v10 = vld [vmem:[%s38116_s3 + $0x1c08] ss:$28 sps:$4 sm:$0xff]  }
 0x722   :  { %19035 = vmatprep.subr.bf16.mxu1 %v27873_v6  ;;  %v27913_v6 = vld [vmem:[%s38116_s3 + $0x2370] ss:$28 sps:$4 sm:$0xff]  }
 0x724   :  { %19505 = vmatpush1.bf16.msra.mxu0 %v27874_v60  ;;  %v27924_v60 = vld [vmem:[%s38116_s3 + $0x1c44] ss:$28 sps:$4 sm:$0xff]  }
 0x725   :  { %19036 = vmatpush1.bf16.msra.mxu1 %v27871_v4  ;;  %19506 = vmatprep.subr.bf16.mxu0 %v27882_v59  ;;  %v27921_v4 = vld [vmem:[%s38116_s3 + $0x23ac] ss:$28 sps:$4 sm:$0xff]   ;;  %v27922_v59 = vld [vmem:[%s38116_s3 + $0x1c40] ss:$28 sps:$4 sm:$0xff]  }
 0x726   :  { %19037 = vmatprep.subr.bf16.mxu1 %v27879_v48  ;;  %v27919_v48 = vld [vmem:[%s38116_s3 + $0x23a8] ss:$28 sps:$4 sm:$0xff]  }
 0x728   :  { %19507 = vmatpush1.bf16.msra.mxu0 %v27880_v37  ;;  %v27930_v37 = vld [vmem:[%s38116_s3 + $0x1c7c] ss:$28 sps:$4 sm:$0xff]  }
 0x729   :  { %19038 = vmatpush1.bf16.msra.mxu1 %v27877_v14  ;;  %19508 = vmatprep.subr.bf16.mxu0 %v27888_v18  ;;  %v27927_v14 = vld [vmem:[%s38116_s3 + $0x23e4] ss:$28 sps:$4 sm:$0xff]   ;;  %v27928_v18 = vld [vmem:[%s38116_s3 + $0x1c78] ss:$28 sps:$4 sm:$0xff]  }
 0x72a   :  { %19039 = vmatprep.subr.bf16.mxu1 %v27885_v15  ;;  %v27925_v15 = vld [vmem:[%s38116_s3 + $0x23e0] ss:$28 sps:$4 sm:$0xff]  }
 0x72c   :  { %19509 = vmatpush1.bf16.msra.mxu0 %v27886_v46  ;;  %v27936_v46 = vld [vmem:[%s38116_s3 + $0x1cb4] ss:$28 sps:$4 sm:$0xff]  }
 0x72d   :  { %19040 = vmatpush1.bf16.msra.mxu1 %v27883_v7  ;;  %19510 = vmatprep.subr.bf16.mxu0 %v27894_v11  ;;  %v27933_v7 = vld [vmem:[%s38116_s3 + $0x241c] ss:$28 sps:$4 sm:$0xff]   ;;  %v27934_v11 = vld [vmem:[%s38116_s3 + $0x1cb0] ss:$28 sps:$4 sm:$0xff]  }
 0x72e   :  { %19041 = vmatprep.subr.bf16.mxu1 %v27891_v17  ;;  %v27931_v17 = vld [vmem:[%s38116_s3 + $0x2418] ss:$28 sps:$4 sm:$0xff]  }
 0x730   :  { %19511 = vmatpush1.bf16.msra.mxu0 %v27892_v16  ;;  %v27942_v16 = vld [vmem:[%s38116_s3 + $0x1cec] ss:$28 sps:$4 sm:$0xff]  }
 0x731   :  { %19042 = vmatpush1.bf16.msra.mxu1 %v27889_v12  ;;  %19512 = vmatprep.subr.bf16.mxu0 %v27900_v23  ;;  %v27939_v12 = vld [vmem:[%s38116_s3 + $0x2454] ss:$28 sps:$4 sm:$0xff]   ;;  %v27940_v23 = vld [vmem:[%s38116_s3 + $0x1ce8] ss:$28 sps:$4 sm:$0xff]  }
 0x732   :  { %19043 = vmatprep.subr.bf16.mxu1 %v27897_v55  ;;  %v27937_v55 = vld [vmem:[%s38116_s3 + $0x2450] ss:$28 sps:$4 sm:$0xff]  }
 0x734   :  { %19513 = vmatpush1.bf16.msra.mxu0 %v27898_v28  ;;  %v27948_v28 = vld [vmem:[%s38116_s3 + $0x1d24] ss:$28 sps:$4 sm:$0xff]  }
 0x735   :  { %19044 = vmatpush1.bf16.msra.mxu1 %v27895_v49  ;;  %19514 = vmatprep.subr.bf16.mxu0 %v27906_v35  ;;  %v27945_v49 = vld [vmem:[%s38116_s3 + $0x248c] ss:$28 sps:$4 sm:$0xff]   ;;  %v27946_v35 = vld [vmem:[%s38116_s3 + $0x1d20] ss:$28 sps:$4 sm:$0xff]  }
 0x736   :  { %19056 = vmatprep.subr.bf16.mxu1 %v27903_v20  ;;  %v27943_v20 = vld [vmem:[%s38116_s3 + $0x2488] ss:$28 sps:$4 sm:$0xff]  }
 0x738   :  { %19046 = vmatmul.mubr.bf16.vlgmr.msra.gmra.mrb[36].mxu1 %v33087_v39  ;;  %19515 = vmatpush1.bf16.msra.mxu0 %v27904_v63  ;;  %v27954_v63 = vld [vmem:[%s38116_s3 + $0x1d5c] ss:$28 sps:$4 sm:$0xff]  }
 0x739   :  { %19057 = vmatpush1.bf16.msra.mxu1 %v27901_v53  ;;  %19088 = vmatprep.mubr.bf16.mxu1 %v34112_v2  ;;  %v27951_v53 = vld [vmem:[%s38116_s3 + $0x24c4] ss:$28 sps:$4 sm:$0xff]  }
 0x73a   :  { %19058 = vmatprep.subr.bf16.mxu1 %v27909_v5  ;;  %19516 = vmatprep.subr.bf16.mxu0 %v27912_v38  ;;  %v27949_v5 = vld [vmem:[%s38116_s3 + $0x24c0] ss:$28 sps:$4 sm:$0xff]   ;;  %v27952_v38 = vld [vmem:[%s38116_s3 + $0x1d58] ss:$28 sps:$4 sm:$0xff]  }
 0x73c   :  { %19517 = vmatpush1.bf16.msra.mxu0 %v27910_v41  ;;  %v27960_v41 = vld [vmem:[%s38116_s3 + $0x1d94] ss:$28 sps:$4 sm:$0xff]  }
 0x73d   :  { %19059 = vmatpush1.bf16.msra.mxu1 %v27907_v40  ;;  %19529 = vmatprep.subr.bf16.mxu0 %v27918_v36  ;;  %v27957_v40 = vld [vmem:[%s38116_s3 + $0x24fc] ss:$28 sps:$4 sm:$0xff]   ;;  %v27958_v36 = vld [vmem:[%s38116_s3 + $0x1d90] ss:$28 sps:$4 sm:$0xff]  }
 0x73e   :  { %19060 = vmatprep.subr.bf16.mxu1 %v27915_v61  ;;  %v27955_v61 = vld [vmem:[%s38116_s3 + $0x24f8] ss:$28 sps:$4 sm:$0xff]  }
 0x73f   :  { %19519 = vmatmul.mubr.bf16.vlgmr.msra.gmra.mrb[36].mxu0 %v32434_v42 }
 0x740   :  { %19530 = vmatpush1.bf16.msra.mxu0 %v27916_v10  ;;  %19561 = vmatprep.mubr.bf16.mxu0 %v33452_v44  ;;  %v27966_v10 = vld [vmem:[%s38116_s3 + $0x1dcc] ss:$28 sps:$4 sm:$0xff]  }
 0x741   :  { %19061 = vmatpush1.bf16.msra.mxu1 %v27913_v6  ;;  %19531 = vmatprep.subr.bf16.mxu0 %v27924_v60  ;;  %v27963_v6 = vld [vmem:[%s38116_s3 + $0x2534] ss:$28 sps:$4 sm:$0xff]   ;;  %v27964_v60 = vld [vmem:[%s38116_s3 + $0x1dc8] ss:$28 sps:$4 sm:$0xff]  }
 0x742   :  { %19062 = vmatprep.subr.bf16.mxu1 %v27921_v4  ;;  %v27961_v4 = vld [vmem:[%s38116_s3 + $0x2530] ss:$28 sps:$4 sm:$0xff]  }
 0x744   :  { %19532 = vmatpush1.bf16.msra.mxu0 %v27922_v59  ;;  %v27972_v59 = vld [vmem:[%s38116_s3 + $0x1e04] ss:$28 sps:$4 sm:$0xff]  }
 0x745   :  { %19063 = vmatpush1.bf16.msra.mxu1 %v27919_v48  ;;  %19533 = vmatprep.subr.bf16.mxu0 %v27930_v37  ;;  %v27969_v48 = vld [vmem:[%s38116_s3 + $0x256c] ss:$28 sps:$4 sm:$0xff]   ;;  %v27970_v37 = vld [vmem:[%s38116_s3 + $0x1e00] ss:$28 sps:$4 sm:$0xff]  }
 0x746   :  { %19064 = vmatprep.subr.bf16.mxu1 %v27927_v14  ;;  %v27967_v14 = vld [vmem:[%s38116_s3 + $0x2568] ss:$28 sps:$4 sm:$0xff]  }
 0x748   :  { %19534 = vmatpush1.bf16.msra.mxu0 %v27928_v18  ;;  %v27978_v18 = vld [vmem:[%s38116_s3 + $0x1e3c] ss:$28 sps:$4 sm:$0xff]  }
 0x749   :  { %19065 = vmatpush1.bf16.msra.mxu1 %v27925_v15  ;;  %19535 = vmatprep.subr.bf16.mxu0 %v27936_v46  ;;  %v27975_v15 = vld [vmem:[%s38116_s3 + $0x25a4] ss:$28 sps:$4 sm:$0xff]   ;;  %v27976_v46 = vld [vmem:[%s38116_s3 + $0x1e38] ss:$28 sps:$4 sm:$0xff]  }
 0x74a   :  { %19066 = vmatprep.subr.bf16.mxu1 %v27933_v7  ;;  %v27973_v7 = vld [vmem:[%s38116_s3 + $0x25a0] ss:$28 sps:$4 sm:$0xff]  }
 0x74c   :  { %19536 = vmatpush1.bf16.msra.mxu0 %v27934_v11  ;;  %v27984_v11 = vld [vmem:[%s38116_s3 + $0x1e74] ss:$28 sps:$4 sm:$0xff]  }
 0x74d   :  { %19067 = vmatpush1.bf16.msra.mxu1 %v27931_v17  ;;  %19537 = vmatprep.subr.bf16.mxu0 %v27942_v16  ;;  %v27981_v17 = vld [vmem:[%s38116_s3 + $0x25dc] ss:$28 sps:$4 sm:$0xff]   ;;  %v27982_v16 = vld [vmem:[%s38116_s3 + $0x1e70] ss:$28 sps:$4 sm:$0xff]  }
 0x74e   :  { %19068 = vmatprep.subr.bf16.mxu1 %v27939_v12  ;;  %v27979_v12 = vld [vmem:[%s38116_s3 + $0x25d8] ss:$28 sps:$4 sm:$0xff]  }
 0x750   :  { %19538 = vmatpush1.bf16.msra.mxu0 %v27940_v23  ;;  %v27990_v23 = vld [vmem:[%s38116_s3 + $0x1eac] ss:$28 sps:$4 sm:$0xff]  }
 0x751   :  { %19069 = vmatpush1.bf16.msra.mxu1 %v27937_v55  ;;  %19539 = vmatprep.subr.bf16.mxu0 %v27948_v28  ;;  %v27987_v55 = vld [vmem:[%s38116_s3 + $0x2614] ss:$28 sps:$4 sm:$0xff]   ;;  %v27988_v28 = vld [vmem:[%s38116_s3 + $0x1ea8] ss:$28 sps:$4 sm:$0xff]  }
 0x752   :  { %19070 = vmatprep.subr.bf16.mxu1 %v27945_v49  ;;  %v27985_v49 = vld [vmem:[%s38116_s3 + $0x2610] ss:$28 sps:$4 sm:$0xff]  }
 0x754   :  { %19540 = vmatpush1.bf16.msra.mxu0 %v27946_v35  ;;  %v27996_v35 = vld [vmem:[%s38116_s3 + $0x1ee4] ss:$28 sps:$4 sm:$0xff]  }
 0x755   :  { %19071 = vmatpush1.bf16.msra.mxu1 %v27943_v20  ;;  %19541 = vmatprep.subr.bf16.mxu0 %v27954_v63  ;;  %v27993_v20 = vld [vmem:[%s38116_s3 + $0x264c] ss:$28 sps:$4 sm:$0xff]   ;;  %v27994_v63 = vld [vmem:[%s38116_s3 + $0x1ee0] ss:$28 sps:$4 sm:$0xff]  }
 0x756   :  { %19072 = vmatprep.subr.bf16.mxu1 %v27951_v53  ;;  %v27991_v53 = vld [vmem:[%s38116_s3 + $0x2648] ss:$28 sps:$4 sm:$0xff]  }
 0x758   :  { %19542 = vmatpush1.bf16.msra.mxu0 %v27952_v38  ;;  %v28002_v38 = vld [vmem:[%s38116_s3 + $0x1f1c] ss:$28 sps:$4 sm:$0xff]  }
 0x759   :  { %19073 = vmatpush1.bf16.msra.mxu1 %v27949_v5  ;;  %19543 = vmatprep.subr.bf16.mxu0 %v27960_v41  ;;  %v27999_v5 = vld [vmem:[%s38116_s3 + $0x2684] ss:$28 sps:$4 sm:$0xff]   ;;  %v28000_v41 = vld [vmem:[%s38116_s3 + $0x1f18] ss:$28 sps:$4 sm:$0xff]  }
 0x75a   :  { %19074 = vmatprep.subr.bf16.mxu1 %v27957_v40  ;;  %v27997_v40 = vld [vmem:[%s38116_s3 + $0x2680] ss:$28 sps:$4 sm:$0xff]  }
 0x75c   :  { %19544 = vmatpush1.bf16.msra.mxu0 %v27958_v36  ;;  %v28008_v36 = vld [vmem:[%s38116_s3 + $0x1f54] ss:$28 sps:$4 sm:$0xff]  }
 0x75d   :  { %19075 = vmatpush1.bf16.msra.mxu1 %v27955_v61  ;;  %19545 = vmatprep.subr.bf16.mxu0 %v27966_v10  ;;  %v28005_v61 = vld [vmem:[%s38116_s3 + $0x26bc] ss:$28 sps:$4 sm:$0xff]   ;;  %v28006_v10 = vld [vmem:[%s38116_s3 + $0x1f50] ss:$28 sps:$4 sm:$0xff]  }
 0x75e   :  { %19076 = vmatprep.subr.bf16.mxu1 %v27963_v6  ;;  %v28003_v6 = vld [vmem:[%s38116_s3 + $0x26b8] ss:$28 sps:$4 sm:$0xff]  }
 0x760   :  { %19546 = vmatpush1.bf16.msra.mxu0 %v27964_v60  ;;  %v28014_v60 = vld [vmem:[%s38116_s3 + $0x1f8c] ss:$28 sps:$4 sm:$0xff]  }
 0x761   :  { %19077 = vmatpush1.bf16.msra.mxu1 %v27961_v4  ;;  %19547 = vmatprep.subr.bf16.mxu0 %v27972_v59  ;;  %v28011_v4 = vld [vmem:[%s38116_s3 + $0x26f4] ss:$28 sps:$4 sm:$0xff]   ;;  %v28012_v59 = vld [vmem:[%s38116_s3 + $0x1f88] ss:$28 sps:$4 sm:$0xff]  }
 0x762   :  { %19078 = vmatprep.subr.bf16.mxu1 %v27969_v48  ;;  %v28009_v48 = vld [vmem:[%s38116_s3 + $0x26f0] ss:$28 sps:$4 sm:$0xff]  }
 0x764   :  { %19548 = vmatpush1.bf16.msra.mxu0 %v27970_v37  ;;  %v28020_v37 = vld [vmem:[%s38116_s3 + $0x1fc4] ss:$28 sps:$4 sm:$0xff]  }
 0x765   :  { %19079 = vmatpush1.bf16.msra.mxu1 %v27967_v14  ;;  %19549 = vmatprep.subr.bf16.mxu0 %v27978_v18  ;;  %v28017_v14 = vld [vmem:[%s38116_s3 + $0x272c] ss:$28 sps:$4 sm:$0xff]   ;;  %v28018_v18 = vld [vmem:[%s38116_s3 + $0x1fc0] ss:$28 sps:$4 sm:$0xff]  }
 0x766   :  { %19080 = vmatprep.subr.bf16.mxu1 %v27975_v15  ;;  %v28015_v15 = vld [vmem:[%s38116_s3 + $0x2728] ss:$28 sps:$4 sm:$0xff]  }
 0x768   :  { %19550 = vmatpush1.bf16.msra.mxu0 %v27976_v46  ;;  %v28026_v46 = vld [vmem:[%s38116_s3 + $0x1ffc] ss:$28 sps:$4 sm:$0xff]  }
 0x769   :  { %19081 = vmatpush1.bf16.msra.mxu1 %v27973_v7  ;;  %19551 = vmatprep.subr.bf16.mxu0 %v27984_v11  ;;  %v28023_v7 = vld [vmem:[%s38116_s3 + $0x2764] ss:$28 sps:$4 sm:$0xff]   ;;  %v28024_v11 = vld [vmem:[%s38116_s3 + $0x1ff8] ss:$28 sps:$4 sm:$0xff]  }
 0x76a   :  { %19082 = vmatprep.subr.bf16.mxu1 %v27981_v17  ;;  %v28021_v17 = vld [vmem:[%s38116_s3 + $0x2760] ss:$28 sps:$4 sm:$0xff]  }
 0x76c   :  { %19552 = vmatpush1.bf16.msra.mxu0 %v27982_v16  ;;  %v28032_v16 = vld [vmem:[%s38116_s3 + $0x2034] ss:$28 sps:$4 sm:$0xff]  }
 0x76d   :  { %19083 = vmatpush1.bf16.msra.mxu1 %v27979_v12  ;;  %19553 = vmatprep.subr.bf16.mxu0 %v27990_v23  ;;  %v28029_v12 = vld [vmem:[%s38116_s3 + $0x279c] ss:$28 sps:$4 sm:$0xff]   ;;  %v28030_v23 = vld [vmem:[%s38116_s3 + $0x2030] ss:$28 sps:$4 sm:$0xff]  }
 0x76e   :  { %19084 = vmatprep.subr.bf16.mxu1 %v27987_v55  ;;  %v28027_v55 = vld [vmem:[%s38116_s3 + $0x2798] ss:$28 sps:$4 sm:$0xff]  }
 0x770   :  { %19554 = vmatpush1.bf16.msra.mxu0 %v27988_v28  ;;  %v28038_v28 = vld [vmem:[%s38116_s3 + $0x206c] ss:$28 sps:$4 sm:$0xff]  }
 0x771   :  { %19085 = vmatpush1.bf16.msra.mxu1 %v27985_v49  ;;  %19555 = vmatprep.subr.bf16.mxu0 %v27996_v35  ;;  %v28035_v49 = vld [vmem:[%s38116_s3 + $0x27d4] ss:$28 sps:$4 sm:$0xff]   ;;  %v28036_v35 = vld [vmem:[%s38116_s3 + $0x2068] ss:$28 sps:$4 sm:$0xff]  }
 0x772   :  { %19086 = vmatprep.subr.bf16.mxu1 %v27993_v20  ;;  %v28033_v20 = vld [vmem:[%s38116_s3 + $0x27d0] ss:$28 sps:$4 sm:$0xff]  }
 0x774   :  { %19556 = vmatpush1.bf16.msra.mxu0 %v27994_v63  ;;  %v28044_v63 = vld [vmem:[%s38116_s3 + $0x20a4] ss:$28 sps:$4 sm:$0xff]  }
 0x775   :  { %19087 = vmatpush1.bf16.msra.mxu1 %v27991_v53  ;;  %19557 = vmatprep.subr.bf16.mxu0 %v28002_v38  ;;  %v28041_v53 = vld [vmem:[%s38116_s3 + $0x280c] ss:$28 sps:$4 sm:$0xff]   ;;  %v28042_v38 = vld [vmem:[%s38116_s3 + $0x20a0] ss:$28 sps:$4 sm:$0xff]  }
 0x776   :  { %19099 = vmatprep.subr.bf16.mxu1 %v27999_v5  ;;  %v28039_v5 = vld [vmem:[%s38116_s3 + $0x2808] ss:$28 sps:$4 sm:$0xff]  }
 0x778   :  { %19089 = vmatmul.mubr.bf16.vlgmr.msra.gmra.mrb[36].mxu1 %v34107_v25  ;;  %19558 = vmatpush1.bf16.msra.mxu0 %v28000_v41  ;;  %v28050_v41 = vld [vmem:[%s38116_s3 + $0x20dc] ss:$28 sps:$4 sm:$0xff]  }
 0x779   :  { %19100 = vmatpush1.bf16.msra.mxu1 %v27997_v40  ;;  %19131 = vmatprep.mubr.bf16.mxu1 %v33749_v54  ;;  %v28047_v40 = vld [vmem:[%s38116_s3 + $0x2844] ss:$28 sps:$4 sm:$0xff]  }
 0x77a   :  { %19101 = vmatprep.subr.bf16.mxu1 %v28005_v61  ;;  %19559 = vmatprep.subr.bf16.mxu0 %v28008_v36  ;;  %v28045_v61 = vld [vmem:[%s38116_s3 + $0x2840] ss:$28 sps:$4 sm:$0xff]   ;;  %v28048_v36 = vld [vmem:[%s38116_s3 + $0x20d8] ss:$28 sps:$4 sm:$0xff]  }
 0x77c   :  { %19560 = vmatpush1.bf16.msra.mxu0 %v28006_v10  ;;  %v28056_v10 = vld [vmem:[%s38116_s3 + $0x2114] ss:$28 sps:$4 sm:$0xff]  }
 0x77d   :  { %19102 = vmatpush1.bf16.msra.mxu1 %v28003_v6  ;;  %19572 = vmatprep.subr.bf16.mxu0 %v28014_v60  ;;  %v28053_v6 = vld [vmem:[%s38116_s3 + $0x287c] ss:$28 sps:$4 sm:$0xff]   ;;  %v28054_v60 = vld [vmem:[%s38116_s3 + $0x2110] ss:$28 sps:$4 sm:$0xff]  }
 0x77e   :  { %19103 = vmatprep.subr.bf16.mxu1 %v28011_v4  ;;  %v28051_v4 = vld [vmem:[%s38116_s3 + $0x2878] ss:$28 sps:$4 sm:$0xff]  }
 0x77f   :  { %19562 = vmatmul.mubr.bf16.vlgmr.msra.gmra.mrb[36].mxu0 %v33450_v22 }
 0x780   :  { %19573 = vmatpush1.bf16.msra.mxu0 %v28012_v59  ;;  %19604 = vmatprep.mubr.bf16.mxu0 %v33095_v56  ;;  %v28062_v59 = vld [vmem:[%s38116_s3 + $0x214c] ss:$28 sps:$4 sm:$0xff]  }
 0x781   :  { %19104 = vmatpush1.bf16.msra.mxu1 %v28009_v48  ;;  %19574 = vmatprep.subr.bf16.mxu0 %v28020_v37  ;;  %v28059_v48 = vld [vmem:[%s38116_s3 + $0x28b4] ss:$28 sps:$4 sm:$0xff]   ;;  %v28060_v37 = vld [vmem:[%s38116_s3 + $0x2148] ss:$28 sps:$4 sm:$0xff]  }
 0x782   :  { %19105 = vmatprep.subr.bf16.mxu1 %v28017_v14  ;;  %v28057_v14 = vld [vmem:[%s38116_s3 + $0x28b0] ss:$28 sps:$4 sm:$0xff]  }
 0x784   :  { %19575 = vmatpush1.bf16.msra.mxu0 %v28018_v18  ;;  %v28068_v18 = vld [vmem:[%s38116_s3 + $0x2184] ss:$28 sps:$4 sm:$0xff]  }
 0x785   :  { %19106 = vmatpush1.bf16.msra.mxu1 %v28015_v15  ;;  %19576 = vmatprep.subr.bf16.mxu0 %v28026_v46  ;;  %v28065_v15 = vld [vmem:[%s38116_s3 + $0x28ec] ss:$28 sps:$4 sm:$0xff]   ;;  %v28066_v46 = vld [vmem:[%s38116_s3 + $0x2180] ss:$28 sps:$4 sm:$0xff]  }
 0x786   :  { %19107 = vmatprep.subr.bf16.mxu1 %v28023_v7  ;;  %v28063_v7 = vld [vmem:[%s38116_s3 + $0x28e8] ss:$28 sps:$4 sm:$0xff]  }
 0x788   :  { %19577 = vmatpush1.bf16.msra.mxu0 %v28024_v11  ;;  %v28074_v11 = vld [vmem:[%s38116_s3 + $0x21bc] ss:$28 sps:$4 sm:$0xff]  }
 0x789   :  { %19108 = vmatpush1.bf16.msra.mxu1 %v28021_v17  ;;  %19578 = vmatprep.subr.bf16.mxu0 %v28032_v16  ;;  %v28071_v17 = vld [vmem:[%s38116_s3 + $0x2924] ss:$28 sps:$4 sm:$0xff]   ;;  %v28072_v16 = vld [vmem:[%s38116_s3 + $0x21b8] ss:$28 sps:$4 sm:$0xff]  }
 0x78a   :  { %19109 = vmatprep.subr.bf16.mxu1 %v28029_v12  ;;  %v28069_v12 = vld [vmem:[%s38116_s3 + $0x2920] ss:$28 sps:$4 sm:$0xff]  }
 0x78c   :  { %19579 = vmatpush1.bf16.msra.mxu0 %v28030_v23  ;;  %v28080_v23 = vld [vmem:[%s38116_s3 + $0x21f4] ss:$28 sps:$4 sm:$0xff]  }
 0x78d   :  { %19110 = vmatpush1.bf16.msra.mxu1 %v28027_v55  ;;  %19580 = vmatprep.subr.bf16.mxu0 %v28038_v28  ;;  %v28077_v55 = vld [vmem:[%s38116_s3 + $0x295c] ss:$28 sps:$4 sm:$0xff]   ;;  %v28078_v28 = vld [vmem:[%s38116_s3 + $0x21f0] ss:$28 sps:$4 sm:$0xff]  }
 0x78e   :  { %19111 = vmatprep.subr.bf16.mxu1 %v28035_v49  ;;  %v28075_v49 = vld [vmem:[%s38116_s3 + $0x2958] ss:$28 sps:$4 sm:$0xff]  }
 0x790   :  { %19581 = vmatpush1.bf16.msra.mxu0 %v28036_v35  ;;  %v28086_v35 = vld [vmem:[%s38116_s3 + $0x222c] ss:$28 sps:$4 sm:$0xff]  }
 0x791   :  { %19112 = vmatpush1.bf16.msra.mxu1 %v28033_v20  ;;  %19582 = vmatprep.subr.bf16.mxu0 %v28044_v63  ;;  %v28083_v20 = vld [vmem:[%s38116_s3 + $0x2994] ss:$28 sps:$4 sm:$0xff]   ;;  %v28084_v63 = vld [vmem:[%s38116_s3 + $0x2228] ss:$28 sps:$4 sm:$0xff]  }
 0x792   :  { %19113 = vmatprep.subr.bf16.mxu1 %v28041_v53  ;;  %v28081_v53 = vld [vmem:[%s38116_s3 + $0x2990] ss:$28 sps:$4 sm:$0xff]  }
 0x794   :  { %19583 = vmatpush1.bf16.msra.mxu0 %v28042_v38  ;;  %v28092_v38 = vld [vmem:[%s38116_s3 + $0x2264] ss:$28 sps:$4 sm:$0xff]  }
 0x795   :  { %19114 = vmatpush1.bf16.msra.mxu1 %v28039_v5  ;;  %19584 = vmatprep.subr.bf16.mxu0 %v28050_v41  ;;  %v28089_v5 = vld [vmem:[%s38116_s3 + $0x29cc] ss:$28 sps:$4 sm:$0xff]   ;;  %v28090_v41 = vld [vmem:[%s38116_s3 + $0x2260] ss:$28 sps:$4 sm:$0xff]  }
 0x796   :  { %19115 = vmatprep.subr.bf16.mxu1 %v28047_v40  ;;  %v28087_v40 = vld [vmem:[%s38116_s3 + $0x29c8] ss:$28 sps:$4 sm:$0xff]  }
 0x798   :  { %19585 = vmatpush1.bf16.msra.mxu0 %v28048_v36  ;;  %v28098_v36 = vld [vmem:[%s38116_s3 + $0x229c] ss:$28 sps:$4 sm:$0xff]  }
 0x799   :  { %19116 = vmatpush1.bf16.msra.mxu1 %v28045_v61  ;;  %19586 = vmatprep.subr.bf16.mxu0 %v28056_v10  ;;  %v28095_v61 = vld [vmem:[%s38116_s3 + $0x2a04] ss:$28 sps:$4 sm:$0xff]   ;;  %v28096_v10 = vld [vmem:[%s38116_s3 + $0x2298] ss:$28 sps:$4 sm:$0xff]  }
 0x79a   :  { %19117 = vmatprep.subr.bf16.mxu1 %v28053_v6  ;;  %v28093_v6 = vld [vmem:[%s38116_s3 + $0x2a00] ss:$28 sps:$4 sm:$0xff]  }
 0x79c   :  { %19587 = vmatpush1.bf16.msra.mxu0 %v28054_v60  ;;  %v28104_v60 = vld [vmem:[%s38116_s3 + $0x22d4] ss:$28 sps:$4 sm:$0xff]  }
 0x79d   :  { %19118 = vmatpush1.bf16.msra.mxu1 %v28051_v4  ;;  %19588 = vmatprep.subr.bf16.mxu0 %v28062_v59  ;;  %v28101_v4 = vld [vmem:[%s38116_s3 + $0x2a3c] ss:$28 sps:$4 sm:$0xff]   ;;  %v28102_v59 = vld [vmem:[%s38116_s3 + $0x22d0] ss:$28 sps:$4 sm:$0xff]  }
 0x79e   :  { %19119 = vmatprep.subr.bf16.mxu1 %v28059_v48  ;;  %v28099_v48 = vld [vmem:[%s38116_s3 + $0x2a38] ss:$28 sps:$4 sm:$0xff]  }
 0x7a0   :  { %19589 = vmatpush1.bf16.msra.mxu0 %v28060_v37  ;;  %v28110_v37 = vld [vmem:[%s38116_s3 + $0x230c] ss:$28 sps:$4 sm:$0xff]  }
 0x7a1   :  { %19120 = vmatpush1.bf16.msra.mxu1 %v28057_v14  ;;  %19590 = vmatprep.subr.bf16.mxu0 %v28068_v18  ;;  %v28107_v14 = vld [vmem:[%s38116_s3 + $0x2a74] ss:$28 sps:$4 sm:$0xff]   ;;  %v28108_v18 = vld [vmem:[%s38116_s3 + $0x2308] ss:$28 sps:$4 sm:$0xff]  }
 0x7a2   :  { %19121 = vmatprep.subr.bf16.mxu1 %v28065_v15  ;;  %v28105_v15 = vld [vmem:[%s38116_s3 + $0x2a70] ss:$28 sps:$4 sm:$0xff]  }
 0x7a4   :  { %19591 = vmatpush1.bf16.msra.mxu0 %v28066_v46  ;;  %v28116_v46 = vld [vmem:[%s38116_s3 + $0x2344] ss:$28 sps:$4 sm:$0xff]  }
 0x7a5   :  { %19122 = vmatpush1.bf16.msra.mxu1 %v28063_v7  ;;  %19592 = vmatprep.subr.bf16.mxu0 %v28074_v11  ;;  %v28113_v7 = vld [vmem:[%s38116_s3 + $0x2aac] ss:$28 sps:$4 sm:$0xff]   ;;  %v28114_v11 = vld [vmem:[%s38116_s3 + $0x2340] ss:$28 sps:$4 sm:$0xff]  }
 0x7a6   :  { %19123 = vmatprep.subr.bf16.mxu1 %v28071_v17  ;;  %v28111_v17 = vld [vmem:[%s38116_s3 + $0x2aa8] ss:$28 sps:$4 sm:$0xff]  }
 0x7a8   :  { %19593 = vmatpush1.bf16.msra.mxu0 %v28072_v16  ;;  %v28122_v16 = vld [vmem:[%s38116_s3 + $0x237c] ss:$28 sps:$4 sm:$0xff]  }
 0x7a9   :  { %19124 = vmatpush1.bf16.msra.mxu1 %v28069_v12  ;;  %19594 = vmatprep.subr.bf16.mxu0 %v28080_v23  ;;  %v28119_v12 = vld [vmem:[%s38116_s3 + $0x14] ss:$28 sps:$4 sm:$0xff]  }
 0x7aa   :  { %19125 = vmatprep.subr.bf16.mxu1 %v28077_v55  ;;  %v28117_v55 = vld [vmem:[%s38116_s3 + $0x10] ss:$28 sps:$4 sm:$0xff]   ;;  %v28120_v23 = vld [vmem:[%s38116_s3 + $0x2378] ss:$28 sps:$4 sm:$0xff]  }
 0x7ac   :  { %19595 = vmatpush1.bf16.msra.mxu0 %v28078_v28  ;;  %v28128_v28 = vld [vmem:[%s38116_s3 + $0x23b4] ss:$28 sps:$4 sm:$0xff]  }
 0x7ad   :  { %19126 = vmatpush1.bf16.msra.mxu1 %v28075_v49  ;;  %19596 = vmatprep.subr.bf16.mxu0 %v28086_v35  ;;  %v28125_v49 = vld [vmem:[%s38116_s3 + $0x4c] ss:$28 sps:$4 sm:$0xff]  }
 0x7ae   :  { %19127 = vmatprep.subr.bf16.mxu1 %v28083_v20  ;;  %v28123_v20 = vld [vmem:[%s38116_s3 + $0x48] ss:$28 sps:$4 sm:$0xff]   ;;  %v28126_v35 = vld [vmem:[%s38116_s3 + $0x23b0] ss:$28 sps:$4 sm:$0xff]  }
 0x7b0   :  { %19597 = vmatpush1.bf16.msra.mxu0 %v28084_v63  ;;  %v28134_v63 = vld [vmem:[%s38116_s3 + $0x23ec] ss:$28 sps:$4 sm:$0xff]  }
 0x7b1   :  { %19128 = vmatpush1.bf16.msra.mxu1 %v28081_v53  ;;  %19598 = vmatprep.subr.bf16.mxu0 %v28092_v38  ;;  %v28131_v53 = vld [vmem:[%s38116_s3 + $0x84] ss:$28 sps:$4 sm:$0xff]  }
 0x7b2   :  { %19129 = vmatprep.subr.bf16.mxu1 %v28089_v5  ;;  %v28129_v5 = vld [vmem:[%s38116_s3 + $0x80] ss:$28 sps:$4 sm:$0xff]   ;;  %v28132_v38 = vld [vmem:[%s38116_s3 + $0x23e8] ss:$28 sps:$4 sm:$0xff]  }
 0x7b4   :  { %19599 = vmatpush1.bf16.msra.mxu0 %v28090_v41  ;;  %v28140_v41 = vld [vmem:[%s38116_s3 + $0x2424] ss:$28 sps:$4 sm:$0xff]  }
 0x7b5   :  { %19130 = vmatpush1.bf16.msra.mxu1 %v28087_v40  ;;  %19600 = vmatprep.subr.bf16.mxu0 %v28098_v36  ;;  %v28137_v40 = vld [vmem:[%s38116_s3 + $0xbc] ss:$28 sps:$4 sm:$0xff]  }
 0x7b6   :  { %19142 = vmatprep.subr.bf16.mxu1 %v28095_v61  ;;  %v28135_v61 = vld [vmem:[%s38116_s3 + $0xb8] ss:$28 sps:$4 sm:$0xff]   ;;  %v28138_v36 = vld [vmem:[%s38116_s3 + $0x2420] ss:$28 sps:$4 sm:$0xff]  }
 0x7b8   :  { %19132 = vmatmul.mubr.bf16.vlgmr.msra.gmra.mrb[36].mxu1 %v33741_v26  ;;  %19601 = vmatpush1.bf16.msra.mxu0 %v28096_v10  ;;  %v28146_v10 = vld [vmem:[%s38116_s3 + $0x245c] ss:$28 sps:$4 sm:$0xff]  }
 0x7b9   :  { %19143 = vmatpush1.bf16.msra.mxu1 %v28093_v6  ;;  %19174 = vmatprep.mubr.bf16.mxu1 %v29192_v1  ;;  %v28143_v6 = vld [vmem:[%s38116_s3 + $0xf4] ss:$28 sps:$4 sm:$0xff]  }
 0x7ba   :  { %19144 = vmatprep.subr.bf16.mxu1 %v28101_v4  ;;  %19602 = vmatprep.subr.bf16.mxu0 %v28104_v60  ;;  %v28141_v4 = vld [vmem:[%s38116_s3 + $0xf0] ss:$28 sps:$4 sm:$0xff]   ;;  %v28144_v60 = vld [vmem:[%s38116_s3 + $0x2458] ss:$28 sps:$4 sm:$0xff]  }
 0x7bc   :  { %19603 = vmatpush1.bf16.msra.mxu0 %v28102_v59  ;;  %v28152_v59 = vld [vmem:[%s38116_s3 + $0x2494] ss:$28 sps:$4 sm:$0xff]  }
 0x7bd   :  { %19145 = vmatpush1.bf16.msra.mxu1 %v28099_v48  ;;  %19615 = vmatprep.subr.bf16.mxu0 %v28110_v37  ;;  %v28149_v48 = vld [vmem:[%s38116_s3 + $0x12c] ss:$28 sps:$4 sm:$0xff]  }
 0x7be   :  { %19146 = vmatprep.subr.bf16.mxu1 %v28107_v14  ;;  %v28147_v14 = vld [vmem:[%s38116_s3 + $0x128] ss:$28 sps:$4 sm:$0xff]   ;;  %v28150_v37 = vld [vmem:[%s38116_s3 + $0x2490] ss:$28 sps:$4 sm:$0xff]  }
 0x7bf   :  { %19605 = vmatmul.mubr.bf16.vlgmr.msra.gmra.mrb[36].mxu0 %v33087_v39 }
 0x7c0   :  { %19616 = vmatpush1.bf16.msra.mxu0 %v28108_v18  ;;  %19647 = vmatprep.mubr.bf16.mxu0 %v34112_v2  ;;  %v28158_v18 = vld [vmem:[%s38116_s3 + $0x24cc] ss:$28 sps:$4 sm:$0xff]  }
 0x7c1   :  { %19147 = vmatpush1.bf16.msra.mxu1 %v28105_v15  ;;  %19617 = vmatprep.subr.bf16.mxu0 %v28116_v46  ;;  %v28155_v15 = vld [vmem:[%s38116_s3 + $0x164] ss:$28 sps:$4 sm:$0xff]  }
 0x7c2   :  { %19148 = vmatprep.subr.bf16.mxu1 %v28113_v7  ;;  %v28153_v7 = vld [vmem:[%s38116_s3 + $0x160] ss:$28 sps:$4 sm:$0xff]   ;;  %v28156_v46 = vld [vmem:[%s38116_s3 + $0x24c8] ss:$28 sps:$4 sm:$0xff]  }
 0x7c4   :  { %19618 = vmatpush1.bf16.msra.mxu0 %v28114_v11  ;;  %v28164_v11 = vld [vmem:[%s38116_s3 + $0x2504] ss:$28 sps:$4 sm:$0xff]  }
 0x7c5   :  { %19149 = vmatpush1.bf16.msra.mxu1 %v28111_v17  ;;  %19619 = vmatprep.subr.bf16.mxu0 %v28122_v16  ;;  %v28161_v17 = vld [vmem:[%s38116_s3 + $0x19c] ss:$28 sps:$4 sm:$0xff]  }
 0x7c6   :  { %19744 = vmatprep.subr.bf16.mxu1 %v28119_v12  ;;  %v28159_v12 = vld [vmem:[%s38116_s3 + $0x198] ss:$28 sps:$4 sm:$0xff]   ;;  %v28162_v16 = vld [vmem:[%s38116_s3 + $0x2500] ss:$28 sps:$4 sm:$0xff]  }
 0x7c8   :  { %24362 = vmatmul.mubr.msk.bf16.vlgmr.msra.gmra.mrb[36].mxu1 %vm18622_vm2, %v34332_v30  ;;  %19620 = vmatpush1.bf16.msra.mxu0 %v28120_v23  ;;  %v28170_v23 = vld [vmem:[%s38116_s3 + $0x253c] ss:$28 sps:$4 sm:$0xff]  }
 0x7c9   :  { %19745 = vmatpush1.bf16.msra.mxu1 %v28117_v55  ;;  %19776 = vmatprep.mubr.bf16.mxu1 %v30622_v43  ;;  %v28167_v55 = vld [vmem:[%s38116_s3 + $0x1d4] ss:$28 sps:$4 sm:$0xff]  }
 0x7ca   :  { %19746 = vmatprep.subr.bf16.mxu1 %v28125_v49  ;;  %19621 = vmatprep.subr.bf16.mxu0 %v28128_v28  ;;  %v28165_v49 = vld [vmem:[%s38116_s3 + $0x1d0] ss:$28 sps:$4 sm:$0xff]   ;;  %v28168_v28 = vld [vmem:[%s38116_s3 + $0x2538] ss:$28 sps:$4 sm:$0xff]  }
 0x7cc   :  { %19622 = vmatpush1.bf16.msra.mxu0 %v28126_v35  ;;  %v28176_v35 = vld [vmem:[%s38116_s3 + $0x2574] ss:$28 sps:$4 sm:$0xff]  }
 0x7cd   :  { %19747 = vmatpush1.bf16.msra.mxu1 %v28123_v20  ;;  %19623 = vmatprep.subr.bf16.mxu0 %v28134_v63  ;;  %v28173_v20 = vld [vmem:[%s38116_s3 + $0x20c] ss:$28 sps:$4 sm:$0xff]  }
 0x7ce   :  { %19748 = vmatprep.subr.bf16.mxu1 %v28131_v53  ;;  %v28171_v53 = vld [vmem:[%s38116_s3 + $0x208] ss:$28 sps:$4 sm:$0xff]   ;;  %v28174_v63 = vld [vmem:[%s38116_s3 + $0x2570] ss:$28 sps:$4 sm:$0xff]  }
 0x7d0   :  { %19624 = vmatpush1.bf16.msra.mxu0 %v28132_v38  ;;  %v28182_v38 = vld [vmem:[%s38116_s3 + $0x25ac] ss:$28 sps:$4 sm:$0xff]  }
 0x7d1   :  { %19749 = vmatpush1.bf16.msra.mxu1 %v28129_v5  ;;  %19625 = vmatprep.subr.bf16.mxu0 %v28140_v41  ;;  %v28179_v5 = vld [vmem:[%s38116_s3 + $0x244] ss:$28 sps:$4 sm:$0xff]  }
 0x7d2   :  { %19750 = vmatprep.subr.bf16.mxu1 %v28137_v40  ;;  %v28177_v40 = vld [vmem:[%s38116_s3 + $0x240] ss:$28 sps:$4 sm:$0xff]   ;;  %v28180_v41 = vld [vmem:[%s38116_s3 + $0x25a8] ss:$28 sps:$4 sm:$0xff]  }
 0x7d4   :  { %19626 = vmatpush1.bf16.msra.mxu0 %v28138_v36  ;;  %v28188_v36 = vld [vmem:[%s38116_s3 + $0x25e4] ss:$28 sps:$4 sm:$0xff]  }
 0x7d5   :  { %19751 = vmatpush1.bf16.msra.mxu1 %v28135_v61  ;;  %19627 = vmatprep.subr.bf16.mxu0 %v28146_v10  ;;  %v28185_v61 = vld [vmem:[%s38116_s3 + $0x27c] ss:$28 sps:$4 sm:$0xff]  }
 0x7d6   :  { %19752 = vmatprep.subr.bf16.mxu1 %v28143_v6  ;;  %v28183_v6 = vld [vmem:[%s38116_s3 + $0x278] ss:$28 sps:$4 sm:$0xff]   ;;  %v28186_v10 = vld [vmem:[%s38116_s3 + $0x25e0] ss:$28 sps:$4 sm:$0xff]  }
 0x7d8   :  { %19628 = vmatpush1.bf16.msra.mxu0 %v28144_v60  ;;  %v28194_v60 = vld [vmem:[%s38116_s3 + $0x261c] ss:$28 sps:$4 sm:$0xff]  }
 0x7d9   :  { %19753 = vmatpush1.bf16.msra.mxu1 %v28141_v4  ;;  %19629 = vmatprep.subr.bf16.mxu0 %v28152_v59  ;;  %v28191_v4 = vld [vmem:[%s38116_s3 + $0x2b4] ss:$28 sps:$4 sm:$0xff]  }
 0x7da   :  { %19754 = vmatprep.subr.bf16.mxu1 %v28149_v48  ;;  %v28189_v48 = vld [vmem:[%s38116_s3 + $0x2b0] ss:$28 sps:$4 sm:$0xff]   ;;  %v28192_v59 = vld [vmem:[%s38116_s3 + $0x2618] ss:$28 sps:$4 sm:$0xff]  }
 0x7dc   :  { %19630 = vmatpush1.bf16.msra.mxu0 %v28150_v37  ;;  %v28200_v37 = vld [vmem:[%s38116_s3 + $0x2654] ss:$28 sps:$4 sm:$0xff]  }
 0x7dd   :  { %19755 = vmatpush1.bf16.msra.mxu1 %v28147_v14  ;;  %19631 = vmatprep.subr.bf16.mxu0 %v28158_v18  ;;  %v28197_v14 = vld [vmem:[%s38116_s3 + $0x2ec] ss:$28 sps:$4 sm:$0xff]  }
 0x7de   :  { %19756 = vmatprep.subr.bf16.mxu1 %v28155_v15  ;;  %v28195_v15 = vld [vmem:[%s38116_s3 + $0x2e8] ss:$28 sps:$4 sm:$0xff]   ;;  %v28198_v18 = vld [vmem:[%s38116_s3 + $0x2650] ss:$28 sps:$4 sm:$0xff]  }
 0x7e0   :  { %19632 = vmatpush1.bf16.msra.mxu0 %v28156_v46  ;;  %v28206_v46 = vld [vmem:[%s38116_s3 + $0x268c] ss:$28 sps:$4 sm:$0xff]  }
 0x7e1   :  { %19757 = vmatpush1.bf16.msra.mxu1 %v28153_v7  ;;  %19633 = vmatprep.subr.bf16.mxu0 %v28164_v11  ;;  %v28203_v7 = vld [vmem:[%s38116_s3 + $0x324] ss:$28 sps:$4 sm:$0xff]  }
 0x7e2   :  { %19758 = vmatprep.subr.bf16.mxu1 %v28161_v17  ;;  %v28201_v17 = vld [vmem:[%s38116_s3 + $0x320] ss:$28 sps:$4 sm:$0xff]   ;;  %v28204_v11 = vld [vmem:[%s38116_s3 + $0x2688] ss:$28 sps:$4 sm:$0xff]  }
 0x7e4   :  { %19634 = vmatpush1.bf16.msra.mxu0 %v28162_v16  ;;  %v28212_v16 = vld [vmem:[%s38116_s3 + $0x26c4] ss:$28 sps:$4 sm:$0xff]  }
 0x7e5   :  { %19759 = vmatpush1.bf16.msra.mxu1 %v28159_v12  ;;  %19635 = vmatprep.subr.bf16.mxu0 %v28170_v23  ;;  %v28209_v12 = vld [vmem:[%s38116_s3 + $0x35c] ss:$28 sps:$4 sm:$0xff]  }
 0x7e6   :  { %19760 = vmatprep.subr.bf16.mxu1 %v28167_v55  ;;  %v28207_v55 = vld [vmem:[%s38116_s3 + $0x358] ss:$28 sps:$4 sm:$0xff]   ;;  %v28210_v23 = vld [vmem:[%s38116_s3 + $0x26c0] ss:$28 sps:$4 sm:$0xff]  }
 0x7e8   :  { %19636 = vmatpush1.bf16.msra.mxu0 %v28168_v28  ;;  %v28218_v28 = vld [vmem:[%s38116_s3 + $0x26fc] ss:$28 sps:$4 sm:$0xff]  }
 0x7e9   :  { %19761 = vmatpush1.bf16.msra.mxu1 %v28165_v49  ;;  %19637 = vmatprep.subr.bf16.mxu0 %v28176_v35  ;;  %v28215_v49 = vld [vmem:[%s38116_s3 + $0x394] ss:$28 sps:$4 sm:$0xff]  }
 0x7ea   :  { %19762 = vmatprep.subr.bf16.mxu1 %v28173_v20  ;;  %v28213_v20 = vld [vmem:[%s38116_s3 + $0x390] ss:$28 sps:$4 sm:$0xff]   ;;  %v28216_v35 = vld [vmem:[%s38116_s3 + $0x26f8] ss:$28 sps:$4 sm:$0xff]  }
 0x7ec   :  { %19638 = vmatpush1.bf16.msra.mxu0 %v28174_v63  ;;  %v28224_v63 = vld [vmem:[%s38116_s3 + $0x2734] ss:$28 sps:$4 sm:$0xff]  }
 0x7ed   :  { %19763 = vmatpush1.bf16.msra.mxu1 %v28171_v53  ;;  %19639 = vmatprep.subr.bf16.mxu0 %v28182_v38  ;;  %v28221_v53 = vld [vmem:[%s38116_s3 + $0x3cc] ss:$28 sps:$4 sm:$0xff]  }
 0x7ee   :  { %19764 = vmatprep.subr.bf16.mxu1 %v28179_v5  ;;  %v28219_v5 = vld [vmem:[%s38116_s3 + $0x3c8] ss:$28 sps:$4 sm:$0xff]   ;;  %v28222_v38 = vld [vmem:[%s38116_s3 + $0x2730] ss:$28 sps:$4 sm:$0xff]  }
 0x7f0   :  { %19640 = vmatpush1.bf16.msra.mxu0 %v28180_v41  ;;  %v28230_v41 = vld [vmem:[%s38116_s3 + $0x276c] ss:$28 sps:$4 sm:$0xff]  }
 0x7f1   :  { %19765 = vmatpush1.bf16.msra.mxu1 %v28177_v40  ;;  %19641 = vmatprep.subr.bf16.mxu0 %v28188_v36  ;;  %v28227_v40 = vld [vmem:[%s38116_s3 + $0x404] ss:$28 sps:$4 sm:$0xff]  }
 0x7f2   :  { %19766 = vmatprep.subr.bf16.mxu1 %v28185_v61  ;;  %v28225_v61 = vld [vmem:[%s38116_s3 + $0x400] ss:$28 sps:$4 sm:$0xff]   ;;  %v28228_v36 = vld [vmem:[%s38116_s3 + $0x2768] ss:$28 sps:$4 sm:$0xff]  }
 0x7f4   :  { %19642 = vmatpush1.bf16.msra.mxu0 %v28186_v10  ;;  %v28236_v10 = vld [vmem:[%s38116_s3 + $0x27a4] ss:$28 sps:$4 sm:$0xff]  }
 0x7f5   :  { %19767 = vmatpush1.bf16.msra.mxu1 %v28183_v6  ;;  %19643 = vmatprep.subr.bf16.mxu0 %v28194_v60  ;;  %v28233_v6 = vld [vmem:[%s38116_s3 + $0x43c] ss:$28 sps:$4 sm:$0xff]  }
 0x7f6   :  { %19768 = vmatprep.subr.bf16.mxu1 %v28191_v4  ;;  %v28231_v4 = vld [vmem:[%s38116_s3 + $0x438] ss:$28 sps:$4 sm:$0xff]   ;;  %v28234_v60 = vld [vmem:[%s38116_s3 + $0x27a0] ss:$28 sps:$4 sm:$0xff]  }
 0x7f8   :  { %19644 = vmatpush1.bf16.msra.mxu0 %v28192_v59  ;;  %v28242_v59 = vld [vmem:[%s38116_s3 + $0x27dc] ss:$28 sps:$4 sm:$0xff]  }
 0x7f9   :  { %19769 = vmatpush1.bf16.msra.mxu1 %v28189_v48  ;;  %19645 = vmatprep.subr.bf16.mxu0 %v28200_v37  ;;  %v28239_v48 = vld [vmem:[%s38116_s3 + $0x474] ss:$28 sps:$4 sm:$0xff]  }
 0x7fa   :  { %19770 = vmatprep.subr.bf16.mxu1 %v28197_v14  ;;  %v28237_v14 = vld [vmem:[%s38116_s3 + $0x470] ss:$28 sps:$4 sm:$0xff]   ;;  %v28240_v37 = vld [vmem:[%s38116_s3 + $0x27d8] ss:$28 sps:$4 sm:$0xff]  }
 0x7fc   :  { %19646 = vmatpush1.bf16.msra.mxu0 %v28198_v18  ;;  %v28248_v18 = vld [vmem:[%s38116_s3 + $0x2814] ss:$28 sps:$4 sm:$0xff]  }
 0x7fd   :  { %19771 = vmatpush1.bf16.msra.mxu1 %v28195_v15  ;;  %19658 = vmatprep.subr.bf16.mxu0 %v28206_v46  ;;  %v28245_v15 = vld [vmem:[%s38116_s3 + $0x4ac] ss:$28 sps:$4 sm:$0xff]  }
 0x7fe   :  { %19772 = vmatprep.subr.bf16.mxu1 %v28203_v7  ;;  %v28243_v7 = vld [vmem:[%s38116_s3 + $0x4a8] ss:$28 sps:$4 sm:$0xff]   ;;  %v28246_v46 = vld [vmem:[%s38116_s3 + $0x2810] ss:$28 sps:$4 sm:$0xff]  }
 0x7ff   :  { %19648 = vmatmul.mubr.bf16.vlgmr.msra.gmra.mrb[36].mxu0 %v34107_v25 }
 0x800   :  { %19659 = vmatpush1.bf16.msra.mxu0 %v28204_v11  ;;  %19690 = vmatprep.mubr.bf16.mxu0 %v33749_v54  ;;  %v28254_v11 = vld [vmem:[%s38116_s3 + $0x284c] ss:$28 sps:$4 sm:$0xff]  }
 0x801   :  { %19773 = vmatpush1.bf16.msra.mxu1 %v28201_v17  ;;  %19660 = vmatprep.subr.bf16.mxu0 %v28212_v16  ;;  %v28251_v17 = vld [vmem:[%s38116_s3 + $0x4e4] ss:$28 sps:$4 sm:$0xff]  }
 0x802   :  { %19774 = vmatprep.subr.bf16.mxu1 %v28209_v12  ;;  %v28249_v12 = vld [vmem:[%s38116_s3 + $0x4e0] ss:$28 sps:$4 sm:$0xff]   ;;  %v28252_v16 = vld [vmem:[%s38116_s3 + $0x2848] ss:$28 sps:$4 sm:$0xff]  }
 0x804   :  { %19661 = vmatpush1.bf16.msra.mxu0 %v28210_v23  ;;  %v28260_v23 = vld [vmem:[%s38116_s3 + $0x2884] ss:$28 sps:$4 sm:$0xff]  }
 0x805   :  { %19775 = vmatpush1.bf16.msra.mxu1 %v28207_v55  ;;  %19662 = vmatprep.subr.bf16.mxu0 %v28218_v28  ;;  %v28257_v55 = vld [vmem:[%s38116_s3 + $0x51c] ss:$28 sps:$4 sm:$0xff]  }
 0x806   :  { %19787 = vmatprep.subr.bf16.mxu1 %v28215_v49  ;;  %v28255_v49 = vld [vmem:[%s38116_s3 + $0x518] ss:$28 sps:$4 sm:$0xff]   ;;  %v28258_v28 = vld [vmem:[%s38116_s3 + $0x2880] ss:$28 sps:$4 sm:$0xff]  }
 0x808   :  { %19777 = vmatmul.mubr.bf16.vlgmr.msra.gmra.mrb[40].mxu1 %v30608_v50  ;;  %19663 = vmatpush1.bf16.msra.mxu0 %v28216_v35  ;;  %v28266_v35 = vld [vmem:[%s38116_s3 + $0x28bc] ss:$28 sps:$4 sm:$0xff]  }
 0x809   :  { %19788 = vmatpush1.bf16.msra.mxu1 %v28213_v20  ;;  %19819 = vmatprep.mubr.bf16.mxu1 %v30834_v21  ;;  %v28263_v20 = vld [vmem:[%s38116_s3 + $0x554] ss:$28 sps:$4 sm:$0xff]  }
 0x80a   :  { %19789 = vmatprep.subr.bf16.mxu1 %v28221_v53  ;;  %19664 = vmatprep.subr.bf16.mxu0 %v28224_v63  ;;  %v28261_v53 = vld [vmem:[%s38116_s3 + $0x550] ss:$28 sps:$4 sm:$0xff]   ;;  %v28264_v63 = vld [vmem:[%s38116_s3 + $0x28b8] ss:$28 sps:$4 sm:$0xff]  }
 0x80c   :  { %19665 = vmatpush1.bf16.msra.mxu0 %v28222_v38  ;;  %v28272_v38 = vld [vmem:[%s38116_s3 + $0x28f4] ss:$28 sps:$4 sm:$0xff]  }
 0x80d   :  { %19790 = vmatpush1.bf16.msra.mxu1 %v28219_v5  ;;  %19666 = vmatprep.subr.bf16.mxu0 %v28230_v41  ;;  %v28269_v5 = vld [vmem:[%s38116_s3 + $0x58c] ss:$28 sps:$4 sm:$0xff]  }
 0x80e   :  { %19791 = vmatprep.subr.bf16.mxu1 %v28227_v40  ;;  %v28267_v40 = vld [vmem:[%s38116_s3 + $0x588] ss:$28 sps:$4 sm:$0xff]   ;;  %v28270_v41 = vld [vmem:[%s38116_s3 + $0x28f0] ss:$28 sps:$4 sm:$0xff]  }
 0x810   :  { %19667 = vmatpush1.bf16.msra.mxu0 %v28228_v36  ;;  %v28278_v36 = vld [vmem:[%s38116_s3 + $0x292c] ss:$28 sps:$4 sm:$0xff]  }
 0x811   :  { %19792 = vmatpush1.bf16.msra.mxu1 %v28225_v61  ;;  %19668 = vmatprep.subr.bf16.mxu0 %v28236_v10  ;;  %v28275_v61 = vld [vmem:[%s38116_s3 + $0x5c4] ss:$28 sps:$4 sm:$0xff]  }
 0x812   :  { %19793 = vmatprep.subr.bf16.mxu1 %v28233_v6  ;;  %v28273_v6 = vld [vmem:[%s38116_s3 + $0x5c0] ss:$28 sps:$4 sm:$0xff]   ;;  %v28276_v10 = vld [vmem:[%s38116_s3 + $0x2928] ss:$28 sps:$4 sm:$0xff]  }
 0x814   :  { %19669 = vmatpush1.bf16.msra.mxu0 %v28234_v60  ;;  %v28284_v60 = vld [vmem:[%s38116_s3 + $0x2964] ss:$28 sps:$4 sm:$0xff]  }
 0x815   :  { %19794 = vmatpush1.bf16.msra.mxu1 %v28231_v4  ;;  %19670 = vmatprep.subr.bf16.mxu0 %v28242_v59  ;;  %v28281_v4 = vld [vmem:[%s38116_s3 + $0x5fc] ss:$28 sps:$4 sm:$0xff]  }
 0x816   :  { %19795 = vmatprep.subr.bf16.mxu1 %v28239_v48  ;;  %v28279_v48 = vld [vmem:[%s38116_s3 + $0x5f8] ss:$28 sps:$4 sm:$0xff]   ;;  %v28282_v59 = vld [vmem:[%s38116_s3 + $0x2960] ss:$28 sps:$4 sm:$0xff]  }
 0x818   :  { %19671 = vmatpush1.bf16.msra.mxu0 %v28240_v37  ;;  %v28290_v37 = vld [vmem:[%s38116_s3 + $0x299c] ss:$28 sps:$4 sm:$0xff]  }
 0x819   :  { %19796 = vmatpush1.bf16.msra.mxu1 %v28237_v14  ;;  %19672 = vmatprep.subr.bf16.mxu0 %v28248_v18  ;;  %v28287_v14 = vld [vmem:[%s38116_s3 + $0x634] ss:$28 sps:$4 sm:$0xff]  }
 0x81a   :  { %19797 = vmatprep.subr.bf16.mxu1 %v28245_v15  ;;  %v28285_v15 = vld [vmem:[%s38116_s3 + $0x630] ss:$28 sps:$4 sm:$0xff]   ;;  %v28288_v18 = vld [vmem:[%s38116_s3 + $0x2998] ss:$28 sps:$4 sm:$0xff]  }
 0x81c   :  { %19673 = vmatpush1.bf16.msra.mxu0 %v28246_v46  ;;  %v28296_v46 = vld [vmem:[%s38116_s3 + $0x29d4] ss:$28 sps:$4 sm:$0xff]  }
 0x81d   :  { %19798 = vmatpush1.bf16.msra.mxu1 %v28243_v7  ;;  %19674 = vmatprep.subr.bf16.mxu0 %v28254_v11  ;;  %v28293_v7 = vld [vmem:[%s38116_s3 + $0x66c] ss:$28 sps:$4 sm:$0xff]  }
 0x81e   :  { %19799 = vmatprep.subr.bf16.mxu1 %v28251_v17  ;;  %v28291_v17 = vld [vmem:[%s38116_s3 + $0x668] ss:$28 sps:$4 sm:$0xff]   ;;  %v28294_v11 = vld [vmem:[%s38116_s3 + $0x29d0] ss:$28 sps:$4 sm:$0xff]  }
 0x820   :  { %19675 = vmatpush1.bf16.msra.mxu0 %v28252_v16  ;;  %v28302_v16 = vld [vmem:[%s38116_s3 + $0x2a0c] ss:$28 sps:$4 sm:$0xff]  }
 0x821   :  { %19800 = vmatpush1.bf16.msra.mxu1 %v28249_v12  ;;  %19676 = vmatprep.subr.bf16.mxu0 %v28260_v23  ;;  %v28299_v12 = vld [vmem:[%s38116_s3 + $0x6a4] ss:$28 sps:$4 sm:$0xff]  }
 0x822   :  { %19801 = vmatprep.subr.bf16.mxu1 %v28257_v55  ;;  %v28297_v55 = vld [vmem:[%s38116_s3 + $0x6a0] ss:$28 sps:$4 sm:$0xff]   ;;  %v28300_v23 = vld [vmem:[%s38116_s3 + $0x2a08] ss:$28 sps:$4 sm:$0xff]  }
 0x824   :  { %19677 = vmatpush1.bf16.msra.mxu0 %v28258_v28  ;;  %v28308_v28 = vld [vmem:[%s38116_s3 + $0x2a44] ss:$28 sps:$4 sm:$0xff]  }
 0x825   :  { %19802 = vmatpush1.bf16.msra.mxu1 %v28255_v49  ;;  %19678 = vmatprep.subr.bf16.mxu0 %v28266_v35  ;;  %v28305_v49 = vld [vmem:[%s38116_s3 + $0x6dc] ss:$28 sps:$4 sm:$0xff]  }
 0x826   :  { %19803 = vmatprep.subr.bf16.mxu1 %v28263_v20  ;;  %v28303_v20 = vld [vmem:[%s38116_s3 + $0x6d8] ss:$28 sps:$4 sm:$0xff]   ;;  %v28306_v35 = vld [vmem:[%s38116_s3 + $0x2a40] ss:$28 sps:$4 sm:$0xff]  }
 0x828   :  { %19679 = vmatpush1.bf16.msra.mxu0 %v28264_v63  ;;  %v28314_v63 = vld [vmem:[%s38116_s3 + $0x2a7c] ss:$28 sps:$4 sm:$0xff]  }
 0x829   :  { %19804 = vmatpush1.bf16.msra.mxu1 %v28261_v53  ;;  %19680 = vmatprep.subr.bf16.mxu0 %v28272_v38  ;;  %v28311_v53 = vld [vmem:[%s38116_s3 + $0x714] ss:$28 sps:$4 sm:$0xff]  }
 0x82a   :  { %19805 = vmatprep.subr.bf16.mxu1 %v28269_v5  ;;  %v28309_v5 = vld [vmem:[%s38116_s3 + $0x710] ss:$28 sps:$4 sm:$0xff]   ;;  %v28312_v38 = vld [vmem:[%s38116_s3 + $0x2a78] ss:$28 sps:$4 sm:$0xff]  }
 0x82c   :  { %19681 = vmatpush1.bf16.msra.mxu0 %v28270_v41  ;;  %v28320_v41 = vld [vmem:[%s38116_s3 + $0x2ab4] ss:$28 sps:$4 sm:$0xff]  }
 0x82d   :  { %19806 = vmatpush1.bf16.msra.mxu1 %v28267_v40  ;;  %19682 = vmatprep.subr.bf16.mxu0 %v28278_v36  ;;  %v28317_v40 = vld [vmem:[%s38116_s3 + $0x74c] ss:$28 sps:$4 sm:$0xff]  }
 0x82e   :  { %19807 = vmatprep.subr.bf16.mxu1 %v28275_v61  ;;  %v28315_v61 = vld [vmem:[%s38116_s3 + $0x748] ss:$28 sps:$4 sm:$0xff]   ;;  %v28318_v36 = vld [vmem:[%s38116_s3 + $0x2ab0] ss:$28 sps:$4 sm:$0xff]  }
 0x830   :  { %19683 = vmatpush1.bf16.msra.mxu0 %v28276_v10  ;;  %v28324_v10 = vld [vmem:[%s38116_s3 + $0x1d8] ss:$28 sps:$4 sm:$0xff]  }
 0x831   :  { %19808 = vmatpush1.bf16.msra.mxu1 %v28273_v6  ;;  %19684 = vmatprep.subr.bf16.mxu0 %v28284_v60  ;;  %v28323_v6 = vld [vmem:[%s38116_s3 + $0x784] ss:$28 sps:$4 sm:$0xff]   ;;  %v28325_v60 = vld [vmem:[%s38116_s3 + $0x18] ss:$28 sps:$4 sm:$0xff]  }
 0x832   :  { %19809 = vmatprep.subr.bf16.mxu1 %v28281_v4  ;;  %v28321_v4 = vld [vmem:[%s38116_s3 + $0x780] ss:$28 sps:$4 sm:$0xff]  }
 0x834   :  { %19685 = vmatpush1.bf16.msra.mxu0 %v28282_v59  ;;  %v28329_v59 = vld [vmem:[%s38116_s3 + $0x210] ss:$28 sps:$4 sm:$0xff]  }
 0x835   :  { %19810 = vmatpush1.bf16.msra.mxu1 %v28279_v48  ;;  %19686 = vmatprep.subr.bf16.mxu0 %v28290_v37  ;;  %v28328_v48 = vld [vmem:[%s38116_s3 + $0x7bc] ss:$28 sps:$4 sm:$0xff]   ;;  %v28330_v37 = vld [vmem:[%s38116_s3 + $0x50] ss:$28 sps:$4 sm:$0xff]  }
 0x836   :  { %19811 = vmatprep.subr.bf16.mxu1 %v28287_v14  ;;  %v28326_v14 = vld [vmem:[%s38116_s3 + $0x7b8] ss:$28 sps:$4 sm:$0xff]  }
 0x838   :  { %19687 = vmatpush1.bf16.msra.mxu0 %v28288_v18  ;;  %v28334_v18 = vld [vmem:[%s38116_s3 + $0x248] ss:$28 sps:$4 sm:$0xff]  }
 0x839   :  { %19812 = vmatpush1.bf16.msra.mxu1 %v28285_v15  ;;  %19688 = vmatprep.subr.bf16.mxu0 %v28296_v46  ;;  %v28333_v15 = vld [vmem:[%s38116_s3 + $0x7f4] ss:$28 sps:$4 sm:$0xff]   ;;  %v28338_v46 = vld [vmem:[%s38116_s3 + $0x82c] ss:$28 sps:$4 sm:$0xff]  }
 0x83a   :  { %19813 = vmatprep.subr.bf16.mxu1 %v28293_v7  ;;  %v28331_v7 = vld [vmem:[%s38116_s3 + $0x7f0] ss:$28 sps:$4 sm:$0xff]  }
 0x83c   :  { %19689 = vmatpush1.bf16.msra.mxu0 %v28294_v11  ;;  %v28336_v11 = vld [vmem:[%s38116_s3 + $0x828] ss:$28 sps:$4 sm:$0xff]  }
 0x83d   :  { %19814 = vmatpush1.bf16.msra.mxu1 %v28291_v17  ;;  %19701 = vmatprep.subr.bf16.mxu0 %v28302_v16  ;;  %v28339_v17 = vld [vmem:[%s38116_s3 + $0x280] ss:$28 sps:$4 sm:$0xff]  }
 0x83e   :  { %19815 = vmatprep.subr.bf16.mxu1 %v28299_v12  ;;  %v28340_v12 = vld [vmem:[%s38116_s3 + $0xc0] ss:$28 sps:$4 sm:$0xff]  }
 0x83f   :  { %19691 = vmatmul.mubr.bf16.vlgmr.msra.gmra.mrb[36].mxu0 %v33741_v26  ;;  %v28343_v16 = vld [vmem:[%s38116_s3 + $0x864] ss:$28 sps:$4 sm:$0xff]  }
 0x840   :  { %19702 = vmatpush1.bf16.msra.mxu0 %v28300_v23  ;;  %19733 = vmatprep.mubr.bf16.mxu0 %v29192_v1  ;;  %v28341_v23 = vld [vmem:[%s38116_s3 + $0x860] ss:$28 sps:$4 sm:$0xff]  }
 0x841   :  { %19816 = vmatpush1.bf16.msra.mxu1 %v28297_v55  ;;  %19703 = vmatprep.subr.bf16.mxu0 %v28308_v28  ;;  %v28344_v55 = vld [vmem:[%s38116_s3 + $0x2b8] ss:$28 sps:$4 sm:$0xff]  }
 0x842   :  { %19817 = vmatprep.subr.bf16.mxu1 %v28305_v49  ;;  %v28345_v49 = vld [vmem:[%s38116_s3 + $0xf8] ss:$28 sps:$4 sm:$0xff]  }
 0x843   :  { %v28348_v28 = vld [vmem:[%s38116_s3 + $0x89c] ss:$28 sps:$4 sm:$0xff]  }
 0x844   :  { %19704 = vmatpush1.bf16.msra.mxu0 %v28306_v35  ;;  %v28346_v35 = vld [vmem:[%s38116_s3 + $0x898] ss:$28 sps:$4 sm:$0xff]  }
 0x845   :  { %19818 = vmatpush1.bf16.msra.mxu1 %v28303_v20  ;;  %19705 = vmatprep.subr.bf16.mxu0 %v28314_v63  ;;  %v28349_v20 = vld [vmem:[%s38116_s3 + $0x2f0] ss:$28 sps:$4 sm:$0xff]  }
 0x846   :  { %19830 = vmatprep.subr.bf16.mxu1 %v28311_v53  ;;  %v28350_v53 = vld [vmem:[%s38116_s3 + $0x130] ss:$28 sps:$4 sm:$0xff]  }
 0x847   :  { %v28353_v63 = vld [vmem:[%s38116_s3 + $0x8d4] ss:$28 sps:$4 sm:$0xff]  }
 0x848   :  { %19820 = vmatmul.mubr.bf16.vlgmr.msra.gmra.mrb[40].mxu1 %v30823_v19  ;;  %19706 = vmatpush1.bf16.msra.mxu0 %v28312_v38  ;;  %v28351_v38 = vld [vmem:[%s38116_s3 + $0x8d0] ss:$28 sps:$4 sm:$0xff]  }
 0x849   :  { %19831 = vmatpush1.bf16.msra.mxu1 %v28309_v5  ;;  %19862 = vmatprep.mubr.bf16.mxu1 %v31499_v9  ;;  %v28354_v5 = vld [vmem:[%s38116_s3 + $0x328] ss:$28 sps:$4 sm:$0xff]  }
 0x84a   :  { %19832 = vmatprep.subr.bf16.mxu1 %v28317_v40  ;;  %19707 = vmatprep.subr.bf16.mxu0 %v28320_v41  ;;  %v28355_v40 = vld [vmem:[%s38116_s3 + $0x168] ss:$28 sps:$4 sm:$0xff]  }
 0x84b   :  { %v28358_v41 = vld [vmem:[%s38116_s3 + $0x90c] ss:$28 sps:$4 sm:$0xff]  }
 0x84c   :  { %19708 = vmatpush1.bf16.msra.mxu0 %v28318_v36  ;;  %v28356_v36 = vld [vmem:[%s38116_s3 + $0x908] ss:$28 sps:$4 sm:$0xff]  }
 0x84d   :  { %19833 = vmatpush1.bf16.msra.mxu1 %v28315_v61  ;;  %24535 = vmatprep.subr.bf16.mxu0 %v28324_v10  ;;  %v28359_v61 = vld [vmem:[%s38116_s3 + $0x360] ss:$28 sps:$4 sm:$0xff]  }
 0x84e   :  { %19834 = vmatprep.subr.bf16.mxu1 %v28323_v6  ;;  %v28360_v6 = vld [vmem:[%s38116_s3 + $0x1a0] ss:$28 sps:$4 sm:$0xff]  }
 0x84f   :  { %24363 = vmatmul.mubr.msk.bf16.vlgmr.msra.gmra.mrb[36].mxu0 %vm18622_vm2, %v34332_v30  ;;  %v28363_v10 = vld [vmem:[%s38116_s3 + $0x944] ss:$28 sps:$4 sm:$0xff]  }
 0x850   :  { %24536 = vmatpush3.bf16.msra.mxu0 %v28325_v60  ;;  %20335 = vmatprep.mubr.bf16.mxu0 %v30622_v43  ;;  %v28335_v43 = vld [vmem:[%s38116_s3 + $0x88] ss:$28 sps:$4 sm:$0xff]   ;;  %v28361_v60 = vld [vmem:[%s38116_s3 + $0x940] ss:$28 sps:$4 sm:$0xff]  }
 0x851   :  { %19835 = vmatpush1.bf16.msra.mxu1 %v28321_v4  ;;  %24537 = vmatprep.subr.bf16.mxu0 %v28329_v59  ;;  %v28364_v4 = vld [vmem:[%s38116_s3 + $0x558] ss:$28 sps:$4 sm:$0xff]  }
 0x852   :  { %19836 = vmatprep.subr.bf16.mxu1 %v28328_v48  ;;  %v28365_v48 = vld [vmem:[%s38116_s3 + $0x398] ss:$28 sps:$4 sm:$0xff]  }
 0x853   :  { %v28368_v59 = vld [vmem:[%s38116_s3 + $0x97c] ss:$28 sps:$4 sm:$0xff]  }
 0x854   :  { %24538 = vmatpush3.bf16.msra.mxu0 %v28330_v37  ;;  %v28366_v37 = vld [vmem:[%s38116_s3 + $0x978] ss:$28 sps:$4 sm:$0xff]  }
 0x855   :  { %19837 = vmatpush1.bf16.msra.mxu1 %v28326_v14  ;;  %24539 = vmatprep.subr.bf16.mxu0 %v28334_v18  ;;  %v28369_v14 = vld [vmem:[%s38116_s3 + $0x590] ss:$28 sps:$4 sm:$0xff]  }
 0x856   :  { %19838 = vmatprep.subr.bf16.mxu1 %v28333_v15  ;;  %v28370_v15 = vld [vmem:[%s38116_s3 + $0x3d0] ss:$28 sps:$4 sm:$0xff]  }
 0x857   :  { %v28373_v18 = vld [vmem:[%s38116_s3 + $0x9b4] ss:$28 sps:$4 sm:$0xff]  }
 0x858   :  { %24540 = vmatpush3.bf16.msra.mxu0 %v28335_v43  ;;  %v28378_v43 = vld [vmem:[%s38116_s3 + $0x9ec] ss:$28 sps:$4 sm:$0xff]  }
 0x859   :  { %19839 = vmatpush1.bf16.msra.mxu1 %v28331_v7  ;;  %24541 = vmatprep.subr.bf16.mxu0 %v28339_v17  ;;  %v28371_v7 = vld [vmem:[%s38116_s3 + $0x9b0] ss:$28 sps:$4 sm:$0xff]   ;;  %v28376_v17 = vld [vmem:[%s38116_s3 + $0x9e8] ss:$28 sps:$4 sm:$0xff]  }
 0x85a   :  { %19840 = vmatprep.subr.bf16.mxu1 %v28338_v46  ;;  %v28379_v46 = vld [vmem:[%s38116_s3 + $0x600] ss:$28 sps:$4 sm:$0xff]  }
 0x85c   :  { %24542 = vmatpush3.bf16.msra.mxu0 %v28340_v12  ;;  %v28383_v12 = vld [vmem:[%s38116_s3 + $0xa24] ss:$28 sps:$4 sm:$0xff]  }
 0x85d   :  { %19841 = vmatpush1.bf16.msra.mxu1 %v28336_v11  ;;  %24543 = vmatprep.subr.bf16.mxu0 %v28344_v55  ;;  %v28380_v11 = vld [vmem:[%s38116_s3 + $0x440] ss:$28 sps:$4 sm:$0xff]  }
 0x85e   :  { %19842 = vmatprep.subr.bf16.mxu1 %v28343_v16  ;;  %v28384_v16 = vld [vmem:[%s38116_s3 + $0x638] ss:$28 sps:$4 sm:$0xff]   ;;  %v28381_v55 = vld [vmem:[%s38116_s3 + $0xa20] ss:$28 sps:$4 sm:$0xff]  }
 0x860   :  { %24544 = vmatpush3.bf16.msra.mxu0 %v28345_v49  ;;  %v28388_v49 = vld [vmem:[%s38116_s3 + $0xa5c] ss:$28 sps:$4 sm:$0xff]  }
 0x861   :  { %19843 = vmatpush1.bf16.msra.mxu1 %v28341_v23  ;;  %24545 = vmatprep.subr.bf16.mxu0 %v28349_v20  ;;  %v28385_v23 = vld [vmem:[%s38116_s3 + $0x478] ss:$28 sps:$4 sm:$0xff]  }
 0x862   :  { %19844 = vmatprep.subr.bf16.mxu1 %v28348_v28  ;;  %v28389_v28 = vld [vmem:[%s38116_s3 + $0x670] ss:$28 sps:$4 sm:$0xff]   ;;  %v28386_v20 = vld [vmem:[%s38116_s3 + $0xa58] ss:$28 sps:$4 sm:$0xff]  }
 0x864   :  { %24546 = vmatpush3.bf16.msra.mxu0 %v28350_v53  ;;  %v28393_v53 = vld [vmem:[%s38116_s3 + $0xa94] ss:$28 sps:$4 sm:$0xff]  }
 0x865   :  { %19845 = vmatpush1.bf16.msra.mxu1 %v28346_v35  ;;  %24547 = vmatprep.subr.bf16.mxu0 %v28354_v5  ;;  %v28390_v35 = vld [vmem:[%s38116_s3 + $0x4b0] ss:$28 sps:$4 sm:$0xff]  }
 0x866   :  { %19846 = vmatprep.subr.bf16.mxu1 %v28353_v63  ;;  %v28394_v63 = vld [vmem:[%s38116_s3 + $0x6a8] ss:$28 sps:$4 sm:$0xff]   ;;  %v28391_v5 = vld [vmem:[%s38116_s3 + $0xa90] ss:$28 sps:$4 sm:$0xff]  }
 0x868   :  { %24548 = vmatpush3.bf16.msra.mxu0 %v28355_v40  ;;  %v28398_v40 = vld [vmem:[%s38116_s3 + $0xacc] ss:$28 sps:$4 sm:$0xff]  }
 0x869   :  { %19847 = vmatpush1.bf16.msra.mxu1 %v28351_v38  ;;  %24549 = vmatprep.subr.bf16.mxu0 %v28359_v61  ;;  %v28395_v38 = vld [vmem:[%s38116_s3 + $0x4e8] ss:$28 sps:$4 sm:$0xff]  }
 0x86a   :  { %19848 = vmatprep.subr.bf16.mxu1 %v28358_v41  ;;  %v28399_v41 = vld [vmem:[%s38116_s3 + $0x6e0] ss:$28 sps:$4 sm:$0xff]   ;;  %v28396_v61 = vld [vmem:[%s38116_s3 + $0xac8] ss:$28 sps:$4 sm:$0xff]  }
 0x86c   :  { %24550 = vmatpush3.bf16.msra.mxu0 %v28360_v6  ;;  %v28403_v6 = vld [vmem:[%s38116_s3 + $0xb04] ss:$28 sps:$4 sm:$0xff]  }
 0x86d   :  { %19849 = vmatpush1.bf16.msra.mxu1 %v28356_v36  ;;  %24557 = vmatprep.subr.bf16.mxu0 %v28364_v4  ;;  %v28400_v36 = vld [vmem:[%s38116_s3 + $0x520] ss:$28 sps:$4 sm:$0xff]  }
 0x86e   :  { %19850 = vmatprep.subr.bf16.mxu1 %v28363_v10  ;;  %v28404_v10 = vld [vmem:[%s38116_s3 + $0x8d8] ss:$28 sps:$4 sm:$0xff]   ;;  %v28401_v4 = vld [vmem:[%s38116_s3 + $0xb00] ss:$28 sps:$4 sm:$0xff]  }
 0x86f   :  { %20336 = vmatmul.mubr.bf16.vlgmr.msra.gmra.mrb[40].mxu0 %v30608_v50  ;;  %v28374_v50 = vld [vmem:[%s38116_s3 + $0x5c8] ss:$28 sps:$4 sm:$0xff]  }
 0x870   :  { %24558 = vmatpush3.bf16.msra.mxu0 %v28365_v48  ;;  %20376 = vmatprep.mubr.bf16.mxu0 %v30834_v21  ;;  %v28375_v21 = vld [vmem:[%s38116_s3 + $0x408] ss:$28 sps:$4 sm:$0xff]   ;;  %v28408_v48 = vld [vmem:[%s38116_s3 + $0xb3c] ss:$28 sps:$4 sm:$0xff]  }
 0x871   :  { %19851 = vmatpush1.bf16.msra.mxu1 %v28361_v60  ;;  %24559 = vmatprep.subr.bf16.mxu0 %v28369_v14  ;;  %v28405_v60 = vld [vmem:[%s38116_s3 + $0x718] ss:$28 sps:$4 sm:$0xff]  }
 0x872   :  { %19852 = vmatprep.subr.bf16.mxu1 %v28368_v59  ;;  %v28409_v59 = vld [vmem:[%s38116_s3 + $0x910] ss:$28 sps:$4 sm:$0xff]   ;;  %v28406_v14 = vld [vmem:[%s38116_s3 + $0xb38] ss:$28 sps:$4 sm:$0xff]  }
 0x874   :  { %24560 = vmatpush3.bf16.msra.mxu0 %v28370_v15  ;;  %v28413_v15 = vld [vmem:[%s38116_s3 + $0xb74] ss:$28 sps:$4 sm:$0xff]  }
 0x875   :  { %19853 = vmatpush1.bf16.msra.mxu1 %v28366_v37  ;;  %24561 = vmatprep.subr.bf16.mxu0 %v28374_v50  ;;  %v28410_v37 = vld [vmem:[%s38116_s3 + $0x750] ss:$28 sps:$4 sm:$0xff]   ;;  %v28415_v50 = vld [vmem:[%s38116_s3 + $0x788] ss:$28 sps:$4 sm:$0xff]  }
 0x876   :  { %19854 = vmatprep.subr.bf16.mxu1 %v28373_v18  ;;  %v28411_v18 = vld [vmem:[%s38116_s3 + $0xb70] ss:$28 sps:$4 sm:$0xff]  }
 0x878   :  { %24562 = vmatpush3.bf16.msra.mxu0 %v28375_v21  ;;  %v28419_v21 = vld [vmem:[%s38116_s3 + $0x980] ss:$28 sps:$4 sm:$0xff]  }
 0x879   :  { %19855 = vmatpush1.bf16.msra.mxu1 %v28371_v7  ;;  %24563 = vmatprep.subr.bf16.mxu0 %v28379_v46  ;;  %v28418_v7 = vld [vmem:[%s38116_s3 + $0xbac] ss:$28 sps:$4 sm:$0xff]  }
 0x87a   :  { %19856 = vmatprep.subr.bf16.mxu1 %v28378_v43 }
 0x87c   :  { %24564 = vmatpush3.bf16.msra.mxu0 %v28380_v11  ;;  %v28420_v11 = vld [vmem:[%s38116_s3 + $0x7c0] ss:$28 sps:$4 sm:$0xff]  }
 0x87d   :  { %19857 = vmatpush1.bf16.msra.mxu1 %v28376_v17  ;;  %24565 = vmatprep.subr.bf16.mxu0 %v28384_v16  ;;  %v28416_v17 = vld [vmem:[%s38116_s3 + $0xba8] ss:$28 sps:$4 sm:$0xff]  }
 0x87e   :  { %19858 = vmatprep.subr.bf16.mxu1 %v28383_v12  ;;  %v28423_v12 = vld [vmem:[%s38116_s3 + $0xbe4] ss:$28 sps:$4 sm:$0xff]  }
 0x880   :  { %24566 = vmatpush3.bf16.msra.mxu0 %v28385_v23 }
 0x881   :  { %19859 = vmatpush1.bf16.msra.mxu1 %v28381_v55  ;;  %24567 = vmatprep.subr.bf16.mxu0 %v28389_v28  ;;  %v28424_v55 = vld [vmem:[%s38116_s3 + $0x9b8] ss:$28 sps:$4 sm:$0xff]  }
 0x882   :  { %19860 = vmatprep.subr.bf16.mxu1 %v28388_v49 }
 0x884   :  { %24568 = vmatpush3.bf16.msra.mxu0 %v28390_v35  ;;  %v28421_v35 = vld [vmem:[%s38116_s3 + $0xbe0] ss:$28 sps:$4 sm:$0xff]  }
 0x885   :  { %19861 = vmatpush1.bf16.msra.mxu1 %v28386_v20  ;;  %24569 = vmatprep.subr.bf16.mxu0 %v28394_v63 }
 0x886   :  { %19873 = vmatprep.subr.bf16.mxu1 %v28393_v53 }
 0x888   :  { %19863 = vmatmul.mubr.bf16.vlgmr.msra.gmra.mrb[40].mxu1 %v31497_v8  ;;  %24570 = vmatpush3.bf16.msra.mxu0 %v28395_v38  ;;  %v28428_v38 = vld [vmem:[%s38116_s3 + $0xc1c] ss:$28 sps:$4 sm:$0xff]  }
 0x889   :  { %19874 = vmatpush1.bf16.msra.mxu1 %v28391_v5  ;;  %19905 = vmatprep.mubr.bf16.mxu1 %v31142_v27  ;;  %v28425_v5 = vld [vmem:[%s38116_s3 + $0x7f8] ss:$28 sps:$4 sm:$0xff]  }
 0x88a   :  { %19875 = vmatprep.subr.bf16.mxu1 %v28398_v40  ;;  %24571 = vmatprep.subr.bf16.mxu0 %v28399_v41  ;;  %v28429_v41 = vld [vmem:[%s38116_s3 + $0x9f0] ss:$28 sps:$4 sm:$0xff]  }
 0x88c   :  { %24572 = vmatpush3.bf16.msra.mxu0 %v28400_v36 }
 0x88d   :  { %19876 = vmatpush1.bf16.msra.mxu1 %v28396_v61  ;;  %24579 = vmatprep.subr.bf16.mxu0 %v28404_v10 }
 0x88e   :  { %19877 = vmatprep.subr.bf16.mxu1 %v28403_v6 }
 0x88f   :  { %20377 = vmatmul.mubr.bf16.vlgmr.msra.gmra.mrb[44].mxu0 %v30823_v19  ;;  %v28414_v19 = vld [vmem:[%s38116_s3 + $0x948] ss:$28 sps:$4 sm:$0xff]  }
 0x890   :  { %24580 = vmatpush3.bf16.msra.mxu0 %v28405_v60  ;;  %20417 = vmatprep.mubr.bf16.mxu0 %v31499_v9  ;;  %v36272_v9 = vld [vmem:[%s38117_s4] sm:$0x7f] }
 0x891   :  { %19878 = vmatpush1.bf16.msra.mxu1 %v28401_v4  ;;  %24581 = vmatprep.subr.bf16.mxu0 %v28409_v59  ;;  %v11534_v43 = vrot.slane %v36272_v9, %v30545_v62  ;;  %v11538_v46 = vrot.slane %v36272_v9, %v30556_v3  ;;  %v28426_v4 = vld [vmem:[%s38116_s3 + $0xc18] ss:$28 sps:$4 sm:$0xff]  }
 0x892   :  { %19879 = vmatprep.subr.bf16.mxu1 %v28408_v48  ;;  %v28430_v48 = vld [vmem:[%s38116_s3 + $0x830] ss:$28 sps:$4 sm:$0xff]  }
 0x893   :  { %v28433_v59 = vld [vmem:[%s38116_s3 + $0xc54] ss:$28 sps:$4 sm:$0xff]  }
 0x894   :  { %24582 = vmatpush3.bf16.msra.mxu0 %v28410_v37  ;;  %v28434_v37 = vld [vmem:[%s38116_s3 + $0xa28] ss:$28 sps:$4 sm:$0xff]  }
 0x895   :  { %19880 = vmatpush1.bf16.msra.mxu1 %v28406_v14  ;;  %24583 = vmatprep.subr.bf16.mxu0 %v28414_v19  ;;  %v28435_v19 = vld [vmem:[%s38116_s3 + $0x868] ss:$28 sps:$4 sm:$0xff]  }
 0x896   :  { %19881 = vmatprep.subr.bf16.mxu1 %v28413_v15  ;;  %v28431_v15 = vld [vmem:[%s38116_s3 + $0xc50] ss:$28 sps:$4 sm:$0xff]  }
 0x898   :  { %24584 = vmatpush3.bf16.msra.mxu0 %v28415_v50  ;;  %v28439_v50 = vld [vmem:[%s38116_s3 + $0xa60] ss:$28 sps:$4 sm:$0xff]  }
 0x899   :  { %19882 = vmatpush1.bf16.msra.mxu1 %v28411_v18  ;;  %24585 = vmatprep.subr.bf16.mxu0 %v28419_v21  ;;  %v28438_v18 = vld [vmem:[%s38116_s3 + $0xc8c] ss:$28 sps:$4 sm:$0xff]   ;;  %v28440_v21 = vld [vmem:[%s38116_s3 + $0x8a0] ss:$28 sps:$4 sm:$0xff]  }
 0x89a   :  { %19883 = vmatprep.subr.bf16.mxu1 %v28418_v7  ;;  %v28436_v7 = vld [vmem:[%s38116_s3 + $0xc88] ss:$28 sps:$4 sm:$0xff]  }
 0x89b   :  { %v19176_v16 = vpop.f32.mrb[36].mxu1 }
 0x89c   :  { %v24908_v23 = vadd.f32 %v19176_v16, %v11534_v43  ;;  %v19178_v49 = vpop.f32.mrb[37].mxu1  ;;  %24586 = vmatpush3.bf16.msra.mxu0 %v28420_v11  ;;  %v28445_v11 = vld [vmem:[%s38116_s3 + $0xa98] ss:$28 sps:$4 sm:$0xff]   ;;  %v28449_v16 = vld [vmem:[%s38116_s3 + $0xc90] ss:$28 sps:$4 sm:$0xff]  }
 0x89d   :  { %v24909_v28 = vadd.f32 %v19178_v49, %v11538_v46  ;;  %v19180_v20 = vpop.f32.mrb[38].mxu1  ;;  %19884 = vmatpush1.bf16.msra.mxu1 %v28416_v17  ;;  %24587 = vmatprep.subr.bf16.mxu0 %v28424_v55  ;;  %v28441_v17 = vld [vmem:[%s38116_s3 + $0xcc0] ss:$28 sps:$4 sm:$0xff]   ;;  %v28446_v55 = vld [vmem:[%s38116_s3 + $0xcf8] ss:$28 sps:$4 sm:$0xff]  }
 0x89e   :  { %v24910_v53 = vadd.f32 %v19180_v20, %v11534_v43  ;;  %v19182_v63 = vpop.f32.mrb[39].mxu1  ;;  %19885 = vmatprep.subr.bf16.mxu1 %v28423_v12  ;;  %v20836_v61 = vmax.f32 %v24908_v23, 0.0  ;;  %v28443_v43 = vld [vmem:[%s38116_s3 + $0xcc4] ss:$28 sps:$4 sm:$0xff]   ;;  %v28448_v12 = vld [vmem:[%s38116_s3 + $0xcfc] ss:$28 sps:$4 sm:$0xff]  }
 0x89f   :  { %v24911_v40 = vadd.f32 %v19182_v63, %v11538_v46  ;;  %v20837_v6 = vmax.f32 %v24909_v28, 0.0  ;;  %v28444_v46 = vld [vmem:[%s38116_s3 + $0xc58] ss:$28 sps:$4 sm:$0xff]   ;;  %v28450_v23 = vld [vmem:[%s38116_s3 + $0xad0] ss:$28 sps:$4 sm:$0xff]  }
 0x8a0   :  { %v20843_v36 = vmax.f32 %v24910_v53, 0.0  ;;  %24588 = vmatpush3.bf16.msra.mxu0 %v28425_v5  ;;  %v28453_v49 = vld [vmem:[%s38116_s3 + $0xd34] ss:$28 sps:$4 sm:$0xff]   ;;  %v28458_v20 = vld [vmem:[%s38116_s3 + $0xd6c] ss:$28 sps:$4 sm:$0xff]  }
 0x8a1   :  { %v20844_v10 = vmax.f32 %v24911_v40, 0.0  ;;  %19886 = vmatpush1.bf16.msra.mxu1 %v28421_v35  ;;  %24589 = vmatprep.subr.bf16.mxu0 %v28429_v41  ;;  %v28451_v28 = vld [vmem:[%s38116_s3 + $0xd30] ss:$28 sps:$4 sm:$0xff]   ;;  %v28459_v35 = vld [vmem:[%s38116_s3 + $0xd00] ss:$28 sps:$4 sm:$0xff]  }
 0x8a2   :  { %v36314_v60 = vpack.c.bf16 %v20843_v36, %v20836_v61  ;;  %19887 = vmatprep.subr.bf16.mxu1 %v28428_v38  ;;  %v28456_v53 = vld [vmem:[%s38116_s3 + $0xd68] ss:$28 sps:$4 sm:$0xff]   ;;  %v28460_v63 = vld [vmem:[%s38116_s3 + $0xb40] ss:$28 sps:$4 sm:$0xff]   ;;  %v28464_v38 = vld [vmem:[%s38116_s3 + $0xd38] ss:$28 sps:$4 sm:$0xff]  }
 0x8a3   :  { %v36322_v14 = vpack.c.bf16 %v20844_v10, %v20837_v6  ;;  %v28463_v5 = vld [vmem:[%s38116_s3 + $0xda4] ss:$28 sps:$4 sm:$0xff]   ;;  %v28465_v41 = vld [vmem:[%s38116_s3 + $0xb78] ss:$28 sps:$4 sm:$0xff]   ;;  %v28469_v36 = vld [vmem:[%s38116_s3 + $0xd70] ss:$28 sps:$4 sm:$0xff]  }
 0x8a4   :  { %24590 = vmatpush3.bf16.msra.mxu0 %v28430_v48  ;;  %v28461_v40 = vld [vmem:[%s38116_s3 + $0xda0] ss:$28 sps:$4 sm:$0xff]   ;;  %v28466_v6 = vld [vmem:[%s38116_s3 + $0xdd8] ss:$28 sps:$4 sm:$0xff]   ;;  %v28470_v10 = vld [vmem:[%s38116_s3 + $0xbb0] ss:$28 sps:$4 sm:$0xff]  }
 0x8a5   :  { %19888 = vmatpush1.bf16.msra.mxu1 %v28426_v4  ;;  %24591 = vmatprep.subr.bf16.mxu0 %v28434_v37  ;;  %v28468_v61 = vld [vmem:[%s38116_s3 + $0xddc] ss:$28 sps:$4 sm:$0xff]   ;;  %v28473_v4 = vld [vmem:[%s38116_s3 + $0xe14] ss:$28 sps:$4 sm:$0xff]   ;;  %v28474_v48 = vld [vmem:[%s38116_s3 + $0xda8] ss:$28 sps:$4 sm:$0xff]  }
 0x8a6   :  { %19889 = vmatprep.subr.bf16.mxu1 %v28433_v59  ;;  %v28471_v59 = vld [vmem:[%s38116_s3 + $0xe10] ss:$28 sps:$4 sm:$0xff]   ;;  %v28475_v37 = vld [vmem:[%s38116_s3 + $0xbe8] ss:$28 sps:$4 sm:$0xff]  }
 0x8a8   :  { %24592 = vmatpush3.bf16.msra.mxu0 %v28435_v19  ;;  %v28479_v19 = vld [vmem:[%s38116_s3 + $0xde0] ss:$28 sps:$4 sm:$0xff]  }
 0x8a9   :  { %19890 = vmatpush1.bf16.msra.mxu1 %v28431_v15  ;;  %24593 = vmatprep.subr.bf16.mxu0 %v28439_v50  ;;  %v28478_v15 = vld [vmem:[%s38116_s3 + $0xe4c] ss:$28 sps:$4 sm:$0xff]   ;;  %v28480_v50 = vld [vmem:[%s38116_s3 + $0xc20] ss:$28 sps:$4 sm:$0xff]  }
 0x8aa   :  { %19891 = vmatprep.subr.bf16.mxu1 %v28438_v18  ;;  %v28476_v18 = vld [vmem:[%s38116_s3 + $0xe48] ss:$28 sps:$4 sm:$0xff]  }
 0x8ac   :  { %24594 = vmatpush3.bf16.msra.mxu0 %v28440_v21  ;;  %v28484_v21 = vld [vmem:[%s38116_s3 + $0xfd8] ss:$28 sps:$4 sm:$0xff]  }
 0x8ad   :  { %19892 = vmatpush1.bf16.msra.mxu1 %v28436_v7  ;;  %24601 = vmatprep.subr.bf16.mxu0 %v28444_v46  ;;  %v28483_v7 = vld [vmem:[%s38116_s3 + $0xe84] ss:$28 sps:$4 sm:$0xff]   ;;  %v28485_v46 = vld [vmem:[%s38116_s3 + $0xe18] ss:$28 sps:$4 sm:$0xff]  }
 0x8ae   :  { %19893 = vmatprep.subr.bf16.mxu1 %v28443_v43  ;;  %v28481_v43 = vld [vmem:[%s38116_s3 + $0xe80] ss:$28 sps:$4 sm:$0xff]  }
 0x8af   :  { %20418 = vmatmul.mubr.bf16.vlgmr.msra.gmra.mrb[48].mxu0 %v31497_v8  ;;  %v28454_v8 = vld [vmem:[%s38116_s3 + $0xcc8] ss:$28 sps:$4 sm:$0xff]  }
 0x8b0   :  { %24602 = vmatpush3.bf16.msra.mxu0 %v28445_v11  ;;  %20458 = vmatprep.mubr.bf16.mxu0 %v31142_v27  ;;  %v28455_v27 = vld [vmem:[%s38116_s3 + $0xb08] ss:$28 sps:$4 sm:$0xff]   ;;  %v28489_v11 = vld [vmem:[%s38116_s3 + $0x1010] ss:$28 sps:$4 sm:$0xff]  }
 0x8b1   :  { %19894 = vmatpush1.bf16.msra.mxu1 %v28441_v17  ;;  %24603 = vmatprep.subr.bf16.mxu0 %v28449_v16  ;;  %v28488_v17 = vld [vmem:[%s38116_s3 + $0xebc] ss:$28 sps:$4 sm:$0xff]   ;;  %v28490_v16 = vld [vmem:[%s38116_s3 + $0xe50] ss:$28 sps:$4 sm:$0xff]  }
 0x8b2   :  { %19895 = vmatprep.subr.bf16.mxu1 %v28448_v12  ;;  %v28486_v12 = vld [vmem:[%s38116_s3 + $0xeb8] ss:$28 sps:$4 sm:$0xff]  }
 0x8b4   :  { %24604 = vmatpush3.bf16.msra.mxu0 %v28450_v23  ;;  %v28491_v23 = vld [vmem:[%s38116_s3 + $0xef0] ss:$28 sps:$4 sm:$0xff]  }
 0x8b5   :  { %19896 = vmatpush1.bf16.msra.mxu1 %v28446_v55  ;;  %24605 = vmatprep.subr.bf16.mxu0 %v28454_v8  ;;  %v28493_v55 = vld [vmem:[%s38116_s3 + $0xef4] ss:$28 sps:$4 sm:$0xff]   ;;  %v28499_v8 = vld [vmem:[%s38116_s3 + $0x1080] ss:$28 sps:$4 sm:$0xff]  }
 0x8b6   :  { %19897 = vmatprep.subr.bf16.mxu1 %v28453_v49  ;;  %v28498_v49 = vld [vmem:[%s38116_s3 + $0xf2c] ss:$28 sps:$4 sm:$0xff]  }
 0x8b8   :  { %24606 = vmatpush3.bf16.msra.mxu0 %v28455_v27  ;;  %v28500_v27 = vld [vmem:[%s38116_s3 + $0xec0] ss:$28 sps:$4 sm:$0xff]  }
 0x8b9   :  { %19898 = vmatpush1.bf16.msra.mxu1 %v28451_v28  ;;  %24607 = vmatprep.subr.bf16.mxu0 %v28459_v35  ;;  %v28496_v28 = vld [vmem:[%s38116_s3 + $0xf28] ss:$28 sps:$4 sm:$0xff]   ;;  %v28504_v35 = vld [vmem:[%s38116_s3 + $0x10b8] ss:$28 sps:$4 sm:$0xff]  }
 0x8ba   :  { %19899 = vmatprep.subr.bf16.mxu1 %v28458_v20  ;;  %v28503_v20 = vld [vmem:[%s38116_s3 + $0xf64] ss:$28 sps:$4 sm:$0xff]  }
 0x8bc   :  { %24608 = vmatpush3.bf16.msra.mxu0 %v28460_v63  ;;  %v28505_v63 = vld [vmem:[%s38116_s3 + $0xef8] ss:$28 sps:$4 sm:$0xff]  }
 0x8bd   :  { %19900 = vmatpush1.bf16.msra.mxu1 %v28456_v53  ;;  %24609 = vmatprep.subr.bf16.mxu0 %v28464_v38  ;;  %v28501_v53 = vld [vmem:[%s38116_s3 + $0xf60] ss:$28 sps:$4 sm:$0xff]   ;;  %v28509_v38 = vld [vmem:[%s38116_s3 + $0x10f0] ss:$28 sps:$4 sm:$0xff]  }
 0x8be   :  { %19901 = vmatprep.subr.bf16.mxu1 %v28463_v5  ;;  %v28508_v5 = vld [vmem:[%s38116_s3 + $0xf9c] ss:$28 sps:$4 sm:$0xff]  }
 0x8c0   :  { %24610 = vmatpush3.bf16.msra.mxu0 %v28465_v41  ;;  %v28510_v41 = vld [vmem:[%s38116_s3 + $0xf30] ss:$28 sps:$4 sm:$0xff]  }
 0x8c1   :  { %19902 = vmatpush1.bf16.msra.mxu1 %v28461_v40  ;;  %24611 = vmatprep.subr.bf16.mxu0 %v28469_v36  ;;  %v28506_v40 = vld [vmem:[%s38116_s3 + $0xf98] ss:$28 sps:$4 sm:$0xff]   ;;  %v28514_v36 = vld [vmem:[%s38116_s3 + $0x1128] ss:$28 sps:$4 sm:$0xff]  }
 0x8c2   :  { %19903 = vmatprep.subr.bf16.mxu1 %v28468_v61  ;;  %v28513_v61 = vld [vmem:[%s38116_s3 + $0xfd4] ss:$28 sps:$4 sm:$0xff]  }
 0x8c4   :  { %24612 = vmatpush3.bf16.msra.mxu0 %v28470_v10  ;;  %v28515_v10 = vld [vmem:[%s38116_s3 + $0xf68] ss:$28 sps:$4 sm:$0xff]  }
 0x8c5   :  { %19904 = vmatpush1.bf16.msra.mxu1 %v28466_v6  ;;  %24613 = vmatprep.subr.bf16.mxu0 %v28474_v48  ;;  %v28511_v6 = vld [vmem:[%s38116_s3 + $0xfd0] ss:$28 sps:$4 sm:$0xff]   ;;  %v28519_v48 = vld [vmem:[%s38116_s3 + $0x1160] ss:$28 sps:$4 sm:$0xff]  }
 0x8c6   :  { %19916 = vmatprep.subr.bf16.mxu1 %v28473_v4  ;;  %v28518_v4 = vld [vmem:[%s38116_s3 + $0x100c] ss:$28 sps:$4 sm:$0xff]  }
 0x8c8   :  { %19906 = vmatmul.mubr.bf16.vlgmr.msra.gmra.mrb[40].mxu1 %v31134_v24  ;;  %24614 = vmatpush3.bf16.msra.mxu0 %v28475_v37  ;;  %v28520_v37 = vld [vmem:[%s38116_s3 + $0xfa0] ss:$28 sps:$4 sm:$0xff]  }
 0x8c9   :  { %19917 = vmatpush1.bf16.msra.mxu1 %v28471_v59  ;;  %19948 = vmatprep.mubr.bf16.mxu1 %v32161_v57  ;;  %v28516_v59 = vld [vmem:[%s38116_s3 + $0x1008] ss:$28 sps:$4 sm:$0xff]  }
 0x8ca   :  { %19918 = vmatprep.subr.bf16.mxu1 %v28478_v15  ;;  %24615 = vmatprep.subr.bf16.mxu0 %v28479_v19  ;;  %v28523_v15 = vld [vmem:[%s38116_s3 + $0x1044] ss:$28 sps:$4 sm:$0xff]   ;;  %v28524_v19 = vld [vmem:[%s38116_s3 + $0x1358] ss:$28 sps:$4 sm:$0xff]  }
 0x8cc   :  { %24616 = vmatpush3.bf16.msra.mxu0 %v28480_v50  ;;  %v28525_v50 = vld [vmem:[%s38116_s3 + $0x1198] ss:$28 sps:$4 sm:$0xff]  }
 0x8cd   :  { %19919 = vmatpush1.bf16.msra.mxu1 %v28476_v18  ;;  %24623 = vmatprep.subr.bf16.mxu0 %v28484_v21  ;;  %v28521_v18 = vld [vmem:[%s38116_s3 + $0x1040] ss:$28 sps:$4 sm:$0xff]   ;;  %v28529_v21 = vld [vmem:[%s38116_s3 + $0x1390] ss:$28 sps:$4 sm:$0xff]  }
 0x8ce   :  { %19920 = vmatprep.subr.bf16.mxu1 %v28483_v7  ;;  %v28528_v7 = vld [vmem:[%s38116_s3 + $0x107c] ss:$28 sps:$4 sm:$0xff]  }
 0x8cf   :  { %20459 = vmatmul.mubr.bf16.vlgmr.msra.gmra.mrb[52].mxu0 %v31134_v24  ;;  %v28494_v24 = vld [vmem:[%s38116_s3 + $0x1048] ss:$28 sps:$4 sm:$0xff]  }
 0x8d0   :  { %24624 = vmatpush3.bf16.msra.mxu0 %v28485_v46  ;;  %20499 = vmatprep.mubr.bf16.mxu0 %v32161_v57  ;;  %v28495_v57 = vld [vmem:[%s38116_s3 + $0xe88] ss:$28 sps:$4 sm:$0xff]   ;;  %v28530_v46 = vld [vmem:[%s38116_s3 + $0x11d0] ss:$28 sps:$4 sm:$0xff]  }
 0x8d1   :  { %19921 = vmatpush1.bf16.msra.mxu1 %v28481_v43  ;;  %24625 = vmatprep.subr.bf16.mxu0 %v28489_v11  ;;  %v28526_v43 = vld [vmem:[%s38116_s3 + $0x1078] ss:$28 sps:$4 sm:$0xff]   ;;  %v28534_v11 = vld [vmem:[%s38116_s3 + $0x13c8] ss:$28 sps:$4 sm:$0xff]  }
 0x8d2   :  { %19922 = vmatprep.subr.bf16.mxu1 %v28488_v17  ;;  %v28533_v17 = vld [vmem:[%s38116_s3 + $0x10b4] ss:$28 sps:$4 sm:$0xff]  }
 0x8d4   :  { %24626 = vmatpush3.bf16.msra.mxu0 %v28490_v16  ;;  %v28535_v16 = vld [vmem:[%s38116_s3 + $0x1208] ss:$28 sps:$4 sm:$0xff]  }
 0x8d5   :  { %19923 = vmatpush1.bf16.msra.mxu1 %v28486_v12  ;;  %24627 = vmatprep.subr.bf16.mxu0 %v28494_v24  ;;  %v28531_v12 = vld [vmem:[%s38116_s3 + $0x10b0] ss:$28 sps:$4 sm:$0xff]   ;;  %v28539_v24 = vld [vmem:[%s38116_s3 + $0x1400] ss:$28 sps:$4 sm:$0xff]  }
 0x8d6   :  { %19924 = vmatprep.subr.bf16.mxu1 %v28493_v55  ;;  %v28538_v55 = vld [vmem:[%s38116_s3 + $0x10ec] ss:$28 sps:$4 sm:$0xff]  }
 0x8d8   :  { %24628 = vmatpush3.bf16.msra.mxu0 %v28495_v57  ;;  %v28540_v57 = vld [vmem:[%s38116_s3 + $0x1240] ss:$28 sps:$4 sm:$0xff]  }
 0x8d9   :  { %19925 = vmatpush1.bf16.msra.mxu1 %v28491_v23  ;;  %24629 = vmatprep.subr.bf16.mxu0 %v28499_v8  ;;  %v28536_v23 = vld [vmem:[%s38116_s3 + $0x10e8] ss:$28 sps:$4 sm:$0xff]   ;;  %v28544_v8 = vld [vmem:[%s38116_s3 + $0x1438] ss:$28 sps:$4 sm:$0xff]  }
 0x8da   :  { %19926 = vmatprep.subr.bf16.mxu1 %v28498_v49  ;;  %v28543_v49 = vld [vmem:[%s38116_s3 + $0x1124] ss:$28 sps:$4 sm:$0xff]  }
 0x8dc   :  { %24630 = vmatpush3.bf16.msra.mxu0 %v28500_v27  ;;  %v28545_v27 = vld [vmem:[%s38116_s3 + $0x1278] ss:$28 sps:$4 sm:$0xff]  }
 0x8dd   :  { %19927 = vmatpush1.bf16.msra.mxu1 %v28496_v28  ;;  %24631 = vmatprep.subr.bf16.mxu0 %v28504_v35  ;;  %v28541_v28 = vld [vmem:[%s38116_s3 + $0x1120] ss:$28 sps:$4 sm:$0xff]   ;;  %v28549_v35 = vld [vmem:[%s38116_s3 + $0x1470] ss:$28 sps:$4 sm:$0xff]  }
 0x8de   :  { %19928 = vmatprep.subr.bf16.mxu1 %v28503_v20  ;;  %v28548_v20 = vld [vmem:[%s38116_s3 + $0x115c] ss:$28 sps:$4 sm:$0xff]  }
 0x8e0   :  { %24632 = vmatpush3.bf16.msra.mxu0 %v28505_v63  ;;  %v28550_v63 = vld [vmem:[%s38116_s3 + $0x12b0] ss:$28 sps:$4 sm:$0xff]  }
 0x8e1   :  { %19929 = vmatpush1.bf16.msra.mxu1 %v28501_v53  ;;  %24633 = vmatprep.subr.bf16.mxu0 %v28509_v38  ;;  %v28546_v53 = vld [vmem:[%s38116_s3 + $0x1158] ss:$28 sps:$4 sm:$0xff]   ;;  %v28554_v38 = vld [vmem:[%s38116_s3 + $0x14a8] ss:$28 sps:$4 sm:$0xff]  }
 0x8e2   :  { %19930 = vmatprep.subr.bf16.mxu1 %v28508_v5  ;;  %v28553_v5 = vld [vmem:[%s38116_s3 + $0x1194] ss:$28 sps:$4 sm:$0xff]  }
 0x8e4   :  { %24634 = vmatpush3.bf16.msra.mxu0 %v28510_v41  ;;  %v28555_v41 = vld [vmem:[%s38116_s3 + $0x12e8] ss:$28 sps:$4 sm:$0xff]  }
 0x8e5   :  { %19931 = vmatpush1.bf16.msra.mxu1 %v28506_v40  ;;  %24635 = vmatprep.subr.bf16.mxu0 %v28514_v36  ;;  %v28551_v40 = vld [vmem:[%s38116_s3 + $0x1190] ss:$28 sps:$4 sm:$0xff]   ;;  %v28559_v36 = vld [vmem:[%s38116_s3 + $0x14e0] ss:$28 sps:$4 sm:$0xff]  }
 0x8e6   :  { %19932 = vmatprep.subr.bf16.mxu1 %v28513_v61  ;;  %v28558_v61 = vld [vmem:[%s38116_s3 + $0x11cc] ss:$28 sps:$4 sm:$0xff]  }
 0x8e8   :  { %24636 = vmatpush3.bf16.msra.mxu0 %v28515_v10  ;;  %v28560_v10 = vld [vmem:[%s38116_s3 + $0x1320] ss:$28 sps:$4 sm:$0xff]  }
 0x8e9   :  { %19933 = vmatpush1.bf16.msra.mxu1 %v28511_v6  ;;  %24637 = vmatprep.subr.bf16.mxu0 %v28519_v48  ;;  %v28556_v6 = vld [vmem:[%s38116_s3 + $0x11c8] ss:$28 sps:$4 sm:$0xff]   ;;  %v28565_v48 = vld [vmem:[%s38116_s3 + $0x1518] ss:$28 sps:$4 sm:$0xff]  }
 0x8ea   :  { %19934 = vmatprep.subr.bf16.mxu1 %v28518_v4  ;;  %v28563_v4 = vld [vmem:[%s38116_s3 + $0x1204] ss:$28 sps:$4 sm:$0xff]  }
 0x8ec   :  { %24638 = vmatpush3.bf16.msra.mxu0 %v28520_v37  ;;  %v28569_v37 = vld [vmem:[%s38116_s3 + $0x1710] ss:$28 sps:$4 sm:$0xff]  }
 0x8ed   :  { %19935 = vmatpush1.bf16.msra.mxu1 %v28516_v59  ;;  %24645 = vmatprep.subr.bf16.mxu0 %v28524_v19  ;;  %v28568_v59 = vld [vmem:[%s38116_s3 + $0x123c] ss:$28 sps:$4 sm:$0xff]   ;;  %v28570_v19 = vld [vmem:[%s38116_s3 + $0x1550] ss:$28 sps:$4 sm:$0xff]  }
 0x8ee   :  { %19936 = vmatprep.subr.bf16.mxu1 %v28523_v15  ;;  %v28566_v15 = vld [vmem:[%s38116_s3 + $0x1238] ss:$28 sps:$4 sm:$0xff]  }
 0x8ef   :  { %20500 = vmatmul.mubr.bf16.vlgmr.msra.gmra.mrb[56].mxu0 %v32159_v51 }
 0x8f0   :  { %24646 = vmatpush3.bf16.msra.mxu0 %v28525_v50  ;;  %20540 = vmatprep.mubr.bf16.mxu0 %v31810_v34  ;;  %v28574_v50 = vld [vmem:[%s38116_s3 + $0x1748] ss:$28 sps:$4 sm:$0xff]  }
 0x8f1   :  { %19937 = vmatpush1.bf16.msra.mxu1 %v28521_v18  ;;  %24647 = vmatprep.subr.bf16.mxu0 %v28529_v21  ;;  %v28573_v18 = vld [vmem:[%s38116_s3 + $0x1274] ss:$28 sps:$4 sm:$0xff]   ;;  %v28575_v21 = vld [vmem:[%s38116_s3 + $0x1588] ss:$28 sps:$4 sm:$0xff]  }
 0x8f2   :  { %19938 = vmatprep.subr.bf16.mxu1 %v28528_v7  ;;  %v28571_v7 = vld [vmem:[%s38116_s3 + $0x1270] ss:$28 sps:$4 sm:$0xff]  }
 0x8f4   :  { %24648 = vmatpush3.bf16.msra.mxu0 %v28530_v46  ;;  %v28579_v46 = vld [vmem:[%s38116_s3 + $0x1780] ss:$28 sps:$4 sm:$0xff]  }
 0x8f5   :  { %19939 = vmatpush1.bf16.msra.mxu1 %v28526_v43  ;;  %24649 = vmatprep.subr.bf16.mxu0 %v28534_v11  ;;  %v28578_v43 = vld [vmem:[%s38116_s3 + $0x12ac] ss:$28 sps:$4 sm:$0xff]   ;;  %v28580_v11 = vld [vmem:[%s38116_s3 + $0x15c0] ss:$28 sps:$4 sm:$0xff]  }
 0x8f6   :  { %19940 = vmatprep.subr.bf16.mxu1 %v28533_v17  ;;  %v28576_v17 = vld [vmem:[%s38116_s3 + $0x12a8] ss:$28 sps:$4 sm:$0xff]  }
 0x8f8   :  { %24650 = vmatpush3.bf16.msra.mxu0 %v28535_v16  ;;  %v28584_v16 = vld [vmem:[%s38116_s3 + $0x17b8] ss:$28 sps:$4 sm:$0xff]  }
 0x8f9   :  { %19941 = vmatpush1.bf16.msra.mxu1 %v28531_v12  ;;  %24651 = vmatprep.subr.bf16.mxu0 %v28539_v24  ;;  %v28583_v12 = vld [vmem:[%s38116_s3 + $0x12e4] ss:$28 sps:$4 sm:$0xff]   ;;  %v28585_v24 = vld [vmem:[%s38116_s3 + $0x15f8] ss:$28 sps:$4 sm:$0xff]  }
 0x8fa   :  { %19942 = vmatprep.subr.bf16.mxu1 %v28538_v55  ;;  %v28581_v55 = vld [vmem:[%s38116_s3 + $0x12e0] ss:$28 sps:$4 sm:$0xff]  }
 0x8fc   :  { %24652 = vmatpush3.bf16.msra.mxu0 %v28540_v57  ;;  %v28589_v57 = vld [vmem:[%s38116_s3 + $0x17f0] ss:$28 sps:$4 sm:$0xff]  }
 0x8fd   :  { %19943 = vmatpush1.bf16.msra.mxu1 %v28536_v23  ;;  %24653 = vmatprep.subr.bf16.mxu0 %v28544_v8  ;;  %v28588_v23 = vld [vmem:[%s38116_s3 + $0x131c] ss:$28 sps:$4 sm:$0xff]   ;;  %v11542_v8 = vrot.slane %v36272_v9, %v30767_v32 }
 0x8fe   :  { %19944 = vmatprep.subr.bf16.mxu1 %v28543_v49  ;;  %v28586_v49 = vld [vmem:[%s38116_s3 + $0x1318] ss:$28 sps:$4 sm:$0xff]  }
 0x900   :  { %24654 = vmatpush3.bf16.msra.mxu0 %v28545_v27  ;;  %v28590_v27 = vld [vmem:[%s38116_s3 + $0x1630] ss:$28 sps:$4 sm:$0xff]  }
 0x901   :  { %19945 = vmatpush1.bf16.msra.mxu1 %v28541_v28  ;;  %24655 = vmatprep.subr.bf16.mxu0 %v28549_v35  ;;  %v11546_v28 = vrot.slane %v36272_v9, %v30776_v47  ;;  %v28594_v35 = vld [vmem:[%s38116_s3 + $0x1828] ss:$28 sps:$4 sm:$0xff]   ;;  %v28591_v47 = vld [vmem:[%s38116_s3 + $0x1350] ss:$28 sps:$4 sm:$0xff]  }
 0x902   :  { %19946 = vmatprep.subr.bf16.mxu1 %v28548_v20  ;;  %v28593_v20 = vld [vmem:[%s38116_s3 + $0x1354] ss:$28 sps:$4 sm:$0xff]  }
 0x904   :  { %24656 = vmatpush3.bf16.msra.mxu0 %v28550_v63 }
 0x905   :  { %19947 = vmatpush1.bf16.msra.mxu1 %v28546_v53  ;;  %24657 = vmatprep.subr.bf16.mxu0 %v28554_v38 }
 0x906   :  { %19959 = vmatprep.subr.bf16.mxu1 %v28553_v5 }
 0x908   :  { %19949 = vmatmul.mubr.bf16.vlgmr.msra.gmra.mrb[40].mxu1 %v32159_v51  ;;  %24658 = vmatpush3.bf16.msra.mxu0 %v28555_v41  ;;  %v28564_v51 = vld [vmem:[%s38116_s3 + $0x16d8] ss:$28 sps:$4 sm:$0xff]   ;;  %v28598_v41 = vld [vmem:[%s38116_s3 + $0x138c] ss:$28 sps:$4 sm:$0xff]  }
 0x909   :  { %19960 = vmatpush1.bf16.msra.mxu1 %v28551_v40  ;;  %19991 = vmatprep.mubr.bf16.mxu1 %v31810_v34  ;;  %v28561_v34 = vld [vmem:[%s38116_s3 + $0x1200] ss:$28 sps:$4 sm:$0xff]   ;;  %v28595_v40 = vld [vmem:[%s38116_s3 + $0x1668] ss:$28 sps:$4 sm:$0xff]  }
 0x90a   :  { %19961 = vmatprep.subr.bf16.mxu1 %v28558_v61  ;;  %24659 = vmatprep.subr.bf16.mxu0 %v28559_v36 }
 0x90c   :  { %24660 = vmatpush3.bf16.msra.mxu0 %v28560_v10 }
 0x90d   :  { %19962 = vmatpush1.bf16.msra.mxu1 %v28556_v6  ;;  %24667 = vmatprep.subr.bf16.mxu0 %v28564_v51  ;;  %v28599_v6 = vld [vmem:[%s38116_s3 + $0x1860] ss:$28 sps:$4 sm:$0xff]  }
 0x90e   :  { %19963 = vmatprep.subr.bf16.mxu1 %v28563_v4 }
 0x90f   :  { %20541 = vmatmul.mubr.bf16.vlgmr.msra.gmra.mrb[60].mxu0 %v31802_v13 }
 0x910   :  { %24668 = vmatpush3.bf16.msra.mxu0 %v28565_v48  ;;  %20581 = vmatprep.mubr.bf16.mxu0 %v32806_v58 }
 0x911   :  { %19964 = vmatpush1.bf16.msra.mxu1 %v28561_v34  ;;  %24669 = vmatprep.subr.bf16.mxu0 %v28569_v37  ;;  %v28596_v34 = vld [vmem:[%s38116_s3 + $0x1388] ss:$28 sps:$4 sm:$0xff]   ;;  %v28600_v37 = vld [vmem:[%s38116_s3 + $0x16a0] ss:$28 sps:$4 sm:$0xff]  }
 0x912   :  { %19965 = vmatprep.subr.bf16.mxu1 %v28568_v59 }
 0x914   :  { %24670 = vmatpush3.bf16.msra.mxu0 %v28570_v19 }
 0x915   :  { %19966 = vmatpush1.bf16.msra.mxu1 %v28566_v15  ;;  %24671 = vmatprep.subr.bf16.mxu0 %v28574_v50  ;;  %v28603_v15 = vld [vmem:[%s38116_s3 + $0x13c4] ss:$28 sps:$4 sm:$0xff]  }
 0x916   :  { %19967 = vmatprep.subr.bf16.mxu1 %v28573_v18  ;;  %v28604_v18 = vld [vmem:[%s38116_s3 + $0x1a58] ss:$28 sps:$4 sm:$0xff]  }
 0x918   :  { %24672 = vmatpush3.bf16.msra.mxu0 %v28575_v21  ;;  %v28605_v21 = vld [vmem:[%s38116_s3 + $0x1898] ss:$28 sps:$4 sm:$0xff]  }
 0x919   :  { %19968 = vmatpush1.bf16.msra.mxu1 %v28571_v7  ;;  %24673 = vmatprep.subr.bf16.mxu0 %v28579_v46  ;;  %v28601_v7 = vld [vmem:[%s38116_s3 + $0x13c0] ss:$28 sps:$4 sm:$0xff]   ;;  %v28609_v46 = vld [vmem:[%s38116_s3 + $0x1a90] ss:$28 sps:$4 sm:$0xff]  }
 0x91a   :  { %19969 = vmatprep.subr.bf16.mxu1 %v28578_v43  ;;  %v28608_v43 = vld [vmem:[%s38116_s3 + $0x13fc] ss:$28 sps:$4 sm:$0xff]  }
 0x91c   :  { %24674 = vmatpush3.bf16.msra.mxu0 %v28580_v11  ;;  %v28610_v11 = vld [vmem:[%s38116_s3 + $0x18d0] ss:$28 sps:$4 sm:$0xff]  }
 0x91d   :  { %19970 = vmatpush1.bf16.msra.mxu1 %v28576_v17  ;;  %24675 = vmatprep.subr.bf16.mxu0 %v28584_v16  ;;  %v28606_v17 = vld [vmem:[%s38116_s3 + $0x13f8] ss:$28 sps:$4 sm:$0xff]   ;;  %v28614_v16 = vld [vmem:[%s38116_s3 + $0x1ac8] ss:$28 sps:$4 sm:$0xff]  }
 0x91e   :  { %19971 = vmatprep.subr.bf16.mxu1 %v28583_v12  ;;  %v28613_v12 = vld [vmem:[%s38116_s3 + $0x1434] ss:$28 sps:$4 sm:$0xff]  }
 0x920   :  { %24676 = vmatpush3.bf16.msra.mxu0 %v28585_v24  ;;  %v28615_v24 = vld [vmem:[%s38116_s3 + $0x1908] ss:$28 sps:$4 sm:$0xff]  }
 0x921   :  { %19972 = vmatpush1.bf16.msra.mxu1 %v28581_v55  ;;  %24677 = vmatprep.subr.bf16.mxu0 %v28589_v57  ;;  %v28611_v55 = vld [vmem:[%s38116_s3 + $0x1430] ss:$28 sps:$4 sm:$0xff]   ;;  %v28619_v57 = vld [vmem:[%s38116_s3 + $0x1b00] ss:$28 sps:$4 sm:$0xff]  }
 0x922   :  { %19973 = vmatprep.subr.bf16.mxu1 %v28588_v23  ;;  %v19735_v53 = vpop.f32.mrb[36].mxu0  ;;  %v28618_v23 = vld [vmem:[%s38116_s3 + $0x146c] ss:$28 sps:$4 sm:$0xff]  }
 0x923   :  { %v24912_v32 = vadd.f32 %v19735_v53, %v11542_v8  ;;  %v19737_v63 = vpop.f32.mrb[37].mxu0  ;;  %v28628_v53 = vld [vmem:[%s38116_s3 + $0x14dc] ss:$28 sps:$4 sm:$0xff]  }
 0x924   :  { %v24913_v5 = vadd.f32 %v19737_v63, %v11546_v28  ;;  %v19739_v38 = vpop.f32.mrb[38].mxu0  ;;  %24678 = vmatpush3.bf16.msra.mxu0 %v28590_v27  ;;  %v28624_v27 = vld [vmem:[%s38116_s3 + $0x1b38] ss:$28 sps:$4 sm:$0xff]  }
 0x925   :  { %19974 = vmatpush1.bf16.msra.mxu1 %v28586_v49  ;;  %v24914_v61 = vadd.f32 %v19739_v38, %v11542_v8  ;;  %v19741_v36 = vpop.f32.mrb[39].mxu0  ;;  %24679 = vmatprep.subr.bf16.mxu0 %v28594_v35  ;;  %v20838_v4 = vmax.f32 %v24912_v32, 0.0  ;;  %v28616_v49 = vld [vmem:[%s38116_s3 + $0x1468] ss:$28 sps:$4 sm:$0xff]   ;;  %v28620_v8 = vld [vmem:[%s38116_s3 + $0x1940] ss:$28 sps:$4 sm:$0xff]  }
 0x926   :  { %19975 = vmatprep.subr.bf16.mxu1 %v28593_v20  ;;  %v24915_v10 = vadd.f32 %v19741_v36, %v11546_v28  ;;  %v20839_v48 = vmax.f32 %v24913_v5, 0.0  ;;  %v28623_v28 = vld [vmem:[%s38116_s3 + $0x14a4] ss:$28 sps:$4 sm:$0xff]   ;;  %v28625_v35 = vld [vmem:[%s38116_s3 + $0x1978] ss:$28 sps:$4 sm:$0xff]  }
 0x927   :  { %v20845_v51 = vmax.f32 %v24914_v61, 0.0  ;;  %v28621_v20 = vld [vmem:[%s38116_s3 + $0x14a0] ss:$28 sps:$4 sm:$0xff]   ;;  %v28629_v32 = vld [vmem:[%s38116_s3 + $0x1b70] ss:$28 sps:$4 sm:$0xff]  }
 0x928   :  { %v20846_v59 = vmax.f32 %v24915_v10, 0.0  ;;  %24680 = vmatpush3.bf16.msra.mxu0 %v28595_v40  ;;  %v28626_v63 = vld [vmem:[%s38116_s3 + $0x14d8] ss:$28 sps:$4 sm:$0xff]   ;;  %v28634_v38 = vld [vmem:[%s38116_s3 + $0x1ba8] ss:$28 sps:$4 sm:$0xff]  }
 0x929   :  { %19976 = vmatpush1.bf16.msra.mxu1 %v28591_v47  ;;  %v36748_v19 = vpack.c.bf16 %v20845_v51, %v20838_v4  ;;  %24681 = vmatprep.subr.bf16.mxu0 %v28599_v6  ;;  %v28630_v47 = vld [vmem:[%s38116_s3 + $0x19b0] ss:$28 sps:$4 sm:$0xff]   ;;  %v28635_v10 = vld [vmem:[%s38116_s3 + $0x19e8] ss:$28 sps:$4 sm:$0xff]  }
 0x92a   :  { %19977 = vmatprep.subr.bf16.mxu1 %v28598_v41  ;;  %v36753_v50 = vpack.c.bf16 %v20846_v59, %v20839_v48  ;;  %v28633_v5 = vld [vmem:[%s38116_s3 + $0x1514] ss:$28 sps:$4 sm:$0xff]   ;;  %v28638_v4 = vld [vmem:[%s38116_s3 + $0x154c] ss:$28 sps:$4 sm:$0xff]  }
 0x92b   :  { %v28631_v61 = vld [vmem:[%s38116_s3 + $0x1510] ss:$28 sps:$4 sm:$0xff]   ;;  %v28636_v59 = vld [vmem:[%s38116_s3 + $0x1548] ss:$28 sps:$4 sm:$0xff]  }
 0x92c   :  { %24682 = vmatpush3.bf16.msra.mxu0 %v28600_v37  ;;  %v28640_v37 = vld [vmem:[%s38116_s3 + $0x1a20] ss:$28 sps:$4 sm:$0xff]  }
 0x92d   :  { %19978 = vmatpush1.bf16.msra.mxu1 %v28596_v34  ;;  %24689 = vmatprep.subr.bf16.mxu0 %v28604_v18  ;;  %v28639_v34 = vld [vmem:[%s38116_s3 + $0x1be0] ss:$28 sps:$4 sm:$0xff]   ;;  %v28645_v18 = vld [vmem:[%s38116_s3 + $0x1c18] ss:$28 sps:$4 sm:$0xff]  }
 0x92e   :  { %19979 = vmatprep.subr.bf16.mxu1 %v28603_v15  ;;  %v28643_v15 = vld [vmem:[%s38116_s3 + $0x1584] ss:$28 sps:$4 sm:$0xff]  }
 0x92f   :  { %20582 = vmatmul.mubr.bf16.vlgmr.msra.gmra.mrb[64].mxu0 %v32804_v52 }
 0x930   :  { %24690 = vmatpush3.bf16.msra.mxu0 %v28605_v21  ;;  %20622 = vmatprep.mubr.bf16.mxu0 %v32442_v29  ;;  %v28649_v21 = vld [vmem:[%s38116_s3 + $0x1e10] ss:$28 sps:$4 sm:$0xff]  }
 0x931   :  { %19980 = vmatpush1.bf16.msra.mxu1 %v28601_v7  ;;  %24691 = vmatprep.subr.bf16.mxu0 %v28609_v46  ;;  %v28648_v7 = vld [vmem:[%s38116_s3 + $0x15bc] ss:$28 sps:$4 sm:$0xff]   ;;  %v28650_v46 = vld [vmem:[%s38116_s3 + $0x1c50] ss:$28 sps:$4 sm:$0xff]  }
 0x932   :  { %19981 = vmatprep.subr.bf16.mxu1 %v28608_v43  ;;  %v28646_v43 = vld [vmem:[%s38116_s3 + $0x15b8] ss:$28 sps:$4 sm:$0xff]  }
 0x934   :  { %24692 = vmatpush3.bf16.msra.mxu0 %v28610_v11  ;;  %v28654_v11 = vld [vmem:[%s38116_s3 + $0x1e48] ss:$28 sps:$4 sm:$0xff]  }
 0x935   :  { %19982 = vmatpush1.bf16.msra.mxu1 %v28606_v17  ;;  %24693 = vmatprep.subr.bf16.mxu0 %v28614_v16  ;;  %v28653_v17 = vld [vmem:[%s38116_s3 + $0x15f4] ss:$28 sps:$4 sm:$0xff]   ;;  %v28655_v16 = vld [vmem:[%s38116_s3 + $0x1c88] ss:$28 sps:$4 sm:$0xff]  }
 0x936   :  { %19983 = vmatprep.subr.bf16.mxu1 %v28613_v12  ;;  %v28651_v12 = vld [vmem:[%s38116_s3 + $0x15f0] ss:$28 sps:$4 sm:$0xff]  }
 0x938   :  { %24694 = vmatpush3.bf16.msra.mxu0 %v28615_v24  ;;  %v28659_v24 = vld [vmem:[%s38116_s3 + $0x1e80] ss:$28 sps:$4 sm:$0xff]  }
 0x939   :  { %19984 = vmatpush1.bf16.msra.mxu1 %v28611_v55  ;;  %24695 = vmatprep.subr.bf16.mxu0 %v28619_v57  ;;  %v28658_v55 = vld [vmem:[%s38116_s3 + $0x162c] ss:$28 sps:$4 sm:$0xff]   ;;  %v28660_v57 = vld [vmem:[%s38116_s3 + $0x1cc0] ss:$28 sps:$4 sm:$0xff]  }
 0x93a   :  { %19985 = vmatprep.subr.bf16.mxu1 %v28618_v23  ;;  %v28656_v23 = vld [vmem:[%s38116_s3 + $0x1628] ss:$28 sps:$4 sm:$0xff]  }
 0x93c   :  { %24696 = vmatpush3.bf16.msra.mxu0 %v28620_v8  ;;  %v28664_v8 = vld [vmem:[%s38116_s3 + $0x1eb8] ss:$28 sps:$4 sm:$0xff]  }
 0x93d   :  { %19986 = vmatpush1.bf16.msra.mxu1 %v28616_v49  ;;  %24697 = vmatprep.subr.bf16.mxu0 %v28624_v27  ;;  %v28663_v49 = vld [vmem:[%s38116_s3 + $0x1664] ss:$28 sps:$4 sm:$0xff]   ;;  %v28665_v27 = vld [vmem:[%s38116_s3 + $0x1cf8] ss:$28 sps:$4 sm:$0xff]  }
 0x93e   :  { %19987 = vmatprep.subr.bf16.mxu1 %v28623_v28  ;;  %v28661_v28 = vld [vmem:[%s38116_s3 + $0x1660] ss:$28 sps:$4 sm:$0xff]  }
 0x940   :  { %24698 = vmatpush3.bf16.msra.mxu0 %v28625_v35  ;;  %v28669_v35 = vld [vmem:[%s38116_s3 + $0x1ef0] ss:$28 sps:$4 sm:$0xff]  }
 0x941   :  { %19988 = vmatpush1.bf16.msra.mxu1 %v28621_v20  ;;  %24699 = vmatprep.subr.bf16.mxu0 %v28629_v32  ;;  %v28668_v20 = vld [vmem:[%s38116_s3 + $0x169c] ss:$28 sps:$4 sm:$0xff]   ;;  %v28670_v32 = vld [vmem:[%s38116_s3 + $0x1d30] ss:$28 sps:$4 sm:$0xff]  }
 0x942   :  { %19989 = vmatprep.subr.bf16.mxu1 %v28628_v53  ;;  %v24551_v40 = vpop.f32.mrb[40].mxu0  ;;  %v28666_v53 = vld [vmem:[%s38116_s3 + $0x1698] ss:$28 sps:$4 sm:$0xff]  }
 0x943   :  { %v24552_v41 = vpop.f32.mrb[41].mxu0 }
 0x944   :  { %v36832_v36 = vadd.f32 %v24552_v41, %v24551_v40  ;;  %v24554_v6 = vpop.f32.mrb[42].mxu0  ;;  %24700 = vmatpush3.bf16.msra.mxu0 %v28630_v47  ;;  %v28673_v47 = vld [vmem:[%s38116_s3 + $0x16d4] ss:$28 sps:$4 sm:$0xff]  }
 0x945   :  { %19990 = vmatpush1.bf16.msra.mxu1 %v28626_v63  ;;  %v24555_v51 = vpop.f32.mrb[43].mxu0  ;;  %24701 = vmatprep.subr.bf16.mxu0 %v28634_v38  ;;  %v11558_v63 = vrot.slane %v36272_v9, %v31072_v45  ;;  %v28671_v40 = vld [vmem:[%s38116_s3 + $0x16d0] ss:$28 sps:$4 sm:$0xff]   ;;  %v28675_v45 = vld [vmem:[%s38116_s3 + $0x1d68] ss:$28 sps:$4 sm:$0xff]  }
 0x946   :  { %20002 = vmatprep.subr.bf16.mxu1 %v28633_v5  ;;  %v36844_v48 = vadd.f32 %v24555_v51, %v24554_v6  ;;  %v28674_v5 = vld [vmem:[%s38116_s3 + $0x1f28] ss:$28 sps:$4 sm:$0xff]   ;;  %v28679_v51 = vld [vmem:[%s38116_s3 + $0x1f60] ss:$28 sps:$4 sm:$0xff]  }
 0x947   :  { %v20338_v9 = vadd.f32 %v36832_v36, %v11558_v63  ;;  %v28676_v36 = vld [vmem:[%s38116_s3 + $0x1708] ss:$28 sps:$4 sm:$0xff]  }
 0x948   :  { %19992 = vmatmul.mubr.bf16.vlgmr.msra.gmra.mrb[40].mxu1 %v31802_v13  ;;  %24702 = vmatpush3.bf16.msra.mxu0 %v28635_v10  ;;  %v28644_v13 = vld [vmem:[%s38116_s3 + $0x1dd8] ss:$28 sps:$4 sm:$0xff]   ;;  %v28678_v10 = vld [vmem:[%s38116_s3 + $0x170c] ss:$28 sps:$4 sm:$0xff]  }
 0x949   :  { %20003 = vmatpush1.bf16.msra.mxu1 %v28631_v61  ;;  %20034 = vmatprep.mubr.bf16.mxu1 %v32806_v58  ;;  %v28641_v58 = vld [vmem:[%s38116_s3 + $0x1580] ss:$28 sps:$4 sm:$0xff]  }
 0x94a   :  { %20004 = vmatprep.subr.bf16.mxu1 %v28638_v4  ;;  %24703 = vmatprep.subr.bf16.mxu0 %v28639_v34  ;;  %v20341_v34 = vadd.f32 %v36844_v48, %v11558_v63  ;;  %v28683_v48 = vld [vmem:[%s38116_s3 + $0x1744] ss:$28 sps:$4 sm:$0xff]   ;;  %v28710_v63 = vld [vmem:[%s38116_s3 + $0x20b0] ss:$28 sps:$4 sm:$0xff]  }
 0x94c   :  { %24704 = vmatpush3.bf16.msra.mxu0 %v28640_v37 }
 0x94d   :  { %20005 = vmatpush1.bf16.msra.mxu1 %v28636_v59  ;;  %24711 = vmatprep.subr.bf16.mxu0 %v28644_v13 }
 0x94e   :  { %20006 = vmatprep.subr.bf16.mxu1 %v28643_v15  ;;  %v28680_v15 = vld [vmem:[%s38116_s3 + $0x1da0] ss:$28 sps:$4 sm:$0xff]  }
 0x94f   :  { %20623 = vmatmul.mubr.bf16.vlgmr.msra.gmra.mrb[68].mxu0 %v32434_v42 }
 0x950   :  { %24712 = vmatpush3.bf16.msra.mxu0 %v28645_v18  ;;  %20663 = vmatprep.mubr.bf16.mxu0 %v33452_v44  ;;  %v28681_v18 = vld [vmem:[%s38116_s3 + $0x1740] ss:$28 sps:$4 sm:$0xff]  }
 0x951   :  { %20007 = vmatpush1.bf16.msra.mxu1 %v28641_v58  ;;  %24713 = vmatprep.subr.bf16.mxu0 %v28649_v21  ;;  %v28684_v58 = vld [vmem:[%s38116_s3 + $0x2158] ss:$28 sps:$4 sm:$0xff]  }
 0x952   :  { %20008 = vmatprep.subr.bf16.mxu1 %v28648_v7  ;;  %v28685_v7 = vld [vmem:[%s38116_s3 + $0x1f98] ss:$28 sps:$4 sm:$0xff]  }
 0x953   :  { %v28688_v21 = vld [vmem:[%s38116_s3 + $0x177c] ss:$28 sps:$4 sm:$0xff]  }
 0x954   :  { %24714 = vmatpush3.bf16.msra.mxu0 %v28650_v46  ;;  %v28686_v46 = vld [vmem:[%s38116_s3 + $0x1778] ss:$28 sps:$4 sm:$0xff]  }
 0x955   :  { %20009 = vmatpush1.bf16.msra.mxu1 %v28646_v43  ;;  %24715 = vmatprep.subr.bf16.mxu0 %v28654_v11  ;;  %v28689_v43 = vld [vmem:[%s38116_s3 + $0x2190] ss:$28 sps:$4 sm:$0xff]  }
 0x956   :  { %20010 = vmatprep.subr.bf16.mxu1 %v28653_v17  ;;  %v28690_v17 = vld [vmem:[%s38116_s3 + $0x1fd0] ss:$28 sps:$4 sm:$0xff]  }
 0x957   :  { %v28693_v11 = vld [vmem:[%s38116_s3 + $0x17b4] ss:$28 sps:$4 sm:$0xff]  }
 0x958   :  { %24716 = vmatpush3.bf16.msra.mxu0 %v28655_v16  ;;  %v28691_v16 = vld [vmem:[%s38116_s3 + $0x17b0] ss:$28 sps:$4 sm:$0xff]  }
 0x959   :  { %20011 = vmatpush1.bf16.msra.mxu1 %v28651_v12  ;;  %24717 = vmatprep.subr.bf16.mxu0 %v28659_v24  ;;  %v28694_v12 = vld [vmem:[%s38116_s3 + $0x21c8] ss:$28 sps:$4 sm:$0xff]  }
 0x95a   :  { %20012 = vmatprep.subr.bf16.mxu1 %v28658_v55  ;;  %v28695_v55 = vld [vmem:[%s38116_s3 + $0x2008] ss:$28 sps:$4 sm:$0xff]  }
 0x95b   :  { %v28698_v24 = vld [vmem:[%s38116_s3 + $0x17ec] ss:$28 sps:$4 sm:$0xff]  }
 0x95c   :  { %24718 = vmatpush3.bf16.msra.mxu0 %v28660_v57  ;;  %v28696_v57 = vld [vmem:[%s38116_s3 + $0x17e8] ss:$28 sps:$4 sm:$0xff]  }
 0x95d   :  { %20013 = vmatpush1.bf16.msra.mxu1 %v28656_v23  ;;  %24719 = vmatprep.subr.bf16.mxu0 %v28664_v8  ;;  %v28699_v23 = vld [vmem:[%s38116_s3 + $0x2200] ss:$28 sps:$4 sm:$0xff]  }
 0x95e   :  { %20014 = vmatprep.subr.bf16.mxu1 %v28663_v49  ;;  %v28700_v49 = vld [vmem:[%s38116_s3 + $0x2040] ss:$28 sps:$4 sm:$0xff]  }
 0x95f   :  { %v28703_v8 = vld [vmem:[%s38116_s3 + $0x1824] ss:$28 sps:$4 sm:$0xff]  }
 0x960   :  { %24720 = vmatpush3.bf16.msra.mxu0 %v28665_v27  ;;  %v28701_v27 = vld [vmem:[%s38116_s3 + $0x1820] ss:$28 sps:$4 sm:$0xff]  }
 0x961   :  { %20015 = vmatpush1.bf16.msra.mxu1 %v28661_v28  ;;  %24721 = vmatprep.subr.bf16.mxu0 %v28669_v35  ;;  %v28704_v28 = vld [vmem:[%s38116_s3 + $0x2238] ss:$28 sps:$4 sm:$0xff]  }
 0x962   :  { %20016 = vmatprep.subr.bf16.mxu1 %v28668_v20  ;;  %v24573_v38 = vpop.f32.mrb[44].mxu0  ;;  %v28705_v20 = vld [vmem:[%s38116_s3 + $0x2078] ss:$28 sps:$4 sm:$0xff]  }
 0x963   :  { %v24574_v41 = vpop.f32.mrb[45].mxu0  ;;  %v28708_v35 = vld [vmem:[%s38116_s3 + $0x185c] ss:$28 sps:$4 sm:$0xff]  }
 0x964   :  { %v24575_v61 = vadd.f32 %v24574_v41, %v24573_v38  ;;  %v24576_v6 = vpop.f32.mrb[46].mxu0  ;;  %24722 = vmatpush3.bf16.msra.mxu0 %v28670_v32  ;;  %v28706_v32 = vld [vmem:[%s38116_s3 + $0x1858] ss:$28 sps:$4 sm:$0xff]  }
 0x965   :  { %20017 = vmatpush1.bf16.msra.mxu1 %v28666_v53  ;;  %v24577_v4 = vpop.f32.mrb[47].mxu0  ;;  %24723 = vmatprep.subr.bf16.mxu0 %v28674_v5  ;;  %v28709_v53 = vld [vmem:[%s38116_s3 + $0x2270] ss:$28 sps:$4 sm:$0xff]   ;;  %v28714_v5 = vld [vmem:[%s38116_s3 + $0x22a8] ss:$28 sps:$4 sm:$0xff]  }
 0x966   :  { %20018 = vmatprep.subr.bf16.mxu1 %v28673_v47  ;;  %v36949_v59 = vadd.f32 %v24575_v61, %v20338_v9  ;;  %v24578_v37 = vadd.f32 %v24577_v4, %v24576_v6  ;;  %v28713_v47 = vld [vmem:[%s38116_s3 + $0x1894] ss:$28 sps:$4 sm:$0xff]   ;;  %v28718_v6 = vld [vmem:[%s38116_s3 + $0x18cc] ss:$28 sps:$4 sm:$0xff]   ;;  %v28719_v4 = vld [vmem:[%s38116_s3 + $0x22e0] ss:$28 sps:$4 sm:$0xff]  }
 0x968   :  { %v36957_v13 = vadd.f32 %v24578_v37, %v20341_v34  ;;  %24724 = vmatpush3.bf16.msra.mxu0 %v28675_v45  ;;  %v28715_v45 = vld [vmem:[%s38116_s3 + $0x20e8] ss:$28 sps:$4 sm:$0xff]  }
 0x969   :  { %20019 = vmatpush1.bf16.msra.mxu1 %v28671_v40  ;;  %24725 = vmatprep.subr.bf16.mxu0 %v28679_v51  ;;  %v28711_v40 = vld [vmem:[%s38116_s3 + $0x1890] ss:$28 sps:$4 sm:$0xff]   ;;  %v28716_v37 = vld [vmem:[%s38116_s3 + $0x18c8] ss:$28 sps:$4 sm:$0xff]  }
 0x96a   :  { %20020 = vmatprep.subr.bf16.mxu1 %v28678_v10 }
 0x96c   :  { %24726 = vmatpush3.bf16.msra.mxu0 %v28680_v15 }
 0x96d   :  { %20021 = vmatpush1.bf16.msra.mxu1 %v28676_v36  ;;  %24733 = vmatprep.subr.bf16.mxu0 %v28684_v58  ;;  %v28720_v36 = vld [vmem:[%s38116_s3 + $0x2120] ss:$28 sps:$4 sm:$0xff]   ;;  %v28729_v58 = vld [vmem:[%s38116_s3 + $0x2510] ss:$28 sps:$4 sm:$0xff]  }
 0x96e   :  { %20022 = vmatprep.subr.bf16.mxu1 %v28683_v48  ;;  %v28728_v48 = vld [vmem:[%s38116_s3 + $0x193c] ss:$28 sps:$4 sm:$0xff]  }
 0x96f   :  { %20664 = vmatmul.mubr.bf16.vlgmr.msra.gmra.mrb[72].mxu0 %v33450_v22 }
 0x970   :  { %24734 = vmatpush3.bf16.msra.mxu0 %v28685_v7  ;;  %20704 = vmatprep.mubr.bf16.mxu0 %v33095_v56  ;;  %v28730_v7 = vld [vmem:[%s38116_s3 + $0x2350] ss:$28 sps:$4 sm:$0xff]  }
 0x971   :  { %20023 = vmatpush1.bf16.msra.mxu1 %v28681_v18  ;;  %24735 = vmatprep.subr.bf16.mxu0 %v28689_v43  ;;  %v28726_v18 = vld [vmem:[%s38116_s3 + $0x1938] ss:$28 sps:$4 sm:$0xff]   ;;  %v28734_v43 = vld [vmem:[%s38116_s3 + $0x2548] ss:$28 sps:$4 sm:$0xff]  }
 0x972   :  { %20024 = vmatprep.subr.bf16.mxu1 %v28688_v21  ;;  %v28733_v21 = vld [vmem:[%s38116_s3 + $0x1974] ss:$28 sps:$4 sm:$0xff]  }
 0x974   :  { %24736 = vmatpush3.bf16.msra.mxu0 %v28690_v17  ;;  %v28735_v17 = vld [vmem:[%s38116_s3 + $0x2388] ss:$28 sps:$4 sm:$0xff]  }
 0x975   :  { %20025 = vmatpush1.bf16.msra.mxu1 %v28686_v46  ;;  %24737 = vmatprep.subr.bf16.mxu0 %v28694_v12  ;;  %v28731_v46 = vld [vmem:[%s38116_s3 + $0x1970] ss:$28 sps:$4 sm:$0xff]   ;;  %v28739_v12 = vld [vmem:[%s38116_s3 + $0x2580] ss:$28 sps:$4 sm:$0xff]  }
 0x976   :  { %20026 = vmatprep.subr.bf16.mxu1 %v28693_v11  ;;  %v28738_v11 = vld [vmem:[%s38116_s3 + $0x19ac] ss:$28 sps:$4 sm:$0xff]  }
 0x978   :  { %24738 = vmatpush3.bf16.msra.mxu0 %v28695_v55  ;;  %v28740_v55 = vld [vmem:[%s38116_s3 + $0x23c0] ss:$28 sps:$4 sm:$0xff]  }
 0x979   :  { %20027 = vmatpush1.bf16.msra.mxu1 %v28691_v16  ;;  %24739 = vmatprep.subr.bf16.mxu0 %v28699_v23  ;;  %v28736_v16 = vld [vmem:[%s38116_s3 + $0x19a8] ss:$28 sps:$4 sm:$0xff]   ;;  %v28744_v23 = vld [vmem:[%s38116_s3 + $0x25b8] ss:$28 sps:$4 sm:$0xff]  }
 0x97a   :  { %20028 = vmatprep.subr.bf16.mxu1 %v28698_v24  ;;  %v28743_v24 = vld [vmem:[%s38116_s3 + $0x19e4] ss:$28 sps:$4 sm:$0xff]  }
 0x97c   :  { %24740 = vmatpush3.bf16.msra.mxu0 %v28700_v49  ;;  %v28745_v49 = vld [vmem:[%s38116_s3 + $0x23f8] ss:$28 sps:$4 sm:$0xff]  }
 0x97d   :  { %20029 = vmatpush1.bf16.msra.mxu1 %v28696_v57  ;;  %24741 = vmatprep.subr.bf16.mxu0 %v28704_v28  ;;  %v28741_v57 = vld [vmem:[%s38116_s3 + $0x19e0] ss:$28 sps:$4 sm:$0xff]   ;;  %v28749_v28 = vld [vmem:[%s38116_s3 + $0x25f0] ss:$28 sps:$4 sm:$0xff]  }
 0x97e   :  { %20030 = vmatprep.subr.bf16.mxu1 %v28703_v8  ;;  %v28748_v8 = vld [vmem:[%s38116_s3 + $0x1a1c] ss:$28 sps:$4 sm:$0xff]  }
 0x980   :  { %24742 = vmatpush3.bf16.msra.mxu0 %v28705_v20  ;;  %v28750_v20 = vld [vmem:[%s38116_s3 + $0x2430] ss:$28 sps:$4 sm:$0xff]  }
 0x981   :  { %20031 = vmatpush1.bf16.msra.mxu1 %v28701_v27  ;;  %24743 = vmatprep.subr.bf16.mxu0 %v28709_v53  ;;  %v28746_v27 = vld [vmem:[%s38116_s3 + $0x1a18] ss:$28 sps:$4 sm:$0xff]   ;;  %v28754_v53 = vld [vmem:[%s38116_s3 + $0x2628] ss:$28 sps:$4 sm:$0xff]  }
 0x982   :  { %20032 = vmatprep.subr.bf16.mxu1 %v28708_v35  ;;  %v24595_v38 = vpop.f32.mrb[48].mxu0  ;;  %v28753_v35 = vld [vmem:[%s38116_s3 + $0x1a54] ss:$28 sps:$4 sm:$0xff]  }
 0x983   :  { %v24596_v41 = vpop.f32.mrb[49].mxu0 }
 0x984   :  { %v24597_v9 = vadd.f32 %v24596_v41, %v24595_v38  ;;  %v24598_v61 = vpop.f32.mrb[50].mxu0  ;;  %24744 = vmatpush3.bf16.msra.mxu0 %v28710_v63  ;;  %v28758_v41 = vld [vmem:[%s38116_s3 + $0x1a8c] ss:$28 sps:$4 sm:$0xff]  }
 0x985   :  { %20033 = vmatpush1.bf16.msra.mxu1 %v28706_v32  ;;  %v24599_v10 = vpop.f32.mrb[51].mxu0  ;;  %24745 = vmatprep.subr.bf16.mxu0 %v28714_v5 }
 0x986   :  { %20045 = vmatprep.subr.bf16.mxu1 %v28713_v47  ;;  %v37052_v51 = vadd.f32 %v24597_v9, %v36949_v59  ;;  %v24600_v34 = vadd.f32 %v24599_v10, %v24598_v61  ;;  %v28724_v59 = vld [vmem:[%s38116_s3 + $0x24d8] ss:$28 sps:$4 sm:$0xff]   ;;  %v28751_v47 = vld [vmem:[%s38116_s3 + $0x1a50] ss:$28 sps:$4 sm:$0xff]   ;;  %v28759_v9 = vld [vmem:[%s38116_s3 + $0x2660] ss:$28 sps:$4 sm:$0xff]  }
 0x987   :  { %v28756_v10 = vld [vmem:[%s38116_s3 + $0x1a88] ss:$28 sps:$4 sm:$0xff]  }
 0x988   :  { %20035 = vmatmul.mubr.bf16.vlgmr.msra.gmra.mrb[40].mxu1 %v32804_v52  ;;  %v37063_v15 = vadd.f32 %v24600_v34, %v36957_v13  ;;  %24746 = vmatpush3.bf16.msra.mxu0 %v28715_v45  ;;  %v28723_v52 = vld [vmem:[%s38116_s3 + $0x1904] ss:$28 sps:$4 sm:$0xff]   ;;  %v28725_v13 = vld [vmem:[%s38116_s3 + $0x2318] ss:$28 sps:$4 sm:$0xff]  }
 0x989   :  { %20046 = vmatpush1.bf16.msra.mxu1 %v28711_v40  ;;  %20077 = vmatprep.mubr.bf16.mxu1 %v32442_v29  ;;  %v28721_v29 = vld [vmem:[%s38116_s3 + $0x1900] ss:$28 sps:$4 sm:$0xff]   ;;  %v28755_v40 = vld [vmem:[%s38116_s3 + $0x2468] ss:$28 sps:$4 sm:$0xff]  }
 0x98a   :  { %20047 = vmatprep.subr.bf16.mxu1 %v28718_v6  ;;  %24747 = vmatprep.subr.bf16.mxu0 %v28719_v4  ;;  %v28760_v34 = vld [vmem:[%s38116_s3 + $0x24a0] ss:$28 sps:$4 sm:$0xff]  }
 0x98c   :  { %24748 = vmatpush3.bf16.msra.mxu0 %v28720_v36  ;;  %v28761_v36 = vld [vmem:[%s38116_s3 + $0x1ac0] ss:$28 sps:$4 sm:$0xff]  }
 0x98d   :  { %20048 = vmatpush1.bf16.msra.mxu1 %v28716_v37  ;;  %24755 = vmatprep.subr.bf16.mxu0 %v28724_v59  ;;  %v28764_v37 = vld [vmem:[%s38116_s3 + $0x2858] ss:$28 sps:$4 sm:$0xff]   ;;  %v28769_v59 = vld [vmem:[%s38116_s3 + $0x2890] ss:$28 sps:$4 sm:$0xff]  }
 0x98e   :  { %20049 = vmatprep.subr.bf16.mxu1 %v28723_v52  ;;  %v28768_v52 = vld [vmem:[%s38116_s3 + $0x1afc] ss:$28 sps:$4 sm:$0xff]  }
 0x98f   :  { %20705 = vmatmul.mubr.bf16.vlgmr.msra.gmra.mrb[76].mxu0 %v33087_v39 }
 0x990   :  { %24756 = vmatpush3.bf16.msra.mxu0 %v28725_v13  ;;  %20745 = vmatprep.mubr.bf16.mxu0 %v34112_v2  ;;  %v28770_v13 = vld [vmem:[%s38116_s3 + $0x26d0] ss:$28 sps:$4 sm:$0xff]  }
 0x991   :  { %20050 = vmatpush1.bf16.msra.mxu1 %v28721_v29  ;;  %24757 = vmatprep.subr.bf16.mxu0 %v28729_v58  ;;  %v28766_v29 = vld [vmem:[%s38116_s3 + $0x1af8] ss:$28 sps:$4 sm:$0xff]   ;;  %v28774_v58 = vld [vmem:[%s38116_s3 + $0x28c8] ss:$28 sps:$4 sm:$0xff]  }
 0x992   :  { %20051 = vmatprep.subr.bf16.mxu1 %v28728_v48  ;;  %v28773_v48 = vld [vmem:[%s38116_s3 + $0x1b34] ss:$28 sps:$4 sm:$0xff]  }
 0x994   :  { %24758 = vmatpush3.bf16.msra.mxu0 %v28730_v7  ;;  %v28775_v7 = vld [vmem:[%s38116_s3 + $0x2708] ss:$28 sps:$4 sm:$0xff]  }
 0x995   :  { %20052 = vmatpush1.bf16.msra.mxu1 %v28726_v18  ;;  %24759 = vmatprep.subr.bf16.mxu0 %v28734_v43  ;;  %v28771_v18 = vld [vmem:[%s38116_s3 + $0x1b30] ss:$28 sps:$4 sm:$0xff]   ;;  %v28779_v43 = vld [vmem:[%s38116_s3 + $0x2900] ss:$28 sps:$4 sm:$0xff]  }
 0x996   :  { %20053 = vmatprep.subr.bf16.mxu1 %v28733_v21  ;;  %v28778_v21 = vld [vmem:[%s38116_s3 + $0x1b6c] ss:$28 sps:$4 sm:$0xff]  }
 0x998   :  { %24760 = vmatpush3.bf16.msra.mxu0 %v28735_v17  ;;  %v28780_v17 = vld [vmem:[%s38116_s3 + $0x2740] ss:$28 sps:$4 sm:$0xff]  }
 0x999   :  { %20054 = vmatpush1.bf16.msra.mxu1 %v28731_v46  ;;  %24761 = vmatprep.subr.bf16.mxu0 %v28739_v12  ;;  %v28776_v46 = vld [vmem:[%s38116_s3 + $0x1b68] ss:$28 sps:$4 sm:$0xff]   ;;  %v28784_v12 = vld [vmem:[%s38116_s3 + $0x2938] ss:$28 sps:$4 sm:$0xff]  }
 0x99a   :  { %20055 = vmatprep.subr.bf16.mxu1 %v28738_v11  ;;  %v28783_v11 = vld [vmem:[%s38116_s3 + $0x1ba4] ss:$28 sps:$4 sm:$0xff]  }
 0x99c   :  { %24762 = vmatpush3.bf16.msra.mxu0 %v28740_v55  ;;  %v28785_v55 = vld [vmem:[%s38116_s3 + $0x2778] ss:$28 sps:$4 sm:$0xff]  }
 0x99d   :  { %20056 = vmatpush1.bf16.msra.mxu1 %v28736_v16  ;;  %24763 = vmatprep.subr.bf16.mxu0 %v28744_v23  ;;  %v28781_v16 = vld [vmem:[%s38116_s3 + $0x1ba0] ss:$28 sps:$4 sm:$0xff]   ;;  %v28789_v23 = vld [vmem:[%s38116_s3 + $0x2970] ss:$28 sps:$4 sm:$0xff]  }
 0x99e   :  { %20057 = vmatprep.subr.bf16.mxu1 %v28743_v24  ;;  %v28788_v24 = vld [vmem:[%s38116_s3 + $0x1bdc] ss:$28 sps:$4 sm:$0xff]  }
 0x9a0   :  { %24764 = vmatpush3.bf16.msra.mxu0 %v28745_v49  ;;  %v28790_v49 = vld [vmem:[%s38116_s3 + $0x27b0] ss:$28 sps:$4 sm:$0xff]  }
 0x9a1   :  { %20058 = vmatpush1.bf16.msra.mxu1 %v28741_v57  ;;  %24765 = vmatprep.subr.bf16.mxu0 %v28749_v28  ;;  %v28786_v57 = vld [vmem:[%s38116_s3 + $0x1bd8] ss:$28 sps:$4 sm:$0xff]   ;;  %v28794_v28 = vld [vmem:[%s38116_s3 + $0x29a8] ss:$28 sps:$4 sm:$0xff]  }
 0x9a2   :  { %20059 = vmatprep.subr.bf16.mxu1 %v28748_v8  ;;  %v24617_v32 = vpop.f32.mrb[52].mxu0  ;;  %v28793_v8 = vld [vmem:[%s38116_s3 + $0x1c14] ss:$28 sps:$4 sm:$0xff]  }
 0x9a3   :  { %v24618_v63 = vpop.f32.mrb[53].mxu0 }
 0x9a4   :  { %v24619_v5 = vadd.f32 %v24618_v63, %v24617_v32  ;;  %v24620_v38 = vpop.f32.mrb[54].mxu0  ;;  %24766 = vmatpush3.bf16.msra.mxu0 %v28750_v20  ;;  %v28795_v63 = vld [vmem:[%s38116_s3 + $0x27e8] ss:$28 sps:$4 sm:$0xff]  }
 0x9a5   :  { %20060 = vmatpush1.bf16.msra.mxu1 %v28746_v27  ;;  %v24621_v45 = vpop.f32.mrb[55].mxu0  ;;  %24767 = vmatprep.subr.bf16.mxu0 %v28754_v53 }
 0x9a6   :  { %20061 = vmatprep.subr.bf16.mxu1 %v28753_v35  ;;  %v37158_v61 = vadd.f32 %v24619_v5, %v37052_v51  ;;  %v24622_v6 = vadd.f32 %v24621_v45, %v24620_v38  ;;  %v28763_v51 = vld [vmem:[%s38116_s3 + $0x1ac4] ss:$28 sps:$4 sm:$0xff]   ;;  %v28791_v35 = vld [vmem:[%s38116_s3 + $0x1c10] ss:$28 sps:$4 sm:$0xff]  }
 0x9a7   :  { %v28799_v38 = vld [vmem:[%s38116_s3 + $0x29e0] ss:$28 sps:$4 sm:$0xff]   ;;  %v28796_v45 = vld [vmem:[%s38116_s3 + $0x1c48] ss:$28 sps:$4 sm:$0xff]  }
 0x9a8   :  { %v37164_v4 = vadd.f32 %v24622_v6, %v37063_v15  ;;  %24768 = vmatpush3.bf16.msra.mxu0 %v28755_v40  ;;  %v28765_v15 = vld [vmem:[%s38116_s3 + $0x2698] ss:$28 sps:$4 sm:$0xff]  }
 0x9a9   :  { %20062 = vmatpush1.bf16.msra.mxu1 %v28751_v47  ;;  %24769 = vmatprep.subr.bf16.mxu0 %v28759_v9  ;;  %v28798_v47 = vld [vmem:[%s38116_s3 + $0x1c4c] ss:$28 sps:$4 sm:$0xff]   ;;  %v28804_v6 = vld [vmem:[%s38116_s3 + $0x2a18] ss:$28 sps:$4 sm:$0xff]  }
 0x9aa   :  { %20063 = vmatprep.subr.bf16.mxu1 %v28758_v41 }
 0x9ac   :  { %24770 = vmatpush3.bf16.msra.mxu0 %v28760_v34  ;;  %v28808_v34 = vld [vmem:[%s38116_s3 + $0x2a50] ss:$28 sps:$4 sm:$0xff]  }
 0x9ad   :  { %20064 = vmatpush1.bf16.msra.mxu1 %v28756_v10  ;;  %24777 = vmatprep.subr.bf16.mxu0 %v28764_v37  ;;  %v28807_v10 = vld [vmem:[%s38116_s3 + $0x1cbc] ss:$28 sps:$4 sm:$0xff]   ;;  %v28809_v37 = vld [vmem:[%s38116_s3 + $0x1cf0] ss:$28 sps:$4 sm:$0xff]  }
 0x9ae   :  { %20065 = vmatprep.subr.bf16.mxu1 %v28763_v51  ;;  %v28811_v51 = vld [vmem:[%s38116_s3 + $0x1cf4] ss:$28 sps:$4 sm:$0xff]  }
 0x9af   :  { %20746 = vmatmul.mubr.bf16.vlgmr.msra.gmra.mrb[80].mxu0 %v34107_v25 }
 0x9b0   :  { %24778 = vmatpush3.bf16.msra.mxu0 %v28765_v15  ;;  %20786 = vmatprep.mubr.bf16.mxu0 %v33749_v54  ;;  %v28815_v15 = vld [vmem:[%s38116_s3 + $0x1d2c] ss:$28 sps:$4 sm:$0xff]  }
 0x9b1   :  { %20066 = vmatpush1.bf16.msra.mxu1 %v28761_v36  ;;  %24779 = vmatprep.subr.bf16.mxu0 %v28769_v59  ;;  %v28812_v36 = vld [vmem:[%s38116_s3 + $0x2a88] ss:$28 sps:$4 sm:$0xff]   ;;  %v28816_v59 = vld [vmem:[%s38116_s3 + $0x2ac0] ss:$28 sps:$4 sm:$0xff]  }
 0x9b2   :  { %20067 = vmatprep.subr.bf16.mxu1 %v28768_v52  ;;  %v28813_v52 = vld [vmem:[%s38116_s3 + $0x1d28] ss:$28 sps:$4 sm:$0xff]  }
 0x9b4   :  { %24780 = vmatpush3.bf16.msra.mxu0 %v28770_v13  ;;  %v28822_v13 = vld [vmem:[%s38118_s5 + $0x4] ss:$8 sps:$4 sm:$0xff]  }
 0x9b5   :  { %20068 = vmatpush1.bf16.msra.mxu1 %v28766_v29  ;;  %24781 = vmatprep.subr.bf16.mxu0 %v28774_v58  ;;  %v28819_v29 = vld [vmem:[%s38116_s3 + $0x1d64] ss:$28 sps:$4 sm:$0xff]  }
 0x9b6   :  { %20069 = vmatprep.subr.bf16.mxu1 %v28773_v48  ;;  %v28817_v48 = vld [vmem:[%s38116_s3 + $0x1d60] ss:$28 sps:$4 sm:$0xff]  }
 0x9b7   :  { %v28820_v58 = vld [vmem:[%s38118_s5] ss:$8 sps:$4 sm:$0xff]  }
 0x9b8   :  { %24782 = vmatpush3.bf16.msra.mxu0 %v28775_v7  ;;  %v28823_v7 = vld [vmem:[%s38116_s3 + $0x1d98] ss:$28 sps:$4 sm:$0xff]  }
 0x9b9   :  { %20070 = vmatpush1.bf16.msra.mxu1 %v28771_v18  ;;  %24783 = vmatprep.subr.bf16.mxu0 %v28779_v43  ;;  %v28828_v18 = vld [vmem:[%s38118_s5 + $0x14] ss:$8 sps:$4 sm:$0xff]  }
 0x9ba   :  { %20071 = vmatprep.subr.bf16.mxu1 %v28778_v21  ;;  %v28826_v21 = vld [vmem:[%s38118_s5 + $0x10] ss:$8 sps:$4 sm:$0xff]  }
 0x9bb   :  { %v28831_v43 = vld [vmem:[%s38116_s3 + $0x1dd4] ss:$28 sps:$4 sm:$0xff]  }
 0x9bc   :  { %24784 = vmatpush3.bf16.msra.mxu0 %v28780_v17 }
 0x9bd   :  { %20072 = vmatpush1.bf16.msra.mxu1 %v28776_v46  ;;  %24785 = vmatprep.subr.bf16.mxu0 %v28784_v12  ;;  %v28834_v46 = vld [vmem:[%s38118_s5 + $0x24] ss:$8 sps:$4 sm:$0xff]  }
 0x9be   :  { %20073 = vmatprep.subr.bf16.mxu1 %v28783_v11 }
 0x9c0   :  { %24786 = vmatpush3.bf16.msra.mxu0 %v28785_v55  ;;  %v28832_v55 = vld [vmem:[%s38118_s5 + $0x20] ss:$8 sps:$4 sm:$0xff]  }
 0x9c1   :  { %20074 = vmatpush1.bf16.msra.mxu1 %v28781_v16  ;;  %24787 = vmatprep.subr.bf16.mxu0 %v28789_v23 }
 0x9c2   :  { %20075 = vmatprep.subr.bf16.mxu1 %v28788_v24  ;;  %v24639_v27 = vpop.f32.mrb[56].mxu0  ;;  %v28837_v24 = vld [vmem:[%s38116_s3 + $0x1e0c] ss:$28 sps:$4 sm:$0xff]  }
 0x9c3   :  { %v24640_v20 = vpop.f32.mrb[57].mxu0 }
 0x9c4   :  { %v24641_v53 = vadd.f32 %v24640_v20, %v24639_v27  ;;  %v24642_v32 = vpop.f32.mrb[58].mxu0  ;;  %24788 = vmatpush3.bf16.msra.mxu0 %v28790_v49  ;;  %v28838_v20 = vld [vmem:[%s38118_s5 + $0x30] ss:$8 sps:$4 sm:$0xff]  }
 0x9c5   :  { %20076 = vmatpush1.bf16.msra.mxu1 %v28786_v57  ;;  %v24643_v5 = vpop.f32.mrb[59].mxu0  ;;  %24789 = vmatprep.subr.bf16.mxu0 %v28794_v28  ;;  %v28840_v57 = vld [vmem:[%s38118_s5 + $0x34] ss:$8 sps:$4 sm:$0xff]   ;;  %v28835_v28 = vld [vmem:[%s38116_s3 + $0x1e08] ss:$28 sps:$4 sm:$0xff]  }
 0x9c6   :  { %20088 = vmatprep.subr.bf16.mxu1 %v28793_v8  ;;  %v37262_v40 = vadd.f32 %v24641_v53, %v37158_v61  ;;  %v24644_v41 = vadd.f32 %v24643_v5, %v24642_v32  ;;  %v28800_v61 = vld [vmem:[%s38116_s3 + $0x2820] ss:$28 sps:$4 sm:$0xff]   ;;  %v28846_v53 = vld [vmem:[%s38118_s5 + $0x44] ss:$8 sps:$4 sm:$0xff]  }
 0x9c7   :  { %v28841_v32 = vld [vmem:[%s38116_s3 + $0x1e40] ss:$28 sps:$4 sm:$0xff]  }
 0x9c8   :  { %20078 = vmatmul.mubr.bf16.vlgmr.msra.gmra.mrb[40].mxu1 %v32434_v42  ;;  %v37270_v9 = vadd.f32 %v24644_v41, %v37164_v4  ;;  %24790 = vmatpush3.bf16.msra.mxu0 %v28795_v63  ;;  %v28803_v42 = vld [vmem:[%s38116_s3 + $0x1c84] ss:$28 sps:$4 sm:$0xff]   ;;  %v28805_v4 = vld [vmem:[%s38116_s3 + $0x1cb8] ss:$28 sps:$4 sm:$0xff]  }
 0x9c9   :  { %20089 = vmatpush1.bf16.msra.mxu1 %v28791_v35  ;;  %20120 = vmatprep.mubr.bf16.mxu1 %v33452_v44  ;;  %v28801_v44 = vld [vmem:[%s38116_s3 + $0x1c80] ss:$28 sps:$4 sm:$0xff]   ;;  %v28855_v41 = vld [vmem:[%s38116_s3 + $0x1eb4] ss:$28 sps:$4 sm:$0xff]  }
 0x9ca   :  { %20090 = vmatprep.subr.bf16.mxu1 %v28798_v47  ;;  %24791 = vmatprep.subr.bf16.mxu0 %v28799_v38  ;;  %v28843_v35 = vld [vmem:[%s38116_s3 + $0x1e44] ss:$28 sps:$4 sm:$0xff]   ;;  %v28849_v47 = vld [vmem:[%s38116_s3 + $0x1e7c] ss:$28 sps:$4 sm:$0xff]  }
 0x9cb   :  { %v28844_v63 = vld [vmem:[%s38118_s5 + $0x40] ss:$8 sps:$4 sm:$0xff]   ;;  %v28852_v5 = vld [vmem:[%s38118_s5 + $0x54] ss:$8 sps:$4 sm:$0xff]  }
 0x9cc   :  { %24792 = vmatpush3.bf16.msra.mxu0 %v28800_v61  ;;  %v28847_v38 = vld [vmem:[%s38116_s3 + $0x1e78] ss:$28 sps:$4 sm:$0xff]   ;;  %v28856_v61 = vld [vmem:[%s38118_s5 + $0x60] ss:$8 sps:$4 sm:$0xff]  }
 0x9cd   :  { %20091 = vmatpush1.bf16.msra.mxu1 %v28796_v45  ;;  %24810 = vmatprep.subr.bf16.mxu0 %v29193_v0  ;;  %v28858_v45 = vld [vmem:[%s38118_s5 + $0x64] ss:$8 sps:$4 sm:$0xff]  }
 0x9ce   :  { %20092 = vmatprep.subr.bf16.mxu1 %v28803_v42  ;;  %v28861_v42 = vld [vmem:[%s38116_s3 + $0x1eec] ss:$28 sps:$4 sm:$0xff]  }
 0x9cf   :  { %20787 = vmatmul.mubr.bf16.vlgmr.msra.gmra.mrb[84].mxu0 %v33741_v26 }
 0x9d0   :  { %24811 = vmatpush3.bf16.msra.mxu0 %v28804_v6  ;;  %24818 = vmatprep.mubr.msk.bf16.mxu0 %vm29194_vm1, %v29193_v0  ;;  %v28859_v6 = vld [vmem:[%s38116_s3 + $0x1ee8] ss:$28 sps:$4 sm:$0xff]  }
 0x9d1   :  { %20093 = vmatpush1.bf16.msra.mxu1 %v28801_v44  ;;  %24812 = vmatprep.subr.bf16.mxu0 %v29193_v0  ;;  %v28864_v44 = vld [vmem:[%s38118_s5 + $0x74] ss:$8 sps:$4 sm:$0xff]  }
 0x9d2   :  { %20094 = vmatprep.subr.bf16.mxu1 %v28807_v10  ;;  %v28862_v10 = vld [vmem:[%s38118_s5 + $0x70] ss:$8 sps:$4 sm:$0xff]  }
 0x9d4   :  { %24813 = vmatpush3.bf16.msra.mxu0 %v28808_v34  ;;  %v28870_v34 = vld [vmem:[%s38118_s5 + $0x84] ss:$8 sps:$4 sm:$0xff]  }
 0x9d5   :  { %20095 = vmatpush1.bf16.msra.mxu1 %v28805_v4  ;;  %24814 = vmatprep.subr.bf16.mxu0 %v29193_v0  ;;  %v28867_v4 = vld [vmem:[%s38116_s3 + $0x1f24] ss:$28 sps:$4 sm:$0xff]  }
 0x9d6   :  { %20096 = vmatprep.subr.bf16.mxu1 %v28811_v51  ;;  %v28865_v51 = vld [vmem:[%s38116_s3 + $0x1f20] ss:$28 sps:$4 sm:$0xff]  }
 0x9d8   :  { %24815 = vmatpush3.bf16.msra.mxu0 %v28812_v36  ;;  %v28873_v36 = vld [vmem:[%s38116_s3 + $0x1f5c] ss:$28 sps:$4 sm:$0xff]  }
 0x9d9   :  { %20097 = vmatpush1.bf16.msra.mxu1 %v28809_v37  ;;  %24816 = vmatprep.subr.bf16.mxu0 %v29193_v0  ;;  %v28825_v0 = vld [vmem:[%s38116_s3 + $0x1d9c] ss:$28 sps:$4 sm:$0xff]   ;;  %v28868_v37 = vld [vmem:[%s38118_s5 + $0x80] ss:$8 sps:$4 sm:$0xff]  }
 0x9da   :  { %20098 = vmatprep.subr.bf16.mxu1 %v28815_v15  ;;  %v28876_v15 = vld [vmem:[%s38118_s5 + $0x94] ss:$8 sps:$4 sm:$0xff]  }
 0x9dc   :  { %24817 = vmatpush3.bf16.msra.mxu0 %v28816_v59  ;;  %v28874_v59 = vld [vmem:[%s38118_s5 + $0x90] ss:$8 sps:$4 sm:$0xff]  }
 0x9dd   :  { %20099 = vmatpush1.bf16.msra.mxu1 %v28813_v52  ;;  %21460 = vmatprep.subr.bf16.mxu0 %v28822_v13  ;;  %v28871_v52 = vld [vmem:[%s38116_s3 + $0x1f58] ss:$28 sps:$4 sm:$0xff]   ;;  %v28882_v13 = vld [vmem:[%s38118_s5 + $0xa4] ss:$8 sps:$4 sm:$0xff]  }
 0x9de   :  { %20100 = vmatprep.subr.bf16.mxu1 %v28819_v29  ;;  %v28879_v29 = vld [vmem:[%s38116_s3 + $0x1f94] ss:$28 sps:$4 sm:$0xff]  }
 0x9df   :  { %24819 = vmatmul.mubr.msk.bf16.vlgmr.msra.gmra.mrb[88].mxu0 %vm18622_vm2, %v34332_v30 }
 0x9e0   :  { %21461 = vmatpush1.bf16.msra.mxu0 %v28820_v58  ;;  %21492 = vmatprep.mubr.bf16.mxu0 %v36322_v14  ;;  %v28829_v14 = vld [vmem:[%s38116_s3 + $0x1dd0] ss:$28 sps:$4 sm:$0xff]  }
 0x9e1   :  { %20101 = vmatpush1.bf16.msra.mxu1 %v28817_v48  ;;  %21462 = vmatprep.subr.bf16.mxu0 %v28828_v18 }
 0x9e2   :  { %20102 = vmatprep.subr.bf16.mxu1 %v28825_v0  ;;  %v24661_v17 = vpop.f32.mrb[60].mxu0  ;;  %v28877_v0 = vld [vmem:[%s38116_s3 + $0x1f90] ss:$28 sps:$4 sm:$0xff]  }
 0x9e3   :  { %v24662_v11 = vpop.f32.mrb[61].mxu0 }
 0x9e4   :  { %v24663_v12 = vadd.f32 %v24662_v11, %v24661_v17  ;;  %v24664_v16 = vpop.f32.mrb[62].mxu0  ;;  %21463 = vmatpush1.bf16.msra.mxu0 %v28826_v21  ;;  %v28880_v21 = vld [vmem:[%s38118_s5 + $0xa0] ss:$8 sps:$4 sm:$0xff]   ;;  %v28888_v17 = vld [vmem:[%s38118_s5 + $0xb4] ss:$8 sps:$4 sm:$0xff]  }
 0x9e5   :  { %20103 = vmatpush1.bf16.msra.mxu1 %v28823_v7  ;;  %v24665_v23 = vpop.f32.mrb[63].mxu0  ;;  %21464 = vmatprep.subr.bf16.mxu0 %v28834_v46 }
 0x9e6   :  { %20104 = vmatprep.subr.bf16.mxu1 %v28831_v43  ;;  %v37364_v49 = vadd.f32 %v24663_v12, %v37262_v40  ;;  %v24666_v8 = vadd.f32 %v24665_v23, %v24664_v16  ;;  %v28850_v40 = vld [vmem:[%s38118_s5 + $0x50] ss:$8 sps:$4 sm:$0xff]   ;;  %v28885_v43 = vld [vmem:[%s38116_s3 + $0x1fcc] ss:$28 sps:$4 sm:$0xff]  }
 0x9e7   :  { %v28883_v12 = vld [vmem:[%s38116_s3 + $0x1fc8] ss:$28 sps:$4 sm:$0xff]  }
 0x9e8   :  { %v37370_v27 = vadd.f32 %v24666_v8, %v37270_v9  ;;  %21465 = vmatpush1.bf16.msra.mxu0 %v28832_v55  ;;  %v28853_v9 = vld [vmem:[%s38116_s3 + $0x1eb0] ss:$28 sps:$4 sm:$0xff]   ;;  %v28892_v23 = vld [vmem:[%s38118_s5 + $0xc0] ss:$8 sps:$4 sm:$0xff]   ;;  %v28895_v8 = vld [vmem:[%s38116_s3 + $0x2038] ss:$28 sps:$4 sm:$0xff]  }
 0x9e9   :  { %20105 = vmatpush1.bf16.msra.mxu1 %v28829_v14  ;;  %21466 = vmatprep.subr.bf16.mxu0 %v28840_v57  ;;  %v28886_v55 = vld [vmem:[%s38118_s5 + $0xb0] ss:$8 sps:$4 sm:$0xff]  }
 0x9ea   :  { %20106 = vmatprep.subr.bf16.mxu1 %v28837_v24  ;;  %v28889_v24 = vld [vmem:[%s38116_s3 + $0x2000] ss:$28 sps:$4 sm:$0xff]  }
 0x9eb   :  { %v28897_v57 = vld [vmem:[%s38116_s3 + $0x203c] ss:$28 sps:$4 sm:$0xff]  }
 0x9ec   :  { %21467 = vmatpush1.bf16.msra.mxu0 %v28838_v20  ;;  %v28906_v20 = vld [vmem:[%s38118_s5 + $0xe4] ss:$8 sps:$4 sm:$0xff]  }
 0x9ed   :  { %20107 = vmatpush1.bf16.msra.mxu1 %v28835_v28  ;;  %21468 = vmatprep.subr.bf16.mxu0 %v28846_v53  ;;  %v28898_v28 = vld [vmem:[%s38118_s5 + $0xd0] ss:$8 sps:$4 sm:$0xff]   ;;  %v28904_v53 = vld [vmem:[%s38118_s5 + $0xe0] ss:$8 sps:$4 sm:$0xff]  }
 0x9ee   :  { %20108 = vmatprep.subr.bf16.mxu1 %v28843_v35  ;;  %v28901_v35 = vld [vmem:[%s38116_s3 + $0x2070] ss:$28 sps:$4 sm:$0xff]  }
 0x9f0   :  { %21469 = vmatpush1.bf16.msra.mxu0 %v28844_v63  ;;  %v28912_v63 = vld [vmem:[%s38118_s5 + $0xf4] ss:$8 sps:$4 sm:$0xff]  }
 0x9f1   :  { %20109 = vmatpush1.bf16.msra.mxu1 %v28841_v32  ;;  %21470 = vmatprep.subr.bf16.mxu0 %v28852_v5  ;;  %v28909_v32 = vld [vmem:[%s38116_s3 + $0x20ac] ss:$28 sps:$4 sm:$0xff]   ;;  %v28910_v5 = vld [vmem:[%s38118_s5 + $0xf0] ss:$8 sps:$4 sm:$0xff]  }
 0x9f2   :  { %20110 = vmatprep.subr.bf16.mxu1 %v28849_v47  ;;  %v28907_v47 = vld [vmem:[%s38116_s3 + $0x20a8] ss:$28 sps:$4 sm:$0xff]  }
 0x9f4   :  { %21471 = vmatpush1.bf16.msra.mxu0 %v28850_v40  ;;  %v28918_v40 = vld [vmem:[%s38118_s5 + $0x104] ss:$8 sps:$4 sm:$0xff]  }
 0x9f5   :  { %20111 = vmatpush1.bf16.msra.mxu1 %v28847_v38  ;;  %21472 = vmatprep.subr.bf16.mxu0 %v28858_v45  ;;  %v28915_v38 = vld [vmem:[%s38116_s3 + $0x20e4] ss:$28 sps:$4 sm:$0xff]  }
 0x9f6   :  { %20112 = vmatprep.subr.bf16.mxu1 %v28855_v41  ;;  %v28913_v41 = vld [vmem:[%s38116_s3 + $0x20e0] ss:$28 sps:$4 sm:$0xff]  }
 0x9f7   :  { %v28916_v45 = vld [vmem:[%s38118_s5 + $0x100] ss:$8 sps:$4 sm:$0xff]  }
 0x9f8   :  { %21473 = vmatpush1.bf16.msra.mxu0 %v28856_v61  ;;  %v28924_v61 = vld [vmem:[%s38118_s5 + $0x114] ss:$8 sps:$4 sm:$0xff]  }
 0x9f9   :  { %20113 = vmatpush1.bf16.msra.mxu1 %v28853_v9  ;;  %21474 = vmatprep.subr.bf16.mxu0 %v28864_v44  ;;  %v28921_v9 = vld [vmem:[%s38116_s3 + $0x211c] ss:$28 sps:$4 sm:$0xff]  }
 0x9fa   :  { %20114 = vmatprep.subr.bf16.mxu1 %v28861_v42  ;;  %v28919_v42 = vld [vmem:[%s38116_s3 + $0x2118] ss:$28 sps:$4 sm:$0xff]  }
 0x9fb   :  { %v28922_v44 = vld [vmem:[%s38118_s5 + $0x110] ss:$8 sps:$4 sm:$0xff]  }
 0x9fc   :  { %21475 = vmatpush1.bf16.msra.mxu0 %v28862_v10 }
 0x9fd   :  { %20115 = vmatpush1.bf16.msra.mxu1 %v28859_v6  ;;  %21476 = vmatprep.subr.bf16.mxu0 %v28870_v34  ;;  %v28927_v6 = vld [vmem:[%s38116_s3 + $0x2154] ss:$28 sps:$4 sm:$0xff]  }
 0x9fe   :  { %20116 = vmatprep.subr.bf16.mxu1 %v28867_v4 }
 0xa00   :  { %21477 = vmatpush1.bf16.msra.mxu0 %v28868_v37  ;;  %v28928_v37 = vld [vmem:[%s38118_s5 + $0x120] ss:$8 sps:$4 sm:$0xff]  }
 0xa01   :  { %20117 = vmatpush1.bf16.msra.mxu1 %v28865_v51  ;;  %21478 = vmatprep.subr.bf16.mxu0 %v28876_v15 }
 0xa02   :  { %20118 = vmatprep.subr.bf16.mxu1 %v28873_v36  ;;  %v24683_v48 = vpop.f32.mrb[64].mxu0  ;;  %v28933_v36 = vld [vmem:[%s38116_s3 + $0x218c] ss:$28 sps:$4 sm:$0xff]  }
 0xa03   :  { %v24684_v58 = vpop.f32.mrb[65].mxu0 }
 0xa04   :  { %v24685_v18 = vadd.f32 %v24684_v58, %v24683_v48  ;;  %v24686_v7 = vpop.f32.mrb[66].mxu0  ;;  %21479 = vmatpush1.bf16.msra.mxu0 %v28874_v59  ;;  %v28934_v58 = vld [vmem:[%s38118_s5 + $0x130] ss:$8 sps:$4 sm:$0xff]  }
 0xa05   :  { %20119 = vmatpush1.bf16.msra.mxu1 %v28871_v52  ;;  %v24687_v46 = vpop.f32.mrb[67].mxu0  ;;  %21480 = vmatprep.subr.bf16.mxu0 %v28882_v13  ;;  %v28936_v52 = vld [vmem:[%s38118_s5 + $0x134] ss:$8 sps:$4 sm:$0xff]   ;;  %v28931_v13 = vld [vmem:[%s38116_s3 + $0x2188] ss:$28 sps:$4 sm:$0xff]  }
 0xa06   :  { %20131 = vmatprep.subr.bf16.mxu1 %v28879_v29  ;;  %v37466_v11 = vadd.f32 %v24685_v18, %v37364_v49  ;;  %v24688_v14 = vadd.f32 %v24687_v46, %v24686_v7  ;;  %v28900_v49 = vld [vmem:[%s38118_s5 + $0xd4] ss:$8 sps:$4 sm:$0xff]   ;;  %v28942_v18 = vld [vmem:[%s38118_s5 + $0x144] ss:$8 sps:$4 sm:$0xff]  }
 0xa07   :  { %v28937_v7 = vld [vmem:[%s38116_s3 + $0x21c0] ss:$28 sps:$4 sm:$0xff]  }
 0xa08   :  { %20121 = vmatmul.mubr.bf16.vlgmr.msra.gmra.mrb[40].mxu1 %v33450_v22  ;;  %v37474_v16 = vadd.f32 %v24688_v14, %v37370_v27  ;;  %21481 = vmatpush1.bf16.msra.mxu0 %v28880_v21  ;;  %v28891_v22 = vld [vmem:[%s38116_s3 + $0x2004] ss:$28 sps:$4 sm:$0xff]   ;;  %v28903_v27 = vld [vmem:[%s38116_s3 + $0x2074] ss:$28 sps:$4 sm:$0xff]  }
 0xa09   :  { %20132 = vmatpush1.bf16.msra.mxu1 %v28877_v0  ;;  %20163 = vmatprep.mubr.bf16.mxu1 %v33095_v56  ;;  %v28894_v56 = vld [vmem:[%s38118_s5 + $0xc4] ss:$8 sps:$4 sm:$0xff]   ;;  %v28940_v21 = vld [vmem:[%s38118_s5 + $0x140] ss:$8 sps:$4 sm:$0xff]   ;;  %v28948_v46 = vld [vmem:[%s38118_s5 + $0x154] ss:$8 sps:$4 sm:$0xff]  }
 0xa0a   :  { %20133 = vmatprep.subr.bf16.mxu1 %v28885_v43  ;;  %21482 = vmatprep.subr.bf16.mxu0 %v28888_v17  ;;  %v28939_v0 = vld [vmem:[%s38116_s3 + $0x21c4] ss:$28 sps:$4 sm:$0xff]   ;;  %v28945_v43 = vld [vmem:[%s38116_s3 + $0x21fc] ss:$28 sps:$4 sm:$0xff]   ;;  %v28951_v14 = vld [vmem:[%s38116_s3 + $0x2234] ss:$28 sps:$4 sm:$0xff]  }
 0xa0b   :  { %v28943_v17 = vld [vmem:[%s38116_s3 + $0x21f8] ss:$28 sps:$4 sm:$0xff]  }
 0xa0c   :  { %21483 = vmatpush1.bf16.msra.mxu0 %v28886_v55  ;;  %v28952_v55 = vld [vmem:[%s38118_s5 + $0x160] ss:$8 sps:$4 sm:$0xff]  }
 0xa0d   :  { %20134 = vmatpush1.bf16.msra.mxu1 %v28883_v12  ;;  %21484 = vmatprep.subr.bf16.mxu0 %v28894_v56  ;;  %v28954_v12 = vld [vmem:[%s38118_s5 + $0x164] ss:$8 sps:$4 sm:$0xff]   ;;  %v28960_v56 = vld [vmem:[%s38118_s5 + $0x174] ss:$8 sps:$4 sm:$0xff]  }
 0xa0e   :  { %20135 = vmatprep.subr.bf16.mxu1 %v28891_v22  ;;  %v28957_v22 = vld [vmem:[%s38116_s3 + $0x226c] ss:$28 sps:$4 sm:$0xff]  }
 0xa10   :  { %21485 = vmatpush1.bf16.msra.mxu0 %v28892_v23  ;;  %v28958_v23 = vld [vmem:[%s38118_s5 + $0x170] ss:$8 sps:$4 sm:$0xff]  }
 0xa11   :  { %20136 = vmatpush1.bf16.msra.mxu1 %v28889_v24  ;;  %21486 = vmatprep.subr.bf16.mxu0 %v28900_v49  ;;  %v28955_v24 = vld [vmem:[%s38116_s3 + $0x2268] ss:$28 sps:$4 sm:$0xff]  }
 0xa12   :  { %20137 = vmatprep.subr.bf16.mxu1 %v28897_v57  ;;  %v28963_v57 = vld [vmem:[%s38116_s3 + $0x22a4] ss:$28 sps:$4 sm:$0xff]  }
 0xa13   :  { %v28966_v49 = vld [vmem:[%s38118_s5 + $0x184] ss:$8 sps:$4 sm:$0xff]  }
 0xa14   :  { %21487 = vmatpush1.bf16.msra.mxu0 %v28898_v28  ;;  %v28964_v28 = vld [vmem:[%s38118_s5 + $0x180] ss:$8 sps:$4 sm:$0xff]  }
 0xa15   :  { %20138 = vmatpush1.bf16.msra.mxu1 %v28895_v8  ;;  %21488 = vmatprep.subr.bf16.mxu0 %v28906_v20  ;;  %v28961_v8 = vld [vmem:[%s38116_s3 + $0x22a0] ss:$28 sps:$4 sm:$0xff]  }
 0xa16   :  { %20139 = vmatprep.subr.bf16.mxu1 %v28903_v27  ;;  %v28969_v27 = vld [vmem:[%s38116_s3 + $0x22dc] ss:$28 sps:$4 sm:$0xff]  }
 0xa17   :  { %v28972_v20 = vld [vmem:[%s38118_s5 + $0x194] ss:$8 sps:$4 sm:$0xff]  }
 0xa18   :  { %21489 = vmatpush1.bf16.msra.mxu0 %v28904_v53  ;;  %v28970_v53 = vld [vmem:[%s38118_s5 + $0x190] ss:$8 sps:$4 sm:$0xff]  }
 0xa19   :  { %20140 = vmatpush1.bf16.msra.mxu1 %v28901_v35  ;;  %21490 = vmatprep.subr.bf16.mxu0 %v28912_v63  ;;  %v28967_v35 = vld [vmem:[%s38116_s3 + $0x22d8] ss:$28 sps:$4 sm:$0xff]   ;;  %v28978_v63 = vld [vmem:[%s38118_s5 + $0x1a4] ss:$8 sps:$4 sm:$0xff]  }
 0xa1a   :  { %20141 = vmatprep.subr.bf16.mxu1 %v28909_v32  ;;  %v28975_v32 = vld [vmem:[%s38116_s3 + $0x2314] ss:$28 sps:$4 sm:$0xff]  }
 0xa1c   :  { %21491 = vmatpush1.bf16.msra.mxu0 %v28910_v5 }
 0xa1d   :  { %20142 = vmatpush1.bf16.msra.mxu1 %v28907_v47  ;;  %21503 = vmatprep.subr.bf16.mxu0 %v28918_v40 }
 0xa1e   :  { %20143 = vmatprep.subr.bf16.mxu1 %v28915_v38  ;;  %v28973_v38 = vld [vmem:[%s38116_s3 + $0x2310] ss:$28 sps:$4 sm:$0xff]  }
 0xa1f   :  { %21493 = vmatmul.mubr.bf16.vlgmr.msra.gmra.mrb[92].mxu0 %v36314_v60  ;;  %v28930_v60 = vld [vmem:[%s38118_s5 + $0x124] ss:$8 sps:$4 sm:$0xff]  }
 0xa20   :  { %21504 = vmatpush1.bf16.msra.mxu0 %v28916_v45  ;;  %21535 = vmatprep.mubr.bf16.mxu0 %v36753_v50  ;;  %v28925_v50 = vld [vmem:[%s38116_s3 + $0x2150] ss:$28 sps:$4 sm:$0xff]   ;;  %v28976_v45 = vld [vmem:[%s38118_s5 + $0x1a0] ss:$8 sps:$4 sm:$0xff]  }
 0xa21   :  { %20144 = vmatpush1.bf16.msra.mxu1 %v28913_v41  ;;  %21505 = vmatprep.subr.bf16.mxu0 %v28924_v61 }
 0xa22   :  { %20145 = vmatprep.subr.bf16.mxu1 %v28921_v9  ;;  %v24705_v10 = vpop.f32.mrb[68].mxu0  ;;  %v28981_v9 = vld [vmem:[%s38116_s3 + $0x234c] ss:$28 sps:$4 sm:$0xff]  }
 0xa23   :  { %v24706_v4 = vpop.f32.mrb[69].mxu0 }
 0xa24   :  { %v24707_v34 = vadd.f32 %v24706_v4, %v24705_v10  ;;  %v24708_v51 = vpop.f32.mrb[70].mxu0  ;;  %21506 = vmatpush1.bf16.msra.mxu0 %v28922_v44  ;;  %v28982_v4 = vld [vmem:[%s38118_s5 + $0x1b0] ss:$8 sps:$4 sm:$0xff]  }
 0xa25   :  { %20146 = vmatpush1.bf16.msra.mxu1 %v28919_v42  ;;  %v24709_v15 = vpop.f32.mrb[71].mxu0  ;;  %21507 = vmatprep.subr.bf16.mxu0 %v28930_v60  ;;  %v28984_v42 = vld [vmem:[%s38118_s5 + $0x1b4] ss:$8 sps:$4 sm:$0xff]   ;;  %v28979_v60 = vld [vmem:[%s38116_s3 + $0x2348] ss:$28 sps:$4 sm:$0xff]  }
 0xa26   :  { %20147 = vmatprep.subr.bf16.mxu1 %v28927_v6  ;;  %v37572_v59 = vadd.f32 %v24707_v34, %v37466_v11  ;;  %v24710_v29 = vadd.f32 %v24709_v15, %v24708_v51  ;;  %v28946_v11 = vld [vmem:[%s38118_s5 + $0x150] ss:$8 sps:$4 sm:$0xff]   ;;  %v28988_v34 = vld [vmem:[%s38118_s5 + $0x1c0] ss:$8 sps:$4 sm:$0xff]  }
 0xa27   :  { %v28993_v51 = vld [vmem:[%s38116_s3 + $0x23bc] ss:$28 sps:$4 sm:$0xff]  }
 0xa28   :  { %v37578_v48 = vadd.f32 %v24710_v29, %v37474_v16  ;;  %21508 = vmatpush1.bf16.msra.mxu0 %v28928_v37  ;;  %v28949_v16 = vld [vmem:[%s38116_s3 + $0x2230] ss:$28 sps:$4 sm:$0xff]   ;;  %v28996_v37 = vld [vmem:[%s38118_s5 + $0x1d4] ss:$8 sps:$4 sm:$0xff]  }
 0xa29   :  { %20148 = vmatpush1.bf16.msra.mxu1 %v28925_v50  ;;  %21509 = vmatprep.subr.bf16.mxu0 %v28936_v52  ;;  %v28985_v50 = vld [vmem:[%s38116_s3 + $0x2380] ss:$28 sps:$4 sm:$0xff]   ;;  %v28994_v15 = vld [vmem:[%s38118_s5 + $0x1d0] ss:$8 sps:$4 sm:$0xff]  }
 0xa2a   :  { %20149 = vmatprep.subr.bf16.mxu1 %v28933_v36  ;;  %v28991_v36 = vld [vmem:[%s38116_s3 + $0x23b8] ss:$28 sps:$4 sm:$0xff]   ;;  %v28997_v29 = vld [vmem:[%s38116_s3 + $0x23f0] ss:$28 sps:$4 sm:$0xff]  }
 0xa2b   :  { %v28999_v52 = vld [vmem:[%s38116_s3 + $0x23f4] ss:$28 sps:$4 sm:$0xff]  }
 0xa2c   :  { %21510 = vmatpush1.bf16.msra.mxu0 %v28934_v58  ;;  %v29008_v58 = vld [vmem:[%s38118_s5 + $0x1f4] ss:$8 sps:$4 sm:$0xff]  }
 0xa2d   :  { %20150 = vmatpush1.bf16.msra.mxu1 %v28931_v13  ;;  %21511 = vmatprep.subr.bf16.mxu0 %v28942_v18  ;;  %v29000_v13 = vld [vmem:[%s38118_s5 + $0x1e0] ss:$8 sps:$4 sm:$0xff]   ;;  %v29006_v18 = vld [vmem:[%s38118_s5 + $0x1f0] ss:$8 sps:$4 sm:$0xff]  }
 0xa2e   :  { %20151 = vmatprep.subr.bf16.mxu1 %v28939_v0  ;;  %v29003_v0 = vld [vmem:[%s38116_s3 + $0x2428] ss:$28 sps:$4 sm:$0xff]  }
 0xa30   :  { %21512 = vmatpush1.bf16.msra.mxu0 %v28940_v21  ;;  %v29101_v21 = vld [vmem:[%s38118_s5 + $0x204] ss:$8 sps:$4 sm:$0xff]  }
 0xa31   :  { %20152 = vmatpush1.bf16.msra.mxu1 %v28937_v7  ;;  %21513 = vmatprep.subr.bf16.mxu0 %v28948_v46  ;;  %v29011_v7 = vld [vmem:[%s38116_s3 + $0x2464] ss:$28 sps:$4 sm:$0xff]   ;;  %v29014_v46 = vld [vmem:[%s38116_s3 + $0x249c] ss:$28 sps:$4 sm:$0xff]  }
 0xa32   :  { %20153 = vmatprep.subr.bf16.mxu1 %v28945_v43  ;;  %v29009_v43 = vld [vmem:[%s38116_s3 + $0x2460] ss:$28 sps:$4 sm:$0xff]  }
 0xa34   :  { %21514 = vmatpush1.bf16.msra.mxu0 %v28946_v11  ;;  %v29104_v11 = vld [vmem:[%s38118_s5 + $0x214] ss:$8 sps:$4 sm:$0xff]  }
 0xa35   :  { %20154 = vmatpush1.bf16.msra.mxu1 %v28943_v17  ;;  %21515 = vmatprep.subr.bf16.mxu0 %v28954_v12  ;;  %v29099_v17 = vld [vmem:[%s38118_s5 + $0x200] ss:$8 sps:$4 sm:$0xff]   ;;  %v29017_v12 = vld [vmem:[%s38116_s3 + $0x24d4] ss:$28 sps:$4 sm:$0xff]  }
 0xa36   :  { %20155 = vmatprep.subr.bf16.mxu1 %v28951_v14  ;;  %v29012_v14 = vld [vmem:[%s38116_s3 + $0x2498] ss:$28 sps:$4 sm:$0xff]  }
 0xa38   :  { %21516 = vmatpush1.bf16.msra.mxu0 %v28952_v55  ;;  %v29107_v55 = vld [vmem:[%s38118_s5 + $0x224] ss:$8 sps:$4 sm:$0xff]  }
 0xa39   :  { %20156 = vmatpush1.bf16.msra.mxu1 %v28949_v16  ;;  %21517 = vmatprep.subr.bf16.mxu0 %v28960_v56  ;;  %v29102_v16 = vld [vmem:[%s38118_s5 + $0x210] ss:$8 sps:$4 sm:$0xff]  }
 0xa3a   :  { %20157 = vmatprep.subr.bf16.mxu1 %v28957_v22  ;;  %v29015_v56 = vld [vmem:[%s38116_s3 + $0x24d0] ss:$28 sps:$4 sm:$0xff]  }
 0xa3c   :  { %21518 = vmatpush1.bf16.msra.mxu0 %v28958_v23 }
 0xa3d   :  { %20158 = vmatpush1.bf16.msra.mxu1 %v28955_v24  ;;  %21519 = vmatprep.subr.bf16.mxu0 %v28966_v49  ;;  %v29105_v49 = vld [vmem:[%s38118_s5 + $0x220] ss:$8 sps:$4 sm:$0xff]  }
 0xa3e   :  { %20159 = vmatprep.subr.bf16.mxu1 %v28963_v57  ;;  %v29020_v57 = vld [vmem:[%s38116_s3 + $0x250c] ss:$28 sps:$4 sm:$0xff]  }
 0xa40   :  { %21520 = vmatpush1.bf16.msra.mxu0 %v28964_v28  ;;  %v29110_v28 = vld [vmem:[%s38118_s5 + $0x234] ss:$8 sps:$4 sm:$0xff]  }
 0xa41   :  { %20160 = vmatpush1.bf16.msra.mxu1 %v28961_v8  ;;  %21521 = vmatprep.subr.bf16.mxu0 %v28972_v20 }
 0xa42   :  { %20161 = vmatprep.subr.bf16.mxu1 %v28969_v27  ;;  %v24727_v47 = vpop.f32.mrb[72].mxu0 }
 0xa43   :  { %v24728_v5 = vpop.f32.mrb[73].mxu0 }
 0xa44   :  { %v24729_v40 = vadd.f32 %v24728_v5, %v24727_v47  ;;  %v24730_v41 = vpop.f32.mrb[74].mxu0  ;;  %21522 = vmatpush1.bf16.msra.mxu0 %v28970_v53  ;;  %v29113_v47 = vld [vmem:[%s38118_s5 + $0x244] ss:$8 sps:$4 sm:$0xff]   ;;  %v29021_v5 = vld [vmem:[%s38116_s3 + $0x2540] ss:$28 sps:$4 sm:$0xff]  }
 0xa45   :  { %20162 = vmatpush1.bf16.msra.mxu1 %v28967_v35  ;;  %v24731_v61 = vpop.f32.mrb[75].mxu0  ;;  %21523 = vmatprep.subr.bf16.mxu0 %v28978_v63  ;;  %v29018_v35 = vld [vmem:[%s38116_s3 + $0x2508] ss:$28 sps:$4 sm:$0xff]   ;;  %v29108_v63 = vld [vmem:[%s38118_s5 + $0x230] ss:$8 sps:$4 sm:$0xff]  }
 0xa46   :  { %20174 = vmatprep.subr.bf16.mxu1 %v28975_v32  ;;  %v37674_v44 = vadd.f32 %v24729_v40, %v37572_v59  ;;  %v24732_v6 = vadd.f32 %v24731_v61, %v24730_v41  ;;  %v29002_v59 = vld [vmem:[%s38118_s5 + $0x1e4] ss:$8 sps:$4 sm:$0xff]   ;;  %v29111_v40 = vld [vmem:[%s38118_s5 + $0x240] ss:$8 sps:$4 sm:$0xff]   ;;  %v29116_v41 = vld [vmem:[%s38118_s5 + $0x254] ss:$8 sps:$4 sm:$0xff]  }
 0xa47   :  { %v29023_v32 = vld [vmem:[%s38116_s3 + $0x2544] ss:$28 sps:$4 sm:$0xff]   ;;  %v29114_v61 = vld [vmem:[%s38118_s5 + $0x250] ss:$8 sps:$4 sm:$0xff]  }
 0xa48   :  { %20164 = vmatmul.mubr.bf16.vlgmr.msra.gmra.mrb[40].mxu1 %v33087_v39  ;;  %v37682_v10 = vadd.f32 %v24732_v6, %v37578_v48  ;;  %21524 = vmatpush1.bf16.msra.mxu0 %v28976_v45  ;;  %v28987_v39 = vld [vmem:[%s38116_s3 + $0x2384] ss:$28 sps:$4 sm:$0xff]   ;;  %v29005_v48 = vld [vmem:[%s38116_s3 + $0x242c] ss:$28 sps:$4 sm:$0xff]   ;;  %v29024_v45 = vld [vmem:[%s38116_s3 + $0x2578] ss:$28 sps:$4 sm:$0xff]  }
 0xa49   :  { %20175 = vmatpush1.bf16.msra.mxu1 %v28973_v38  ;;  %20206 = vmatprep.mubr.bf16.mxu1 %v34112_v2  ;;  %v28990_v2 = vld [vmem:[%s38118_s5 + $0x1c4] ss:$8 sps:$4 sm:$0xff]   ;;  %v29026_v38 = vld [vmem:[%s38116_s3 + $0x257c] ss:$28 sps:$4 sm:$0xff]  }
 0xa4a   :  { %20176 = vmatprep.subr.bf16.mxu1 %v28981_v9  ;;  %21525 = vmatprep.subr.bf16.mxu0 %v28984_v42  ;;  %v29029_v9 = vld [vmem:[%s38116_s3 + $0x25b4] ss:$28 sps:$4 sm:$0xff]   ;;  %v29119_v42 = vld [vmem:[%s38118_s5 + $0x264] ss:$8 sps:$4 sm:$0xff]  }
 0xa4b   :  { %v29032_v6 = vld [vmem:[%s38116_s3 + $0x25ec] ss:$28 sps:$4 sm:$0xff]  }
 0xa4c   :  { %21526 = vmatpush1.bf16.msra.mxu0 %v28982_v4  ;;  %v29030_v4 = vld [vmem:[%s38116_s3 + $0x25e8] ss:$28 sps:$4 sm:$0xff]  }
 0xa4d   :  { %20177 = vmatpush1.bf16.msra.mxu1 %v28979_v60  ;;  %21527 = vmatprep.subr.bf16.mxu0 %v28990_v2  ;;  %v29117_v60 = vld [vmem:[%s38118_s5 + $0x260] ss:$8 sps:$4 sm:$0xff]   ;;  %v29120_v2 = vld [vmem:[%s38118_s5 + $0x270] ss:$8 sps:$4 sm:$0xff]  }
 0xa4e   :  { %20178 = vmatprep.subr.bf16.mxu1 %v28987_v39  ;;  %v29035_v39 = vld [vmem:[%s38116_s3 + $0x2624] ss:$28 sps:$4 sm:$0xff]  }
 0xa50   :  { %21528 = vmatpush1.bf16.msra.mxu0 %v28988_v34  ;;  %v29033_v34 = vld [vmem:[%s38116_s3 + $0x2620] ss:$28 sps:$4 sm:$0xff]  }
 0xa51   :  { %20179 = vmatpush1.bf16.msra.mxu1 %v28985_v50  ;;  %21529 = vmatprep.subr.bf16.mxu0 %v28996_v37  ;;  %v29125_v50 = vld [vmem:[%s38118_s5 + $0x284] ss:$8 sps:$4 sm:$0xff]   ;;  %v29123_v37 = vld [vmem:[%s38118_s5 + $0x280] ss:$8 sps:$4 sm:$0xff]  }
 0xa52   :  { %20180 = vmatprep.subr.bf16.mxu1 %v28993_v51  ;;  %v29038_v51 = vld [vmem:[%s38116_s3 + $0x265c] ss:$28 sps:$4 sm:$0xff]  }
 0xa54   :  { %21530 = vmatpush1.bf16.msra.mxu0 %v28994_v15  ;;  %v29036_v15 = vld [vmem:[%s38116_s3 + $0x2658] ss:$28 sps:$4 sm:$0xff]  }
 0xa55   :  { %20181 = vmatpush1.bf16.msra.mxu1 %v28991_v36  ;;  %21531 = vmatprep.subr.bf16.mxu0 %v29002_v59  ;;  %v29128_v36 = vld [vmem:[%s38118_s5 + $0x294] ss:$8 sps:$4 sm:$0xff]   ;;  %v29126_v59 = vld [vmem:[%s38118_s5 + $0x290] ss:$8 sps:$4 sm:$0xff]  }
 0xa56   :  { %20182 = vmatprep.subr.bf16.mxu1 %v28999_v52  ;;  %v29041_v52 = vld [vmem:[%s38116_s3 + $0x2694] ss:$28 sps:$4 sm:$0xff]  }
 0xa58   :  { %21532 = vmatpush1.bf16.msra.mxu0 %v29000_v13 }
 0xa59   :  { %20183 = vmatpush1.bf16.msra.mxu1 %v28997_v29  ;;  %21533 = vmatprep.subr.bf16.mxu0 %v29008_v58  ;;  %v29131_v29 = vld [vmem:[%s38118_s5 + $0x2a4] ss:$8 sps:$4 sm:$0xff]  }
 0xa5a   :  { %20184 = vmatprep.subr.bf16.mxu1 %v29005_v48  ;;  %v29039_v58 = vld [vmem:[%s38116_s3 + $0x2690] ss:$28 sps:$4 sm:$0xff]  }
 0xa5c   :  { %21534 = vmatpush1.bf16.msra.mxu0 %v29006_v18 }
 0xa5d   :  { %20185 = vmatpush1.bf16.msra.mxu1 %v29003_v0  ;;  %21546 = vmatprep.subr.bf16.mxu0 %v29101_v21  ;;  %v29129_v21 = vld [vmem:[%s38118_s5 + $0x2a0] ss:$8 sps:$4 sm:$0xff]  }
 0xa5e   :  { %20186 = vmatprep.subr.bf16.mxu1 %v29011_v7  ;;  %v29044_v7 = vld [vmem:[%s38116_s3 + $0x26cc] ss:$28 sps:$4 sm:$0xff]  }
 0xa5f   :  { %21536 = vmatmul.mubr.bf16.vlgmr.msra.gmra.mrb[92].mxu0 %v36748_v19 }
 0xa60   :  { %21547 = vmatpush1.bf16.msra.mxu0 %v29099_v17 }
 0xa61   :  { %20187 = vmatpush1.bf16.msra.mxu1 %v29009_v43  ;;  %21548 = vmatprep.subr.bf16.mxu0 %v29104_v11 }
 0xa62   :  { %20188 = vmatprep.subr.bf16.mxu1 %v29014_v46  ;;  %v24749_v19 = vpop.f32.mrb[76].mxu0  ;;  %v29134_v46 = vld [vmem:[%s38118_s5 + $0x2b4] ss:$8 sps:$4 sm:$0xff]  }
 0xa63   :  { %v24750_v22 = vpop.f32.mrb[77].mxu0 }
 0xa64   :  { %v24751_v24 = vadd.f32 %v24750_v22, %v24749_v19  ;;  %v24752_v23 = vpop.f32.mrb[78].mxu0  ;;  %21549 = vmatpush1.bf16.msra.mxu0 %v29102_v16  ;;  %v29047_v16 = vld [vmem:[%s38116_s3 + $0x2704] ss:$28 sps:$4 sm:$0xff]   ;;  %v29050_v19 = vld [vmem:[%s38116_s3 + $0x273c] ss:$28 sps:$4 sm:$0xff]  }
 0xa65   :  { %20189 = vmatpush1.bf16.msra.mxu1 %v29012_v14  ;;  %v24753_v8 = vpop.f32.mrb[79].mxu0  ;;  %21550 = vmatprep.subr.bf16.mxu0 %v29107_v55  ;;  %v29042_v14 = vld [vmem:[%s38116_s3 + $0x26c8] ss:$28 sps:$4 sm:$0xff]   ;;  %v29045_v55 = vld [vmem:[%s38116_s3 + $0x2700] ss:$28 sps:$4 sm:$0xff]  }
 0xa66   :  { %20190 = vmatprep.subr.bf16.mxu1 %v29017_v12  ;;  %v37779_v27 = vadd.f32 %v24751_v24, %v37674_v44  ;;  %v24754_v20 = vadd.f32 %v24753_v8, %v24752_v23  ;;  %v29027_v44 = vld [vmem:[%s38116_s3 + $0x25b0] ss:$28 sps:$4 sm:$0xff]   ;;  %v29135_v22 = vld [vmem:[%s38118_s5 + $0x2c0] ss:$8 sps:$4 sm:$0xff]   ;;  %v29048_v24 = vld [vmem:[%s38116_s3 + $0x2738] ss:$28 sps:$4 sm:$0xff]  }
 0xa67   :  { %v29053_v23 = vld [vmem:[%s38116_s3 + $0x2774] ss:$28 sps:$4 sm:$0xff]   ;;  %v29056_v8 = vld [vmem:[%s38116_s3 + $0x27ac] ss:$28 sps:$4 sm:$0xff]  }
 0xa68   :  { %v37785_v53 = vadd.f32 %v24754_v20, %v37682_v10  ;;  %21551 = vmatpush1.bf16.msra.mxu0 %v29105_v49  ;;  %v29122_v10 = vld [vmem:[%s38118_s5 + $0x274] ss:$8 sps:$4 sm:$0xff]   ;;  %v29051_v49 = vld [vmem:[%s38116_s3 + $0x2770] ss:$28 sps:$4 sm:$0xff]  }
 0xa69   :  { %20191 = vmatpush1.bf16.msra.mxu1 %v29015_v56  ;;  %21552 = vmatprep.subr.bf16.mxu0 %v29110_v28  ;;  %v29140_v56 = vld [vmem:[%s38118_s5 + $0x2d4] ss:$8 sps:$4 sm:$0xff]   ;;  %v29054_v28 = vld [vmem:[%s38116_s3 + $0x27a8] ss:$28 sps:$4 sm:$0xff]  }
 0xa6a   :  { %20192 = vmatprep.subr.bf16.mxu1 %v29020_v57  ;;  %v29138_v57 = vld [vmem:[%s38118_s5 + $0x2d0] ss:$8 sps:$4 sm:$0xff]   ;;  %v29057_v20 = vld [vmem:[%s38116_s3 + $0x27e0] ss:$28 sps:$4 sm:$0xff]  }
 0xa6c   :  { %21553 = vmatpush1.bf16.msra.mxu0 %v29108_v63 }
 0xa6d   :  { %20193 = vmatpush1.bf16.msra.mxu1 %v29018_v35  ;;  %21554 = vmatprep.subr.bf16.mxu0 %v29113_v47  ;;  %v29062_v35 = vld [vmem:[%s38116_s3 + $0x281c] ss:$28 sps:$4 sm:$0xff]  }
 0xa6e   :  { %20194 = vmatprep.subr.bf16.mxu1 %v29023_v32  ;;  %v29065_v32 = vld [vmem:[%s38116_s3 + $0x2854] ss:$28 sps:$4 sm:$0xff]  }
 0xa70   :  { %21555 = vmatpush1.bf16.msra.mxu0 %v29111_v40 }
 0xa71   :  { %20195 = vmatpush1.bf16.msra.mxu1 %v29021_v5  ;;  %21556 = vmatprep.subr.bf16.mxu0 %v29116_v41  ;;  %v29063_v5 = vld [vmem:[%s38116_s3 + $0x2850] ss:$28 sps:$4 sm:$0xff]  }
 0xa72   :  { %20196 = vmatprep.subr.bf16.mxu1 %v29026_v38  ;;  %v29068_v41 = vld [vmem:[%s38116_s3 + $0x288c] ss:$28 sps:$4 sm:$0xff]  }
 0xa74   :  { %21557 = vmatpush1.bf16.msra.mxu0 %v29114_v61 }
 0xa75   :  { %20197 = vmatpush1.bf16.msra.mxu1 %v29024_v45  ;;  %21558 = vmatprep.subr.bf16.mxu0 %v29119_v42  ;;  %v29066_v42 = vld [vmem:[%s38116_s3 + $0x2888] ss:$28 sps:$4 sm:$0xff]  }
 0xa76   :  { %20198 = vmatprep.subr.bf16.mxu1 %v29029_v9 }
 0xa78   :  { %21559 = vmatpush1.bf16.msra.mxu0 %v29117_v60  ;;  %v29069_v60 = vld [vmem:[%s38116_s3 + $0x28c0] ss:$28 sps:$4 sm:$0xff]  }
 0xa79   :  { %20199 = vmatpush1.bf16.msra.mxu1 %v29027_v44  ;;  %21560 = vmatprep.subr.bf16.mxu0 %v29122_v10  ;;  %v29071_v44 = vld [vmem:[%s38116_s3 + $0x28c4] ss:$28 sps:$4 sm:$0xff]   ;;  %v29074_v10 = vld [vmem:[%s38116_s3 + $0x28fc] ss:$28 sps:$4 sm:$0xff]  }
 0xa7a   :  { %20200 = vmatprep.subr.bf16.mxu1 %v29032_v6 }
 0xa7c   :  { %21561 = vmatpush1.bf16.msra.mxu0 %v29120_v2 }
 0xa7d   :  { %20201 = vmatpush1.bf16.msra.mxu1 %v29030_v4  ;;  %21562 = vmatprep.subr.bf16.mxu0 %v29125_v50  ;;  %v29072_v4 = vld [vmem:[%s38116_s3 + $0x28f8] ss:$28 sps:$4 sm:$0xff]  }
 0xa7e   :  { %20202 = vmatprep.subr.bf16.mxu1 %v29035_v39  ;;  %v29077_v39 = vld [vmem:[%s38116_s3 + $0x2934] ss:$28 sps:$4 sm:$0xff]  }
 0xa80   :  { %21563 = vmatpush1.bf16.msra.mxu0 %v29123_v37 }
 0xa81   :  { %20203 = vmatpush1.bf16.msra.mxu1 %v29033_v34  ;;  %21564 = vmatprep.subr.bf16.mxu0 %v29128_v36  ;;  %v29080_v36 = vld [vmem:[%s38116_s3 + $0x296c] ss:$28 sps:$4 sm:$0xff]  }
 0xa82   :  { %20204 = vmatprep.subr.bf16.mxu1 %v29038_v51  ;;  %v24771_v13 = vpop.f32.mrb[80].mxu0  ;;  %v29075_v51 = vld [vmem:[%s38116_s3 + $0x2930] ss:$28 sps:$4 sm:$0xff]  }
 0xa83   :  { %v24772_v48 = vpop.f32.mrb[81].mxu0 }
 0xa84   :  { %v24773_v0 = vadd.f32 %v24772_v48, %v24771_v13  ;;  %v24774_v18 = vpop.f32.mrb[82].mxu0  ;;  %21565 = vmatpush1.bf16.msra.mxu0 %v29126_v59  ;;  %v29078_v13 = vld [vmem:[%s38116_s3 + $0x2968] ss:$28 sps:$4 sm:$0xff]  }
 0xa85   :  { %20205 = vmatpush1.bf16.msra.mxu1 %v29036_v15  ;;  %v24775_v43 = vpop.f32.mrb[83].mxu0  ;;  %21566 = vmatprep.subr.bf16.mxu0 %v29131_v29  ;;  %v29083_v48 = vld [vmem:[%s38116_s3 + $0x29a4] ss:$28 sps:$4 sm:$0xff]  }
 0xa86   :  { %20217 = vmatprep.subr.bf16.mxu1 %v29041_v52  ;;  %v20748_v17 = vadd.f32 %v24773_v0, %v37779_v27  ;;  %v24776_v11 = vadd.f32 %v24775_v43, %v24774_v18  ;;  %v29059_v27 = vld [vmem:[%s38116_s3 + $0x27e4] ss:$28 sps:$4 sm:$0xff]   ;;  %v29086_v18 = vld [vmem:[%s38116_s3 + $0x29dc] ss:$28 sps:$4 sm:$0xff]   ;;  %v29087_v43 = vld [vmem:[%s38116_s3 + $0x2a10] ss:$28 sps:$4 sm:$0xff]  }
 0xa87   :  { %v29081_v0 = vld [vmem:[%s38116_s3 + $0x29a0] ss:$28 sps:$4 sm:$0xff]  }
 0xa88   :  { %20207 = vmatmul.mubr.bf16.vlgmr.msra.gmra.mrb[40].mxu1 %v34107_v25  ;;  %v20751_v12 = vadd.f32 %v24776_v11, %v37785_v53  ;;  %21567 = vmatpush1.bf16.msra.mxu0 %v29129_v21  ;;  %v29132_v25 = vld [vmem:[%s38118_s5 + $0x2b0] ss:$8 sps:$4 sm:$0xff]   ;;  %v29095_v11 = vld [vmem:[%s38116_s3 + $0x2a84] ss:$28 sps:$4 sm:$0xff]  }
 0xa89   :  { %20218 = vmatpush1.bf16.msra.mxu1 %v29039_v58  ;;  %20249 = vmatprep.mubr.bf16.mxu1 %v33749_v54  ;;  %v29137_v54 = vld [vmem:[%s38118_s5 + $0x2c4] ss:$8 sps:$4 sm:$0xff]   ;;  %v29060_v53 = vld [vmem:[%s38116_s3 + $0x2818] ss:$28 sps:$4 sm:$0xff]  }
 0xa8a   :  { %20219 = vmatprep.subr.bf16.mxu1 %v29044_v7  ;;  %21568 = vmatprep.subr.bf16.mxu0 %v29134_v46  ;;  %v29084_v7 = vld [vmem:[%s38116_s3 + $0x29d8] ss:$28 sps:$4 sm:$0xff]   ;;  %v29092_v46 = vld [vmem:[%s38116_s3 + $0x2a4c] ss:$28 sps:$4 sm:$0xff]  }
 0xa8b   :  { %v29089_v21 = vld [vmem:[%s38116_s3 + $0x2a14] ss:$28 sps:$4 sm:$0xff]  }
 0xa8c   :  { %21569 = vmatpush1.bf16.msra.mxu0 %v29132_v25  ;;  %v29141_v25 = vld [vmem:[%s38118_s5 + $0x2e0] ss:$8 sps:$4 sm:$0xff]  }
 0xa8d   :  { %20220 = vmatpush1.bf16.msra.mxu1 %v29042_v14  ;;  %21570 = vmatprep.subr.bf16.mxu0 %v29137_v54  ;;  %v29093_v14 = vld [vmem:[%s38116_s3 + $0x2a80] ss:$28 sps:$4 sm:$0xff]  }
 0xa8e   :  { %20221 = vmatprep.subr.bf16.mxu1 %v29047_v16  ;;  %v29143_v16 = vld [vmem:[%s38118_s5 + $0x2e4] ss:$8 sps:$4 sm:$0xff]   ;;  %v29146_v54 = vld [vmem:[%s38118_s5 + $0x2f4] ss:$8 sps:$4 sm:$0xff]  }
 0xa90   :  { %21571 = vmatpush1.bf16.msra.mxu0 %v29135_v22 }
 0xa91   :  { %20222 = vmatpush1.bf16.msra.mxu1 %v29045_v55  ;;  %21572 = vmatprep.subr.bf16.mxu0 %v29140_v56  ;;  %v29144_v55 = vld [vmem:[%s38118_s5 + $0x2f0] ss:$8 sps:$4 sm:$0xff]  }
 0xa92   :  { %20223 = vmatprep.subr.bf16.mxu1 %v29050_v19  ;;  %v29191_v19 = vld [vmem:[%s38117_s4] sm:$0x7f] }
 0xa93   :  { %v11550_v22 = vrot.slane %v29191_v19, %v31442_v31  ;;  %v11554_v56 = vrot.slane %v29191_v19, %v31451_v33  ;;  %v29147_v31 = vld [vmem:[%s38118_s5 + $0x300] ss:$8 sps:$4 sm:$0xff]   ;;  %v29195_v33 = vmov 0.0|0.0  }
 0xa94   :  { %21573 = vmatpush1.bf16.msra.mxu0 %v29138_v57 }
 0xa95   :  { %20224 = vmatpush1.bf16.msra.mxu1 %v29048_v24  ;;  %21574 = vmatprep.subr.bf16.mxu0 %v29143_v16 }
 0xa96   :  { %20225 = vmatprep.subr.bf16.mxu1 %v29053_v23 }
 0xa98   :  { %21575 = vmatpush1.bf16.msra.mxu0 %v29141_v25 }
 0xa99   :  { %20226 = vmatpush1.bf16.msra.mxu1 %v29051_v49  ;;  %21576 = vmatprep.subr.bf16.mxu0 %v29146_v54 }
 0xa9a   :  { %20227 = vmatprep.subr.bf16.mxu1 %v29056_v8 }
 0xa9c   :  { %21577 = vmatpush1.bf16.msra.mxu0 %v29144_v55 }
 0xa9d   :  { %20228 = vmatpush1.bf16.msra.mxu1 %v29054_v28 }
 0xa9e   :  { %20229 = vmatprep.subr.bf16.mxu1 %v29059_v27 }
 0xaa1   :  { %20230 = vmatpush1.bf16.msra.mxu1 %v29057_v20 }
 0xaa2   :  { %20231 = vmatprep.subr.bf16.mxu1 %v29062_v35  ;;  %v24793_v63 = vpop.f32.mrb[84].mxu0 }
 0xaa3   :  { %v24794_v47 = vpop.f32.mrb[85].mxu0 }
 0xaa4   :  { %v24795_v38 = vadd.f32 %v24794_v47, %v24793_v63  ;;  %v24796_v40 = vpop.f32.mrb[86].mxu0 }
 0xaa5   :  { %20232 = vmatpush1.bf16.msra.mxu1 %v29060_v53  ;;  %v24797_v45 = vpop.f32.mrb[87].mxu0 }
 0xaa6   :  { %20233 = vmatprep.subr.bf16.mxu1 %v29065_v32  ;;  %v24798_v9 = vadd.f32 %v24797_v45, %v24796_v40  ;;  %v20789_v61 = vadd.f32 %v24795_v38, %v20748_v17  ;;  %v29090_v17 = vld [vmem:[%s38116_s3 + $0x2a48] ss:$28 sps:$4 sm:$0xff]   ;;  %v21638_v45 = vld [vmem:[%s38119_s7 + $0x10] sm:$0xff] }
 0xaa7   :  { %v21636_v38 = vld [vmem:[%s38119_s7] sm:$0xff]  ;;  %v21637_v40 = vld [vmem:[%s38119_s7 + $0x8] sm:$0xff] }
 0xaa8   :  { %v20792_v6 = vadd.f32 %v24798_v9, %v20751_v12  ;;  %v29096_v12 = vld [vmem:[%s38116_s3 + $0x2ab8] ss:$28 sps:$4 sm:$0xff]  }
 0xaa9   :  { %20234 = vmatpush1.bf16.msra.mxu1 %v29063_v5  ;;  %v21639_v9 = vld [vmem:[%s38119_s7 + $0x18] sm:$0xff] }
 0xaaa   :  { %20235 = vmatprep.subr.bf16.mxu1 %v29068_v41  ;;  %v24823_v41 = vpack.c.bf16 %v21637_v40, %v21636_v38 }
 0xaad   :  { %20236 = vmatpush1.bf16.msra.mxu1 %v29066_v42  ;;  %v21641_v42 = vld [vmem:[%s38119_s7 + $0x28] sm:$0xff] }
 0xaae   :  { %20237 = vmatprep.subr.bf16.mxu1 %v29071_v44 }
 0xab1   :  { %20238 = vmatpush1.bf16.msra.mxu1 %v29069_v60  ;;  %v21643_v60 = vld [vmem:[%s38119_s7 + $0x38] sm:$0xff] }
 0xab2   :  { %20239 = vmatprep.subr.bf16.mxu1 %v29074_v10  ;;  %v20829_v2 = vpop.f32.mrb[88].mxu0 }
 0xab3   :  { %v20830_v50 = vadd.f32 %v20829_v2, %v20789_v61  ;;  %v24820_v34 = vpop.f32.mrb[89].mxu0  ;;  %v21640_v61 = vld [vmem:[%s38119_s7 + $0x20] sm:$0xff] }
 0xab4   :  { %v20832_v37 = vpop.f32.mrb[90].mxu0  ;;  %v24829_v44 = vpack.c.bf16 %v21641_v42, %v21640_v61  ;;  %v21647_v34 = vld [vmem:[%s38119_s7 + $0x58] sm:$0xff] }
 0xab5   :  { %20240 = vmatpush1.bf16.msra.mxu1 %v29072_v4  ;;  %v20833_v15 = vadd.f32 %v20832_v37, %v20792_v6  ;;  %v24821_v52 = vpop.f32.mrb[91].mxu0  ;;  %v20842_v59 = vmax.f32 %v20830_v50, 0.0  ;;  %v21642_v6 = vld [vmem:[%s38119_s7 + $0x30] sm:$0xff]  ;;  %v21644_v4 = vld [vmem:[%s38119_s7 + $0x40] sm:$0xff] }
 0xab6   :  { %20241 = vmatprep.subr.bf16.mxu1 %v29077_v39  ;;  %v24832_v10 = vpack.c.bf16 %v21643_v60, %v21642_v6  ;;  %v21645_v39 = vld [vmem:[%s38119_s7 + $0x48] sm:$0xff]  ;;  %v21646_v50 = vld [vmem:[%s38119_s7 + $0x50] sm:$0xff]  ;;  %v21648_v37 = vld [vmem:[%s38119_s7 + $0x60] sm:$0xff] }
 0xab7   :  { %v20849_v29 = vmax.f32 %v20833_v15, 0.0  ;;  %v24835_v2 = vpack.c.bf16 %v21645_v39, %v21644_v4  ;;  %v21650_v52 = vld [vmem:[%s38119_s7 + $0x70] sm:$0xff] }
 0xab9   :  { %20242 = vmatpush1.bf16.msra.mxu1 %v29075_v51  ;;  %v37977_v58 = vpack.c.bf16 %v20849_v29, %v20842_v59  ;;  %v24838_v51 = vpack.c.bf16 %v21647_v34, %v21646_v50  ;;  %v21651_v59 = vld [vmem:[%s38119_s7 + $0x78] sm:$0xff] }
 0xaba   :  { %20243 = vmatprep.subr.bf16.mxu1 %v29080_v36  ;;  %v21649_v36 = vld [vmem:[%s38119_s7 + $0x68] sm:$0xff]  ;;  %v24844_v29 = vpack.c.bf16 %v21651_v59, %v21650_v52 }
 0xabb   :  { %v24841_v15 = vpack.c.bf16 %v21649_v36, %v21648_v37 }
 0xabd   :  { %20244 = vmatpush1.bf16.msra.mxu1 %v29078_v13  ;;  %v21652_v13 = vld [vmem:[%s38119_s7 + $0x80] sm:$0xff] }
 0xabe   :  { %20245 = vmatprep.subr.bf16.mxu1 %v29083_v48  ;;  %v21653_v48 = vld [vmem:[%s38119_s7 + $0x88] sm:$0xff] }
 0xac1   :  { %20246 = vmatpush1.bf16.msra.mxu1 %v29081_v0  ;;  %v21654_v0 = vld [vmem:[%s38119_s7 + $0x90] sm:$0xff] }
 0xac2   :  { %20247 = vmatprep.subr.bf16.mxu1 %v29086_v18  ;;  %v21655_v18 = vld [vmem:[%s38119_s7 + $0x98] sm:$0xff] }
 0xac5   :  { %20248 = vmatpush1.bf16.msra.mxu1 %v29084_v7  ;;  %v24850_v7 = vpack.c.bf16 %v21655_v18, %v21654_v0 }
 0xac6   :  { %20260 = vmatprep.subr.bf16.mxu1 %v29089_v21  ;;  %v20955_v21 = vld [vmem:[%s38120_s6] sm:$0x3] }
 0xac8   :  { %20250 = vmatmul.mubr.bf16.vlgmr.msra.gmra.mrb[40].mxu1 %v33741_v26  ;;  %v29098_v26 = vld [vmem:[%s38116_s3 + $0x2abc] ss:$28 sps:$4 sm:$0xff]  }
 0xac9   :  { %20261 = vmatpush1.bf16.msra.mxu1 %v29087_v43  ;;  %20292 = vmatprep.mubr.bf16.mxu1 %v29192_v1  ;;  %v20960_v43 = vrot.slane %v20955_v21, %v30545_v62 }
 0xaca   :  { %20262 = vmatprep.subr.bf16.mxu1 %v29092_v46  ;;  %v20964_v46 = vrot.slane %v20955_v21, %v30556_v3 }
 0xacd   :  { %20263 = vmatpush1.bf16.msra.mxu1 %v29090_v17 }
 0xace   :  { %20264 = vmatprep.subr.bf16.mxu1 %v29095_v11 }
 0xad1   :  { %20265 = vmatpush1.bf16.msra.mxu1 %v29093_v14 }
 0xad2   :  { %20266 = vmatprep.subr.bf16.mxu1 %v29098_v26 }
 0xad5   :  { %20267 = vmatpush1.bf16.msra.mxu1 %v29096_v12 }
 0xad8   :  { %24364 = vmatmul.mubr.msk.bf16.vlgmr.msra.gmra.mrb[40].mxu1 %vm18622_vm2, %v34332_v30  ;;  %v29149_v30 = vld [vmem:[%s38118_s5 + $0x304] ss:$8 sps:$4 sm:$0xff]  }
 0xad9   :  { %21589 = vmatprep.subr.bf16.mxu0 %v29149_v30 }
 0xbab   :  { %v20294_v24 = vpop.f32.mrb[40].mxu1 }
 0xbac   :  { %v24916_v23 = vadd.f32 %v20294_v24, %v11550_v22  ;;  %v20296_v57 = vpop.f32.mrb[41].mxu1 }
 0xbad   :  { %v24917_v49 = vadd.f32 %v20296_v57, %v11554_v56  ;;  %v20298_v8 = vpop.f32.mrb[42].mxu1 }
 0xbae   :  { %v24918_v28 = vadd.f32 %v20298_v8, %v11550_v22  ;;  %v20300_v27 = vpop.f32.mrb[43].mxu1  ;;  %v20840_v35 = vmax.f32 %v24916_v23, 0.0 }
 0xbaf   :  { %v24919_v20 = vadd.f32 %v20300_v27, %v11554_v56  ;;  %v20841_v32 = vmax.f32 %v24917_v49, 0.0 }
 0xbb0   :  { %v20847_v53 = vmax.f32 %v24918_v28, 0.0 }
 0xbb1   :  { %v20848_v63 = vmax.f32 %v24919_v20, 0.0 }
 0xbb2   :  { %v20854_v47 = vpack.c.bf16 %v20847_v53, %v20840_v35 }
 0xbb3   :  { %v20855_v5 = vpack.c.bf16 %v20848_v63, %v20841_v32 }
 0xbb5   :  { %21578 = vmatprep.mubr.bf16.mxu0 %v20855_v5 }
 0xbb6   :  { %21579 = vmatmul.mubr.bf16.vlgmr.msra.gmra.mrb[92].mxu0 %v20854_v47 }
 0xbb7   :  { %21590 = vmatpush1.bf16.msra.mxu0 %v29147_v31  ;;  %21621 = vmatprep.mubr.bf16.mxu0 %v29192_v1  ;;  %v24826_v1 = vpack.c.bf16 %v21639_v9, %v21638_v45 }
 0xbb8   :  { %24822 = vmatprep.subr.bf16.mxu0 %v29195_v33 }
 0xbc2   :  { %24464 = vmatmul.mubr.msk.bf16.vlgmr.msra.gmra.mrb[92].mxu0 %vm7654_vm0, %v37977_v58  ;;  %v24847_v58 = vpack.c.bf16 %v21653_v48, %v21652_v13 }
 0xbc3   :  { %24824 = vmatpush1.bf16.msra.mxu0 %v24823_v41 }
 0xbc4   :  { %24825 = vmatprep.subr.bf16.mxu0 %v29195_v33 }
 0xbc7   :  { %24827 = vmatpush1.bf16.msra.mxu0 %v24826_v1 }
 0xbc8   :  { %24828 = vmatprep.subr.bf16.mxu0 %v29195_v33 }
 0xbcb   :  { %24830 = vmatpush1.bf16.msra.mxu0 %v24829_v44 }
 0xbcc   :  { %24831 = vmatprep.subr.bf16.mxu0 %v29195_v33 }
 0xbcf   :  { %24833 = vmatpush1.bf16.msra.mxu0 %v24832_v10 }
 0xbd0   :  { %24834 = vmatprep.subr.bf16.mxu0 %v29195_v33 }
 0xbd3   :  { %24836 = vmatpush1.bf16.msra.mxu0 %v24835_v2 }
 0xbd4   :  { %24837 = vmatprep.subr.bf16.mxu0 %v29195_v33 }
 0xbd7   :  { %24839 = vmatpush1.bf16.msra.mxu0 %v24838_v51 }
 0xbd8   :  { %24840 = vmatprep.subr.bf16.mxu0 %v29195_v33 }
 0xbdb   :  { %24842 = vmatpush1.bf16.msra.mxu0 %v24841_v15 }
 0xbdc   :  { %24843 = vmatprep.subr.bf16.mxu0 %v29195_v33 }
 0xbdf   :  { %24845 = vmatpush1.bf16.msra.mxu0 %v24844_v29 }
 0xbe0   :  { %24846 = vmatprep.subr.bf16.mxu0 %v29195_v33 }
 0xbe3   :  { %24848 = vmatpush1.bf16.msra.mxu0 %v24847_v58 }
 0xbe4   :  { %24849 = vmatprep.subr.bf16.mxu0 %v29195_v33 }
 0xbe7   :  { %24851 = vmatpush1.bf16.msra.mxu0 %v24850_v7 }
 0xc95   :  { %v21623_v17 = vpop.f32.mrb[92].mxu0 }
 0xc96   :  { %v24920_v11 = vadd.f32 %v21623_v17, %v20960_v43  ;;  %v21625_v14 = vpop.f32.mrb[93].mxu0 }
 0xc97   :  { %v24921_v26 = vadd.f32 %v21625_v14, %v20964_v46  ;;  %v21627_v12 = vpop.f32.mrb[94].mxu0 }
 0xc98   :  { %v21629_v16 = vpop.f32.mrb[95].mxu0  ;;  %v21632_v55 = vmax.f32 %v24920_v11, 0.0  ;;  %v24922_v30 = vadd.f32 %v21627_v12, %v20960_v43 }
 0xc99   :  { %v21633_v25 = vmax.f32 %v24921_v26, 0.0  ;;  %v24923_v54 = vadd.f32 %v21629_v16, %v20964_v46 }
 0xc9a   :  { %v21634_v22 = vmax.f32 %v24922_v30, 0.0 }
 0xc9b   :  { %v21635_v19 = vmax.f32 %v24923_v54, 0.0  ;;  %24465 = vmatprep.mubr.msk.f32.mxu0 %vm21656_vm3, %v21633_v25 }
 0xc9c   :  { %21728 = vmatmul.mubr.f32.vlgmr.msra.gmra.mrb[96].mxu0 %v21632_v55 }
 0xc9d   :  { %24466 = vmatprep.mubr.msk.f32.mxu0 %vm21656_vm3, %v21635_v19 }
 0xca0   :  { %21733 = vmatmul.mubr.f32.gmra.mrb[98].mxu0 %v21634_v22 }
 0xd6f   :  { %v21729_v62 = vpop.f32.mrb[96].mxu0 }
 0xd70   :  { %21738 = vst [vmem:[%s38121_s8] sm:$0xff] %v21729_v62  ;;  %v21731_v3 = vpop.f32.mrb[97].mxu0 }
 0xd73   :  { %v21734_v56 = vpop.f32.mrb[98].mxu0 }
 0xd74   :  { %21739 = vst [vmem:[%s38121_s8 + $0x8] sm:$0xff] %v21734_v56  ;;  %v21736_v24 = vpop.f32.mrb[99].mxu0 }

</bundles_post_ra>
